<compile_context>
chip_gen: v7x
topology: tpu7x:2x2x1
jax: 0.10.0
libtpu: 0.0.40
codegen_flags: <defaults>
</compile_context>

<pallas_src>
import functools

import jax
import jax.numpy as jnp
import numpy as np
from jax.experimental import pallas as pl
from jax.experimental.pallas import tpu as pltpu


# ----------------------------------------------------------------------------
# Pallas kernel: one grid step = `bw` windows, full attention fused in VMEM
# ----------------------------------------------------------------------------
def _window_attn_kernel(x_ref, wqkv_ref, bqkv_ref, wproj_ref, bproj_ref,
                        bias_ref, *rest, num_heads, head_dim, mask_mode,
                        mask_nw):
    if mask_mode == "none":
        mask_ref = None
        o_ref, qkv_ref, oacc_ref = rest
    else:
        mask_ref, o_ref, qkv_ref, oacc_ref = rest

    bw, N, C = x_ref.shape          # static block shape
    hd = head_dim

    # qkv projection: one (bw*N, C) @ (C, 3C) bf16 matmul, f32 accumulate.
    # qk scale is already folded into the q-columns of Wqkv / bqkv.
    x2 = x_ref[...].reshape(bw * N, C)
    qkv_ref[...] = (jnp.dot(x2, wqkv_ref[...],
                            preferred_element_type=jnp.float32)
                    + bqkv_ref[...])                       # (bw*N, 3C) f32

    for h in range(num_heads):      # small static unrolled head loop
        lo = h * hd
        q_h = qkv_ref[:, lo:lo + hd].astype(jnp.bfloat16).reshape(bw, N, hd)
        k_h = qkv_ref[:, C + lo:C + lo + hd].astype(jnp.bfloat16) \
                 .reshape(bw, N, hd)
        v_h = qkv_ref[:, 2 * C + lo:2 * C + lo + hd].astype(jnp.bfloat16) \
                 .reshape(bw, N, hd)

        # attention logits (bf16 x bf16 -> f32 acc) + relative position bias
        s = jnp.einsum('bnd,bmd->bnm', q_h, k_h,
                       preferred_element_type=jnp.float32)   # (bw, N, N)
        s = s + bias_ref[0, h]                               # (N, N) broadcast

        if mask_mode == "block":
            s = s + mask_ref[...]                            # (bw, N, N)
        elif mask_mode == "resident":
            s = (s.reshape(bw // mask_nw, mask_nw, N, N)
                 + mask_ref[...][None]).reshape(bw, N, N)

        # softmax in f32 (divide on the EUP via approximate reciprocal)
        m = jnp.max(s, axis=-1, keepdims=True)
        e = jnp.exp(s - m)
        p = e * pl.reciprocal(jnp.sum(e, axis=-1, keepdims=True), approx=True)

        # attn @ v  (bf16 operands, f32 accumulate)
        o_h = jnp.einsum('bnm,bmd->bnd', p.astype(jnp.bfloat16), v_h,
                         preferred_element_type=jnp.float32)  # (bw, N, hd)

        # assemble heads lane-contiguously for a single full-K projection
        oacc_ref[:, lo:lo + hd] = o_h.reshape(bw * N, hd)

    # output projection: ONE (bw*N, C) @ (C, C) matmul (K = C fills the MXU)
    y = jnp.dot(oacc_ref[...].astype(jnp.bfloat16), wproj_ref[...],
                preferred_element_type=jnp.float32) + bproj_ref[...]
    o_ref[...] = y.reshape(bw, N, C).astype(o_ref.dtype)


# ----------------------------------------------------------------------------
# WindowAttention3D forward (wrapper: bias gather, scale folding, pallas_call)
# ----------------------------------------------------------------------------
def window_attention_3d(x, qkv_w, qkv_b, proj_w, proj_b, rpb_table,
                        rel_pos_index, *, num_heads, mask=None, qk_scale=None,
                        block_windows=8, out_dtype=jnp.bfloat16):
    """x: (B_, N, C); qkv_w: (C, 3C); qkv_b: (3C,) or None; proj_w: (C, C);
    proj_b: (C,); rpb_table: ((2Wd-1)(2Wh-1)(2Ww-1), H); rel_pos_index: (Nw,Nw);
    mask: (nW, N, N) additive (0 / -inf style) or None."""
    B_, N, C = x.shape
    H = num_heads
    hd = C // H
    scale = float(qk_scale if qk_scale is not None else hd ** (-0.5))

    # relative position bias (1, H, N, N) — tiny gather, plain-JAX glue
    idx = rel_pos_index[:N, :N].reshape(-1)
    rel_bias = jnp.take(rpb_table.astype(jnp.float32), idx, axis=0)
    rel_bias = rel_bias.reshape(N, N, H).transpose(2, 0, 1)[None]   # (1,H,N,N)

    if qkv_b is None:
        qkv_b = jnp.zeros((3 * C,), jnp.float32)

    # fold qk scale into the q-columns of Wqkv / bqkv (amortized across grid)
    scale_col = jnp.concatenate([jnp.full((C,), scale, jnp.float32),
                                 jnp.ones((2 * C,), jnp.float32)])
    wqkv = (qkv_w.astype(jnp.float32) * scale_col[None, :]).astype(jnp.bfloat16)
    bqkv = (qkv_b.astype(jnp.float32) * scale_col).reshape(1, 3 * C)
    wproj = proj_w.astype(jnp.bfloat16)
    bproj = proj_b.astype(jnp.float32).reshape(1, C)
    x_bf = x.astype(jnp.bfloat16)

    # choose windows-per-block so the mask is deliverable without tiling to B_
    bw = max(1, min(block_windows, B_))
    mask_mode, mask_nw, mask_arr = "none", 0, None
    if mask is not None:
        nW = int(mask.shape[0])
        assert B_ % nW == 0, "B_ must be a multiple of nW"
        mask_nw = nW
        mask_arr = mask.astype(jnp.float32)
        if bw >= nW:
            bw = (bw // nW) * nW            # bw % nW == 0  -> mask resident
            mask_mode = "resident"
        else:
            while nW % bw:                  # nW % bw == 0  -> stream per block
                bw -= 1
            mask_mode = "block"

    pad = (-B_) % bw
    if pad:
        x_bf = jnp.pad(x_bf, ((0, pad), (0, 0), (0, 0)))
    Bp = B_ + pad
    grid = (Bp // bw,)

    in_specs = [
        pl.BlockSpec((bw, N, C), lambda i: (i, 0, 0)),        # x
        pl.BlockSpec((C, 3 * C), lambda i: (0, 0)),           # Wqkv (scaled)
        pl.BlockSpec((1, 3 * C), lambda i: (0, 0)),           # bqkv (scaled)
        pl.BlockSpec((C, C), lambda i: (0, 0)),               # Wproj
        pl.BlockSpec((1, C), lambda i: (0, 0)),               # bproj
        pl.BlockSpec((1, H, N, N), lambda i: (0, 0, 0, 0)),   # rel. pos. bias
    ]
    operands = [x_bf, wqkv, bqkv, wproj, bproj, rel_bias]
    if mask_mode == "resident":
        in_specs.append(pl.BlockSpec((mask_nw, N, N), lambda i: (0, 0, 0)))
        operands.append(mask_arr)
    elif mask_mode == "block":
        nblk = mask_nw // bw
        in_specs.append(pl.BlockSpec((bw, N, N), lambda i: (i % nblk, 0, 0)))
        operands.append(mask_arr)

    kernel = functools.partial(_window_attn_kernel, num_heads=H, head_dim=hd,
                               mask_mode=mask_mode, mask_nw=mask_nw)

    out = pl.pallas_call(
        kernel,
        out_shape=jax.ShapeDtypeStruct((Bp, N, C), out_dtype),
        grid_spec=pltpu.PrefetchScalarGridSpec(
            num_scalar_prefetch=0,
            grid=grid,
            in_specs=in_specs,
            out_specs=pl.BlockSpec((bw, N, C), lambda i: (i, 0, 0)),
            scratch_shapes=[
                pltpu.VMEM((bw * N, 3 * C), jnp.float32),   # qkv
                pltpu.VMEM((bw * N, C), jnp.float32),       # per-head outputs
            ]),
        compiler_params=pltpu.CompilerParams(
            dimension_semantics=("parallel",)),
    )(*operands)

    return out[:B_] if pad else out


# ----------------------------------------------------------------------------
# Relative position index (static, identical to the PyTorch buffer)
# ----------------------------------------------------------------------------
def compute_relative_position_index(window_size):
    Wd, Wh, Ww = window_size
    coords = np.stack(np.meshgrid(np.arange(Wd), np.arange(Wh), np.arange(Ww),
                                  indexing='ij'))                  # (3,Wd,Wh,Ww)
    coords_flatten = coords.reshape(3, -1)
    rel = coords_flatten[:, :, None] - coords_flatten[:, None, :]  # (3, N, N)
    rel = rel.transpose(1, 2, 0).astype(np.int64)                  # (N, N, 3)
    rel[:, :, 0] += Wd - 1
    rel[:, :, 1] += Wh - 1
    rel[:, :, 2] += Ww - 1
    rel[:, :, 0] *= (2 * Wh - 1) * (2 * Ww - 1)
    rel[:, :, 1] *= (2 * Ww - 1)
    return rel.sum(-1).astype(np.int32)                            # (N, N)


# ----------------------------------------------------------------------------
# Pure-JAX reference (f32, highest precision) for verification
# ----------------------------------------------------------------------------
def reference_forward(x, qkv_w, qkv_b, proj_w, proj_b, rpb_table,
                      rel_pos_index, *, num_heads, mask=None, qk_scale=None):
    B_, N, C = x.shape
    H = num_heads
    hd = C // H
    scale = qk_scale if qk_scale is not None else hd ** (-0.5)
    if qkv_b is None:
        qkv_b = jnp.zeros((3 * C,), jnp.float32)
    hi = jax.lax.Precision.HIGHEST

    qkv = jnp.dot(x, qkv_w, precision=hi) + qkv_b
    qkv = qkv.reshape(B_, N, 3, H, hd).transpose(2, 0, 3, 1, 4)
    q, k, v = qkv[0] * scale, qkv[1], qkv[2]                      # (B_,H,N,hd)
    attn = jnp.einsum('bhnd,bhmd->bhnm', q, k, precision=hi)

    idx = rel_pos_index[:N, :N].reshape(-1)
    rel_bias = jnp.take(rpb_table, idx, axis=0).reshape(N, N, H).transpose(2, 0, 1)
    attn = attn + rel_bias[None]
    if mask is not None:
        nW = mask.shape[0]
        attn = attn.reshape(B_ // nW, nW, H, N, N) + mask[None, :, None]
        attn = attn.reshape(B_, H, N, N)
    attn = jax.nn.softmax(attn, axis=-1)
    out = jnp.einsum('bhnm,bhmd->bhnd', attn, v, precision=hi)
    out = out.transpose(0, 2, 1, 3).reshape(B_, N, C)
    return jnp.dot(out, proj_w, precision=hi) + proj_b


if __name__ == "__main__":
    key = jax.random.PRNGKey(0)
    k_x, k_wq, k_bq, k_wp, k_bp, k_t, k_m = jax.random.split(key, 7)

    # Module config: dim=128 (lane-dense), 4 heads, window (2,4,4) -> N=32
    dim = 128
    num_heads = 4
    window_size = (2, 4, 4)
    N = window_size[0] * window_size[1] * window_size[2]          # 32
    B, nW = 8, 8
    B_ = B * nW                                                   # 64 windows

    x = jax.random.normal(k_x, (B_, N, dim), dtype=jnp.float32)

    # Synthetic parameters (stored as (in, out), consistent with the reference)
    qkv_w = 0.05 * jax.random.normal(k_wq, (dim, 3 * dim), dtype=jnp.float32)
    qkv_b = 0.05 * jax.random.normal(k_bq, (3 * dim,), dtype=jnp.float32)
    proj_w = 0.05 * jax.random.normal(k_wp, (dim, dim), dtype=jnp.float32)
    proj_b = 0.05 * jax.random.normal(k_bp, (dim,), dtype=jnp.float32)
    n_rel = ((2 * window_size[0] - 1) * (2 * window_size[1] - 1)
             * (2 * window_size[2] - 1))
    rpb_table = 0.02 * jax.random.normal(k_t, (n_rel, num_heads),
                                         dtype=jnp.float32)
    rel_pos_index = jnp.asarray(compute_relative_position_index(window_size))

    # shifted-window style additive mask: 0 / -100 per (window, query, key)
    mask = jnp.where(jax.random.bernoulli(k_m, 0.75, (nW, N, N)),
                     0.0, -100.0).astype(jnp.float32)

    def check(mask_arg, block_windows):
        fwd = jax.jit(functools.partial(window_attention_3d,
                                        num_heads=num_heads,
                                        block_windows=block_windows))
        y = fwd(x, qkv_w, qkv_b, proj_w, proj_b, rpb_table, rel_pos_index,
                mask=mask_arg)
        jax.block_until_ready(y)
        y_ref = reference_forward(x, qkv_w, qkv_b, proj_w, proj_b, rpb_table,
                                  rel_pos_index, num_heads=num_heads,
                                  mask=mask_arg)
        np.testing.assert_allclose(np.asarray(y).astype(np.float32),
                                   np.asarray(y_ref), rtol=3e-2, atol=3e-2)

    check(None, 8)   # no mask                       (bw=8,  grid=8)
    check(mask, 8)   # masked, mask resident in VMEM (bw=8,  grid=8)
    check(mask, 4)   # masked, mask streamed / block (bw=4,  grid=16)

    print("KERNEL_OK")
</pallas_src>

<mosaic_0001>
module attributes {stable_mosaic.version = 11 : i64} {
  func.func @_window_attn_kernel(%arg0: i32, %arg1: memref<8x32x128xbf16, #tpu.memory_space<vmem>>, %arg2: memref<128x384xbf16, #tpu.memory_space<vmem>>, %arg3: memref<1x384xf32, #tpu.memory_space<vmem>>, %arg4: memref<128x128xbf16, #tpu.memory_space<vmem>>, %arg5: memref<1x128xf32, #tpu.memory_space<vmem>>, %arg6: memref<1x4x32x32xf32, #tpu.memory_space<vmem>>, %arg7: memref<8x32x128xbf16, #tpu.memory_space<vmem>>, %arg8: memref<256x384xf32, #tpu.memory_space<vmem>>, %arg9: memref<256x128xf32, #tpu.memory_space<vmem>>) attributes {dimension_semantics = [#tpu.dimension_semantics<parallel>], iteration_bounds = array<i64: 8>, scalar_prefetch = 0 : i64, scratch_operands = 2 : i64, tpu.core_type = #tpu.core_type<tc>, window_params = [{transform_indices = @transform_0, window_bounds = array<i64: 8, 32, 128>}, {pipeline_mode = #tpu.pipeline_mode<synchronous>, transform_indices = @transform_1, window_bounds = array<i64: 128, 384>}, {pipeline_mode = #tpu.pipeline_mode<synchronous>, transform_indices = @transform_2, window_bounds = array<i64: 1, 384>}, {pipeline_mode = #tpu.pipeline_mode<synchronous>, transform_indices = @transform_3, window_bounds = array<i64: 128, 128>}, {pipeline_mode = #tpu.pipeline_mode<synchronous>, transform_indices = @transform_4, window_bounds = array<i64: 1, 128>}, {pipeline_mode = #tpu.pipeline_mode<synchronous>, transform_indices = @transform_5, window_bounds = array<i64: 1, 4, 32, 32>}, {transform_indices = @transform_6, window_bounds = array<i64: 8, 32, 128>}]} {
    %c0 = arith.constant 0 : index
    %c0_0 = arith.constant 0 : index
    %c0_1 = arith.constant 0 : index
    %0 = vector.load %arg1[%c0, %c0_0, %c0_1] : memref<8x32x128xbf16, #tpu.memory_space<vmem>>, vector<8x32x128xbf16>
    %1 = vector.shape_cast %0 : vector<8x32x128xbf16> to vector<256x128xbf16>
    %c0_2 = arith.constant 0 : index
    %c0_3 = arith.constant 0 : index
    %2 = vector.load %arg2[%c0_2, %c0_3] : memref<128x384xbf16, #tpu.memory_space<vmem>>, vector<128x384xbf16>
    %cst = arith.constant dense<0.000000e+00> : vector<256x384xf32>
    %3 = tpu.matmul %1, %2, %cst {dimension_numbers = #tpu.dot_dimension_numbers<[1], [0], [0], [1], [0, 0, 1, 1], [], []>} : vector<256x128xbf16>, vector<128x384xbf16>, vector<256x384xf32> -> vector<256x384xf32>
    %c0_4 = arith.constant 0 : index
    %c0_5 = arith.constant 0 : index
    %4 = vector.load %arg3[%c0_4, %c0_5] : memref<1x384xf32, #tpu.memory_space<vmem>>, vector<1x384xf32>
    %5 = vector.broadcast %4 : vector<1x384xf32> to vector<256x384xf32>
    %6 = arith.addf %3, %5 : vector<256x384xf32>
    %c0_6 = arith.constant 0 : index
    %c0_7 = arith.constant 0 : index
    %7 = vector.load %arg8[%c0_6, %c0_7] : memref<256x384xf32, #tpu.memory_space<vmem>>, vector<256x384xf32>
    tpu.vector_store %arg8[%c0_6, %c0_7], %6 {strides = array<i32>} : memref<256x384xf32, #tpu.memory_space<vmem>>, vector<256x384xf32>,
    %c0_8 = arith.constant 0 : index
    %c0_9 = arith.constant 0 : index
    %8 = vector.load %arg8[%c0_8, %c0_9] : memref<256x384xf32, #tpu.memory_space<vmem>>, vector<256x32xf32>
    %9 = arith.truncf %8 : vector<256x32xf32> to vector<256x32xbf16>
    %10 = vector.shape_cast %9 : vector<256x32xbf16> to vector<8x32x32xbf16>
    %c0_10 = arith.constant 0 : index
    %c128 = arith.constant 128 : index
    %11 = vector.load %arg8[%c0_10, %c128] : memref<256x384xf32, #tpu.memory_space<vmem>>, vector<256x32xf32>
    %12 = arith.truncf %11 : vector<256x32xf32> to vector<256x32xbf16>
    %13 = vector.shape_cast %12 : vector<256x32xbf16> to vector<8x32x32xbf16>
    %c0_11 = arith.constant 0 : index
    %c256 = arith.constant 256 : index
    %14 = vector.load %arg8[%c0_11, %c256] : memref<256x384xf32, #tpu.memory_space<vmem>>, vector<256x32xf32>
    %15 = arith.truncf %14 : vector<256x32xf32> to vector<256x32xbf16>
    %16 = vector.shape_cast %15 : vector<256x32xbf16> to vector<8x32x32xbf16>
    "tpu.trace_start"() <{level = 10 : i32, message = "bnd,bmd->bnm"}> : () -> ()
    %cst_12 = arith.constant dense<0.000000e+00> : vector<8x32x32xf32>
    %17 = tpu.matmul %10, %13, %cst_12 {dimension_numbers = #tpu.dot_dimension_numbers<[2], [2], [1], [1], [0, 0, 0, 1, 1, 1], [0], [0]>} : vector<8x32x32xbf16>, vector<8x32x32xbf16>, vector<8x32x32xf32> -> vector<8x32x32xf32>
    "tpu.trace_stop"() : () -> ()
    %c0_13 = arith.constant 0 : index
    %c0_14 = arith.constant 0 : index
    %c0_15 = arith.constant 0 : index
    %c0_16 = arith.constant 0 : index
    %18 = vector.load %arg6[%c0_13, %c0_14, %c0_15, %c0_16] : memref<1x4x32x32xf32, #tpu.memory_space<vmem>>, vector<1x1x32x32xf32>
    %19 = vector.shape_cast %18 : vector<1x1x32x32xf32> to vector<32x32xf32>
    %20 = vector.shape_cast %19 : vector<32x32xf32> to vector<1x32x32xf32>
    %21 = vector.broadcast %20 : vector<1x32x32xf32> to vector<8x32x32xf32>
    %22 = arith.addf %17, %21 : vector<8x32x32xf32>
    %cst_17 = arith.constant dense<0xFF800000> : vector<8x32xf32>
    %23 = vector.multi_reduction <maximumf>, %22, %cst_17 [2] : vector<8x32x32xf32> to vector<8x32xf32>
    %24 = vector.shape_cast %23 : vector<8x32xf32> to vector<8x32x1xf32>
    %25 = vector.broadcast %24 : vector<8x32x1xf32> to vector<8x32x32xf32>
    %26 = arith.subf %22, %25 : vector<8x32x32xf32>
    %27 = math.exp %26 : vector<8x32x32xf32>
    %cst_18 = arith.constant dense<0.000000e+00> : vector<8x32xf32>
    %28 = vector.multi_reduction <add>, %27, %cst_18 [2] : vector<8x32x32xf32> to vector<8x32xf32>
    %29 = vector.shape_cast %28 : vector<8x32xf32> to vector<8x32x1xf32>
    %30 = tpu.reciprocal %29 {approx = true} : vector<8x32x1xf32> -> vector<8x32x1xf32>
    %31 = vector.broadcast %30 : vector<8x32x1xf32> to vector<8x32x32xf32>
    %32 = arith.mulf %27, %31 : vector<8x32x32xf32>
    %33 = arith.truncf %32 : vector<8x32x32xf32> to vector<8x32x32xbf16>
    "tpu.trace_start"() <{level = 10 : i32, message = "bnm,bmd->bnd"}> : () -> ()
    %cst_19 = arith.constant dense<0.000000e+00> : vector<8x32x32xf32>
    %34 = tpu.matmul %33, %16, %cst_19 {dimension_numbers = #tpu.dot_dimension_numbers<[2], [1], [1], [2], [0, 0, 0, 1, 1, 2], [0], [0]>} : vector<8x32x32xbf16>, vector<8x32x32xbf16>, vector<8x32x32xf32> -> vector<8x32x32xf32>
    "tpu.trace_stop"() : () -> ()
    %35 = vector.shape_cast %34 : vector<8x32x32xf32> to vector<256x32xf32>
    %c0_20 = arith.constant 0 : index
    %c0_21 = arith.constant 0 : index
    %36 = vector.load %arg9[%c0_20, %c0_21] : memref<256x128xf32, #tpu.memory_space<vmem>>, vector<256x32xf32>
    tpu.vector_store %arg9[%c0_20, %c0_21], %35 {strides = array<i32>} : memref<256x128xf32, #tpu.memory_space<vmem>>, vector<256x32xf32>,
    %c0_22 = arith.constant 0 : index
    %c32 = arith.constant 32 : index
    %37 = vector.load %arg8[%c0_22, %c32] : memref<256x384xf32, #tpu.memory_space<vmem>>, vector<256x32xf32>
    %38 = arith.truncf %37 : vector<256x32xf32> to vector<256x32xbf16>
    %39 = vector.shape_cast %38 : vector<256x32xbf16> to vector<8x32x32xbf16>
    %c0_23 = arith.constant 0 : index
    %c160 = arith.constant 160 : index
    %40 = vector.load %arg8[%c0_23, %c160] : memref<256x384xf32, #tpu.memory_space<vmem>>, vector<256x32xf32>
    %41 = arith.truncf %40 : vector<256x32xf32> to vector<256x32xbf16>
    %42 = vector.shape_cast %41 : vector<256x32xbf16> to vector<8x32x32xbf16>
    %c0_24 = arith.constant 0 : index
    %c288 = arith.constant 288 : index
    %43 = vector.load %arg8[%c0_24, %c288] : memref<256x384xf32, #tpu.memory_space<vmem>>, vector<256x32xf32>
    %44 = arith.truncf %43 : vector<256x32xf32> to vector<256x32xbf16>
    %45 = vector.shape_cast %44 : vector<256x32xbf16> to vector<8x32x32xbf16>
    "tpu.trace_start"() <{level = 10 : i32, message = "bnd,bmd->bnm"}> : () -> ()
    %cst_25 = arith.constant dense<0.000000e+00> : vector<8x32x32xf32>
    %46 = tpu.matmul %39, %42, %cst_25 {dimension_numbers = #tpu.dot_dimension_numbers<[2], [2], [1], [1], [0, 0, 0, 1, 1, 1], [0], [0]>} : vector<8x32x32xbf16>, vector<8x32x32xbf16>, vector<8x32x32xf32> -> vector<8x32x32xf32>
    "tpu.trace_stop"() : () -> ()
    %c0_26 = arith.constant 0 : index
    %c1 = arith.constant 1 : index
    %c0_27 = arith.constant 0 : index
    %c0_28 = arith.constant 0 : index
    %47 = vector.load %arg6[%c0_26, %c1, %c0_27, %c0_28] : memref<1x4x32x32xf32, #tpu.memory_space<vmem>>, vector<1x1x32x32xf32>
    %48 = vector.shape_cast %47 : vector<1x1x32x32xf32> to vector<32x32xf32>
    %49 = vector.shape_cast %48 : vector<32x32xf32> to vector<1x32x32xf32>
    %50 = vector.broadcast %49 : vector<1x32x32xf32> to vector<8x32x32xf32>
    %51 = arith.addf %46, %50 : vector<8x32x32xf32>
    %cst_29 = arith.constant dense<0xFF800000> : vector<8x32xf32>
    %52 = vector.multi_reduction <maximumf>, %51, %cst_29 [2] : vector<8x32x32xf32> to vector<8x32xf32>
    %53 = vector.shape_cast %52 : vector<8x32xf32> to vector<8x32x1xf32>
    %54 = vector.broadcast %53 : vector<8x32x1xf32> to vector<8x32x32xf32>
    %55 = arith.subf %51, %54 : vector<8x32x32xf32>
    %56 = math.exp %55 : vector<8x32x32xf32>
    %cst_30 = arith.constant dense<0.000000e+00> : vector<8x32xf32>
    %57 = vector.multi_reduction <add>, %56, %cst_30 [2] : vector<8x32x32xf32> to vector<8x32xf32>
    %58 = vector.shape_cast %57 : vector<8x32xf32> to vector<8x32x1xf32>
    %59 = tpu.reciprocal %58 {approx = true} : vector<8x32x1xf32> -> vector<8x32x1xf32>
    %60 = vector.broadcast %59 : vector<8x32x1xf32> to vector<8x32x32xf32>
    %61 = arith.mulf %56, %60 : vector<8x32x32xf32>
    %62 = arith.truncf %61 : vector<8x32x32xf32> to vector<8x32x32xbf16>
    "tpu.trace_start"() <{level = 10 : i32, message = "bnm,bmd->bnd"}> : () -> ()
    %cst_31 = arith.constant dense<0.000000e+00> : vector<8x32x32xf32>
    %63 = tpu.matmul %62, %45, %cst_31 {dimension_numbers = #tpu.dot_dimension_numbers<[2], [1], [1], [2], [0, 0, 0, 1, 1, 2], [0], [0]>} : vector<8x32x32xbf16>, vector<8x32x32xbf16>, vector<8x32x32xf32> -> vector<8x32x32xf32>
    "tpu.trace_stop"() : () -> ()
    %64 = vector.shape_cast %63 : vector<8x32x32xf32> to vector<256x32xf32>
    %c0_32 = arith.constant 0 : index
    %c32_33 = arith.constant 32 : index
    %65 = vector.load %arg9[%c0_32, %c32_33] : memref<256x128xf32, #tpu.memory_space<vmem>>, vector<256x32xf32>
    tpu.vector_store %arg9[%c0_32, %c32_33], %64 {strides = array<i32>} : memref<256x128xf32, #tpu.memory_space<vmem>>, vector<256x32xf32>,
    %c0_34 = arith.constant 0 : index
    %c64 = arith.constant 64 : index
    %66 = vector.load %arg8[%c0_34, %c64] : memref<256x384xf32, #tpu.memory_space<vmem>>, vector<256x32xf32>
    %67 = arith.truncf %66 : vector<256x32xf32> to vector<256x32xbf16>
    %68 = vector.shape_cast %67 : vector<256x32xbf16> to vector<8x32x32xbf16>
    %c0_35 = arith.constant 0 : index
    %c192 = arith.constant 192 : index
    %69 = vector.load %arg8[%c0_35, %c192] : memref<256x384xf32, #tpu.memory_space<vmem>>, vector<256x32xf32>
    %70 = arith.truncf %69 : vector<256x32xf32> to vector<256x32xbf16>
    %71 = vector.shape_cast %70 : vector<256x32xbf16> to vector<8x32x32xbf16>
    %c0_36 = arith.constant 0 : index
    %c320 = arith.constant 320 : index
    %72 = vector.load %arg8[%c0_36, %c320] : memref<256x384xf32, #tpu.memory_space<vmem>>, vector<256x32xf32>
    %73 = arith.truncf %72 : vector<256x32xf32> to vector<256x32xbf16>
    %74 = vector.shape_cast %73 : vector<256x32xbf16> to vector<8x32x32xbf16>
    "tpu.trace_start"() <{level = 10 : i32, message = "bnd,bmd->bnm"}> : () -> ()
    %cst_37 = arith.constant dense<0.000000e+00> : vector<8x32x32xf32>
    %75 = tpu.matmul %68, %71, %cst_37 {dimension_numbers = #tpu.dot_dimension_numbers<[2], [2], [1], [1], [0, 0, 0, 1, 1, 1], [0], [0]>} : vector<8x32x32xbf16>, vector<8x32x32xbf16>, vector<8x32x32xf32> -> vector<8x32x32xf32>
    "tpu.trace_stop"() : () -> ()
    %c0_38 = arith.constant 0 : index
    %c2 = arith.constant 2 : index
    %c0_39 = arith.constant 0 : index
    %c0_40 = arith.constant 0 : index
    %76 = vector.load %arg6[%c0_38, %c2, %c0_39, %c0_40] : memref<1x4x32x32xf32, #tpu.memory_space<vmem>>, vector<1x1x32x32xf32>
    %77 = vector.shape_cast %76 : vector<1x1x32x32xf32> to vector<32x32xf32>
    %78 = vector.shape_cast %77 : vector<32x32xf32> to vector<1x32x32xf32>
    %79 = vector.broadcast %78 : vector<1x32x32xf32> to vector<8x32x32xf32>
    %80 = arith.addf %75, %79 : vector<8x32x32xf32>
    %cst_41 = arith.constant dense<0xFF800000> : vector<8x32xf32>
    %81 = vector.multi_reduction <maximumf>, %80, %cst_41 [2] : vector<8x32x32xf32> to vector<8x32xf32>
    %82 = vector.shape_cast %81 : vector<8x32xf32> to vector<8x32x1xf32>
    %83 = vector.broadcast %82 : vector<8x32x1xf32> to vector<8x32x32xf32>
    %84 = arith.subf %80, %83 : vector<8x32x32xf32>
    %85 = math.exp %84 : vector<8x32x32xf32>
    %cst_42 = arith.constant dense<0.000000e+00> : vector<8x32xf32>
    %86 = vector.multi_reduction <add>, %85, %cst_42 [2] : vector<8x32x32xf32> to vector<8x32xf32>
    %87 = vector.shape_cast %86 : vector<8x32xf32> to vector<8x32x1xf32>
    %88 = tpu.reciprocal %87 {approx = true} : vector<8x32x1xf32> -> vector<8x32x1xf32>
    %89 = vector.broadcast %88 : vector<8x32x1xf32> to vector<8x32x32xf32>
    %90 = arith.mulf %85, %89 : vector<8x32x32xf32>
    %91 = arith.truncf %90 : vector<8x32x32xf32> to vector<8x32x32xbf16>
    "tpu.trace_start"() <{level = 10 : i32, message = "bnm,bmd->bnd"}> : () -> ()
    %cst_43 = arith.constant dense<0.000000e+00> : vector<8x32x32xf32>
    %92 = tpu.matmul %91, %74, %cst_43 {dimension_numbers = #tpu.dot_dimension_numbers<[2], [1], [1], [2], [0, 0, 0, 1, 1, 2], [0], [0]>} : vector<8x32x32xbf16>, vector<8x32x32xbf16>, vector<8x32x32xf32> -> vector<8x32x32xf32>
    "tpu.trace_stop"() : () -> ()
    %93 = vector.shape_cast %92 : vector<8x32x32xf32> to vector<256x32xf32>
    %c0_44 = arith.constant 0 : index
    %c64_45 = arith.constant 64 : index
    %94 = vector.load %arg9[%c0_44, %c64_45] : memref<256x128xf32, #tpu.memory_space<vmem>>, vector<256x32xf32>
    tpu.vector_store %arg9[%c0_44, %c64_45], %93 {strides = array<i32>} : memref<256x128xf32, #tpu.memory_space<vmem>>, vector<256x32xf32>,
    %c0_46 = arith.constant 0 : index
    %c96 = arith.constant 96 : index
    %95 = vector.load %arg8[%c0_46, %c96] : memref<256x384xf32, #tpu.memory_space<vmem>>, vector<256x32xf32>
    %96 = arith.truncf %95 : vector<256x32xf32> to vector<256x32xbf16>
    %97 = vector.shape_cast %96 : vector<256x32xbf16> to vector<8x32x32xbf16>
    %c0_47 = arith.constant 0 : index
    %c224 = arith.constant 224 : index
    %98 = vector.load %arg8[%c0_47, %c224] : memref<256x384xf32, #tpu.memory_space<vmem>>, vector<256x32xf32>
    %99 = arith.truncf %98 : vector<256x32xf32> to vector<256x32xbf16>
    %100 = vector.shape_cast %99 : vector<256x32xbf16> to vector<8x32x32xbf16>
    %c0_48 = arith.constant 0 : index
    %c352 = arith.constant 352 : index
    %101 = vector.load %arg8[%c0_48, %c352] : memref<256x384xf32, #tpu.memory_space<vmem>>, vector<256x32xf32>
    %102 = arith.truncf %101 : vector<256x32xf32> to vector<256x32xbf16>
    %103 = vector.shape_cast %102 : vector<256x32xbf16> to vector<8x32x32xbf16>
    "tpu.trace_start"() <{level = 10 : i32, message = "bnd,bmd->bnm"}> : () -> ()
    %cst_49 = arith.constant dense<0.000000e+00> : vector<8x32x32xf32>
    %104 = tpu.matmul %97, %100, %cst_49 {dimension_numbers = #tpu.dot_dimension_numbers<[2], [2], [1], [1], [0, 0, 0, 1, 1, 1], [0], [0]>} : vector<8x32x32xbf16>, vector<8x32x32xbf16>, vector<8x32x32xf32> -> vector<8x32x32xf32>
    "tpu.trace_stop"() : () -> ()
    %c0_50 = arith.constant 0 : index
    %c3 = arith.constant 3 : index
    %c0_51 = arith.constant 0 : index
    %c0_52 = arith.constant 0 : index
    %105 = vector.load %arg6[%c0_50, %c3, %c0_51, %c0_52] : memref<1x4x32x32xf32, #tpu.memory_space<vmem>>, vector<1x1x32x32xf32>
    %106 = vector.shape_cast %105 : vector<1x1x32x32xf32> to vector<32x32xf32>
    %107 = vector.shape_cast %106 : vector<32x32xf32> to vector<1x32x32xf32>
    %108 = vector.broadcast %107 : vector<1x32x32xf32> to vector<8x32x32xf32>
    %109 = arith.addf %104, %108 : vector<8x32x32xf32>
    %cst_53 = arith.constant dense<0xFF800000> : vector<8x32xf32>
    %110 = vector.multi_reduction <maximumf>, %109, %cst_53 [2] : vector<8x32x32xf32> to vector<8x32xf32>
    %111 = vector.shape_cast %110 : vector<8x32xf32> to vector<8x32x1xf32>
    %112 = vector.broadcast %111 : vector<8x32x1xf32> to vector<8x32x32xf32>
    %113 = arith.subf %109, %112 : vector<8x32x32xf32>
    %114 = math.exp %113 : vector<8x32x32xf32>
    %cst_54 = arith.constant dense<0.000000e+00> : vector<8x32xf32>
    %115 = vector.multi_reduction <add>, %114, %cst_54 [2] : vector<8x32x32xf32> to vector<8x32xf32>
    %116 = vector.shape_cast %115 : vector<8x32xf32> to vector<8x32x1xf32>
    %117 = tpu.reciprocal %116 {approx = true} : vector<8x32x1xf32> -> vector<8x32x1xf32>
    %118 = vector.broadcast %117 : vector<8x32x1xf32> to vector<8x32x32xf32>
    %119 = arith.mulf %114, %118 : vector<8x32x32xf32>
    %120 = arith.truncf %119 : vector<8x32x32xf32> to vector<8x32x32xbf16>
    "tpu.trace_start"() <{level = 10 : i32, message = "bnm,bmd->bnd"}> : () -> ()
    %cst_55 = arith.constant dense<0.000000e+00> : vector<8x32x32xf32>
    %121 = tpu.matmul %120, %103, %cst_55 {dimension_numbers = #tpu.dot_dimension_numbers<[2], [1], [1], [2], [0, 0, 0, 1, 1, 2], [0], [0]>} : vector<8x32x32xbf16>, vector<8x32x32xbf16>, vector<8x32x32xf32> -> vector<8x32x32xf32>
    "tpu.trace_stop"() : () -> ()
    %122 = vector.shape_cast %121 : vector<8x32x32xf32> to vector<256x32xf32>
    %c0_56 = arith.constant 0 : index
    %c96_57 = arith.constant 96 : index
    %123 = vector.load %arg9[%c0_56, %c96_57] : memref<256x128xf32, #tpu.memory_space<vmem>>, vector<256x32xf32>
    tpu.vector_store %arg9[%c0_56, %c96_57], %122 {strides = array<i32>} : memref<256x128xf32, #tpu.memory_space<vmem>>, vector<256x32xf32>,
    %c0_58 = arith.constant 0 : index
    %c0_59 = arith.constant 0 : index
    %124 = vector.load %arg9[%c0_58, %c0_59] : memref<256x128xf32, #tpu.memory_space<vmem>>, vector<256x128xf32>
    %125 = arith.truncf %124 : vector<256x128xf32> to vector<256x128xbf16>
    %c0_60 = arith.constant 0 : index
    %c0_61 = arith.constant 0 : index
    %126 = vector.load %arg4[%c0_60, %c0_61] : memref<128x128xbf16, #tpu.memory_space<vmem>>, vector<128x128xbf16>
    %cst_62 = arith.constant dense<0.000000e+00> : vector<256x128xf32>
    %127 = tpu.matmul %125, %126, %cst_62 {dimension_numbers = #tpu.dot_dimension_numbers<[1], [0], [0], [1], [0, 0, 1, 1], [], []>} : vector<256x128xbf16>, vector<128x128xbf16>, vector<256x128xf32> -> vector<256x128xf32>
    %c0_63 = arith.constant 0 : index
    %c0_64 = arith.constant 0 : index
    %128 = vector.load %arg5[%c0_63, %c0_64] : memref<1x128xf32, #tpu.memory_space<vmem>>, vector<1x128xf32>
    %129 = vector.broadcast %128 : vector<1x128xf32> to vector<256x128xf32>
    %130 = arith.addf %127, %129 : vector<256x128xf32>
    %131 = vector.shape_cast %130 : vector<256x128xf32> to vector<8x32x128xf32>
    %132 = arith.truncf %131 : vector<8x32x128xf32> to vector<8x32x128xbf16>
    %c0_65 = arith.constant 0 : index
    %c0_66 = arith.constant 0 : index
    %c0_67 = arith.constant 0 : index
    %133 = vector.load %arg7[%c0_65, %c0_66, %c0_67] : memref<8x32x128xbf16, #tpu.memory_space<vmem>>, vector<8x32x128xbf16>
    tpu.vector_store %arg7[%c0_65, %c0_66, %c0_67], %132 {strides = array<i32>} : memref<8x32x128xbf16, #tpu.memory_space<vmem>>, vector<8x32x128xbf16>,
    return
  }
  func.func @transform_0(%arg0: i32) -> (i32, i32, i32) {
    %c0_i32 = arith.constant 0 : i32
    %c0_i32_0 = arith.constant 0 : i32
    %c0_i32_1 = arith.constant 0 : i32
    return %arg0, %c0_i32, %c0_i32_0 : i32, i32, i32
  }
  func.func @transform_1(%arg0: i32) -> (i32, i32) {
    %c0_i32 = arith.constant 0 : i32
    %c0_i32_0 = arith.constant 0 : i32
    %c0_i32_1 = arith.constant 0 : i32
    return %c0_i32, %c0_i32_0 : i32, i32
  }
  func.func @transform_2(%arg0: i32) -> (i32, i32) {
    %c0_i32 = arith.constant 0 : i32
    %c0_i32_0 = arith.constant 0 : i32
    %c0_i32_1 = arith.constant 0 : i32
    return %c0_i32, %c0_i32_0 : i32, i32
  }
  func.func @transform_3(%arg0: i32) -> (i32, i32) {
    %c0_i32 = arith.constant 0 : i32
    %c0_i32_0 = arith.constant 0 : i32
    %c0_i32_1 = arith.constant 0 : i32
    return %c0_i32, %c0_i32_0 : i32, i32
  }
  func.func @transform_4(%arg0: i32) -> (i32, i32) {
    %c0_i32 = arith.constant 0 : i32
    %c0_i32_0 = arith.constant 0 : i32
    %c0_i32_1 = arith.constant 0 : i32
    return %c0_i32, %c0_i32_0 : i32, i32
  }
  func.func @transform_5(%arg0: i32) -> (i32, i32, i32, i32) {
    %c0_i32 = arith.constant 0 : i32
    %c0_i32_0 = arith.constant 0 : i32
    %c0_i32_1 = arith.constant 0 : i32
    %c0_i32_2 = arith.constant 0 : i32
    %c0_i32_3 = arith.constant 0 : i32
    return %c0_i32, %c0_i32_0, %c0_i32_1, %c0_i32_2 : i32, i32, i32, i32
  }
  func.func @transform_6(%arg0: i32) -> (i32, i32, i32) {
    %c0_i32 = arith.constant 0 : i32
    %c0_i32_0 = arith.constant 0 : i32
    %c0_i32_1 = arith.constant 0 : i32
    return %arg0, %c0_i32, %c0_i32_0 : i32, i32, i32
  }
}

</mosaic_0001>

<bundles_post_ra>
// kernel: mul.9
= control target key start
LH: loop header
LB: loop body
LE: loop exit
PB: predicated region body
PF: predicated region fallthrough
CT: control target
= control target key end

     0   :  { %3 = vsyncpa [#allocation1], 0  ;;  %s46_s9 = smov [#allocation0]   ;;  %s80_s0 = inlined_call_operand.hbm [shape: f32[384], index: 0, kind: input, shape index: {}]   ;;  %s81_s1 = inlined_call_operand.vmem [shape: f32[384], index: 1, kind: input, shape index: {}]   ;;  %s82_s2 = inlined_call_operand.vmem [shape: f32[384], index: 2, kind: output, shape index: {}]  }
   0x1   :  { %s8_s10 = sshll.u32 %s46_s9, 4  ;;  %s22_s13 = scalar_lea.hbm %s80_s0, 64  ;;  %s9_s10 = int_to_ptr.vmem [resolvable:$true] %s8_s10 }
   0x2   :  { %p23_p0 = scmp.ne.s32.totalorder %s80_s0, %s22_s13  ;;  %p26_p1 = scmp.lt.u32.totalorder %s22_s13, %s80_s0 }
   0x4   :  { %p28_p2 = pnand %p26_p1, %p23_p0 }
   0x6   :  { %31 = shalt.err (!%p28_p2)
}
   0x7   :  { %s32_s18 = scalar_lea.vmem %s9_s10, 64  ;;  %p37_p4 = scmp.lt.s32.totalorder %s9_s10, %s9_s10 }
   0x8   :  { %p33_p3 = scmp.ne.s32.totalorder %s9_s10, %s32_s18  ;;  %p38_p5 = scmp.lt.s32.totalorder %s32_s18, %s32_s18 }
   0xa   :  { %p39_p6 = por %p38_p5, %p37_p4 }
   0xc   :  { %p40_p7 = pnand %p39_p6, %p33_p3 }
   0xe   :  { %43 = shalt.err (!%p40_p7)
}
   0xf   :  { %11 = dma.hbm_to_vmem [thread:$0]  %s80_s0, 64, %s9_s10, [#allocation1]  }
  0x10   :  { %44 = dma.done.wait [#allocation1], 64  }
  0x11   :  { %45 = vsyncadd [#allocation1], 4294967232  ;;  %v13_v0 = vld [vmem:[#allocation0] sm:$0x7] }
  0x12   :  { %v14_v1 = vld [vmem:[%s81_s1] sm:$0x7] }
  0x13   :  { %v17_v2 = vmul.f32 %v14_v1, %v13_v0 }
  0x15   :  { %19 = vst [vmem:[%s82_s2] sm:$0xf] %v17_v2 }
  0x16   :  { %20 = vsyncpa [#allocation1], 1 }

// kernel: window_attention_3d.1
= control target key start
LH: loop header
LB: loop body
LE: loop exit
PB: predicated region body
PF: predicated region fallthrough
CT: control target
= control target key end

     0   :  { %11 = vsyncpa [#allocation5], 0  ;;  %s13618_s0 = inlined_call_operand.vmem [shape: bf16[64,32,128], index: 0, kind: input, shape index: {}]   ;;  %s13619_s1 = inlined_call_operand.vmem [shape: bf16[128,384], index: 1, kind: input, shape index: {}]   ;;  %s13620_s2 = inlined_call_operand.vmem [shape: f32[1,384], index: 2, kind: input, shape index: {}]   ;;  %s13621_s3 = inlined_call_operand.vmem [shape: bf16[128,128], index: 3, kind: input, shape index: {}]   ;;  %s13622_s4 = inlined_call_operand.vmem [shape: f32[1,128], index: 4, kind: input, shape index: {}]   ;;  %s13623_s5 = inlined_call_operand.vmem [shape: f32[1,4,32,32], index: 5, kind: input, shape index: {}]   ;;  %s13624_s6 = inlined_call_operand.hbm [shape: bf16[64,32,128], index: 6, kind: output, shape index: {}]  }
   0x1   :  { %13 = vsyncpa [#allocation5 + $0x1], 0  ;;  %s10378_s21 = smov 0   ;;  %s10380_s22 = smov 0  }
   0x2   :  { %s10382_s23 = smov 0   ;;  %s10384_s24 = smov 0  }
   0x3 LB: > { %s10399_s25 = sadd.s32 4294967295, %s10335_s24   ;;  %s8304_s26 = sadd.s32 4294967294, %s10335_s24   ;;  %s10335_s24 = sphi %s10384_s24, %s14021_s24   ;;  %s10331_s23 = sphi %s10382_s23, %s14020_s23   ;;  %s10327_s22 = sphi %s10380_s22, %s14019_s22   ;;  %s10323_s21 = sphi %s10378_s21, %s14018_s21  }
   0x4   : > { %s10403_s27 = sadd.s32 1, %s10335_s24   ;;  %s157_s28 = sadd.s32 1, %s10331_s23 }
   0x5   : > { %s154_s29 = ssub.s32 %s10335_s24, %s10403_s27  ;;  %p167_p0 = scmp.ne.s32.totalorder %s10331_s23, %s10327_s22 }
   0x6   : > { %p155_p1 = scmp.eq.s32.totalorder %s154_s29, 0  ;;  %p168_p2 = scmp.eq.s32.totalorder %s10399_s25, 7 }
   0x7   : > { %p173_p3 = scmp.ne.s32.totalorder %s10327_s22, %s10323_s21  ;;  %p174_p4 = scmp.eq.s32.totalorder %s8304_s26, 7 }
   0x8   : > { %s10414_s30 = scalar_select %p155_p1, %s10331_s23, %s157_s28  }
   0x9   : > { %p10416_p5 = por %p168_p2, %p167_p0  ;;  %p10420_p6 = por %p174_p4, %p173_p3 }
   0xa   : > { %p8307_p7 = scmp.ge.s32.totalorder %s10335_s24, 1  ;;  %p217_p8 = scmp.lt.s32.totalorder %s10335_s24, 9 }
   0xc   : > { %p218_p9 = pnand %p8307_p7, %p217_p8 }
   0xe   : > { %221 = sbr.rel (%p218_p9) target bundleno = 3534 (0xdce), region = 44 }
  0x15   : > { %v9705_v0 = vld [vmem:[%s13619_s1 + $0x4] ss:$12 sps:$4 sm:$0xff]   ;;  %s8309_s11 = sshll.u32 %s10399_s25, 3  ;;  %v9707_v1 = vld [vmem:[%s13619_s1] ss:$12 sps:$4 sm:$0xff]   ;;  %v10337_v2 = vmov 0   ;;  %v323_v41 = vlaneseq }
  0x16   : > { %594 = vmatprep.mubr.bf16.mxu0 %v10337_v2  ;;  %p249_p10 = scmp.lt.s32.totalorder %s8309_s11, 63  ;;  %704 = vmatprep.mubr.bf16.mxu1 %v10337_v2  ;;  %v9708_v3 = vld [vmem:[%s13619_s1 + $0x1c] ss:$12 sps:$4 sm:$0xff]   ;;  %v9710_v4 = vld [vmem:[%s13619_s1 + $0x18] ss:$12 sps:$4 sm:$0xff]   ;;  %vm1160_vm0 = vcmask 261120  }
  0x17   : > { %562 = vmatprep.subr.bf16.mxu0 %v9705_v0  ;;  %9581 = vmatprep.subr.bf16.mxu1 %v9705_v0  ;;  %v9711_v5 = vld [vmem:[%s13619_s1 + $0x34] ss:$12 sps:$4 sm:$0xff]   ;;  %v9713_v6 = vld [vmem:[%s13619_s1 + $0x30] ss:$12 sps:$4 sm:$0xff]   ;;  %v9714_v7 = vld [vmem:[%s13619_s1 + $0x4c] ss:$12 sps:$4 sm:$0xff]  }
  0x18   : > { %563 = vmatpush1.bf16.msra.mxu0 %v9707_v1  ;;  %s14023_s11 = smov (!%p249_p10, %s8309_s11), 63  ;;  %9589 = vmatpush1.bf16.msra.mxu1 %v9707_v1  ;;  %v9716_v8 = vld [vmem:[%s13619_s1 + $0x48] ss:$12 sps:$4 sm:$0xff]   ;;  %v9717_v9 = vld [vmem:[%s13619_s1 + $0x64] ss:$12 sps:$4 sm:$0xff]   ;;  %v10544_v42 = vshrl.u32 %v323_v41, 7 }
  0x19   : > { %564 = vmatprep.subr.bf16.mxu0 %v9708_v3  ;;  %9582 = vmatprep.subr.bf16.mxu1 %v9708_v3  ;;  %s8539_s20 = sshll.u32 %s14023_s11, 4  ;;  %v9719_v10 = vld [vmem:[%s13619_s1 + $0x60] ss:$12 sps:$4 sm:$0xff]   ;;  %v9720_v11 = vld [vmem:[%s13619_s1 + $0x7c] ss:$12 sps:$4 sm:$0xff]   ;;  %s10338_s11 = smov 96  }
  0x1a   : > { %s10453_s13 = scalar_lea.vmem %s13618_s0, %s8539_s20  ;;  %v9722_v12 = vld [vmem:[%s13619_s1 + $0x78] ss:$12 sps:$4 sm:$0xff]   ;;  %v9723_v13 = vld [vmem:[%s13619_s1 + $0x94] ss:$12 sps:$4 sm:$0xff]   ;;  %v9725_v14 = vld [vmem:[%s13619_s1 + $0x90] ss:$12 sps:$4 sm:$0xff]  }
  0x1b   : > { %v9726_v15 = vld [vmem:[%s13619_s1 + $0xac] ss:$12 sps:$4 sm:$0xff]   ;;  %v9728_v16 = vld [vmem:[%s13619_s1 + $0xa8] ss:$12 sps:$4 sm:$0xff]   ;;  %v9729_v18 = vld [vmem:[%s10453_s13] sm:$0xff]   ;;  %v325_v43 = vsub.s32 0, %v10544_v42 }
  0x1c   : > { %565 = vmatpush1.bf16.msra.mxu0 %v9710_v4  ;;  %9590 = vmatpush1.bf16.msra.mxu1 %v9710_v4  ;;  %v9745_v17 = vld [vmem:[%s13619_s1 + $0x8] ss:$12 sps:$4 sm:$0xff]   ;;  %v10487_v19 = vld [vmem:[%s10453_s13 + $0x58] sm:$0xff]   ;;  %v9746_v20 = vld [vmem:[%s13619_s1 + $0x20] ss:$12 sps:$4 sm:$0xff]   ;;  %v329_v45 = vsub.s32 1, %v10544_v42 }
  0x1d   : > { %566 = vmatprep.subr.bf16.mxu0 %v9711_v5  ;;  %9583 = vmatprep.subr.bf16.mxu1 %v9711_v5  ;;  %v9747_v21 = vld [vmem:[%s13619_s1 + $0x38] ss:$12 sps:$4 sm:$0xff]   ;;  %v9730_v22 = vld [vmem:[%s10453_s13 + $0x8] sm:$0xff]   ;;  %v9748_v24 = vld [vmem:[%s13619_s1 + $0x50] ss:$12 sps:$4 sm:$0xff]   ;;  %s10339_s28 = smov 64  }
  0x1e   : > { %v10500_v23 = vld [vmem:[%s10453_s13 + $0x60] sm:$0xff]   ;;  %v9749_v25 = vld [vmem:[%s13619_s1 + $0x68] ss:$12 sps:$4 sm:$0xff]   ;;  %v9732_v30 = vld [vmem:[%s10453_s13 + $0x18] sm:$0xff]   ;;  %s10340_s18 = smov 32   ;;  %vm4222_vm1 = vcmask 523520  }
  0x1f   : > { %v9731_v26 = vld [vmem:[%s10453_s13 + $0x10] sm:$0xff]   ;;  %v9742_v27 = vld [vmem:[%s10453_s13 + $0x68] sm:$0xff]   ;;  %v9751_v29 = vld [vmem:[%s13619_s1 + $0x98] ss:$12 sps:$4 sm:$0xff]   ;;  %vm5988_vm2 = vcmask 785920   ;;  %vm7754_vm3 = vcmask 1048320  }
  0x20   : > { %567 = vmatpush1.bf16.msra.mxu0 %v9713_v6  ;;  %9591 = vmatpush1.bf16.msra.mxu1 %v9713_v6  ;;  %v9750_v28 = vld [vmem:[%s13619_s1 + $0x80] ss:$12 sps:$4 sm:$0xff]   ;;  %v9743_v31 = vld [vmem:[%s10453_s13 + $0x70] sm:$0xff]   ;;  %v9744_v34 = vld [vmem:[%s10453_s13 + $0x78] sm:$0xff]   ;;  %s8573_s20 = sshll.u32 %s10399_s25, 11  ;;  %s10341_s14 = smov [#allocation4]  }
  0x21   : > { %568 = vmatprep.subr.bf16.mxu0 %v9714_v7  ;;  %9584 = vmatprep.subr.bf16.mxu1 %v9714_v7  ;;  %v9752_v32 = vld [vmem:[%s13619_s1 + $0xb0] ss:$12 sps:$4 sm:$0xff]   ;;  %v9733_v33 = vld [vmem:[%s10453_s13 + $0x20] sm:$0xff]   ;;  %v9734_v35 = vld [vmem:[%s10453_s13 + $0x28] sm:$0xff]   ;;  %s13567_s10 = scalar_lea.hbm %s13624_s6, %s8573_s20  ;;  %s10277_s15 = sshll.u32 %s10341_s14, 4  ;;  %s10278_s15 = int_to_ptr.vmem [resolvable:$false] %s10277_s15 }
  0x22   : > { %v9735_v36 = vld [vmem:[%s10453_s13 + $0x30] sm:$0xff]   ;;  %v9736_v37 = vld [vmem:[%s10453_s13 + $0x38] sm:$0xff]   ;;  %v9737_v38 = vld [vmem:[%s10453_s13 + $0x40] sm:$0xff]   ;;  %s10279_s16 = scalar_lea.vmem %s10278_s15, 4096 }
  0x23   : > { %v9738_v39 = vld [vmem:[%s10453_s13 + $0x48] sm:$0xff]   ;;  %v9740_v40 = vld [vmem:[%s10453_s13 + $0x50] sm:$0xff]   ;;  %v10550_v44 = vld [vmem:[%s13620_s2] sm:$0x7] }
  0x24   : > { %569 = vmatpush1.bf16.msra.mxu0 %v9716_v8  ;;  %9592 = vmatpush1.bf16.msra.mxu1 %v9716_v8  ;;  %v10554_v46 = vrot.slane %v10550_v44, %v325_v43  ;;  %v10557_v48 = vrot.slane %v10550_v44, %v329_v45 }
  0x25   : > { %570 = vmatprep.subr.bf16.mxu0 %v9717_v9  ;;  %9585 = vmatprep.subr.bf16.mxu1 %v9717_v9 }
  0x28   : > { %571 = vmatpush1.bf16.msra.mxu0 %v9719_v10  ;;  %9593 = vmatpush1.bf16.msra.mxu1 %v9719_v10 }
  0x29   : > { %572 = vmatprep.subr.bf16.mxu0 %v9720_v11  ;;  %9586 = vmatprep.subr.bf16.mxu1 %v9720_v11 }
  0x2c   : > { %573 = vmatpush1.bf16.msra.mxu0 %v9722_v12  ;;  %9594 = vmatpush1.bf16.msra.mxu1 %v9722_v12 }
  0x2d   : > { %574 = vmatprep.subr.bf16.mxu0 %v9723_v13  ;;  %9587 = vmatprep.subr.bf16.mxu1 %v9723_v13 }
  0x30   : > { %575 = vmatpush1.bf16.msra.mxu0 %v9725_v14  ;;  %9595 = vmatpush1.bf16.msra.mxu1 %v9725_v14 }
  0x31   : > { %576 = vmatprep.subr.bf16.mxu0 %v9726_v15  ;;  %9588 = vmatprep.subr.bf16.mxu1 %v9726_v15 }
  0x34   : > { %577 = vmatpush1.bf16.msra.mxu0 %v9728_v16  ;;  %9596 = vmatpush1.bf16.msra.mxu1 %v9728_v16 }
  0x35   : > { %8973 = vmatprep.subr.bf16.mxu1 %v9745_v17 }
  0x37   : > { %595 = vmatmul.mubr.bf16.vlgmr.msra.gmra.mrb[0].mxu0 %v9729_v18  ;;  %705 = vmatmul.mubr.bf16.vlgmr.msra.gmra.mrb[0].mxu1 %v10487_v19 }
  0x38   : > { %604 = vmatprep.mubr.bf16.mxu0 %v10337_v2  ;;  %714 = vmatprep.mubr.bf16.mxu1 %v10337_v2 }
  0x39   : > { %8974 = vmatpush3.bf16.msra.mxu1 %v9745_v17 }
  0x3a   : > { %8975 = vmatprep.subr.bf16.mxu1 %v9746_v20 }
  0x3d   : > { %8976 = vmatpush3.bf16.msra.mxu1 %v9746_v20 }
  0x3e   : > { %8977 = vmatprep.subr.bf16.mxu1 %v9747_v21 }
  0x3f   : > { %605 = vmatmul.mubr.bf16.gmra.mrb[4].mxu0 %v9730_v22  ;;  %715 = vmatmul.mubr.bf16.gmra.mrb[4].mxu1 %v10500_v23 }
  0x40   : > { %614 = vmatprep.mubr.bf16.mxu0 %v10337_v2  ;;  %724 = vmatprep.mubr.bf16.mxu1 %v10337_v2 }
  0x41   : > { %8978 = vmatpush3.bf16.msra.mxu1 %v9747_v21 }
  0x42   : > { %8979 = vmatprep.subr.bf16.mxu1 %v9748_v24 }
  0x45   : > { %8980 = vmatpush3.bf16.msra.mxu1 %v9748_v24 }
  0x46   : > { %8981 = vmatprep.subr.bf16.mxu1 %v9749_v25 }
  0x47   : > { %615 = vmatmul.mubr.bf16.gmra.mrb[8].mxu0 %v9731_v26  ;;  %725 = vmatmul.mubr.bf16.gmra.mrb[8].mxu1 %v9742_v27 }
  0x48   : > { %624 = vmatprep.mubr.bf16.mxu0 %v10337_v2  ;;  %734 = vmatprep.mubr.bf16.mxu1 %v10337_v2 }
  0x49   : > { %8982 = vmatpush3.bf16.msra.mxu1 %v9749_v25 }
  0x4a   : > { %8983 = vmatprep.subr.bf16.mxu1 %v9750_v28 }
  0x4d   : > { %8984 = vmatpush3.bf16.msra.mxu1 %v9750_v28 }
  0x4e   : > { %8985 = vmatprep.subr.bf16.mxu1 %v9751_v29 }
  0x4f   : > { %625 = vmatmul.mubr.bf16.gmra.mrb[12].mxu0 %v9732_v30  ;;  %735 = vmatmul.mubr.bf16.gmra.mrb[12].mxu1 %v9743_v31 }
  0x50   : > { %634 = vmatprep.mubr.bf16.mxu0 %v10337_v2  ;;  %744 = vmatprep.mubr.bf16.mxu1 %v10337_v2 }
  0x51   : > { %8986 = vmatpush3.bf16.msra.mxu1 %v9751_v29 }
  0x52   : > { %8987 = vmatprep.subr.bf16.mxu1 %v9752_v32 }
  0x55   : > { %8988 = vmatpush3.bf16.msra.mxu1 %v9752_v32 }
  0x57   : > { %635 = vmatmul.mubr.bf16.gmra.mrb[16].mxu0 %v9733_v33  ;;  %745 = vmatmul.mubr.bf16.gmra.mrb[16].mxu1 %v9744_v34 }
  0x58   : > { %644 = vmatprep.mubr.bf16.mxu0 %v10337_v2  ;;  %8989 = vmatprep.mubr.bf16.mxu1 %v9729_v18 }
  0x5f   : > { %645 = vmatmul.mubr.bf16.gmra.mrb[20].mxu0 %v9734_v35  ;;  %8990 = vmatmul.mubr.bf16.vlgmr.msra.gmra.mrb[20].mxu1 %v9730_v22 }
  0x60   : > { %654 = vmatprep.mubr.bf16.mxu0 %v10337_v2  ;;  %8993 = vmatprep.mubr.bf16.mxu1 %v9731_v26 }
  0x67   : > { %655 = vmatmul.mubr.bf16.gmra.mrb[24].mxu0 %v9735_v36  ;;  %8994 = vmatmul.mubr.bf16.gmra.mrb[24].mxu1 %v9732_v30 }
  0x68   : > { %664 = vmatprep.mubr.bf16.mxu0 %v10337_v2  ;;  %8997 = vmatprep.mubr.bf16.mxu1 %v9733_v33 }
  0x6f   : > { %665 = vmatmul.mubr.bf16.gmra.mrb[28].mxu0 %v9736_v37  ;;  %8998 = vmatmul.mubr.bf16.gmra.mrb[28].mxu1 %v9734_v35 }
  0x70   : > { %674 = vmatprep.mubr.bf16.mxu0 %v10337_v2  ;;  %9001 = vmatprep.mubr.bf16.mxu1 %v9735_v36 }
  0x77   : > { %675 = vmatmul.mubr.bf16.gmra.mrb[32].mxu0 %v9737_v38  ;;  %9002 = vmatmul.mubr.bf16.gmra.mrb[32].mxu1 %v9736_v37 }
  0x78   : > { %684 = vmatprep.mubr.bf16.mxu0 %v10337_v2  ;;  %9005 = vmatprep.mubr.bf16.mxu1 %v9737_v38 }
  0x7f   : > { %685 = vmatmul.mubr.bf16.gmra.mrb[36].mxu0 %v9738_v39  ;;  %9006 = vmatmul.mubr.bf16.gmra.mrb[36].mxu1 %v9738_v39 }
  0x80   : > { %694 = vmatprep.mubr.bf16.mxu0 %v10337_v2  ;;  %9009 = vmatprep.mubr.bf16.mxu1 %v9740_v40 }
  0x87   : > { %695 = vmatmul.mubr.bf16.gmra.mrb[40].mxu0 %v9740_v40  ;;  %9010 = vmatmul.mubr.bf16.gmra.mrb[40].mxu1 %v10487_v19 }
  0x88   : > { %9013 = vmatprep.mubr.bf16.mxu1 %v10500_v23 }
  0x8f   : > { %9014 = vmatmul.mubr.bf16.gmra.mrb[44].mxu1 %v9742_v27 }
  0x90   : > { %9017 = vmatprep.mubr.bf16.mxu1 %v9743_v31 }
  0x97   : > { %9018 = vmatmul.mubr.bf16.gmra.mrb[48].mxu1 %v9744_v34 }
 0x10a   : > { %v596_v47 = vpop.f32.mrb[0].mxu0  ;;  %v706_v49 = vpop.f32.mrb[0].mxu1 }
 0x10b   : > { %v598_v50 = vpop.f32.mrb[1].mxu0  ;;  %v707_v51 = vadd.f32 %v706_v49, %v10554_v46  ;;  %v708_v52 = vpop.f32.mrb[1].mxu1  ;;  %v597_v56 = vadd.f32 %v596_v47, %v10554_v46 }
 0x10c   : > { %v600_v53 = vpop.f32.mrb[2].mxu0  ;;  %v709_v54 = vadd.f32 %v708_v52, %v10557_v48  ;;  %v710_v55 = vpop.f32.mrb[2].mxu1  ;;  %v599_v61 = vadd.f32 %v598_v50, %v10557_v48 }
 0x10d   : > { %v601_v57 = vadd.f32 %v600_v53, %v10554_v46  ;;  %v602_v58 = vpop.f32.mrb[3].mxu0  ;;  %v711_v59 = vadd.f32 %v710_v55, %v10554_v46  ;;  %v712_v60 = vpop.f32.mrb[3].mxu1 }
 0x10e   : > { %v603_v62 = vadd.f32 %v602_v58, %v10557_v48  ;;  %v713_v63 = vadd.f32 %v712_v60, %v10557_v48 }
 0x10f   : > { %v10567_v0 = vpack.c.bf16 %v601_v57, %v597_v56  ;;  %v10569_v1 = vpack.c.bf16 %v711_v59, %v707_v51 }
 0x110   : > { %v10571_v2 = vpack.c.bf16 %v603_v62, %v599_v61  ;;  %v10573_v3 = vpack.c.bf16 %v713_v63, %v709_v54 }
 0x111   : > { %13731 = vst [vmem:[#allocation7_spill] sm:$0xff] %v10569_v1  ;;  %9025 = vmatprep.mubr.msk.bf16.mxu1 %vm1160_vm0, %v10567_v0 }
 0x112   : > { %13732 = vst [vmem:[#allocation8_spill] sm:$0xff] %v10573_v3  ;;  %v606_v4 = vpop.f32.mrb[4].mxu0  ;;  %9597 = vmatprep.subr.msk.bf16.mxu1 %vm1160_vm0, %v10571_v2  ;;  %v1168_v5 = vsel %vm1160_vm0, %v10571_v2, 0  ;;  %v716_v6 = vpop.f32.mrb[4].mxu1 }
 0x113   : > { %v608_v7 = vpop.f32.mrb[5].mxu0  ;;  %9022 = vmatpush3.bf16.xpose.msra.mxu1 %v1168_v5  ;;  %v717_v8 = vadd.f32 %v716_v6, %v10554_v46  ;;  %v718_v9 = vpop.f32.mrb[5].mxu1  ;;  %v607_v13 = vadd.f32 %v606_v4, %v10554_v46 }
 0x114   : > { %v610_v10 = vpop.f32.mrb[6].mxu0  ;;  %v719_v11 = vadd.f32 %v718_v9, %v10557_v48  ;;  %v720_v12 = vpop.f32.mrb[6].mxu1  ;;  %v609_v18 = vadd.f32 %v608_v7, %v10557_v48 }
 0x115   : > { %v611_v14 = vadd.f32 %v610_v10, %v10554_v46  ;;  %v612_v15 = vpop.f32.mrb[7].mxu0  ;;  %v721_v16 = vadd.f32 %v720_v12, %v10554_v46  ;;  %v722_v17 = vpop.f32.mrb[7].mxu1 }
 0x116   : > { %v613_v19 = vadd.f32 %v612_v15, %v10557_v48  ;;  %v723_v20 = vadd.f32 %v722_v17, %v10557_v48 }
 0x117   : > { %v10589_v21 = vpack.c.bf16 %v611_v14, %v607_v13  ;;  %v10591_v22 = vpack.c.bf16 %v721_v16, %v717_v8 }
 0x118   : > { %v10593_v23 = vpack.c.bf16 %v613_v19, %v609_v18  ;;  %v10595_v24 = vpack.c.bf16 %v723_v20, %v719_v11  ;;  %v333_v20 = vsub.s32 2, %v10544_v42 }
 0x119   : > { %13733 = vst [vmem:[#allocation9_spill] sm:$0xff] %v10591_v22 }
 0x11a   : > { %13734 = vst [vmem:[#allocation10_spill] sm:$0xff] %v10593_v23  ;;  %13735 = vst [vmem:[#allocation11_spill] sm:$0xff] %v10595_v24  ;;  %v616_v25 = vpop.f32.mrb[8].mxu0  ;;  %9598 = vmatprep.subr.msk.bf16.mxu1 %vm1160_vm0, %v10593_v23  ;;  %v1171_v26 = vsel %vm1160_vm0, %v10593_v23, 0  ;;  %v726_v27 = vpop.f32.mrb[8].mxu1 }
 0x11b   : > { %v618_v28 = vpop.f32.mrb[9].mxu0  ;;  %9024 = vmatpush3.bf16.xpose.msra.mxu1 %v1171_v26  ;;  %v727_v29 = vadd.f32 %v726_v27, %v10554_v46  ;;  %v728_v30 = vpop.f32.mrb[9].mxu1  ;;  %v617_v34 = vadd.f32 %v616_v25, %v10554_v46 }
 0x11c   : > { %v620_v31 = vpop.f32.mrb[10].mxu0  ;;  %v729_v32 = vadd.f32 %v728_v30, %v10557_v48  ;;  %v730_v33 = vpop.f32.mrb[10].mxu1  ;;  %v619_v39 = vadd.f32 %v618_v28, %v10557_v48 }
 0x11d   : > { %v621_v35 = vadd.f32 %v620_v31, %v10554_v46  ;;  %v622_v36 = vpop.f32.mrb[11].mxu0  ;;  %v731_v37 = vadd.f32 %v730_v33, %v10554_v46  ;;  %v732_v38 = vpop.f32.mrb[11].mxu1 }
 0x11e   : > { %v623_v40 = vadd.f32 %v622_v36, %v10557_v48  ;;  %v733_v41 = vadd.f32 %v732_v38, %v10557_v48  ;;  %v10663_v36 = vrot.slane %v10550_v44, %v333_v20 }
 0x11f   : > { %v10609_v43 = vpack.c.bf16 %v621_v35, %v617_v34  ;;  %v10611_v45 = vpack.c.bf16 %v731_v37, %v727_v29 }
 0x120   : > { %v10613_v47 = vpack.c.bf16 %v623_v40, %v619_v39  ;;  %v10615_v49 = vpack.c.bf16 %v733_v41, %v729_v32 }
 0x121   : > { %13736 = vst [vmem:[#allocation12_spill] sm:$0xff] %v10609_v43  ;;  %13737 = vst [vmem:[#allocation13_spill] sm:$0xff] %v10611_v45 }
 0x122   : > { %13738 = vst [vmem:[#allocation14_spill] sm:$0xff] %v10615_v49  ;;  %v626_v50 = vpop.f32.mrb[12].mxu0  ;;  %9026 = vmatmul.mubr.msk.bf16.vlgmr.msra.gmra.mrb[52].mxu1 %vm1160_vm0, %v10589_v21  ;;  %9599 = vmatprep.subr.msk.bf16.mxu1 %vm1160_vm0, %v10613_v47  ;;  %v1229_v51 = vsel %vm1160_vm0, %v10613_v47, 0  ;;  %v736_v52 = vpop.f32.mrb[12].mxu1 }
 0x123   : > { %v628_v53 = vpop.f32.mrb[13].mxu0  ;;  %9030 = vmatpush3.bf16.xpose.msra.mxu1 %v1229_v51  ;;  %9033 = vmatprep.mubr.msk.bf16.mxu1 %vm1160_vm0, %v10609_v43  ;;  %v737_v54 = vadd.f32 %v736_v52, %v10554_v46  ;;  %v738_v55 = vpop.f32.mrb[13].mxu1  ;;  %v627_v59 = vadd.f32 %v626_v50, %v10554_v46 }
 0x124   : > { %v630_v56 = vpop.f32.mrb[14].mxu0  ;;  %v739_v57 = vadd.f32 %v738_v55, %v10557_v48  ;;  %v740_v58 = vpop.f32.mrb[14].mxu1  ;;  %v629_v4 = vadd.f32 %v628_v53, %v10557_v48 }
 0x125   : > { %v631_v60 = vadd.f32 %v630_v56, %v10554_v46  ;;  %v632_v61 = vpop.f32.mrb[15].mxu0  ;;  %v741_v62 = vadd.f32 %v740_v58, %v10554_v46  ;;  %v742_v63 = vpop.f32.mrb[15].mxu1 }
 0x126   : > { %v633_v5 = vadd.f32 %v632_v61, %v10557_v48  ;;  %v743_v6 = vadd.f32 %v742_v63, %v10557_v48 }
 0x127   : > { %v10633_v7 = vpack.c.bf16 %v631_v60, %v627_v59  ;;  %v10635_v8 = vpack.c.bf16 %v741_v62, %v737_v54 }
 0x128   : > { %v10637_v9 = vpack.c.bf16 %v633_v5, %v629_v4  ;;  %v10639_v10 = vpack.c.bf16 %v743_v6, %v739_v57 }
 0x129   : > { %13739 = vst [vmem:[#allocation15_spill] sm:$0xff] %v10635_v8 }
 0x12a   : > { %13740 = vst [vmem:[#allocation16_spill] sm:$0xff] %v10639_v10  ;;  %v636_v11 = vpop.f32.mrb[16].mxu0  ;;  %9600 = vmatprep.subr.msk.bf16.mxu1 %vm1160_vm0, %v10637_v9  ;;  %v1232_v12 = vsel %vm1160_vm0, %v10637_v9, 0  ;;  %v746_v13 = vpop.f32.mrb[16].mxu1 }
 0x12b   : > { %v638_v14 = vpop.f32.mrb[17].mxu0  ;;  %9032 = vmatpush3.bf16.xpose.msra.mxu1 %v1232_v12  ;;  %v747_v15 = vadd.f32 %v746_v13, %v10554_v46  ;;  %v748_v16 = vpop.f32.mrb[17].mxu1  ;;  %v637_v25 = vadd.f32 %v636_v11, %v10554_v46 }
 0x12c   : > { %v640_v17 = vpop.f32.mrb[18].mxu0  ;;  %v749_v18 = vadd.f32 %v748_v16, %v10557_v48  ;;  %v750_v19 = vpop.f32.mrb[18].mxu1  ;;  %v639_v30 = vadd.f32 %v638_v14, %v10557_v48 }
 0x12d   : > { %v641_v26 = vadd.f32 %v640_v17, %v10554_v46  ;;  %v642_v27 = vpop.f32.mrb[19].mxu0  ;;  %v751_v28 = vadd.f32 %v750_v19, %v10554_v46  ;;  %v752_v29 = vpop.f32.mrb[19].mxu1 }
 0x12e   : > { %v643_v31 = vadd.f32 %v642_v27, %v10557_v48  ;;  %v753_v32 = vadd.f32 %v752_v29, %v10557_v48 }
 0x12f   : > { %v10654_v33 = vpack.c.bf16 %v641_v26, %v637_v25  ;;  %v10656_v34 = vpack.c.bf16 %v751_v28, %v747_v15 }
 0x130   : > { %v10658_v35 = vpack.c.bf16 %v643_v31, %v639_v30  ;;  %v10660_v42 = vpack.c.bf16 %v753_v32, %v749_v18 }
 0x131   : > { %13741 = vst [vmem:[#allocation17_spill] sm:$0xff] %v10654_v33  ;;  %13742 = vst [vmem:[#allocation18_spill] sm:$0xff] %v10656_v34 }
 0x132   : > { %13743 = vst [vmem:[#allocation19_spill] sm:$0xff] %v10658_v35  ;;  %13744 = vst [vmem:[#allocation20_spill] sm:$0xff] %v10660_v42  ;;  %v646_v37 = vpop.f32.mrb[20].mxu0  ;;  %9034 = vmatmul.mubr.msk.bf16.vlgmr.msra.gmra.mrb[56].mxu1 %vm1160_vm0, %v10633_v7  ;;  %9601 = vmatprep.subr.msk.bf16.mxu1 %vm1160_vm0, %v10658_v35  ;;  %v1290_v38 = vsel %vm1160_vm0, %v10658_v35, 0  ;;  %v8991_v39 = vpop.f32.mrb[20].mxu1 }
 0x133   : > { %v648_v40 = vpop.f32.mrb[21].mxu0  ;;  %9038 = vmatpush3.bf16.xpose.msra.mxu1 %v1290_v38  ;;  %9041 = vmatprep.mubr.msk.bf16.mxu1 %vm1160_vm0, %v10654_v33  ;;  %v798_v41 = vadd.f32 %v8991_v39, %v10663_v36  ;;  %v789_v44 = vpop.f32.mrb[21].mxu1  ;;  %v647_v53 = vadd.f32 %v646_v37, %v10554_v46 }
 0x134   : > { %v650_v50 = vpop.f32.mrb[22].mxu0  ;;  %v790_v51 = vadd.f32 %v789_v44, %v10663_v36  ;;  %v8992_v52 = vpop.f32.mrb[22].mxu1  ;;  %v649_v58 = vadd.f32 %v648_v40, %v10557_v48 }
 0x135   : > { %v651_v54 = vadd.f32 %v650_v50, %v10554_v46  ;;  %v652_v55 = vpop.f32.mrb[23].mxu0  ;;  %v801_v56 = vadd.f32 %v8992_v52, %v10663_v36  ;;  %v792_v57 = vpop.f32.mrb[23].mxu1 }
 0x136   : > { %v653_v59 = vadd.f32 %v652_v55, %v10557_v48  ;;  %v793_v60 = vadd.f32 %v792_v57, %v10663_v36 }
 0x137   : > { %v10681_v61 = vpack.c.bf16 %v651_v54, %v647_v53  ;;  %v10683_v62 = vpack.c.bf16 %v801_v56, %v798_v41 }
 0x138   : > { %v10685_v63 = vpack.c.bf16 %v653_v59, %v649_v58  ;;  %v10687_v4 = vpack.c.bf16 %v793_v60, %v790_v51 }
 0x139   : > { %13745 = vst [vmem:[#allocation21_spill] sm:$0xff] %v10683_v62 }
 0x13a   : > { %13746 = vst [vmem:[#allocation22_spill] sm:$0xff] %v10687_v4  ;;  %v656_v5 = vpop.f32.mrb[24].mxu0  ;;  %9602 = vmatprep.subr.msk.bf16.mxu1 %vm1160_vm0, %v10685_v63  ;;  %v1293_v6 = vsel %vm1160_vm0, %v10685_v63, 0  ;;  %v8995_v11 = vpop.f32.mrb[24].mxu1 }
 0x13b   : > { %v658_v12 = vpop.f32.mrb[25].mxu0  ;;  %9040 = vmatpush3.bf16.xpose.msra.mxu1 %v1293_v6  ;;  %v814_v13 = vadd.f32 %v8995_v11, %v10663_v36  ;;  %v805_v14 = vpop.f32.mrb[25].mxu1  ;;  %v657_v18 = vadd.f32 %v656_v5, %v10554_v46 }
 0x13c   : > { %v660_v15 = vpop.f32.mrb[26].mxu0  ;;  %v806_v16 = vadd.f32 %v805_v14, %v10663_v36  ;;  %v8996_v17 = vpop.f32.mrb[26].mxu1  ;;  %v659_v27 = vadd.f32 %v658_v12, %v10557_v48 }
 0x13d   : > { %v661_v19 = vadd.f32 %v660_v15, %v10554_v46  ;;  %v662_v20 = vpop.f32.mrb[27].mxu0  ;;  %v817_v25 = vadd.f32 %v8996_v17, %v10663_v36  ;;  %v808_v26 = vpop.f32.mrb[27].mxu1 }
 0x13e   : > { %v663_v28 = vadd.f32 %v662_v20, %v10557_v48  ;;  %v809_v29 = vadd.f32 %v808_v26, %v10663_v36 }
 0x13f   : > { %v10701_v30 = vpack.c.bf16 %v661_v19, %v657_v18  ;;  %v10703_v31 = vpack.c.bf16 %v817_v25, %v814_v13 }
 0x140   : > { %v10705_v32 = vpack.c.bf16 %v663_v28, %v659_v27  ;;  %v10707_v37 = vpack.c.bf16 %v809_v29, %v806_v16 }
 0x141   : > { %13747 = vst [vmem:[#allocation23_spill] sm:$0xff] %v10701_v30  ;;  %13748 = vst [vmem:[#allocation24_spill] sm:$0xff] %v10703_v31 }
 0x142   : > { %13749 = vst [vmem:[#allocation25_spill] sm:$0xff] %v10705_v32  ;;  %13750 = vst [vmem:[#allocation26_spill] sm:$0xff] %v10707_v37  ;;  %v666_v38 = vpop.f32.mrb[28].mxu0  ;;  %9042 = vmatmul.mubr.msk.bf16.vlgmr.msra.gmra.mrb[60].mxu1 %vm1160_vm0, %v10681_v61  ;;  %9603 = vmatprep.subr.msk.bf16.mxu1 %vm1160_vm0, %v10705_v32  ;;  %v1351_v39 = vsel %vm1160_vm0, %v10705_v32, 0  ;;  %v8999_v40 = vpop.f32.mrb[28].mxu1 }
 0x143   : > { %v668_v41 = vpop.f32.mrb[29].mxu0  ;;  %9046 = vmatpush3.bf16.xpose.msra.mxu1 %v1351_v39  ;;  %9049 = vmatprep.mubr.msk.bf16.mxu1 %vm1160_vm0, %v10701_v30  ;;  %v830_v44 = vadd.f32 %v8999_v40, %v10663_v36  ;;  %v821_v50 = vpop.f32.mrb[29].mxu1  ;;  %v667_v54 = vadd.f32 %v666_v38, %v10554_v46 }
 0x144   : > { %v670_v51 = vpop.f32.mrb[30].mxu0  ;;  %v822_v52 = vadd.f32 %v821_v50, %v10663_v36  ;;  %v9000_v53 = vpop.f32.mrb[30].mxu1  ;;  %v669_v59 = vadd.f32 %v668_v41, %v10557_v48 }
 0x145   : > { %v671_v55 = vadd.f32 %v670_v51, %v10554_v46  ;;  %v672_v56 = vpop.f32.mrb[31].mxu0  ;;  %v833_v57 = vadd.f32 %v9000_v53, %v10663_v36  ;;  %v824_v58 = vpop.f32.mrb[31].mxu1 }
 0x146   : > { %v673_v60 = vadd.f32 %v672_v56, %v10557_v48  ;;  %v825_v5 = vadd.f32 %v824_v58, %v10663_v36 }
 0x147   : > { %v10725_v6 = vpack.c.bf16 %v671_v55, %v667_v54  ;;  %v10727_v11 = vpack.c.bf16 %v833_v57, %v830_v44 }
 0x148   : > { %v10729_v12 = vpack.c.bf16 %v673_v60, %v669_v59  ;;  %v10731_v13 = vpack.c.bf16 %v825_v5, %v822_v52 }
 0x149   : > { %13751 = vst [vmem:[#allocation27_spill] sm:$0xff] %v10727_v11 }
 0x14a   : > { %13752 = vst [vmem:[#allocation28_spill] sm:$0xff] %v10731_v13  ;;  %v676_v14 = vpop.f32.mrb[32].mxu0  ;;  %9604 = vmatprep.subr.msk.bf16.mxu1 %vm1160_vm0, %v10729_v12  ;;  %v1354_v15 = vsel %vm1160_vm0, %v10729_v12, 0  ;;  %v9003_v16 = vpop.f32.mrb[32].mxu1 }
 0x14b   : > { %v678_v17 = vpop.f32.mrb[33].mxu0  ;;  %9048 = vmatpush3.bf16.xpose.msra.mxu1 %v1354_v15  ;;  %v846_v18 = vadd.f32 %v9003_v16, %v10663_v36  ;;  %v837_v19 = vpop.f32.mrb[33].mxu1  ;;  %v677_v27 = vadd.f32 %v676_v14, %v10554_v46 }
 0x14c   : > { %v680_v20 = vpop.f32.mrb[34].mxu0  ;;  %v838_v25 = vadd.f32 %v837_v19, %v10663_v36  ;;  %v9004_v26 = vpop.f32.mrb[34].mxu1  ;;  %v679_v40 = vadd.f32 %v678_v17, %v10557_v48 }
 0x14d   : > { %v681_v28 = vadd.f32 %v680_v20, %v10554_v46  ;;  %v682_v29 = vpop.f32.mrb[35].mxu0  ;;  %v849_v38 = vadd.f32 %v9004_v26, %v10663_v36  ;;  %v840_v39 = vpop.f32.mrb[35].mxu1 }
 0x14e   : > { %v683_v41 = vadd.f32 %v682_v29, %v10557_v48  ;;  %v841_v44 = vadd.f32 %v840_v39, %v10663_v36 }
 0x14f   : > { %v10745_v50 = vpack.c.bf16 %v681_v28, %v677_v27  ;;  %v10747_v51 = vpack.c.bf16 %v849_v38, %v846_v18 }
 0x150   : > { %v10749_v52 = vpack.c.bf16 %v683_v41, %v679_v40  ;;  %v10751_v53 = vpack.c.bf16 %v841_v44, %v838_v25 }
 0x151   : > { %13753 = vst [vmem:[#allocation29_spill] sm:$0xff] %v10745_v50  ;;  %13754 = vst [vmem:[#allocation30_spill] sm:$0xff] %v10747_v51  ;;  %9057 = vmatprep.mubr.msk.bf16.mxu0 %vm1160_vm0, %v10745_v50 }
 0x152   : > { %13755 = vst [vmem:[#allocation31_spill] sm:$0xff] %v10749_v52  ;;  %13756 = vst [vmem:[#allocation32_spill] sm:$0xff] %v10751_v53  ;;  %v686_v54 = vpop.f32.mrb[36].mxu0  ;;  %9050 = vmatmul.mubr.msk.bf16.vlgmr.msra.gmra.mrb[64].mxu1 %vm1160_vm0, %v10725_v6  ;;  %9605 = vmatprep.subr.msk.bf16.mxu0 %vm1160_vm0, %v10749_v52  ;;  %v1412_v55 = vsel %vm1160_vm0, %v10749_v52, 0  ;;  %v9007_v56 = vpop.f32.mrb[36].mxu1 }
 0x153   : > { %v688_v57 = vpop.f32.mrb[37].mxu0  ;;  %9054 = vmatpush3.bf16.xpose.msra.mxu0 %v1412_v55  ;;  %v862_v58 = vadd.f32 %v9007_v56, %v10663_v36  ;;  %v853_v59 = vpop.f32.mrb[37].mxu1  ;;  %v687_v15 = vadd.f32 %v686_v54, %v10554_v46 }
 0x154   : > { %v690_v60 = vpop.f32.mrb[38].mxu0  ;;  %v854_v5 = vadd.f32 %v853_v59, %v10663_v36  ;;  %v9008_v14 = vpop.f32.mrb[38].mxu1  ;;  %v689_v20 = vadd.f32 %v688_v57, %v10557_v48 }
 0x155   : > { %v691_v16 = vadd.f32 %v690_v60, %v10554_v46  ;;  %v692_v17 = vpop.f32.mrb[39].mxu0  ;;  %v865_v18 = vadd.f32 %v9008_v14, %v10663_v36  ;;  %v856_v19 = vpop.f32.mrb[39].mxu1 }
 0x156   : > { %v693_v25 = vadd.f32 %v692_v17, %v10557_v48  ;;  %v857_v26 = vadd.f32 %v856_v19, %v10663_v36 }
 0x157   : > { %v10769_v27 = vpack.c.bf16 %v691_v16, %v687_v15  ;;  %v10771_v28 = vpack.c.bf16 %v865_v18, %v862_v58 }
 0x158   : > { %v10773_v29 = vpack.c.bf16 %v693_v25, %v689_v20  ;;  %v10775_v38 = vpack.c.bf16 %v857_v26, %v854_v5  ;;  %v1534_v26 = vsel %vm1160_vm0, %v10595_v24, 0 }
 0x159   : > { %13757 = vst [vmem:[#allocation33_spill] sm:$0xff] %v10769_v27  ;;  %13758 = vst [vmem:[#allocation34_spill] sm:$0xff] %v10771_v28 }
 0x15a   : > { %13759 = vst [vmem:[#allocation35_spill] sm:$0xff] %v10773_v29  ;;  %13760 = vst [vmem:[#allocation36_spill] sm:$0xff] %v10775_v38  ;;  %v696_v39 = vpop.f32.mrb[40].mxu0  ;;  %9606 = vmatprep.subr.msk.bf16.mxu0 %vm1160_vm0, %v10773_v29  ;;  %v1415_v40 = vsel %vm1160_vm0, %v10773_v29, 0  ;;  %v9011_v41 = vpop.f32.mrb[40].mxu1 }
 0x15b   : > { %v698_v44 = vpop.f32.mrb[41].mxu0  ;;  %9056 = vmatpush3.bf16.xpose.msra.mxu0 %v1415_v40  ;;  %v878_v54 = vadd.f32 %v9011_v41, %v10663_v36  ;;  %v869_v55 = vpop.f32.mrb[41].mxu1  ;;  %v697_v59 = vadd.f32 %v696_v39, %v10554_v46 }
 0x15c   : > { %v700_v56 = vpop.f32.mrb[42].mxu0  ;;  %9609 = vmatprep.subr.msk.bf16.mxu0 %vm1160_vm0, %v10595_v24  ;;  %v870_v57 = vadd.f32 %v869_v55, %v10663_v36  ;;  %v9012_v58 = vpop.f32.mrb[42].mxu1  ;;  %v699_v16 = vadd.f32 %v698_v44, %v10557_v48 }
 0x15d   : > { %v701_v60 = vadd.f32 %v700_v56, %v10554_v46  ;;  %v702_v5 = vpop.f32.mrb[43].mxu0  ;;  %v881_v14 = vadd.f32 %v9012_v58, %v10663_v36  ;;  %v872_v15 = vpop.f32.mrb[43].mxu1 }
 0x15e   : > { %v703_v17 = vadd.f32 %v702_v5, %v10557_v48  ;;  %v873_v18 = vadd.f32 %v872_v15, %v10663_v36  ;;  %v1476_v5 = vsel %vm1160_vm0, %v10573_v3, 0 }
 0x15f   : > { %v10791_v19 = vpack.c.bf16 %v701_v60, %v697_v59  ;;  %v10793_v20 = vpack.c.bf16 %v881_v14, %v878_v54  ;;  %v1537_v59 = vsel %vm1160_vm0, %v10615_v49, 0 }
 0x160   : > { %v10795_v25 = vpack.c.bf16 %v703_v17, %v699_v16  ;;  %v10799_v46 = vpack.c.bf16 %v873_v18, %v870_v57 }
 0x161   : > { %13761 = vst [vmem:[#allocation37_spill] sm:$0xff] %v10791_v19  ;;  %13762 = vst [vmem:[#allocation38_spill] sm:$0xff] %v10793_v20  ;;  %9065 = vmatprep.mubr.msk.bf16.mxu1 %vm1160_vm0, %v10791_v19 }
 0x162   : > { %13763 = vst [vmem:[#allocation39_spill] sm:$0xff] %v10795_v25  ;;  %13764 = vst [vmem:[#allocation40_spill] sm:$0xff] %v10799_v46  ;;  %9058 = vmatmul.mubr.msk.bf16.vlgmr.msra.gmra.mrb[44].mxu0 %vm1160_vm0, %v10769_v27  ;;  %9607 = vmatprep.subr.msk.bf16.mxu1 %vm1160_vm0, %v10795_v25  ;;  %v1473_v48 = vsel %vm1160_vm0, %v10795_v25, 0  ;;  %v9015_v39 = vpop.f32.mrb[44].mxu1 }
 0x163   : > { %9062 = vmatpush3.bf16.xpose.msra.mxu1 %v1473_v48  ;;  %9070 = vmatpush3.bf16.xpose.msra.mxu0 %v1534_v26  ;;  %v894_v40 = vadd.f32 %v9015_v39, %v10663_v36  ;;  %v885_v41 = vpop.f32.mrb[45].mxu1 }
 0x164   : > { %9608 = vmatprep.subr.msk.bf16.mxu1 %vm1160_vm0, %v10573_v3  ;;  %9610 = vmatprep.subr.msk.bf16.mxu0 %vm1160_vm0, %v10615_v49  ;;  %v886_v44 = vadd.f32 %v885_v41, %v10663_v36  ;;  %v9016_v54 = vpop.f32.mrb[46].mxu1  ;;  %v1595_v41 = vsel %vm1160_vm0, %v10639_v10, 0 }
 0x165   : > { %9073 = vmatprep.mubr.msk.bf16.mxu0 %vm1160_vm0, %v10591_v22  ;;  %v897_v55 = vadd.f32 %v9016_v54, %v10663_v36  ;;  %v888_v56 = vpop.f32.mrb[47].mxu1  ;;  %v10864_v54 = vld [vmem:[%s13623_s5 + $0x10] sm:$0xff] }
 0x166   : > { %v889_v57 = vadd.f32 %v888_v56, %v10663_v36 }
 0x167   : > { %v10819_v58 = vpack.c.bf16 %v897_v55, %v894_v40  ;;  %v10869_v55 = vld [vmem:[%s13623_s5] sm:$0xff] }
 0x168   : > { %v10823_v60 = vpack.c.bf16 %v889_v57, %v886_v44  ;;  %v10874_v57 = vld [vmem:[%s13623_s5 + $0x18] sm:$0xff] }
 0x169   : > { %13765 = vst [vmem:[#allocation41_spill] sm:$0xff] %v10819_v58 }
 0x16a   : > { %13766 = vst [vmem:[#allocation42_spill] sm:$0xff] %v10823_v60  ;;  %v9019_v14 = vpop.f32.mrb[48].mxu1 }
 0x16b   : > { %9064 = vmatpush3.bf16.xpose.msra.mxu1 %v1476_v5  ;;  %9072 = vmatpush3.bf16.xpose.msra.mxu0 %v1537_v59  ;;  %v910_v15 = vadd.f32 %v9019_v14, %v10663_v36  ;;  %v901_v16 = vpop.f32.mrb[49].mxu1  ;;  %v10882_v14 = vld [vmem:[%s13623_s5 + $0x8] sm:$0xff] }
 0x16c   : > { %9611 = vmatprep.subr.msk.bf16.mxu1 %vm1160_vm0, %v10639_v10  ;;  %v902_v17 = vadd.f32 %v901_v16, %v10663_v36  ;;  %v9020_v18 = vpop.f32.mrb[50].mxu1  ;;  %9085 = vmatprep.subr.bf16.mxu0 %v10687_v4 }
 0x16d   : > { %v913_v26 = vadd.f32 %v9020_v18, %v10663_v36  ;;  %v904_v48 = vpop.f32.mrb[51].mxu1 }
 0x16e   : > { %v905_v39 = vadd.f32 %v904_v48, %v10663_v36  ;;  %v1598_v36 = vsel %vm1160_vm0, %v10660_v42, 0 }
 0x16f   : > { %v10834_v40 = vpack.c.bf16 %v913_v26, %v910_v15 }
 0x170   : > { %v10838_v44 = vpack.c.bf16 %v905_v39, %v902_v17 }
 0x171   : > { %13767 = vst [vmem:[#allocation43_spill] sm:$0xff] %v10834_v40 }
 0x172   : > { %13768 = vst [vmem:[#allocation44_spill] sm:$0xff] %v10838_v44  ;;  %9066 = vmatmul.mubr.msk.bf16.vlgmr.msra.gmra.mrb[68].mxu1 %vm1160_vm0, %v10569_v1  ;;  %9074 = vmatmul.mubr.msk.bf16.vlgmr.msra.gmra.mrb[48].mxu0 %vm1160_vm0, %v10611_v45 }
 0x173   : > { %9078 = vmatpush3.bf16.xpose.msra.mxu1 %v1595_v41  ;;  %9081 = vmatprep.mubr.msk.bf16.mxu1 %vm1160_vm0, %v10635_v8 }
 0x174   : > { %9612 = vmatprep.subr.msk.bf16.mxu1 %vm1160_vm0, %v10660_v42  ;;  %9086 = vmatpush3.bf16.msra.mxu0 %v10687_v4 }
 0x175   : > { %9087 = vmatprep.subr.bf16.mxu0 %v10683_v62 }
 0x178   : > { %9088 = vmatpush3.bf16.msra.mxu0 %v10683_v62 }
 0x179   : > { %9101 = vmatprep.subr.bf16.mxu0 %v10731_v13 }
 0x17b   : > { %9080 = vmatpush3.bf16.xpose.msra.mxu1 %v1598_v36 }
 0x17c   : > { %9093 = vmatprep.subr.bf16.mxu1 %v10707_v37 }
 0x182   : > { %9082 = vmatmul.mubr.msk.bf16.vlgmr.msra.gmra.mrb[72].mxu1 %vm1160_vm0, %v10656_v34 }
 0x183   : > { %9094 = vmatpush3.bf16.msra.mxu1 %v10707_v37 }
 0x184   : > { %9095 = vmatprep.subr.bf16.mxu1 %v10703_v31 }
 0x187   : > { %9096 = vmatpush3.bf16.msra.mxu1 %v10703_v31 }
 0x188   : > { %9109 = vmatprep.subr.bf16.mxu1 %v10751_v53 }
 0x1f5   : > { %v9027_v56 = vpop.f32.mrb[52].mxu1 }
 0x1f6   : > { %v10877_v59 = vadd.f32 %v9027_v56, %v10864_v54  ;;  %v1207_v5 = vpop.f32.mrb[53].mxu1 }
 0x1f7   : > { %v10885_v15 = vadd.f32 %v1207_v5, %v10869_v55  ;;  %v9028_v16 = vpop.f32.mrb[54].mxu1 }
 0x1f8   : > { %v10888_v17 = vadd.f32 %v9028_v16, %v10874_v57  ;;  %v1210_v18 = vpop.f32.mrb[55].mxu1  ;;  %v1655_v26 = vsel %vm1160_vm0, %v10877_v59, -inf }
 0x1f9   : > { %v10893_v48 = vadd.f32 %v1210_v18, %v10882_v14  ;;  %1656 = vmax.xlane.f32.xlu1 %v1655_v26  ;;  %v1649_v39 = vsel %vm1160_vm0, %v10885_v15, -inf }
 0x1fa   : > { %1650 = vmax.xlane.f32.xlu0 %v1649_v39  ;;  %v1658_v41 = vsel %vm1160_vm0, %v10888_v17, -inf }
 0x1fb   : > { %v1652_v36 = vsel %vm1160_vm0, %v10893_v48, -inf }
 0x1fd   : > { %1659 = vmax.xlane.f32.xlu1 %v1658_v41 }
 0x1fe   : > { %1653 = vmax.xlane.f32.xlu0 %v1652_v36 }
 0x205   : > { %v9035_v56 = vpop.f32.mrb[56].mxu1 }
 0x206   : > { %v10902_v5 = vadd.f32 %v9035_v56, %v10864_v54  ;;  %v1268_v16 = vpop.f32.mrb[57].mxu1 }
 0x207   : > { %v9036_v18 = vpop.f32.mrb[58].mxu1  ;;  %v10905_v26 = vadd.f32 %v1268_v16, %v10869_v55 }
 0x208   : > { %v10908_v40 = vadd.f32 %v9036_v18, %v10874_v57  ;;  %v1271_v39 = vpop.f32.mrb[59].mxu1  ;;  %v1667_v41 = vsel %vm1160_vm0, %v10902_v5, -inf }
 0x209   : > { %1668 = vmax.xlane.f32.xlu0 %v1667_v41  ;;  %v10913_v62 = vadd.f32 %v1271_v39, %v10882_v14  ;;  %v1661_v56 = vsel %vm1160_vm0, %v10905_v26, -inf }
 0x20a   : > { %v1670_v36 = vsel %vm1160_vm0, %v10908_v40, -inf }
 0x20b   : > { %1671 = vmax.xlane.f32.xlu1 %v1670_v36  ;;  %v1664_v16 = vsel %vm1160_vm0, %v10913_v62, -inf }
 0x20d   : > { %1662 = vmax.xlane.f32.xlu0 %v1661_v56 }
 0x20f   : > { %1665 = vmax.xlane.f32.xlu1 %v1664_v16 }
 0x215   : > { %v9043_v18 = vpop.f32.mrb[60].mxu1 }
 0x216   : > { %v10922_v58 = vadd.f32 %v9043_v18, %v10864_v54  ;;  %v1329_v41 = vpop.f32.mrb[61].mxu1 }
 0x217   : > { %v9044_v34 = vpop.f32.mrb[62].mxu1  ;;  %v10925_v39 = vadd.f32 %v1329_v41, %v10869_v55 }
 0x218   : > { %v10928_v42 = vadd.f32 %v9044_v34, %v10874_v57  ;;  %v1332_v36 = vpop.f32.mrb[63].mxu1  ;;  %v1679_v56 = vsel %vm1160_vm0, %v10922_v58, -inf }
 0x219   : > { %1680 = vmax.xlane.f32.xlu0 %v1679_v56  ;;  %v10933_v22 = vadd.f32 %v1332_v36, %v10882_v14  ;;  %v1673_v18 = vsel %vm1160_vm0, %v10925_v39, -inf }
 0x21a   : > { %v1682_v16 = vsel %vm1160_vm0, %v10928_v42, -inf }
 0x21b   : > { %1683 = vmax.xlane.f32.xlu1 %v1682_v16  ;;  %v1676_v34 = vsel %vm1160_vm0, %v10933_v22, -inf }
 0x21d   : > { %1674 = vmax.xlane.f32.xlu0 %v1673_v18 }
 0x21f   : > { %1677 = vmax.xlane.f32.xlu1 %v1676_v34 }
 0x225   : > { %v9051_v41 = vpop.f32.mrb[64].mxu1 }
 0x226   : > { %v10942_v44 = vadd.f32 %v9051_v41, %v10864_v54  ;;  %v1390_v56 = vpop.f32.mrb[65].mxu1 }
 0x227   : > { %v9052_v10 = vpop.f32.mrb[66].mxu1  ;;  %v10945_v36 = vadd.f32 %v1390_v56, %v10869_v55 }
 0x228   : > { %v10948_v20 = vadd.f32 %v9052_v10, %v10874_v57  ;;  %v1393_v16 = vpop.f32.mrb[67].mxu1  ;;  %v1691_v18 = vsel %vm1160_vm0, %v10942_v44, -inf }
 0x229   : > { %1692 = vmax.xlane.f32.xlu0 %v1691_v18  ;;  %v10953_v19 = vadd.f32 %v1393_v16, %v10882_v14  ;;  %v1685_v41 = vsel %vm1160_vm0, %v10945_v36, -inf }
 0x22a   : > { %v1694_v34 = vsel %vm1160_vm0, %v10948_v20, -inf }
 0x22b   : > { %1695 = vmax.xlane.f32.xlu1 %v1694_v34  ;;  %v1688_v10 = vsel %vm1160_vm0, %v10953_v19, -inf }
 0x22d   : > { %1686 = vmax.xlane.f32.xlu0 %v1685_v41 }
 0x22f   : > { %1689 = vmax.xlane.f32.xlu1 %v1688_v10 }
 0x235   : > { %v9059_v56 = vpop.f32.mrb[44].mxu0 }
 0x236   : > { %v10962_v24 = vadd.f32 %v9059_v56, %v10864_v54  ;;  %v1451_v18 = vpop.f32.mrb[45].mxu0 }
 0x237   : > { %v9060_v50 = vpop.f32.mrb[46].mxu0  ;;  %v10965_v16 = vadd.f32 %v1451_v18, %v10869_v55 }
 0x238   : > { %v10968_v60 = vadd.f32 %v9060_v50, %v10874_v57  ;;  %v1703_v34 = vsel %vm1160_vm0, %v10962_v24, -inf  ;;  %v1454_v41 = vpop.f32.mrb[47].mxu0 }
 0x239   : > { %1704 = vmax.xlane.f32.xlu0 %v1703_v34  ;;  %v10973_v25 = vadd.f32 %v1454_v41, %v10882_v14  ;;  %v1697_v56 = vsel %vm1160_vm0, %v10965_v16, -inf }
 0x23a   : > { %v1706_v10 = vsel %vm1160_vm0, %v10968_v60, -inf }
 0x23b   : > { %1707 = vmax.xlane.f32.xlu1 %v1706_v10  ;;  %v1700_v50 = vsel %vm1160_vm0, %v10973_v25, -inf }
 0x23d   : > { %1698 = vmax.xlane.f32.xlu0 %v1697_v56 }
 0x23f   : > { %1701 = vmax.xlane.f32.xlu1 %v1700_v50 }
 0x245   : > { %v9067_v18 = vpop.f32.mrb[68].mxu1  ;;  %v9075_v31 = vpop.f32.mrb[48].mxu0 }
 0x246   : > { %v10982_v28 = vadd.f32 %v9067_v18, %v10864_v54  ;;  %v1512_v34 = vpop.f32.mrb[69].mxu1  ;;  %v1573_v41 = vpop.f32.mrb[49].mxu0 }
 0x247   : > { %v9068_v30 = vpop.f32.mrb[70].mxu1  ;;  %v9076_v37 = vpop.f32.mrb[50].mxu0  ;;  %v10985_v52 = vadd.f32 %v1512_v34, %v10869_v55  ;;  %v10998_v8 = vadd.f32 %v1573_v41, %v10869_v55 }
 0x248   : > { %v10988_v10 = vadd.f32 %v9068_v30, %v10874_v57  ;;  %v1715_v56 = vsel %vm1160_vm0, %v10982_v28, -inf  ;;  %v1515_v4 = vpop.f32.mrb[71].mxu1  ;;  %v1576_v50 = vpop.f32.mrb[51].mxu0  ;;  %v10993_v33 = vadd.f32 %v9076_v37, %v10874_v57  ;;  %v11008_v37 = vadd.f32 %v9075_v31, %v10864_v54 }
 0x249   : > { %1716 = vmax.xlane.f32.xlu0 %v1715_v56  ;;  %v1709_v30 = vsel %vm1160_vm0, %v10985_v52, -inf  ;;  %v11003_v34 = vadd.f32 %v1515_v4, %v10882_v14  ;;  %v11013_v41 = vadd.f32 %v1576_v50, %v10882_v14 }
 0x24a   : > { %v1718_v18 = vsel %vm1160_vm0, %v10988_v10, -inf  ;;  %v1730_v56 = vsel %vm1160_vm0, %v10993_v33, -inf  ;;  %v1727_v4 = vsel %vm1160_vm0, %v11008_v37, -inf }
 0x24b   : > { %1719 = vmax.xlane.f32.xlu1 %v1718_v18  ;;  %v1721_v18 = vsel %vm1160_vm0, %v10998_v8, -inf  ;;  %v1724_v31 = vsel %vm1160_vm0, %v11013_v41, -inf }
 0x24d   : > { %1710 = vmax.xlane.f32.xlu0 %v1709_v30  ;;  %v1712_v30 = vsel %vm1160_vm0, %v11003_v34, -inf }
 0x24f   : > { %1731 = vmax.xlane.f32.xlu1 %v1730_v56 }
 0x251   : > { %1722 = vmax.xlane.f32.xlu0 %v1721_v18 }
 0x253   : > { %1713 = vmax.xlane.f32.xlu1 %v1712_v30 }
 0x255   : > { %v9083_v46 = vpop.f32.mrb[72].mxu1  ;;  %1728 = vmax.xlane.f32.xlu0 %v1727_v4 }
 0x256   : > { %v1634_v56 = vpop.f32.mrb[73].mxu1  ;;  %v11022_v32 = vadd.f32 %v9083_v46, %v10864_v54 }
 0x257   : > { %v11025_v18 = vadd.f32 %v1634_v56, %v10869_v55  ;;  %v9084_v50 = vpop.f32.mrb[74].mxu1  ;;  %1725 = vmax.xlane.f32.xlu1 %v1724_v31 }
 0x258   : > { %v11028_v45 = vadd.f32 %v9084_v50, %v10874_v57  ;;  %v1637_v30 = vpop.f32.mrb[75].mxu1  ;;  %v1739_v54 = vsel %vm1160_vm0, %v11022_v32, -inf }
 0x259   : > { %v1733_v51 = vsel %vm1160_vm0, %v11025_v18, -inf  ;;  %v11033_v4 = vadd.f32 %v1637_v30, %v10882_v14 }
 0x25a   : > { %1734 = vmax.xlane.f32.xlu0 %v1733_v51  ;;  %v1742_v46 = vsel %vm1160_vm0, %v11028_v45, -inf }
 0x25b   : > { %1743 = vmax.xlane.f32.xlu1 %v1742_v46  ;;  %v1736_v55 = vsel %vm1160_vm0, %v11033_v4, -inf }
 0x25e   : > { %1740 = vmax.xlane.f32.xlu0 %v1739_v54 }
 0x25f   : > { %1737 = vmax.xlane.f32.xlu1 %v1736_v55 }
 0x286   : > { %v1657_v57 = vpop.xlane.xlu1 %1656 }
 0x287   : > { %v1747_v56 = vsub.f32 %v10877_v59, %v1657_v57  ;;  %v1651_v31 = vpop.xlane.xlu0 %1650 }
 0x288   : > { %v1745_v14 = vsub.f32 %v10885_v15, %v1651_v31 }
 0x289   : > { %v1781_v50 = vmul.f32 1.442695, %v1747_v56 }
 0x28a   : > { %v1777_v51 = vmul.f32 1.442695, %v1745_v14  ;;  %v1660_v30 = vpop.xlane.xlu1 %1659 }
 0x28b   : > { %9761 = vpow2.f32 %v1781_v50  ;;  %v1748_v46 = vsub.f32 %v10888_v17, %v1660_v30  ;;  %v1654_v53 = vpop.xlane.xlu0 %1653 }
 0x28c   : > { %v1746_v43 = vsub.f32 %v10893_v48, %v1654_v53  ;;  %9763 = vpow2.f32 %v1777_v51 }
 0x28d   : > { %v1783_v1 = vmul.f32 1.442695, %v1748_v46 }
 0x28e   : > { %v1779_v35 = vmul.f32 1.442695, %v1746_v43 }
 0x28f   : > { %9765 = vpow2.f32 %v1783_v1 }
 0x290   : > { %9767 = vpow2.f32 %v1779_v35 }
 0x295   : > { %v11045_v54 = vpop.eup %9761 }
 0x296   : > { %v1669_v59 = vpop.xlane.xlu0 %1668  ;;  %v1847_v15 = vsel %vm1160_vm0, %v11045_v54, 0.0  ;;  %v11049_v55 = vpop.eup %9763 }
 0x297   : > { %v1751_v57 = vsub.f32 %v10902_v5, %v1669_v59  ;;  %1848 = vadd.xlane.f32.xlu0 %v1847_v15  ;;  %v1841_v35 = vsel %vm1160_vm0, %v11049_v55, 0.0 }
 0x298   : > { %v1672_v17 = vpop.xlane.xlu1 %1671 }
 0x299   : > { %v11052_v56 = vpop.eup %9765  ;;  %v1789_v53 = vmul.f32 1.442695, %v1751_v57  ;;  %v1752_v48 = vsub.f32 %v10908_v40, %v1672_v17 }
 0x29a   : > { %v1663_v43 = vpop.xlane.xlu0 %1662  ;;  %v1850_v1 = vsel %vm1160_vm0, %v11052_v56, 0.0  ;;  %v11059_v31 = vpop.eup %9767 }
 0x29b   : > { %9769 = vpow2.f32 %v1789_v53  ;;  %v1791_v14 = vmul.f32 1.442695, %v1752_v48  ;;  %v1749_v5 = vsub.f32 %v10905_v26, %v1663_v43  ;;  %1851 = vadd.xlane.f32.xlu1 %v1850_v1  ;;  %1842 = vadd.xlane.f32.xlu0 %v1841_v35  ;;  %v1844_v30 = vsel %vm1160_vm0, %v11059_v31, 0.0 }
 0x29c   : > { %v1666_v50 = vpop.xlane.xlu1 %1665 }
 0x29d   : > { %9771 = vpow2.f32 %v1791_v14  ;;  %v1785_v51 = vmul.f32 1.442695, %v1749_v5  ;;  %v1750_v40 = vsub.f32 %v10913_v62, %v1666_v50 }
 0x29f   : > { %9773 = vpow2.f32 %v1785_v51  ;;  %v1787_v46 = vmul.f32 1.442695, %v1750_v40  ;;  %1845 = vadd.xlane.f32.xlu1 %v1844_v30 }
 0x2a1   : > { %9775 = vpow2.f32 %v1787_v46 }
 0x2a5   : > { %v11065_v59 = vpop.eup %9769 }
 0x2a6   : > { %v1681_v15 = vpop.xlane.xlu0 %1680  ;;  %v1859_v26 = vsel %vm1160_vm0, %v11065_v59, 0.0 }
 0x2a7   : > { %v11069_v57 = vpop.eup %9771  ;;  %v1755_v17 = vsub.f32 %v10922_v58, %v1681_v15  ;;  %1860 = vadd.xlane.f32.xlu0 %v1859_v26 }
 0x2a8   : > { %v1684_v53 = vpop.xlane.xlu1 %1683  ;;  %v1862_v62 = vsel %vm1160_vm0, %v11069_v57, 0.0 }
 0x2a9   : > { %v11074_v48 = vpop.eup %9773  ;;  %v1797_v43 = vmul.f32 1.442695, %v1755_v17  ;;  %v1756_v1 = vsub.f32 %v10928_v42, %v1684_v53  ;;  %1863 = vadd.xlane.f32.xlu1 %v1862_v62 }
 0x2aa   : > { %v1675_v35 = vpop.xlane.xlu0 %1674  ;;  %v1853_v14 = vsel %vm1160_vm0, %v11074_v48, 0.0 }
 0x2ab   : > { %v11079_v5 = vpop.eup %9775  ;;  %9777 = vpow2.f32 %v1797_v43  ;;  %v1799_v50 = vmul.f32 1.442695, %v1756_v1  ;;  %v1753_v58 = vsub.f32 %v10925_v39, %v1675_v35  ;;  %1854 = vadd.xlane.f32.xlu0 %v1853_v14 }
 0x2ac   : > { %v1678_v51 = vpop.xlane.xlu1 %1677  ;;  %v1856_v40 = vsel %vm1160_vm0, %v11079_v5, 0.0 }
 0x2ad   : > { %9779 = vpow2.f32 %v1799_v50  ;;  %v1793_v30 = vmul.f32 1.442695, %v1753_v58  ;;  %v1754_v42 = vsub.f32 %v10933_v22, %v1678_v51  ;;  %1857 = vadd.xlane.f32.xlu1 %v1856_v40 }
 0x2af   : > { %9781 = vpow2.f32 %v1793_v30  ;;  %v1795_v46 = vmul.f32 1.442695, %v1754_v42 }
 0x2b1   : > { %9783 = vpow2.f32 %v1795_v46 }
 0x2b5   : > { %v11085_v15 = vpop.eup %9777 }
 0x2b6   : > { %v1693_v26 = vpop.xlane.xlu0 %1692  ;;  %v1871_v17 = vsel %vm1160_vm0, %v11085_v15, 0.0 }
 0x2b7   : > { %v11089_v39 = vpop.eup %9779  ;;  %v1759_v53 = vsub.f32 %v10942_v44, %v1693_v26  ;;  %1872 = vadd.xlane.f32.xlu0 %v1871_v17 }
 0x2b8   : > { %v1696_v62 = vpop.xlane.xlu1 %1695  ;;  %v1874_v43 = vsel %vm1160_vm0, %v11089_v39, 0.0 }
 0x2b9   : > { %v11094_v22 = vpop.eup %9781  ;;  %v1805_v1 = vmul.f32 1.442695, %v1759_v53  ;;  %v1760_v35 = vsub.f32 %v10948_v20, %v1696_v62  ;;  %1875 = vadd.xlane.f32.xlu1 %v1874_v43 }
 0x2ba   : > { %v1687_v14 = vpop.xlane.xlu0 %1686  ;;  %v1865_v50 = vsel %vm1160_vm0, %v11094_v22, 0.0 }
 0x2bb   : > { %v11099_v58 = vpop.eup %9783  ;;  %9785 = vpow2.f32 %v1805_v1  ;;  %v1807_v51 = vmul.f32 1.442695, %v1760_v35  ;;  %v1757_v44 = vsub.f32 %v10945_v36, %v1687_v14  ;;  %1866 = vadd.xlane.f32.xlu0 %v1865_v50 }
 0x2bc   : > { %v1690_v40 = vpop.xlane.xlu1 %1689  ;;  %v1868_v30 = vsel %vm1160_vm0, %v11099_v58, 0.0 }
 0x2bd   : > { %9787 = vpow2.f32 %v1807_v51  ;;  %v1801_v42 = vmul.f32 1.442695, %v1757_v44  ;;  %v1758_v20 = vsub.f32 %v10953_v19, %v1690_v40  ;;  %1869 = vadd.xlane.f32.xlu1 %v1868_v30 }
 0x2bf   : > { %9789 = vpow2.f32 %v1801_v42  ;;  %v1803_v46 = vmul.f32 1.442695, %v1758_v20 }
 0x2c1   : > { %9791 = vpow2.f32 %v1803_v46 }
 0x2c5   : > { %v11105_v26 = vpop.eup %9785 }
 0x2c6   : > { %v1705_v17 = vpop.xlane.xlu0 %1704  ;;  %v1883_v53 = vsel %vm1160_vm0, %v11105_v26, 0.0 }
 0x2c7   : > { %v11109_v36 = vpop.eup %9787  ;;  %v1763_v62 = vsub.f32 %v10962_v24, %v1705_v17  ;;  %1884 = vadd.xlane.f32.xlu0 %v1883_v53 }
 0x2c8   : > { %v1708_v43 = vpop.xlane.xlu1 %1707  ;;  %v1886_v1 = vsel %vm1160_vm0, %v11109_v36, 0.0 }
 0x2c9   : > { %v11114_v19 = vpop.eup %9789  ;;  %v1813_v35 = vmul.f32 1.442695, %v1763_v62  ;;  %v1764_v14 = vsub.f32 %v10968_v60, %v1708_v43  ;;  %1887 = vadd.xlane.f32.xlu1 %v1886_v1 }
 0x2ca   : > { %v1699_v50 = vpop.xlane.xlu0 %1698  ;;  %v1877_v51 = vsel %vm1160_vm0, %v11114_v19, 0.0 }
 0x2cb   : > { %v11119_v44 = vpop.eup %9791  ;;  %9793 = vpow2.f32 %v1813_v35  ;;  %v1815_v40 = vmul.f32 1.442695, %v1764_v14  ;;  %v1761_v24 = vsub.f32 %v10965_v16, %v1699_v50  ;;  %1878 = vadd.xlane.f32.xlu0 %v1877_v51 }
 0x2cc   : > { %v1702_v30 = vpop.xlane.xlu1 %1701  ;;  %v1880_v42 = vsel %vm1160_vm0, %v11119_v44, 0.0 }
 0x2cd   : > { %9795 = vpow2.f32 %v1815_v40  ;;  %v1809_v20 = vmul.f32 1.442695, %v1761_v24  ;;  %v1762_v60 = vsub.f32 %v10973_v25, %v1702_v30  ;;  %1881 = vadd.xlane.f32.xlu1 %v1880_v42 }
 0x2cf   : > { %9797 = vpow2.f32 %v1809_v20  ;;  %v1811_v46 = vmul.f32 1.442695, %v1762_v60 }
 0x2d1   : > { %9799 = vpow2.f32 %v1811_v46 }
 0x2d5   : > { %v11125_v17 = vpop.eup %9793 }
 0x2d6   : > { %v1717_v53 = vpop.xlane.xlu0 %1716  ;;  %v1895_v62 = vsel %vm1160_vm0, %v11125_v17, 0.0 }
 0x2d7   : > { %v11129_v16 = vpop.eup %9795  ;;  %v1767_v43 = vsub.f32 %v10982_v28, %v1717_v53  ;;  %1896 = vadd.xlane.f32.xlu0 %v1895_v62 }
 0x2d8   : > { %v1720_v1 = vpop.xlane.xlu1 %1719  ;;  %v1898_v35 = vsel %vm1160_vm0, %v11129_v16, 0.0 }
 0x2d9   : > { %v11134_v25 = vpop.eup %9797  ;;  %v1821_v14 = vmul.f32 1.442695, %v1767_v43  ;;  %v1768_v50 = vsub.f32 %v10988_v10, %v1720_v1  ;;  %1899 = vadd.xlane.f32.xlu1 %v1898_v35 }
 0x2da   : > { %v1711_v51 = vpop.xlane.xlu0 %1710  ;;  %v1889_v40 = vsel %vm1160_vm0, %v11134_v25, 0.0 }
 0x2db   : > { %v11139_v24 = vpop.eup %9799  ;;  %9801 = vpow2.f32 %v1821_v14  ;;  %v1823_v30 = vmul.f32 1.442695, %v1768_v50  ;;  %1890 = vadd.xlane.f32.xlu0 %v1889_v40  ;;  %v1765_v46 = vsub.f32 %v10985_v52, %v1711_v51 }
 0x2dc   : > { %v1732_v28 = vpop.xlane.xlu1 %1731  ;;  %v1892_v42 = vsel %vm1160_vm0, %v11139_v24, 0.0 }
 0x2dd   : > { %9803 = vpow2.f32 %v1823_v30  ;;  %v1772_v20 = vsub.f32 %v10993_v33, %v1732_v28  ;;  %1893 = vadd.xlane.f32.xlu1 %v1892_v42  ;;  %v1817_v14 = vmul.f32 1.442695, %v1765_v46 }
 0x2de   : > { %v1723_v60 = vpop.xlane.xlu0 %1722 }
 0x2df   : > { %v1831_v10 = vmul.f32 1.442695, %v1772_v20  ;;  %v1769_v30 = vsub.f32 %v10998_v8, %v1723_v60 }
 0x2e0   : > { %v1714_v53 = vpop.xlane.xlu1 %1713 }
 0x2e1   : > { %9805 = vpow2.f32 %v1831_v10  ;;  %v1766_v62 = vsub.f32 %v11003_v34, %v1714_v53  ;;  %v1825_v20 = vmul.f32 1.442695, %v1769_v30 }
 0x2e2   : > { %v1729_v43 = vpop.xlane.xlu0 %1728 }
 0x2e3   : > { %v1819_v1 = vmul.f32 1.442695, %v1766_v62  ;;  %v1771_v35 = vsub.f32 %v11008_v37, %v1729_v43 }
 0x2e4   : > { %v1726_v50 = vpop.xlane.xlu1 %1725 }
 0x2e5   : > { %v11147_v40 = vpop.eup %9801  ;;  %9807 = vpow2.f32 %v1819_v1  ;;  %v1829_v33 = vmul.f32 1.442695, %v1771_v35  ;;  %v1770_v28 = vsub.f32 %v11013_v41, %v1726_v50 }
 0x2e6   : > { %v1907_v52 = vsel %vm1160_vm0, %v11147_v40, 0.0 }
 0x2e7   : > { %v11153_v51 = vpop.eup %9803  ;;  %9809 = vpow2.f32 %v1829_v33  ;;  %v1827_v34 = vmul.f32 1.442695, %v1770_v28  ;;  %1908 = vadd.xlane.f32.xlu0 %v1907_v52  ;;  %v1735_v42 = vpop.xlane.xlu0 %1734 }
 0x2e8   : > { %9811 = vpow2.f32 %v1817_v14  ;;  %v1910_v37 = vsel %vm1160_vm0, %v11153_v51, 0.0  ;;  %v1773_v46 = vsub.f32 %v11025_v18, %v1735_v42 }
 0x2e9   : > { %9813 = vpow2.f32 %v1827_v34  ;;  %1911 = vadd.xlane.f32.xlu1 %v1910_v37 }
 0x2ea   : > { %9815 = vpow2.f32 %v1825_v20  ;;  %v1833_v35 = vmul.f32 1.442695, %v1773_v46  ;;  %v1744_v20 = vpop.xlane.xlu1 %1743 }
 0x2eb   : > { %v11157_v8 = vpop.eup %9805  ;;  %v1741_v60 = vpop.xlane.xlu0 %1740 }
 0x2ec   : > { %v1775_v41 = vsub.f32 %v11022_v32, %v1741_v60  ;;  %v1922_v10 = vsel %vm1160_vm0, %v11157_v8, 0.0  ;;  %v1776_v60 = vsub.f32 %v11028_v45, %v1744_v20 }
 0x2ed   : > { %1923 = vadd.xlane.f32.xlu1 %v1922_v10 }
 0x2ee   : > { %v1837_v53 = vmul.f32 1.442695, %v1775_v41  ;;  %v1738_v41 = vpop.xlane.xlu1 %1737  ;;  %v1839_v10 = vmul.f32 1.442695, %v1776_v60 }
 0x2ef   : > { %v11163_v62 = vpop.eup %9807  ;;  %v1774_v46 = vsub.f32 %v11033_v4, %v1738_v41 }
 0x2f0   : > { %v1904_v43 = vsel %vm1160_vm0, %v11163_v62, 0.0  ;;  %9817 = vpow2.f32 %v1837_v53 }
 0x2f1   : > { %v11167_v1 = vpop.eup %9809  ;;  %1905 = vadd.xlane.f32.xlu1 %v1904_v43  ;;  %9819 = vpow2.f32 %v1833_v35  ;;  %v1835_v53 = vmul.f32 1.442695, %v1774_v46 }
 0x2f2   : > { %v11169_v14 = vpop.eup %9811  ;;  %v1919_v32 = vsel %vm1160_vm0, %v11167_v1, 0.0  ;;  %9821 = vpow2.f32 %v1839_v10 }
 0x2f3   : > { %v11173_v50 = vpop.eup %9813  ;;  %1920 = vadd.xlane.f32.xlu0 %v1919_v32  ;;  %v1901_v30 = vsel %vm1160_vm0, %v11169_v14, 0.0  ;;  %9823 = vpow2.f32 %v1835_v53 }
 0x2f4   : > { %v1916_v18 = vsel %vm1160_vm0, %v11173_v50, 0.0  ;;  %v11179_v33 = vpop.eup %9815 }
 0x2f5   : > { %1917 = vadd.xlane.f32.xlu1 %v1916_v18  ;;  %v1913_v28 = vsel %vm1160_vm0, %v11179_v33, 0.0 }
 0x2f7   : > { %1902 = vadd.xlane.f32.xlu0 %v1901_v30 }
 0x2fa   : > { %v11183_v52 = vpop.eup %9817 }
 0x2fb   : > { %1914 = vadd.xlane.f32.xlu0 %v1913_v28  ;;  %v1931_v34 = vsel %vm1160_vm0, %v11183_v52, 0.0  ;;  %v11187_v42 = vpop.eup %9819 }
 0x2fc   : > { %v1925_v37 = vsel %vm1160_vm0, %v11187_v42, 0.0  ;;  %v11207_v32 = vpop.eup %9821 }
 0x2fd   : > { %v1934_v18 = vsel %vm1160_vm0, %v11207_v32, 0.0  ;;  %v11213_v30 = vpop.eup %9823 }
 0x2fe   : > { %v1928_v28 = vsel %vm1160_vm0, %v11213_v30, 0.0 }
 0x2ff   : > { %1932 = vadd.xlane.f32.xlu0 %v1931_v34 }
 0x303   : > { %1926 = vadd.xlane.f32.xlu0 %v1925_v37 }
 0x306   : > { %2648 = vrot.lane.b32.xlu1 %v10593_v23, %s10338_s11 }
 0x30a   : > { %2719 = vrot.lane.b32.xlu1 %v10613_v47, %s10338_s11 }
 0x319   : > { %2646 = vrot.lane.b32.xlu0 %v10571_v2, %s10338_s11 }
 0x31d   : > { %2721 = vrot.lane.b32.xlu0 %v10637_v9, %s10338_s11 }
 0x321   : > { %2642 = vrot.lane.b32.xlu0 %v10589_v21, %s10338_s11 }
 0x324   : > { %v1849_v43 = vpop.xlane.xlu0 %1848 }
 0x325   : > { %2794 = vrot.lane.b32.xlu0 %v10685_v63, %s10338_s11 }
 0x328   : > { %v1852_v45 = vpop.xlane.xlu1 %1851  ;;  %v1843_v35 = vpop.xlane.xlu0 %1842 }
 0x329   : > { %2715 = vrot.lane.b32.xlu0 %v10633_v7, %s10338_s11  ;;  %9825 = vrcp.f32 %v1852_v45 }
 0x32a   : > { %9827 = vrcp.f32 %v1843_v35 }
 0x32b   : > { %9829 = vrcp.f32 %v1849_v43 }
 0x32c   : > { %v1846_v4 = vpop.xlane.xlu1 %1845 }
 0x32d   : > { %9831 = vrcp.f32 %v1846_v4  ;;  %2867 = vrot.lane.b32.xlu0 %v10729_v12, %s10338_s11 }
 0x32e   : > { %1935 = vadd.xlane.f32.xlu1 %v1934_v18 }
 0x331   : > { %2788 = vrot.lane.b32.xlu0 %v10681_v61, %s10338_s11 }
 0x332   : > { %1929 = vadd.xlane.f32.xlu1 %v1928_v28 }
 0x333   : > { %v9826_v34 = vpop.eup %9825 }
 0x334   : > { %v1861_v37 = vpop.xlane.xlu0 %1860  ;;  %v9828_v20 = vpop.eup %9827  ;;  %v1972_v46 = vmul.f32 %v9826_v34, %v11052_v56 }
 0x335   : > { %2940 = vrot.lane.b32.xlu0 %v10773_v29, %s10338_s11  ;;  %v9830_v60 = vpop.eup %9829  ;;  %v1969_v43 = vmul.f32 %v9828_v20, %v11049_v55 }
 0x336   : > { %v1864_v41 = vpop.xlane.xlu1 %1863  ;;  %v1971_v35 = vmul.f32 %v9830_v60, %v11045_v54 }
 0x337   : > { %v9832_v10 = vpop.eup %9831  ;;  %9833 = vrcp.f32 %v1864_v41 }
 0x338   : > { %v1855_v53 = vpop.xlane.xlu0 %1854  ;;  %v1970_v45 = vmul.f32 %v9832_v10, %v11059_v31  ;;  %v2002_v28 = vpack.c.bf16 %v1972_v46, %v1971_v35  ;;  %v13769_v46 = vld [vmem:[#allocation19_spill] sm:$0xff] }
 0x339   : > { %9835 = vrcp.f32 %v1855_v53  ;;  %2861 = vrot.lane.b32.xlu0 %v10725_v6, %s10338_s11 }
 0x33a   : > { %9837 = vrcp.f32 %v1861_v37  ;;  %v1858_v4 = vpop.xlane.xlu1 %1857  ;;  %v2001_v18 = vpack.c.bf16 %v1970_v45, %v1969_v43  ;;  %v13770_v45 = vld [vmem:[#allocation7_spill] sm:$0xff] }
 0x33b   : > { %9839 = vrcp.f32 %v1858_v4  ;;  %v13774_v4 = vld [vmem:[#allocation13_spill] sm:$0xff] }
 0x33c   : > { %9089 = vmatprep.mubr.msk.bf16.mxu0 %vm1160_vm0, %v2001_v18  ;;  %v13775_v18 = vld [vmem:[#allocation25_spill] sm:$0xff] }
 0x33d   : > { %3013 = vrot.lane.b32.xlu0 %v10573_v3, %s10338_s11  ;;  %9090 = vmatmul.mubr.msk.bf16.vlgmr.msra.gmra.mrb[52].mxu0 %vm1160_vm0, %v2002_v28  ;;  %v13776_v28 = vld [vmem:[#allocation40_spill] sm:$0xff] }
 0x33e   : > { %9102 = vmatpush3.bf16.msra.mxu0 %v10731_v13 }
 0x33f   : > { %9103 = vmatprep.subr.bf16.mxu0 %v10727_v11 }
 0x341   : > { %2934 = vrot.lane.b32.xlu0 %v10769_v27, %s10338_s11  ;;  %v9834_v54 = vpop.eup %9833 }
 0x342   : > { %9104 = vmatpush3.bf16.msra.mxu0 %v10727_v11  ;;  %v1976_v37 = vmul.f32 %v9834_v54, %v11069_v57  ;;  %v13777_v54 = vld [vmem:[#allocation15_spill] sm:$0xff] }
 0x343   : > { %v9836_v55 = vpop.eup %9835  ;;  %9117 = vmatprep.subr.bf16.mxu0 %v10775_v38  ;;  %2640 = vrot.lane.b32.xlu1 %v10567_v0, %s10338_s11 }
 0x344   : > { %v9838_v56 = vpop.eup %9837  ;;  %v1873_v31 = vpop.xlane.xlu0 %1872  ;;  %v1973_v60 = vmul.f32 %v9836_v55, %v11074_v48  ;;  %v13771_v48 = vld [vmem:[#allocation12_spill] sm:$0xff] }
 0x345   : > { %v9840_v34 = vpop.eup %9839  ;;  %3086 = vrot.lane.b32.xlu0 %v10615_v49, %s10338_s11  ;;  %v1975_v10 = vmul.f32 %v9838_v56, %v11065_v59  ;;  %v13772_v59 = vld [vmem:[#allocation32_spill] sm:$0xff] }
 0x346   : > { %v1876_v20 = vpop.xlane.xlu1 %1875  ;;  %v1974_v41 = vmul.f32 %v9840_v34, %v11079_v5  ;;  %v13773_v5 = vld [vmem:[#allocation30_spill] sm:$0xff] }
 0x347   : > { %2792 = vrot.lane.b32.xlu1 %v13769_v46, %s10338_s11  ;;  %9841 = vrcp.f32 %v1876_v20  ;;  %v2004_v57 = vpack.c.bf16 %v1976_v37, %v1975_v10 }
 0x348   : > { %v1867_v53 = vpop.xlane.xlu0 %1866  ;;  %v2003_v43 = vpack.c.bf16 %v1974_v41, %v1973_v60  ;;  %v13779_v41 = vld [vmem:[#allocation22_spill] sm:$0xff] }
 0x349   : > { %9843 = vrcp.f32 %v1867_v53  ;;  %3007 = vrot.lane.b32.xlu0 %v13770_v45, %s10338_s11  ;;  %v13781_v45 = vld [vmem:[#allocation26_spill] sm:$0xff] }
 0x34a   : > { %9845 = vrcp.f32 %v1873_v31  ;;  %v1870_v35 = vpop.xlane.xlu1 %1869  ;;  %9097 = vmatprep.mubr.msk.bf16.mxu1 %vm1160_vm0, %v2003_v43  ;;  %v13778_v31 = vld [vmem:[#allocation17_spill] sm:$0xff] }
 0x34b   : > { %9847 = vrcp.f32 %v1870_v35  ;;  %2713 = vrot.lane.b32.xlu1 %v13771_v48, %s10338_s11  ;;  %9098 = vmatmul.mubr.msk.bf16.vlgmr.msra.gmra.mrb[76].mxu1 %vm1160_vm0, %v2004_v57  ;;  %v13780_v35 = vld [vmem:[#allocation31_spill] sm:$0xff] }
 0x34c   : > { %9110 = vmatpush3.bf16.msra.mxu1 %v13772_v59 }
 0x34d   : > { %9111 = vmatprep.subr.bf16.mxu1 %v13773_v5  ;;  %3080 = vrot.lane.b32.xlu0 %v13774_v4, %s10338_s11 }
 0x34f   : > { %2865 = vrot.lane.b32.xlu1 %v13775_v18, %s10338_s11 }
 0x350   : > { %9112 = vmatpush3.bf16.msra.mxu1 %v13773_v5 }
 0x351   : > { %9125 = vmatprep.subr.bf16.mxu1 %v13776_v28  ;;  %3151 = vrot.lane.b32.xlu0 %v13777_v54, %s10338_s11  ;;  %v9842_v55 = vpop.eup %9841 }
 0x352   : > { %v1980_v60 = vmul.f32 %v9842_v55, %v11089_v39 }
 0x353   : > { %v9844_v56 = vpop.eup %9843  ;;  %2786 = vrot.lane.b32.xlu1 %v13778_v31, %s10338_s11 }
 0x354   : > { %v9846_v34 = vpop.eup %9845  ;;  %v1885_v37 = vpop.xlane.xlu0 %1884  ;;  %v1977_v53 = vmul.f32 %v9844_v56, %v11094_v22  ;;  %v13782_v22 = vld [vmem:[#allocation23_spill] sm:$0xff]  ;;  %v13786_v56 = vld [vmem:[#allocation42_spill] sm:$0xff] }
 0x355   : > { %v9848_v20 = vpop.eup %9847  ;;  %3592 = vrot.lane.b32.xlu0 %v13779_v41, %s10338_s11  ;;  %v1979_v57 = vmul.f32 %v9846_v34, %v11085_v15  ;;  %v13783_v15 = vld [vmem:[#allocation34_spill] sm:$0xff] }
 0x356   : > { %v1888_v10 = vpop.xlane.xlu1 %1887  ;;  %v1978_v43 = vmul.f32 %v9848_v20, %v11099_v58  ;;  %v13784_v58 = vld [vmem:[#allocation24_spill] sm:$0xff] }
 0x357   : > { %2938 = vrot.lane.b32.xlu1 %v13780_v35, %s10338_s11  ;;  %9849 = vrcp.f32 %v1888_v10  ;;  %v2006_v39 = vpack.c.bf16 %v1980_v60, %v1979_v57 }
 0x358   : > { %v1879_v54 = vpop.xlane.xlu0 %1878  ;;  %v2005_v4 = vpack.c.bf16 %v1978_v43, %v1977_v53 }
 0x359   : > { %9851 = vrcp.f32 %v1879_v54  ;;  %3655 = vrot.lane.b32.xlu0 %v13781_v45, %s10338_s11  ;;  %v13785_v54 = vld [vmem:[#allocation39_spill] sm:$0xff] }
 0x35a   : > { %9853 = vrcp.f32 %v1885_v37  ;;  %v1882_v55 = vpop.xlane.xlu1 %1881  ;;  %9105 = vmatprep.mubr.msk.bf16.mxu0 %vm1160_vm0, %v2005_v4  ;;  %v13787_v37 = vld [vmem:[#allocation29_spill] sm:$0xff] }
 0x35b   : > { %9855 = vrcp.f32 %v1882_v55  ;;  %2859 = vrot.lane.b32.xlu1 %v13782_v22, %s10338_s11  ;;  %9106 = vmatmul.mubr.msk.bf16.vlgmr.msra.gmra.mrb[56].mxu0 %vm1160_vm0, %v2006_v39 }
 0x35c   : > { %9118 = vmatpush3.bf16.msra.mxu0 %v10775_v38 }
 0x35d   : > { %9119 = vmatprep.subr.bf16.mxu0 %v13783_v15  ;;  %3657 = vrot.lane.b32.xlu0 %v13784_v58, %s10338_s11 }
 0x35f   : > { %3011 = vrot.lane.b32.xlu1 %v13785_v54, %s10338_s11 }
 0x360   : > { %9120 = vmatpush3.bf16.msra.mxu0 %v13783_v15 }
 0x361   : > { %9133 = vmatprep.subr.bf16.mxu0 %v13786_v56  ;;  %3781 = vrot.lane.b32.xlu0 %v13772_v59, %s10338_s11  ;;  %v9850_v4 = vpop.eup %9849  ;;  %v13788_v59 = vld [vmem:[#allocation11_spill] sm:$0xff] }
 0x362   : > { %v1984_v53 = vmul.f32 %v9850_v4, %v11109_v36 }
 0x363   : > { %v9852_v34 = vpop.eup %9851  ;;  %2932 = vrot.lane.b32.xlu1 %v13787_v37, %s10338_s11 }
 0x364   : > { %v9854_v20 = vpop.eup %9853  ;;  %v1897_v60 = vpop.xlane.xlu0 %1896  ;;  %v1981_v57 = vmul.f32 %v9852_v34, %v11114_v19  ;;  %v13789_v19 = vld [vmem:[#allocation37_spill] sm:$0xff] }
 0x365   : > { %v9856_v10 = vpop.eup %9855  ;;  %3783 = vrot.lane.b32.xlu0 %v13773_v5, %s10338_s11  ;;  %v1983_v55 = vmul.f32 %v9854_v20, %v11105_v26  ;;  %v13790_v26 = vld [vmem:[#allocation38_spill] sm:$0xff]  ;;  %v13793_v20 = vld [vmem:[#allocation9_spill] sm:$0xff] }
 0x366   : > { %v1900_v43 = vpop.xlane.xlu1 %1899  ;;  %v1982_v39 = vmul.f32 %v9856_v10, %v11119_v44  ;;  %v13791_v44 = vld [vmem:[#allocation16_spill] sm:$0xff] }
 0x367   : > { %3084 = vrot.lane.b32.xlu1 %v13788_v59, %s10338_s11  ;;  %9857 = vrcp.f32 %v1900_v43  ;;  %v2008_v36 = vpack.c.bf16 %v1984_v53, %v1983_v55 }
 0x368   : > { %v1891_v58 = vpop.xlane.xlu0 %1890  ;;  %v2007_v45 = vpack.c.bf16 %v1982_v39, %v1981_v57 }
 0x369   : > { %9859 = vrcp.f32 %v1891_v58  ;;  %3907 = vrot.lane.b32.xlu0 %v13776_v28, %s10338_s11  ;;  %v13792_v58 = vld [vmem:[#allocation44_spill] sm:$0xff] }
 0x36a   : > { %9861 = vrcp.f32 %v1897_v60  ;;  %v1894_v4 = vpop.xlane.xlu1 %1893  ;;  %9113 = vmatprep.mubr.msk.bf16.mxu1 %vm1160_vm0, %v2007_v45 }
 0x36b   : > { %9863 = vrcp.f32 %v1894_v4  ;;  %3005 = vrot.lane.b32.xlu1 %v13789_v19, %s10338_s11  ;;  %9114 = vmatmul.mubr.msk.bf16.vlgmr.msra.gmra.mrb[80].mxu1 %vm1160_vm0, %v2008_v36  ;;  %v13794_v36 = vld [vmem:[#allocation20_spill] sm:$0xff] }
 0x36c   : > { %9126 = vmatpush3.bf16.msra.mxu1 %v13776_v28 }
 0x36d   : > { %9127 = vmatprep.subr.bf16.mxu1 %v13790_v26  ;;  %3970 = vrot.lane.b32.xlu0 %v13786_v56, %s10338_s11 }
 0x36f   : > { %3157 = vrot.lane.b32.xlu1 %v13791_v44, %s10338_s11 }
 0x370   : > { %9128 = vmatpush3.bf16.msra.mxu1 %v13790_v26 }
 0x371   : > { %9141 = vmatprep.subr.bf16.mxu1 %v13792_v58  ;;  %3909 = vrot.lane.b32.xlu0 %v13790_v26, %s10338_s11  ;;  %v9858_v45 = vpop.eup %9857 }
 0x372   : > { %v1988_v53 = vmul.f32 %v9858_v45, %v11129_v16  ;;  %v13795_v16 = vld [vmem:[#allocation18_spill] sm:$0xff] }
 0x373   : > { %v9860_v34 = vpop.eup %9859  ;;  %3078 = vrot.lane.b32.xlu1 %v13793_v20, %s10338_s11 }
 0x374   : > { %v9862_v60 = vpop.eup %9861  ;;  %v1985_v57 = vmul.f32 %v9860_v34, %v11134_v25  ;;  %v1909_v45 = vpop.xlane.xlu0 %1908  ;;  %v13796_v25 = vld [vmem:[#allocation41_spill] sm:$0xff] }
 0x375   : > { %v9864_v10 = vpop.eup %9863  ;;  %4033 = vrot.lane.b32.xlu0 %v13792_v58, %s10338_s11  ;;  %v1987_v55 = vmul.f32 %v9862_v60, %v11125_v17  ;;  %v13797_v17 = vld [vmem:[#allocation21_spill] sm:$0xff] }
 0x376   : > { %v1912_v43 = vpop.xlane.xlu1 %1911  ;;  %v1986_v39 = vmul.f32 %v9864_v10, %v11139_v24 }
 0x377   : > { %3159 = vrot.lane.b32.xlu1 %v13794_v36, %s10338_s11  ;;  %v2010_v26 = vpack.c.bf16 %v1988_v53, %v1987_v55  ;;  %9865 = vrcp.f32 %v1912_v43 }
 0x378   : > { %v2009_v4 = vpack.c.bf16 %v1986_v39, %v1985_v57 }
 0x37a   : > { %v1924_v28 = vpop.xlane.xlu1 %1923  ;;  %9121 = vmatprep.mubr.msk.bf16.mxu0 %vm1160_vm0, %v2009_v4 }
 0x37b   : > { %3153 = vrot.lane.b32.xlu1 %v13795_v16, %s10338_s11  ;;  %9122 = vmatmul.mubr.msk.bf16.vlgmr.msra.gmra.mrb[60].mxu0 %vm1160_vm0, %v2010_v26 }
 0x37c   : > { %9134 = vmatpush3.bf16.msra.mxu0 %v13786_v56 }
 0x37d   : > { %9135 = vmatprep.subr.bf16.mxu0 %v13796_v25 }
 0x37e   : > { %v1906_v24 = vpop.xlane.xlu1 %1905 }
 0x37f   : > { %3594 = vrot.lane.b32.xlu1 %v13797_v17, %s10338_s11  ;;  %9867 = vrcp.f32 %v1906_v24 }
 0x380   : > { %9136 = vmatpush3.bf16.msra.mxu0 %v13796_v25  ;;  %v1921_v34 = vpop.xlane.xlu0 %1920  ;;  %9869 = vrcp.f32 %v1909_v45 }
 0x381   : > { %v9866_v53 = vpop.eup %9865 }
 0x382   : > { %v1918_v60 = vpop.xlane.xlu1 %1917  ;;  %v1992_v4 = vmul.f32 %v9866_v53, %v11153_v51 }
 0x383   : > { %3718 = vrot.lane.b32.xlu1 %v10731_v13, %s10338_s11 }
 0x384   : > { %v1903_v26 = vpop.xlane.xlu0 %1902 }
 0x385   : > { %9871 = vrcp.f32 %v1903_v26 }
 0x386   : > { %9873 = vrcp.f32 %v1921_v34  ;;  %v2649_v53 = vpop.permute.xlu1 %2648 }
 0x387   : > { %9875 = vrcp.f32 %v1918_v60  ;;  %3720 = vrot.lane.b32.xlu1 %v10727_v11, %s10338_s11 }
 0x388   : > { %9877 = vrcp.f32 %v1924_v28  ;;  %v1915_v10 = vpop.xlane.xlu0 %1914 }
 0x389   : > { %9879 = vrcp.f32 %v1915_v10  ;;  %v9868_v57 = vpop.eup %9867 }
 0x38a   : > { %v9870_v39 = vpop.eup %9869  ;;  %v1990_v28 = vmul.f32 %v9868_v57, %v11163_v62 }
 0x38b   : > { %3844 = vrot.lane.b32.xlu1 %v10775_v38, %s10338_s11  ;;  %v1991_v26 = vmul.f32 %v9870_v39, %v11147_v40 }
 0x38c   : > { %v1933_v43 = vpop.xlane.xlu0 %1932 }
 0x38d   : > { %v2012_v51 = vpack.c.bf16 %v1992_v4, %v1991_v26 }
 0x38f   : > { %v9872_v55 = vpop.eup %9871  ;;  %3846 = vrot.lane.b32.xlu1 %v13783_v15, %s10338_s11 }
 0x390   : > { %v9874_v45 = vpop.eup %9873  ;;  %v1927_v24 = vpop.xlane.xlu0 %1926  ;;  %v1989_v34 = vmul.f32 %v9872_v55, %v11169_v14 }
 0x391   : > { %v9876_v60 = vpop.eup %9875  ;;  %v1995_v11 = vmul.f32 %v9874_v45, %v11167_v1  ;;  %v13798_v1 = vld [vmem:[#allocation43_spill] sm:$0xff] }
 0x392   : > { %v9878_v10 = vpop.eup %9877  ;;  %v2011_v38 = vpack.c.bf16 %v1990_v28, %v1989_v34  ;;  %v1994_v62 = vmul.f32 %v9876_v60, %v11173_v50 }
 0x393   : > { %v9880_v56 = vpop.eup %9879  ;;  %3972 = vrot.lane.b32.xlu1 %v13796_v25, %s10338_s11  ;;  %v1996_v57 = vmul.f32 %v9878_v10, %v11157_v8  ;;  %v2720_v8 = vpop.permute.xlu1 %2719 }
 0x394   : > { %9129 = vmatprep.mubr.msk.bf16.mxu1 %vm1160_vm0, %v2011_v38  ;;  %v2647_v15 = vpop.permute.xlu0 %2646  ;;  %v1993_v14 = vmul.f32 %v9880_v56, %v11179_v33  ;;  %v2660_v56 = vsel %vm1160_vm0, %v2649_v53, 0 }
 0x395   : > { %9130 = vmatmul.mubr.msk.bf16.vlgmr.msra.gmra.mrb[84].mxu1 %vm1160_vm0, %v2012_v51  ;;  %9613 = vmatprep.subr.msk.bf16.mxu0 %vm1160_vm0, %v2647_v15  ;;  %v2014_v38 = vpack.c.bf16 %v1996_v57, %v1995_v11  ;;  %v2657_v50 = vsel %vm1160_vm0, %v2647_v15, 0 }
 0x396   : > { %9142 = vmatpush3.bf16.msra.mxu1 %v13792_v58  ;;  %v2013_v40 = vpack.c.bf16 %v1994_v62, %v1993_v14 }
 0x397   : > { %9143 = vmatprep.subr.bf16.mxu1 %v13798_v1  ;;  %4035 = vrot.lane.b32.xlu1 %v13798_v1, %s10338_s11 }
 0x398   : > { %9137 = vmatprep.mubr.msk.bf16.mxu0 %vm1160_vm0, %v2013_v40  ;;  %v2722_v33 = vpop.permute.xlu0 %2721 }
 0x399   : > { %9138 = vmatmul.mubr.msk.bf16.vlgmr.msra.gmra.mrb[64].mxu0 %vm1160_vm0, %v2014_v38 }
 0x39a   : > { %9144 = vmatpush3.bf16.msra.mxu1 %v13798_v1  ;;  %9150 = vmatpush3.bf16.xpose.msra.mxu0 %v2657_v50 }
 0x39b   : > { %9614 = vmatprep.subr.msk.bf16.mxu0 %vm1160_vm0, %v2649_v53  ;;  %9615 = vmatprep.subr.msk.bf16.mxu1 %vm1160_vm0, %v2720_v8 }
 0x39c   : > { %v2643_v39 = vpop.permute.xlu0 %2642 }
 0x3a0   : > { %v2795_v11 = vpop.permute.xlu0 %2794 }
 0x3a2   : > { %9152 = vmatpush3.bf16.xpose.msra.mxu0 %v2660_v56 }
 0x3a4   : > { %v2716_v55 = vpop.permute.xlu0 %2715 }
 0x3a8   : > { %v11366_v4 = vpop.permute.xlu0 %2867 }
 0x3ac   : > { %v2789_v34 = vpop.permute.xlu0 %2788 }
 0x3b0   : > { %v2941_v28 = vpop.permute.xlu0 %2940 }
 0x3b4   : > { %v2862_v53 = vpop.permute.xlu0 %2861 }
 0x3bb   : > { %v1936_v45 = vpop.xlane.xlu1 %1935 }
 0x3bc   : > { %9881 = vrcp.f32 %v1936_v45 }
 0x3bd   : > { %9883 = vrcp.f32 %v1927_v24 }
 0x3be   : > { %9885 = vrcp.f32 %v1933_v43 }
 0x3bf   : > { %v1930_v15 = vpop.xlane.xlu1 %1929 }
 0x3c0   : > { %9887 = vrcp.f32 %v1930_v15 }
 0x3c3   : > { %v2641_v60 = vpop.permute.xlu1 %2640 }
 0x3c4   : > { %9153 = vmatprep.mubr.msk.bf16.mxu0 %vm1160_vm0, %v2641_v60  ;;  %v2730_v60 = vsel %vm1160_vm0, %v2720_v8, 0 }
 0x3c5   : > { %9154 = vmatmul.mubr.msk.bf16.vlgmr.msra.gmra.mrb[68].mxu0 %vm1160_vm0, %v2643_v39  ;;  %v3014_v39 = vpop.permute.xlu0 %3013 }
 0x3c6   : > { %v9882_v26 = vpop.eup %9881 }
 0x3c7   : > { %v2793_v10 = vpop.permute.xlu1 %2792  ;;  %v9884_v51 = vpop.eup %9883  ;;  %v2000_v43 = vmul.f32 %v9882_v26, %v11207_v32  ;;  %v2806_v32 = vsel %vm1160_vm0, %v2795_v11, 0  ;;  %v2733_v26 = vsel %vm1160_vm0, %v2722_v33, 0 }
 0x3c8   : > { %9617 = vmatprep.subr.msk.bf16.mxu0 %vm1160_vm0, %v2793_v10  ;;  %v2803_v14 = vsel %vm1160_vm0, %v2793_v10, 0  ;;  %v9886_v62 = vpop.eup %9885  ;;  %v1997_v40 = vmul.f32 %v9884_v51, %v11187_v42 }
 0x3c9   : > { %9166 = vmatpush3.bf16.xpose.msra.mxu0 %v2803_v14  ;;  %v1999_v50 = vmul.f32 %v9886_v62, %v11183_v52  ;;  %v2935_v52 = vpop.permute.xlu0 %2934  ;;  %v2952_v62 = vsel %vm1160_vm0, %v2941_v28, 0 }
 0x3ca   : > { %v9888_v24 = vpop.eup %9887  ;;  %9618 = vmatprep.subr.msk.bf16.mxu0 %vm1160_vm0, %v2795_v11 }
 0x3cb   : > { %v2714_v57 = vpop.permute.xlu1 %2713  ;;  %v1998_v38 = vmul.f32 %v9888_v24, %v11213_v30  ;;  %v2016_v45 = vpack.c.bf16 %v2000_v43, %v1999_v50 }
 0x3cd   : > { %v2015_v56 = vpack.c.bf16 %v1998_v38, %v1997_v40  ;;  %v3087_v8 = vpop.permute.xlu0 %3086 }
 0x3cf   : > { %v2866_v15 = vpop.permute.xlu1 %2865  ;;  %9145 = vmatprep.mubr.msk.bf16.mxu1 %vm1160_vm0, %v2015_v56 }
 0x3d0   : > { %9146 = vmatmul.mubr.msk.bf16.vlgmr.msra.gmra.mrb[88].mxu1 %vm1160_vm0, %v2016_v45 }
 0x3d1   : > { %9158 = vmatpush3.bf16.xpose.msra.mxu1 %v2730_v60  ;;  %9161 = vmatprep.mubr.msk.bf16.mxu1 %vm1160_vm0, %v2714_v57  ;;  %v3008_v14 = vpop.permute.xlu0 %3007  ;;  %v2879_v57 = vsel %vm1160_vm0, %v11366_v4, 0  ;;  %v3025_v60 = vsel %vm1160_vm0, %v3014_v39, 0 }
 0x3d2   : > { %9616 = vmatprep.subr.msk.bf16.mxu1 %vm1160_vm0, %v2722_v33  ;;  %9168 = vmatpush3.bf16.xpose.msra.mxu0 %v2806_v32  ;;  %v2876_v33 = vsel %vm1160_vm0, %v2866_v15, 0 }
 0x3d3   : > { %v2787_v42 = vpop.permute.xlu1 %2786 }
 0x3d4   : > { %9169 = vmatprep.mubr.msk.bf16.mxu0 %vm1160_vm0, %v2787_v42 }
 0x3d5   : > { %v3081_v24 = vpop.permute.xlu0 %3080 }
 0x3d7   : > { %v2939_v30 = vpop.permute.xlu1 %2938 }
 0x3d8   : > { %9621 = vmatprep.subr.msk.bf16.mxu0 %vm1160_vm0, %v2939_v30  ;;  %v2949_v10 = vsel %vm1160_vm0, %v2939_v30, 0 }
 0x3d9   : > { %9160 = vmatpush3.bf16.xpose.msra.mxu1 %v2733_v26  ;;  %9170 = vmatmul.mubr.msk.bf16.vlgmr.msra.gmra.mrb[72].mxu0 %vm1160_vm0, %v2789_v34  ;;  %v3152_v40 = vpop.permute.xlu0 %3151 }
 0x3da   : > { %9619 = vmatprep.subr.msk.bf16.mxu1 %vm1160_vm0, %v2866_v15  ;;  %9182 = vmatpush3.bf16.xpose.msra.mxu0 %v2949_v10 }
 0x3db   : > { %9622 = vmatprep.subr.msk.bf16.mxu0 %vm1160_vm0, %v2941_v28  ;;  %v2860_v11 = vpop.permute.xlu1 %2859 }
 0x3dd   : > { %v3593_v56 = vpop.permute.xlu0 %3592 }
 0x3df   : > { %v3012_v51 = vpop.permute.xlu1 %3011 }
 0x3e0   : > { %9162 = vmatmul.mubr.msk.bf16.vlgmr.msra.gmra.mrb[92].mxu1 %vm1160_vm0, %v2716_v55  ;;  %v3022_v50 = vsel %vm1160_vm0, %v3012_v51, 0 }
 0x3e1   : > { %9174 = vmatpush3.bf16.xpose.msra.mxu1 %v2876_v33  ;;  %9177 = vmatprep.mubr.msk.bf16.mxu1 %vm1160_vm0, %v2860_v11  ;;  %v3656_v30 = vpop.permute.xlu0 %3655 }
 0x3e2   : > { %9620 = vmatprep.subr.msk.bf16.mxu1 %vm1160_vm0, %v11366_v4  ;;  %9184 = vmatpush3.bf16.xpose.msra.mxu0 %v2952_v62  ;;  %v3098_v4 = vsel %vm1160_vm0, %v3087_v8, 0 }
 0x3e3   : > { %v2933_v34 = vpop.permute.xlu1 %2932 }
 0x3e4   : > { %9185 = vmatprep.mubr.msk.bf16.mxu0 %vm1160_vm0, %v2933_v34 }
 0x3e5   : > { %v3658_v26 = vpop.permute.xlu0 %3657 }
 0x3e7   : > { %v3085_v43 = vpop.permute.xlu1 %3084 }
 0x3e8   : > { %9625 = vmatprep.subr.msk.bf16.mxu0 %vm1160_vm0, %v3085_v43  ;;  %v3095_v55 = vsel %vm1160_vm0, %v3085_v43, 0 }
 0x3e9   : > { %9176 = vmatpush3.bf16.xpose.msra.mxu1 %v2879_v57  ;;  %9186 = vmatmul.mubr.msk.bf16.vlgmr.msra.gmra.mrb[76].mxu0 %vm1160_vm0, %v2935_v52 }
 0x3ea   : > { %9623 = vmatprep.subr.msk.bf16.mxu1 %vm1160_vm0, %v3012_v51  ;;  %9198 = vmatpush3.bf16.xpose.msra.mxu0 %v3095_v55 }
 0x3eb   : > { %9626 = vmatprep.subr.msk.bf16.mxu0 %vm1160_vm0, %v3087_v8  ;;  %v3006_v28 = vpop.permute.xlu1 %3005 }
 0x3ef   : > { %v3158_v38 = vpop.permute.xlu1 %3157 }
 0x3f0   : > { %9178 = vmatmul.mubr.msk.bf16.vlgmr.msra.gmra.mrb[96].mxu1 %vm1160_vm0, %v2862_v53  ;;  %v3168_v42 = vsel %vm1160_vm0, %v3158_v38, 0 }
 0x3f1   : > { %9190 = vmatpush3.bf16.xpose.msra.mxu1 %v3022_v50  ;;  %9193 = vmatprep.mubr.msk.bf16.mxu1 %vm1160_vm0, %v3006_v28 }
 0x3f2   : > { %9624 = vmatprep.subr.msk.bf16.mxu1 %vm1160_vm0, %v3014_v39  ;;  %9200 = vmatpush3.bf16.xpose.msra.mxu0 %v3098_v4 }
 0x3f3   : > { %9213 = vmatprep.subr.bf16.mxu0 %v3593_v56  ;;  %v3079_v45 = vpop.permute.xlu1 %3078 }
 0x3f4   : > { %9201 = vmatprep.mubr.msk.bf16.mxu0 %vm1160_vm0, %v3079_v45 }
 0x3f7   : > { %v3160_v15 = vpop.permute.xlu1 %3159 }
 0x3f8   : > { %v3171_v52 = vsel %vm1160_vm0, %v3160_v15, 0 }
 0x3f9   : > { %9192 = vmatpush3.bf16.xpose.msra.mxu1 %v3025_v60  ;;  %9202 = vmatmul.mubr.msk.bf16.vlgmr.msra.gmra.mrb[80].mxu0 %vm1160_vm0, %v3081_v24 }
 0x3fa   : > { %9627 = vmatprep.subr.msk.bf16.mxu1 %vm1160_vm0, %v3158_v38  ;;  %9214 = vmatpush3.bf16.msra.mxu0 %v3593_v56 }
 0x3fb   : > { %v3154_v53 = vpop.permute.xlu1 %3153 }
 0x3ff   : > { %v3595_v32 = vpop.permute.xlu1 %3594 }
 0x400   : > { %9194 = vmatmul.mubr.msk.bf16.vlgmr.msra.gmra.mrb[100].mxu1 %vm1160_vm0, %v3008_v14  ;;  %9215 = vmatprep.subr.bf16.mxu0 %v3595_v32  ;;  %v11426_v14 = vpop.permute.xlu0 %3781 }
 0x401   : > { %9206 = vmatpush3.bf16.xpose.msra.mxu1 %v3168_v42  ;;  %9209 = vmatprep.mubr.msk.bf16.mxu1 %vm1160_vm0, %v3152_v40  ;;  %13799 = vst [vmem:[#allocation19_spill] sm:$0xff] %v11426_v14 }
 0x402   : > { %9628 = vmatprep.subr.msk.bf16.mxu1 %vm1160_vm0, %v3160_v15  ;;  %9216 = vmatpush3.bf16.msra.mxu0 %v3595_v32 }
 0x403   : > { %v11417_v39 = vpop.permute.xlu1 %3718 }
 0x404   : > { %9229 = vmatprep.subr.bf16.mxu0 %v11417_v39 }
 0x409   : > { %9208 = vmatpush3.bf16.xpose.msra.mxu1 %v3171_v52 }
 0x40a   : > { %9221 = vmatprep.subr.bf16.mxu1 %v3656_v30 }
 0x410   : > { %9210 = vmatmul.mubr.msk.bf16.vlgmr.msra.gmra.mrb[104].mxu1 %vm1160_vm0, %v3154_v53  ;;  %v9091_v10 = vpop.f32.mrb[52].mxu0 }
 0x411   : > { %2459 = vst.msk [vmem:[#allocation3 + $0x10] sm:$0xff] %vm1160_vm0, %v9091_v10  ;;  %9222 = vmatpush3.bf16.msra.mxu1 %v3656_v30  ;;  %v2057_v8 = vpop.f32.mrb[53].mxu0 }
 0x412   : > { %2457 = vst.msk [vmem:[#allocation3] sm:$0xff] %vm1160_vm0, %v2057_v8  ;;  %9223 = vmatprep.subr.bf16.mxu1 %v3658_v26  ;;  %v9092_v11 = vpop.f32.mrb[54].mxu0 }
 0x413   : > { %2460 = vst.msk [vmem:[#allocation3 + $0x18] sm:$0xff] %vm1160_vm0, %v9092_v11  ;;  %v2060_v51 = vpop.f32.mrb[55].mxu0  ;;  %v11456_v11 = vld [vmem:[%s13623_s5 + $0x30] sm:$0xff] }
 0x414   : > { %2458 = vst.msk [vmem:[#allocation3 + $0x8] sm:$0xff] %vm1160_vm0, %v2060_v51 }
 0x415   : > { %9224 = vmatpush3.bf16.msra.mxu1 %v3658_v26 }
 0x416   : > { %9237 = vmatprep.subr.bf16.mxu1 %v11426_v14 }
 0x41e   : > { %v9099_v33 = vpop.f32.mrb[76].mxu1 }
 0x41f   : > { %2463 = vst.msk [vmem:[#allocation3 + $0x30] sm:$0xff] %vm1160_vm0, %v9099_v33  ;;  %v2112_v62 = vpop.f32.mrb[77].mxu1  ;;  %v11461_v33 = vld [vmem:[%s13623_s5 + $0x20] sm:$0xff] }
 0x420   : > { %2461 = vst.msk [vmem:[#allocation3 + $0x20] sm:$0xff] %vm1160_vm0, %v2112_v62  ;;  %v9100_v34 = vpop.f32.mrb[78].mxu1 }
 0x421   : > { %2464 = vst.msk [vmem:[#allocation3 + $0x38] sm:$0xff] %vm1160_vm0, %v9100_v34  ;;  %v2115_v24 = vpop.f32.mrb[79].mxu1 }
 0x422   : > { %2462 = vst.msk [vmem:[#allocation3 + $0x28] sm:$0xff] %vm1160_vm0, %v2115_v24  ;;  %v11469_v24 = vld [vmem:[%s13623_s5 + $0x28] sm:$0xff] }
 0x42e   : > { %v9107_v43 = vpop.f32.mrb[56].mxu0 }
 0x42f   : > { %2467 = vst.msk [vmem:[#allocation3 + $0x50] sm:$0xff] %vm1160_vm0, %v9107_v43  ;;  %v2167_v57 = vpop.f32.mrb[57].mxu0 }
 0x430   : > { %2465 = vst.msk [vmem:[#allocation3 + $0x40] sm:$0xff] %vm1160_vm0, %v2167_v57  ;;  %v9108_v55 = vpop.f32.mrb[58].mxu0 }
 0x431   : > { %2468 = vst.msk [vmem:[#allocation3 + $0x58] sm:$0xff] %vm1160_vm0, %v9108_v55  ;;  %v2170_v28 = vpop.f32.mrb[59].mxu0 }
 0x432   : > { %2466 = vst.msk [vmem:[#allocation3 + $0x48] sm:$0xff] %vm1160_vm0, %v2170_v28 }
 0x43e   : > { %v9115_v40 = vpop.f32.mrb[80].mxu1 }
 0x43f   : > { %2471 = vst.msk [vmem:[#allocation3 + $0x70] sm:$0xff] %vm1160_vm0, %v9115_v40  ;;  %v2222_v38 = vpop.f32.mrb[81].mxu1  ;;  %v11479_v40 = vld [vmem:[%s13623_s5 + $0x38] sm:$0xff] }
 0x440   : > { %2469 = vst.msk [vmem:[#allocation3 + $0x60] sm:$0xff] %vm1160_vm0, %v2222_v38  ;;  %v9116_v50 = vpop.f32.mrb[82].mxu1 }
 0x441   : > { %2472 = vst.msk [vmem:[#allocation3 + $0x78] sm:$0xff] %vm1160_vm0, %v9116_v50  ;;  %v2225_v4 = vpop.f32.mrb[83].mxu1 }
 0x442   : > { %2470 = vst.msk [vmem:[#allocation3 + $0x68] sm:$0xff] %vm1160_vm0, %v2225_v4 }
 0x44e   : > { %v9123_v56 = vpop.f32.mrb[60].mxu0 }
 0x44f   : > { %2475 = vst.msk [vmem:[#allocation3 + $0x90] sm:$0xff] %vm1160_vm0, %v9123_v56  ;;  %v2277_v45 = vpop.f32.mrb[61].mxu0 }
 0x450   : > { %2473 = vst.msk [vmem:[#allocation3 + $0x80] sm:$0xff] %vm1160_vm0, %v2277_v45  ;;  %v9124_v15 = vpop.f32.mrb[62].mxu0 }
 0x451   : > { %2476 = vst.msk [vmem:[#allocation3 + $0x98] sm:$0xff] %vm1160_vm0, %v9124_v15  ;;  %v2280_v60 = vpop.f32.mrb[63].mxu0 }
 0x452   : > { %2474 = vst.msk [vmem:[#allocation3 + $0x88] sm:$0xff] %vm1160_vm0, %v2280_v60 }
 0x468   : > { %v9131_v53 = vpop.f32.mrb[84].mxu1 }
 0x469   : > { %2479 = vst.msk [vmem:[#allocation3 + $0xb0] sm:$0xff] %vm1160_vm0, %v9131_v53  ;;  %v2332_v32 = vpop.f32.mrb[85].mxu1 }
 0x46a   : > { %2477 = vst.msk [vmem:[#allocation3 + $0xa0] sm:$0xff] %vm1160_vm0, %v2332_v32  ;;  %v9132_v42 = vpop.f32.mrb[86].mxu1 }
 0x46b   : > { %2480 = vst.msk [vmem:[#allocation3 + $0xb8] sm:$0xff] %vm1160_vm0, %v9132_v42  ;;  %v2335_v52 = vpop.f32.mrb[87].mxu1 }
 0x46c   : > { %2478 = vst.msk [vmem:[#allocation3 + $0xa8] sm:$0xff] %vm1160_vm0, %v2335_v52  ;;  %v9139_v30 = vpop.f32.mrb[64].mxu0 }
 0x46d   : > { %2483 = vst.msk [vmem:[#allocation3 + $0xd0] sm:$0xff] %vm1160_vm0, %v9139_v30  ;;  %v2387_v26 = vpop.f32.mrb[65].mxu0 }
 0x46e   : > { %2481 = vst.msk [vmem:[#allocation3 + $0xc0] sm:$0xff] %vm1160_vm0, %v2387_v26  ;;  %v9140_v10 = vpop.f32.mrb[66].mxu0 }
 0x46f   : > { %2484 = vst.msk [vmem:[#allocation3 + $0xd8] sm:$0xff] %vm1160_vm0, %v9140_v10  ;;  %v2390_v8 = vpop.f32.mrb[67].mxu0 }
 0x470   : > { %2482 = vst.msk [vmem:[#allocation3 + $0xc8] sm:$0xff] %vm1160_vm0, %v2390_v8 }
 0x498   : > { %v9155_v51 = vpop.f32.mrb[68].mxu0 }
 0x499   : > { %v11464_v62 = vadd.f32 %v9155_v51, %v11456_v11  ;;  %v2696_v34 = vpop.f32.mrb[69].mxu0 }
 0x49a   : > { %v9156_v43 = vpop.f32.mrb[70].mxu0  ;;  %v11472_v57 = vadd.f32 %v11461_v33, %v2696_v34 }
 0x49b   : > { %v2699_v55 = vpop.f32.mrb[71].mxu0  ;;  %v3228_v28 = vsel %vm1160_vm0, %v11464_v62, -inf  ;;  %v11487_v4 = vadd.f32 %v9156_v43, %v11479_v40 }
 0x49c   : > { %v11482_v38 = vadd.f32 %v11469_v24, %v2699_v55  ;;  %3229 = vmax.xlane.f32.xlu0 %v3228_v28  ;;  %v3222_v56 = vsel %vm1160_vm0, %v11472_v57, -inf }
 0x49d   : > { %v3231_v15 = vsel %vm1160_vm0, %v11487_v4, -inf }
 0x49e   : > { %v3225_v50 = vsel %vm1160_vm0, %v11482_v38, -inf }
 0x49f   : > { %3226 = vmax.xlane.f32.xlu1 %v3225_v50 }
 0x4a0   : > { %3223 = vmax.xlane.f32.xlu0 %v3222_v56 }
 0x4a3   : > { %v9147_v45 = vpop.f32.mrb[88].mxu1 }
 0x4a4   : > { %2487 = vst.msk [vmem:[#allocation3 + $0xf0] sm:$0xff] %vm1160_vm0, %v9147_v45  ;;  %v2442_v60 = vpop.f32.mrb[89].mxu1  ;;  %3232 = vmax.xlane.f32.xlu0 %v3231_v15 }
 0x4a5   : > { %2485 = vst.msk [vmem:[#allocation3 + $0xe0] sm:$0xff] %vm1160_vm0, %v2442_v60  ;;  %v9148_v53 = vpop.f32.mrb[90].mxu1 }
 0x4a6   : > { %2488 = vst.msk [vmem:[#allocation3 + $0xf8] sm:$0xff] %vm1160_vm0, %v9148_v53  ;;  %v2445_v32 = vpop.f32.mrb[91].mxu1 }
 0x4a7   : > { %2486 = vst.msk [vmem:[#allocation3 + $0xe8] sm:$0xff] %vm1160_vm0, %v2445_v32 }
 0x4ac   : > { %v9171_v42 = vpop.f32.mrb[72].mxu0 }
 0x4ad   : > { %v2842_v52 = vpop.f32.mrb[73].mxu0  ;;  %v11501_v43 = vadd.f32 %v9171_v42, %v11456_v11 }
 0x4ae   : > { %v9172_v30 = vpop.f32.mrb[74].mxu0 }
 0x4af   : > { %v2845_v26 = vpop.f32.mrb[75].mxu0  ;;  %v11509_v56 = vadd.f32 %v9172_v30, %v11479_v40  ;;  %v3252_v60 = vsel %vm1160_vm0, %v11501_v43, -inf }
 0x4b1   : > { %v3255_v42 = vsel %vm1160_vm0, %v11509_v56, -inf }
 0x4b3   : > { %v9163_v10 = vpop.f32.mrb[92].mxu1 }
 0x4b4   : > { %v11498_v8 = vadd.f32 %v9163_v10, %v11456_v11  ;;  %v2769_v51 = vpop.f32.mrb[93].mxu1  ;;  %v11524_v10 = vadd.f32 %v11461_v33, %v2842_v52 }
 0x4b5   : > { %v9164_v34 = vpop.f32.mrb[94].mxu1  ;;  %v11514_v15 = vadd.f32 %v11461_v33, %v2769_v51 }
 0x4b6   : > { %v11504_v55 = vadd.f32 %v9164_v34, %v11479_v40  ;;  %v2772_v28 = vpop.f32.mrb[95].mxu1  ;;  %v3240_v50 = vsel %vm1160_vm0, %v11498_v8, -inf }
 0x4b7   : > { %3241 = vmax.xlane.f32.xlu0 %v3240_v50  ;;  %v11519_v53 = vadd.f32 %v11469_v24, %v2772_v28  ;;  %v3234_v51 = vsel %vm1160_vm0, %v11514_v15, -inf }
 0x4b8   : > { %v3243_v45 = vsel %vm1160_vm0, %v11504_v55, -inf }
 0x4b9   : > { %3244 = vmax.xlane.f32.xlu1 %v3243_v45  ;;  %v11529_v45 = vadd.f32 %v11469_v24, %v2845_v26  ;;  %v3237_v28 = vsel %vm1160_vm0, %v11519_v53, -inf }
 0x4bb   : > { %3253 = vmax.xlane.f32.xlu0 %v3252_v60  ;;  %v3246_v60 = vsel %vm1160_vm0, %v11524_v10, -inf }
 0x4bc   : > { %v9187_v32 = vpop.f32.mrb[76].mxu0 }
 0x4bd   : > { %3256 = vmax.xlane.f32.xlu1 %v3255_v42  ;;  %v2988_v30 = vpop.f32.mrb[77].mxu0  ;;  %v11541_v26 = vadd.f32 %v9187_v32, %v11456_v11 }
 0x4be   : > { %v9188_v34 = vpop.f32.mrb[78].mxu0  ;;  %v11564_v17 = vadd.f32 %v11461_v33, %v2988_v30 }
 0x4bf   : > { %3235 = vmax.xlane.f32.xlu0 %v3234_v51  ;;  %v2991_v50 = vpop.f32.mrb[79].mxu0  ;;  %v3249_v51 = vsel %vm1160_vm0, %v11529_v45, -inf  ;;  %v3276_v32 = vsel %vm1160_vm0, %v11541_v26, -inf }
 0x4c1   : > { %3238 = vmax.xlane.f32.xlu1 %v3237_v28 }
 0x4c3   : > { %3247 = vmax.xlane.f32.xlu0 %v3246_v60  ;;  %v9179_v42 = vpop.f32.mrb[96].mxu1 }
 0x4c4   : > { %v11536_v52 = vadd.f32 %v9179_v42, %v11456_v11  ;;  %v2915_v1 = vpop.f32.mrb[97].mxu1  ;;  %v11549_v42 = vadd.f32 %v9188_v34, %v11479_v40 }
 0x4c5   : > { %3250 = vmax.xlane.f32.xlu1 %v3249_v51  ;;  %v9180_v25 = vpop.f32.mrb[98].mxu1  ;;  %v11554_v51 = vadd.f32 %v11461_v33, %v2915_v1 }
 0x4c6   : > { %v11544_v58 = vadd.f32 %v9180_v25, %v11479_v40  ;;  %v2918_v28 = vpop.f32.mrb[99].mxu1  ;;  %v3264_v60 = vsel %vm1160_vm0, %v11536_v52, -inf }
 0x4c7   : > { %3265 = vmax.xlane.f32.xlu0 %v3264_v60  ;;  %v11559_v25 = vadd.f32 %v11469_v24, %v2918_v28  ;;  %v3279_v60 = vsel %vm1160_vm0, %v11549_v42, -inf  ;;  %v3258_v1 = vsel %vm1160_vm0, %v11554_v51, -inf }
 0x4c8   : > { %v3267_v13 = vsel %vm1160_vm0, %v11544_v58, -inf }
 0x4c9   : > { %3268 = vmax.xlane.f32.xlu1 %v3267_v13  ;;  %v3261_v28 = vsel %vm1160_vm0, %v11559_v25, -inf }
 0x4cb   : > { %3277 = vmax.xlane.f32.xlu0 %v3276_v32  ;;  %v11569_v32 = vadd.f32 %v11469_v24, %v2991_v50 }
 0x4cc   : > { %v9203_v5 = vpop.f32.mrb[80].mxu0 }
 0x4cd   : > { %3280 = vmax.xlane.f32.xlu1 %v3279_v60  ;;  %v3134_v34 = vpop.f32.mrb[81].mxu0  ;;  %v3270_v60 = vsel %vm1160_vm0, %v11564_v17, -inf  ;;  %v11581_v50 = vadd.f32 %v9203_v5, %v11456_v11 }
 0x4ce   : > { %v9204_v13 = vpop.f32.mrb[82].mxu0 }
 0x4cf   : > { %3259 = vmax.xlane.f32.xlu0 %v3258_v1  ;;  %v3137_v16 = vpop.f32.mrb[83].mxu0  ;;  %v3273_v1 = vsel %vm1160_vm0, %v11569_v32, -inf  ;;  %v3300_v5 = vsel %vm1160_vm0, %v11581_v50, -inf }
 0x4d1   : > { %3262 = vmax.xlane.f32.xlu1 %v3261_v28 }
 0x4d3   : > { %3271 = vmax.xlane.f32.xlu0 %v3270_v60  ;;  %v9195_v36 = vpop.f32.mrb[100].mxu1 }
 0x4d4   : > { %v11576_v30 = vadd.f32 %v9195_v36, %v11456_v11  ;;  %v3061_v20 = vpop.f32.mrb[101].mxu1  ;;  %v11589_v36 = vadd.f32 %v9204_v13, %v11479_v40  ;;  %v11604_v13 = vadd.f32 %v11461_v33, %v3134_v34 }
 0x4d5   : > { %3274 = vmax.xlane.f32.xlu1 %v3273_v1  ;;  %v9196_v41 = vpop.f32.mrb[102].mxu1  ;;  %v11594_v1 = vadd.f32 %v11461_v33, %v3061_v20  ;;  %v11609_v20 = vadd.f32 %v11469_v24, %v3137_v16 }
 0x4d6   : > { %v11584_v44 = vadd.f32 %v9196_v41, %v11479_v40  ;;  %v3064_v28 = vpop.f32.mrb[103].mxu1  ;;  %v3288_v60 = vsel %vm1160_vm0, %v11576_v30, -inf }
 0x4d7   : > { %3289 = vmax.xlane.f32.xlu0 %v3288_v60  ;;  %v11599_v41 = vadd.f32 %v11469_v24, %v3064_v28  ;;  %v3303_v60 = vsel %vm1160_vm0, %v11589_v36, -inf  ;;  %v3294_v28 = vsel %vm1160_vm0, %v11604_v13, -inf  ;;  %v3297_v59 = vsel %vm1160_vm0, %v11609_v20, -inf }
 0x4d8   : > { %v3291_v14 = vsel %vm1160_vm0, %v11584_v44, -inf }
 0x4d9   : > { %3292 = vmax.xlane.f32.xlu1 %v3291_v14  ;;  %v3282_v14 = vsel %vm1160_vm0, %v11594_v1, -inf }
 0x4db   : > { %3301 = vmax.xlane.f32.xlu0 %v3300_v5  ;;  %v3285_v5 = vsel %vm1160_vm0, %v11599_v41, -inf }
 0x4dd   : > { %3304 = vmax.xlane.f32.xlu1 %v3303_v60 }
 0x4df   : > { %3283 = vmax.xlane.f32.xlu0 %v3282_v14 }
 0x4e1   : > { %3286 = vmax.xlane.f32.xlu1 %v3285_v5 }
 0x4e3   : > { %3295 = vmax.xlane.f32.xlu0 %v3294_v28  ;;  %v9211_v19 = vpop.f32.mrb[104].mxu1 }
 0x4e4   : > { %v11616_v60 = vadd.f32 %v9211_v19, %v11456_v11  ;;  %v3207_v34 = vpop.f32.mrb[105].mxu1 }
 0x4e5   : > { %3298 = vmax.xlane.f32.xlu1 %v3297_v59  ;;  %v9212_v14 = vpop.f32.mrb[106].mxu1  ;;  %v11621_v16 = vadd.f32 %v11461_v33, %v3207_v34  ;;  %v11639_v34 = vpop.permute.xlu1 %3720 }
 0x4e6   : > { %v11624_v37 = vadd.f32 %v9212_v14, %v11479_v40  ;;  %v3210_v5 = vpop.f32.mrb[107].mxu1  ;;  %v3312_v28 = vsel %vm1160_vm0, %v11616_v60, -inf  ;;  %v11637_v40 = vpop.permute.xlu0 %3783 }
 0x4e7   : > { %3313 = vmax.xlane.f32.xlu0 %v3312_v28  ;;  %v11629_v19 = vadd.f32 %v11469_v24, %v3210_v5  ;;  %v3306_v59 = vsel %vm1160_vm0, %v11621_v16, -inf  ;;  %13800 = vst [vmem:[#allocation12_spill] sm:$0xff] %v11637_v40 }
 0x4e8   : > { %v3315_v11 = vsel %vm1160_vm0, %v11624_v37, -inf }
 0x4e9   : > { %3316 = vmax.xlane.f32.xlu1 %v3315_v11  ;;  %v3309_v33 = vsel %vm1160_vm0, %v11629_v19, -inf  ;;  %v11643_v24 = vpop.permute.xlu1 %3844 }
 0x4ea   : > { %v11641_v14 = vpop.permute.xlu0 %3907  ;;  %13802 = vst [vmem:[#allocation17_spill] sm:$0xff] %v11643_v24 }
 0x4eb   : > { %3307 = vmax.xlane.f32.xlu0 %v3306_v59  ;;  %13801 = vst [vmem:[#allocation25_spill] sm:$0xff] %v11641_v14 }
 0x4ed   : > { %3310 = vmax.xlane.f32.xlu1 %v3309_v33  ;;  %v11647_v28 = vpop.permute.xlu1 %3846 }
 0x4ee   : > { %v11645_v5 = vpop.permute.xlu0 %3970  ;;  %13804 = vst [vmem:[#allocation46_spill] sm:$0xff] %v11647_v28 }
 0x4ef   : > { %13803 = vst [vmem:[#allocation45_spill] sm:$0xff] %v11645_v5 }
 0x4f1   : > { %v11651_v49 = vpop.permute.xlu1 %3972 }
 0x4f2   : > { %v11649_v11 = vpop.permute.xlu0 %3909  ;;  %13806 = vst [vmem:[#allocation48_spill] sm:$0xff] %v11651_v49 }
 0x4f3   : > { %13805 = vst [vmem:[#allocation47_spill] sm:$0xff] %v11649_v11 }
 0x4f5   : > { %v11655_v54 = vpop.permute.xlu1 %4035 }
 0x4f6   : > { %v11653_v59 = vpop.permute.xlu0 %4033  ;;  %13808 = vst [vmem:[#allocation50_spill] sm:$0xff] %v11655_v54 }
 0x4f7   : > { %13807 = vst [vmem:[#allocation49_spill] sm:$0xff] %v11653_v59 }
 0x529   : > { %v3230_v33 = vpop.xlane.xlu0 %3229 }
 0x52a   : > { %v3320_v40 = vsub.f32 %v11464_v62, %v3230_v33 }
 0x52c   : > { %v3354_v27 = vmul.f32 1.442695, %v3320_v40  ;;  %v3227_v22 = vpop.xlane.xlu1 %3226 }
 0x52d   : > { %v3224_v14 = vpop.xlane.xlu0 %3223  ;;  %v3319_v5 = vsub.f32 %v11482_v38, %v3227_v22 }
 0x52e   : > { %9889 = vpow2.f32 %v3354_v27  ;;  %v3318_v3 = vsub.f32 %v11472_v57, %v3224_v14 }
 0x52f   : > { %v3352_v11 = vmul.f32 1.442695, %v3319_v5 }
 0x530   : > { %v3350_v28 = vmul.f32 1.442695, %v3318_v3 }
 0x531   : > { %v3233_v24 = vpop.xlane.xlu0 %3232 }
 0x532   : > { %9891 = vpow2.f32 %v3350_v28  ;;  %v3321_v49 = vsub.f32 %v11487_v4, %v3233_v24 }
 0x534   : > { %v3356_v59 = vmul.f32 1.442695, %v3321_v49 }
 0x536   : > { %9893 = vpow2.f32 %v3356_v59 }
 0x537   : > { %9895 = vpow2.f32 %v3352_v11 }
 0x538   : > { %v11661_v54 = vpop.eup %9889 }
 0x539   : > { %v3420_v62 = vsel %vm1160_vm0, %v11661_v54, 0.0 }
 0x53a   : > { %3421 = vadd.xlane.f32.xlu0 %v3420_v62 }
 0x53c   : > { %v11665_v27 = vpop.eup %9891 }
 0x53d   : > { %v3414_v22 = vsel %vm1160_vm0, %v11665_v27, 0.0 }
 0x53e   : > { %3415 = vadd.xlane.f32.xlu0 %v3414_v22 }
 0x540   : > { %v11669_v3 = vpop.eup %9893 }
 0x541   : > { %v3423_v57 = vsel %vm1160_vm0, %v11669_v3, 0.0  ;;  %v11673_v49 = vpop.eup %9895 }
 0x542   : > { %3424 = vadd.xlane.f32.xlu1 %v3423_v57  ;;  %v3417_v40 = vsel %vm1160_vm0, %v11673_v49, 0.0 }
 0x544   : > { %v3242_v38 = vpop.xlane.xlu0 %3241 }
 0x545   : > { %v3324_v4 = vsub.f32 %v11498_v8, %v3242_v38 }
 0x546   : > { %v3245_v14 = vpop.xlane.xlu1 %3244  ;;  %3418 = vadd.xlane.f32.xlu1 %v3417_v40 }
 0x547   : > { %v3362_v24 = vmul.f32 1.442695, %v3324_v4  ;;  %v3325_v5 = vsub.f32 %v11504_v55, %v3245_v14 }
 0x548   : > { %v3254_v28 = vpop.xlane.xlu0 %3253 }
 0x549   : > { %9897 = vpow2.f32 %v3362_v24  ;;  %v3364_v11 = vmul.f32 1.442695, %v3325_v5  ;;  %v3328_v59 = vsub.f32 %v11501_v43, %v3254_v28 }
 0x54a   : > { %v3257_v33 = vpop.xlane.xlu1 %3256 }
 0x54b   : > { %9899 = vpow2.f32 %v3364_v11  ;;  %v3370_v62 = vmul.f32 1.442695, %v3328_v59  ;;  %v3329_v22 = vsub.f32 %v11509_v56, %v3257_v33 }
 0x54c   : > { %v3236_v57 = vpop.xlane.xlu0 %3235 }
 0x54d   : > { %9901 = vpow2.f32 %v3370_v62  ;;  %v3372_v8 = vmul.f32 1.442695, %v3329_v22  ;;  %v3322_v38 = vsub.f32 %v11514_v15, %v3236_v57 }
 0x54e   : > { %v3239_v35 = vpop.xlane.xlu1 %3238 }
 0x54f   : > { %9903 = vpow2.f32 %v3372_v8  ;;  %v3358_v4 = vmul.f32 1.442695, %v3322_v38  ;;  %v3323_v55 = vsub.f32 %v11519_v53, %v3239_v35 }
 0x550   : > { %v3248_v40 = vpop.xlane.xlu0 %3247 }
 0x551   : > { %9905 = vpow2.f32 %v3358_v4  ;;  %v3360_v14 = vmul.f32 1.442695, %v3323_v55  ;;  %v3326_v43 = vsub.f32 %v11524_v10, %v3248_v40 }
 0x552   : > { %v3251_v24 = vpop.xlane.xlu1 %3250 }
 0x553   : > { %v11684_v5 = vpop.eup %9897  ;;  %9907 = vpow2.f32 %v3360_v14  ;;  %v3366_v56 = vmul.f32 1.442695, %v3326_v43  ;;  %v3327_v28 = vsub.f32 %v11529_v45, %v3251_v24 }
 0x554   : > { %v3266_v11 = vpop.xlane.xlu0 %3265  ;;  %v3432_v15 = vsel %vm1160_vm0, %v11684_v5, 0.0 }
 0x555   : > { %v11689_v59 = vpop.eup %9899  ;;  %9909 = vpow2.f32 %v3366_v56  ;;  %v3368_v35 = vmul.f32 1.442695, %v3327_v28  ;;  %v3332_v53 = vsub.f32 %v11536_v52, %v3266_v11  ;;  %3433 = vadd.xlane.f32.xlu0 %v3432_v15 }
 0x556   : > { %v3435_v10 = vsel %vm1160_vm0, %v11689_v59, 0.0 }
 0x557   : > { %v11694_v33 = vpop.eup %9901  ;;  %9911 = vpow2.f32 %v3368_v35  ;;  %v3378_v62 = vmul.f32 1.442695, %v3332_v53  ;;  %3436 = vadd.xlane.f32.xlu1 %v3435_v10 }
 0x558   : > { %v3278_v45 = vpop.xlane.xlu0 %3277  ;;  %v3444_v22 = vsel %vm1160_vm0, %v11694_v33, 0.0 }
 0x559   : > { %v11698_v57 = vpop.eup %9903  ;;  %9913 = vpow2.f32 %v3378_v62  ;;  %v3336_v8 = vsub.f32 %v11541_v26, %v3278_v45  ;;  %3445 = vadd.xlane.f32.xlu0 %v3444_v22 }
 0x55a   : > { %v3447_v52 = vsel %vm1160_vm0, %v11698_v57, 0.0 }
 0x55b   : > { %v11703_v38 = vpop.eup %9905  ;;  %v3386_v4 = vmul.f32 1.442695, %v3336_v8  ;;  %3448 = vadd.xlane.f32.xlu1 %v3447_v52 }
 0x55c   : > { %v3260_v55 = vpop.xlane.xlu0 %3259  ;;  %v3426_v40 = vsel %vm1160_vm0, %v11703_v38, 0.0 }
 0x55d   : > { %v11707_v14 = vpop.eup %9907  ;;  %9915 = vpow2.f32 %v3386_v4  ;;  %v3330_v43 = vsub.f32 %v11554_v51, %v3260_v55  ;;  %3427 = vadd.xlane.f32.xlu0 %v3426_v40  ;;  %v3269_v55 = vpop.xlane.xlu1 %3268 }
 0x55e   : > { %v3429_v26 = vsel %vm1160_vm0, %v11707_v14, 0.0 }
 0x55f   : > { %v11712_v24 = vpop.eup %9909  ;;  %v3374_v56 = vmul.f32 1.442695, %v3330_v43  ;;  %3430 = vadd.xlane.f32.xlu1 %v3429_v26 }
 0x560   : > { %v3272_v28 = vpop.xlane.xlu0 %3271  ;;  %v3438_v11 = vsel %vm1160_vm0, %v11712_v24, 0.0 }
 0x561   : > { %v11716_v15 = vpop.eup %9911  ;;  %9917 = vpow2.f32 %v3374_v56  ;;  %v3334_v35 = vsub.f32 %v11564_v17, %v3272_v28  ;;  %3439 = vadd.xlane.f32.xlu0 %v3438_v11  ;;  %v3281_v40 = vpop.xlane.xlu1 %3280  ;;  %v3333_v28 = vsub.f32 %v11544_v58, %v3269_v55 }
 0x562   : > { %v3441_v51 = vsel %vm1160_vm0, %v11716_v15, 0.0 }
 0x563   : > { %v11721_v53 = vpop.eup %9913  ;;  %v3382_v10 = vmul.f32 1.442695, %v3334_v35  ;;  %3442 = vadd.xlane.f32.xlu1 %v3441_v51  ;;  %v3380_v11 = vmul.f32 1.442695, %v3333_v28  ;;  %v3337_v35 = vsub.f32 %v11549_v42, %v3281_v40 }
 0x564   : > { %v3456_v62 = vsel %vm1160_vm0, %v11721_v53, 0.0  ;;  %v3290_v43 = vpop.xlane.xlu0 %3289 }
 0x565   : > { %9919 = vpow2.f32 %v3382_v10  ;;  %3457 = vadd.xlane.f32.xlu0 %v3456_v62  ;;  %v3263_v26 = vpop.xlane.xlu1 %3262  ;;  %v3388_v62 = vmul.f32 1.442695, %v3337_v35  ;;  %v3340_v42 = vsub.f32 %v11576_v30, %v3290_v43 }
 0x566   : > { %9921 = vpow2.f32 %v3380_v11 }
 0x567   : > { %v11725_v45 = vpop.eup %9915  ;;  %9923 = vpow2.f32 %v3388_v62 }
 0x568   : > { %13809 = vst [vmem:[#allocation51_spill] sm:$0xff] %v11725_v45  ;;  %v3468_v22 = vsel %vm1160_vm0, %v11725_v45, 0.0  ;;  %v3302_v56 = vpop.xlane.xlu0 %3301 }
 0x569   : > { %3469 = vadd.xlane.f32.xlu0 %v3468_v22  ;;  %v3275_v51 = vpop.xlane.xlu1 %3274  ;;  %v3331_v22 = vsub.f32 %v11559_v25, %v3263_v26  ;;  %v3344_v58 = vsub.f32 %v11581_v50, %v3302_v56  ;;  %v3394_v25 = vmul.f32 1.442695, %v3340_v42 }
 0x56a   : > { %v3335_v45 = vsub.f32 %v11569_v32, %v3275_v51 }
 0x56b   : > { %v11729_v17 = vpop.eup %9917  ;;  %v3402_v11 = vmul.f32 1.442695, %v3344_v58 }
 0x56c   : > { %v3450_v8 = vsel %vm1160_vm0, %v11729_v17, 0.0  ;;  %v3284_v10 = vpop.xlane.xlu0 %3283  ;;  %v3384_v55 = vmul.f32 1.442695, %v3335_v45 }
 0x56d   : > { %3451 = vadd.xlane.f32.xlu0 %v3450_v8  ;;  %v3293_v8 = vpop.xlane.xlu1 %3292  ;;  %v3338_v26 = vsub.f32 %v11594_v1, %v3284_v10 }
 0x56e   : > { %v3341_v43 = vsub.f32 %v11584_v44, %v3293_v8 }
 0x56f   : > { %v11733_v52 = vpop.eup %9919 }
 0x570   : > { %13810 = vst [vmem:[#allocation52_spill] sm:$0xff] %v11733_v52  ;;  %v3462_v4 = vsel %vm1160_vm0, %v11733_v52, 0.0  ;;  %v11747_v52 = vpop.eup %9921 }
 0x571   : > { %3463 = vadd.xlane.f32.xlu0 %v3462_v4  ;;  %v3296_v4 = vpop.xlane.xlu0 %3295  ;;  %v3305_v40 = vpop.xlane.xlu1 %3304  ;;  %v3459_v32 = vsel %vm1160_vm0, %v11747_v52, 0.0 }
 0x572   : > { %v3342_v35 = vsub.f32 %v11604_v13, %v3296_v4  ;;  %v11753_v51 = vpop.eup %9923  ;;  %v3390_v13 = vmul.f32 1.442695, %v3338_v26 }
 0x573   : > { %v3471_v56 = vsel %vm1160_vm0, %v11753_v51, 0.0 }
 0x574   : > { %4414 = vrot.lane.b32.xlu1 %v10593_v23, %s10339_s28  ;;  %v3376_v23 = vmul.f32 1.442695, %v3331_v22  ;;  %v3396_v22 = vmul.f32 1.442695, %v3341_v43 }
 0x575   : > { %v3314_v28 = vpop.xlane.xlu0 %3313  ;;  %v3287_v50 = vpop.xlane.xlu1 %3286 }
 0x576   : > { %9925 = vpow2.f32 %v3376_v23  ;;  %v3398_v23 = vmul.f32 1.442695, %v3342_v35  ;;  %v3348_v30 = vsub.f32 %v11616_v60, %v3314_v28  ;;  %v3345_v60 = vsub.f32 %v11589_v36, %v3305_v40 }
 0x577   : > { %9927 = vpow2.f32 %v3384_v55 }
 0x578   : > { %9929 = vpow2.f32 %v3402_v11  ;;  %v3410_v10 = vmul.f32 1.442695, %v3348_v30  ;;  %v3404_v42 = vmul.f32 1.442695, %v3345_v60 }
 0x579   : > { %v3308_v45 = vpop.xlane.xlu0 %3307  ;;  %9931 = vpow2.f32 %v3394_v25  ;;  %v3299_v4 = vpop.xlane.xlu1 %3298 }
 0x57a   : > { %9933 = vpow2.f32 %v3398_v23  ;;  %v3346_v62 = vsub.f32 %v11621_v16, %v3308_v45  ;;  %v3339_v16 = vsub.f32 %v11599_v41, %v3287_v50  ;;  %v3343_v26 = vsub.f32 %v11609_v20, %v3299_v4 }
 0x57b   : > { %9935 = vpow2.f32 %v3390_v13 }
 0x57c   : > { %9937 = vpow2.f32 %v3410_v10  ;;  %v3406_v8 = vmul.f32 1.442695, %v3346_v62  ;;  %v3392_v25 = vmul.f32 1.442695, %v3339_v16  ;;  %v3400_v50 = vmul.f32 1.442695, %v3343_v26 }
 0x57d   : > { %9939 = vpow2.f32 %v3396_v22  ;;  %v3317_v40 = vpop.xlane.xlu1 %3316 }
 0x57e   : > { %9941 = vpow2.f32 %v3406_v8  ;;  %v3349_v45 = vsub.f32 %v11624_v37, %v3317_v40 }
 0x57f   : > { %9943 = vpow2.f32 %v3404_v42 }
 0x580   : > { %v11759_v1 = vpop.eup %9925  ;;  %9945 = vpow2.f32 %v3392_v25  ;;  %v3412_v62 = vmul.f32 1.442695, %v3349_v45 }
 0x581   : > { %v3453_v58 = vsel %vm1160_vm0, %v11759_v1, 0.0  ;;  %v11765_v44 = vpop.eup %9927  ;;  %v3311_v43 = vpop.xlane.xlu1 %3310  ;;  %9947 = vpow2.f32 %v3400_v50 }
 0x582   : > { %v11767_v55 = vpop.eup %9929  ;;  %v3465_v28 = vsel %vm1160_vm0, %v11765_v44, 0.0  ;;  %v3347_v22 = vsub.f32 %v11629_v19, %v3311_v43  ;;  %9949 = vpow2.f32 %v3412_v62 }
 0x583   : > { %v11772_v36 = vpop.eup %9931  ;;  %v3492_v11 = vsel %vm1160_vm0, %v11767_v55, 0.0 }
 0x584   : > { %v11776_v35 = vpop.eup %9933  ;;  %v3480_v41 = vsel %vm1160_vm0, %v11772_v36, 0.0 }
 0x585   : > { %v3486_v23 = vsel %vm1160_vm0, %v11776_v35, 0.0 }
 0x587   : > { %4412 = vrot.lane.b32.xlu0 %v10571_v2, %s10339_s28 }
 0x598   : > { %3460 = vadd.xlane.f32.xlu1 %v3459_v32  ;;  %v11781_v32 = vpop.eup %9935 }
 0x599   : > { %v11785_v30 = vpop.eup %9937  ;;  %v3474_v20 = vsel %vm1160_vm0, %v11781_v32, 0.0 }
 0x59a   : > { %v11790_v13 = vpop.eup %9939 }
 0x59b   : > { %v11794_v10 = vpop.eup %9941  ;;  %v3483_v37 = vsel %vm1160_vm0, %v11790_v13, 0.0 }
 0x59c   : > { %3472 = vadd.xlane.f32.xlu1 %v3471_v56  ;;  %v3504_v56 = vsel %vm1160_vm0, %v11785_v30, 0.0  ;;  %v11799_v60 = vpop.eup %9943  ;;  %v3498_v4 = vsel %vm1160_vm0, %v11794_v10, 0.0 }
 0x59d   : > { %v3495_v8 = vsel %vm1160_vm0, %v11799_v60, 0.0  ;;  %v11805_v42 = vpop.eup %9945 }
 0x59e   : > { %v3477_v19 = vsel %vm1160_vm0, %v11805_v42, 0.0  ;;  %v11809_v16 = vpop.eup %9947 }
 0x59f   : > { %v11813_v40 = vpop.eup %9949 }
 0x5a0   : > { %3454 = vadd.xlane.f32.xlu1 %v3453_v58  ;;  %v3408_v58 = vmul.f32 1.442695, %v3347_v22 }
 0x5a2   : > { %9951 = vpow2.f32 %v3408_v58 }
 0x5a4   : > { %3466 = vadd.xlane.f32.xlu1 %v3465_v28  ;;  %v3489_v28 = vsel %vm1160_vm0, %v11809_v16, 0.0 }
 0x5a6   : > { %3493 = vadd.xlane.f32.xlu0 %v3492_v11  ;;  %v3507_v11 = vsel %vm1160_vm0, %v11813_v40, 0.0 }
 0x5a8   : > { %3481 = vadd.xlane.f32.xlu1 %v3480_v41 }
 0x5aa   : > { %3487 = vadd.xlane.f32.xlu0 %v3486_v23 }
 0x5ac   : > { %3475 = vadd.xlane.f32.xlu1 %v3474_v20  ;;  %v11817_v25 = vpop.eup %9951 }
 0x5ad   : > { %v3501_v26 = vsel %vm1160_vm0, %v11817_v25, 0.0 }
 0x5ae   : > { %3505 = vadd.xlane.f32.xlu0 %v3504_v56 }
 0x5b0   : > { %3484 = vadd.xlane.f32.xlu1 %v3483_v37 }
 0x5b2   : > { %3499 = vadd.xlane.f32.xlu0 %v3498_v4 }
 0x5b4   : > { %3496 = vadd.xlane.f32.xlu1 %v3495_v8 }
 0x5b8   : > { %3478 = vadd.xlane.f32.xlu1 %v3477_v19 }
 0x5bc   : > { %3490 = vadd.xlane.f32.xlu1 %v3489_v28 }
 0x5c0   : > { %3508 = vadd.xlane.f32.xlu1 %v3507_v11 }
 0x5c4   : > { %3502 = vadd.xlane.f32.xlu1 %v3501_v26 }
 0x5c7   : > { %v3422_v41 = vpop.xlane.xlu0 %3421 }
 0x5c8   : > { %4485 = vrot.lane.b32.xlu0 %v10613_v47, %s10339_s28 }
 0x5cb   : > { %v3416_v23 = vpop.xlane.xlu0 %3415 }
 0x5cc   : > { %4487 = vrot.lane.b32.xlu0 %v10637_v9, %s10339_s28 }
 0x5cf   : > { %v3425_v50 = vpop.xlane.xlu1 %3424 }
 0x5d0   : > { %4408 = vrot.lane.b32.xlu0 %v10589_v21, %s10339_s28  ;;  %9953 = vrcp.f32 %v3425_v50 }
 0x5d1   : > { %9955 = vrcp.f32 %v3416_v23  ;;  %v13814_v23 = vld [vmem:[#allocation23_spill] sm:$0xff] }
 0x5d2   : > { %9957 = vrcp.f32 %v3422_v41 }
 0x5d3   : > { %v3419_v45 = vpop.xlane.xlu1 %3418 }
 0x5d4   : > { %9959 = vrcp.f32 %v3419_v45  ;;  %4560 = vrot.lane.b32.xlu0 %v10685_v63, %s10339_s28 }
 0x5d5   : > { %4406 = vrot.lane.b32.xlu1 %v10567_v0, %s10339_s28 }
 0x5d8   : > { %4481 = vrot.lane.b32.xlu0 %v10633_v7, %s10339_s28 }
 0x5d9   : > { %4558 = vrot.lane.b32.xlu1 %v13769_v46, %s10339_s28 }
 0x5da   : > { %v9954_v43 = vpop.eup %9953 }
 0x5db   : > { %v9956_v20 = vpop.eup %9955  ;;  %v3545_v22 = vmul.f32 %v9954_v43, %v11669_v3  ;;  %v13811_v3 = vld [vmem:[#allocation31_spill] sm:$0xff] }
 0x5dc   : > { %4633 = vrot.lane.b32.xlu0 %v10729_v12, %s10339_s28  ;;  %v9958_v56 = vpop.eup %9957  ;;  %v3542_v37 = vmul.f32 %v9956_v20, %v11665_v27  ;;  %v13816_v43 = vld [vmem:[#allocation39_spill] sm:$0xff] }
 0x5dd   : > { %4479 = vrot.lane.b32.xlu1 %v13771_v48, %s10339_s28  ;;  %v3544_v58 = vmul.f32 %v9958_v56, %v11661_v54  ;;  %v13817_v56 = vld [vmem:[#allocation14_spill] sm:$0xff] }
 0x5de   : > { %v9960_v62 = vpop.eup %9959 }
 0x5df   : > { %v3543_v4 = vmul.f32 %v9960_v62, %v11673_v49  ;;  %v3575_v28 = vpack.c.bf16 %v3545_v22, %v3544_v58  ;;  %v13812_v49 = vld [vmem:[#allocation17_spill] sm:$0xff] }
 0x5e0   : > { %4554 = vrot.lane.b32.xlu0 %v10681_v61, %s10339_s28  ;;  %v13818_v22 = vld [vmem:[#allocation29_spill] sm:$0xff] }
 0x5e1   : > { %4631 = vrot.lane.b32.xlu1 %v13775_v18, %s10339_s28  ;;  %v3574_v8 = vpack.c.bf16 %v3543_v4, %v3542_v37 }
 0x5e2   : > { %v3434_v19 = vpop.xlane.xlu0 %3433 }
 0x5e3   : > { %9217 = vmatprep.mubr.msk.bf16.mxu0 %vm1160_vm0, %v3574_v8 }
 0x5e4   : > { %v3437_v11 = vpop.xlane.xlu1 %3436  ;;  %4706 = vrot.lane.b32.xlu0 %v10773_v29, %s10339_s28  ;;  %9218 = vmatmul.mubr.msk.bf16.vlgmr.msra.gmra.mrb[84].mxu0 %vm1160_vm0, %v3575_v28 }
 0x5e5   : > { %4552 = vrot.lane.b32.xlu1 %v13778_v31, %s10339_s28  ;;  %9230 = vmatpush3.bf16.msra.mxu0 %v11417_v39  ;;  %9961 = vrcp.f32 %v3437_v11  ;;  %v13813_v39 = vld [vmem:[#allocation8_spill] sm:$0xff] }
 0x5e6   : > { %9231 = vmatprep.subr.bf16.mxu0 %v11639_v34  ;;  %v3446_v54 = vpop.xlane.xlu0 %3445 }
 0x5e8   : > { %v3449_v27 = vpop.xlane.xlu1 %3448  ;;  %4627 = vrot.lane.b32.xlu0 %v10725_v6, %s10339_s28 }
 0x5e9   : > { %4704 = vrot.lane.b32.xlu1 %v13811_v3, %s10339_s28  ;;  %9232 = vmatpush3.bf16.msra.mxu0 %v11639_v34  ;;  %v13815_v34 = vld [vmem:[#allocation33_spill] sm:$0xff] }
 0x5ea   : > { %9245 = vmatprep.subr.bf16.mxu0 %v13812_v49  ;;  %v3428_v26 = vpop.xlane.xlu0 %3427 }
 0x5eb   : > { %9963 = vrcp.f32 %v3428_v26  ;;  %v13820_v26 = vld [vmem:[#allocation11_spill] sm:$0xff] }
 0x5ec   : > { %9965 = vrcp.f32 %v3434_v19  ;;  %v3431_v41 = vpop.xlane.xlu1 %3430  ;;  %4779 = vrot.lane.b32.xlu0 %v13813_v39, %s10339_s28  ;;  %v13819_v19 = vld [vmem:[#allocation7_spill] sm:$0xff] }
 0x5ed   : > { %9967 = vrcp.f32 %v3431_v41  ;;  %4625 = vrot.lane.b32.xlu1 %v13814_v23, %s10339_s28 }
 0x5ee   : > { %9969 = vrcp.f32 %v3449_v27  ;;  %v3440_v50 = vpop.xlane.xlu0 %3439 }
 0x5ef   : > { %9971 = vrcp.f32 %v3440_v50  ;;  %v9962_v20 = vpop.eup %9961 }
 0x5f0   : > { %9973 = vrcp.f32 %v3446_v54  ;;  %v3443_v45 = vpop.xlane.xlu1 %3442  ;;  %4700 = vrot.lane.b32.xlu0 %v13815_v34, %s10339_s28  ;;  %v3549_v58 = vmul.f32 %v9962_v20, %v11689_v59  ;;  %v13821_v20 = vld [vmem:[#allocation13_spill] sm:$0xff] }
 0x5f1   : > { %9975 = vrcp.f32 %v3443_v45  ;;  %4777 = vrot.lane.b32.xlu1 %v13816_v43, %s10339_s28 }
 0x5f4   : > { %4852 = vrot.lane.b32.xlu0 %v13817_v56, %s10339_s28 }
 0x5f5   : > { %v9964_v62 = vpop.eup %9963  ;;  %4698 = vrot.lane.b32.xlu1 %v13818_v22, %s10339_s28 }
 0x5f6   : > { %v9966_v37 = vpop.eup %9965  ;;  %v3546_v28 = vmul.f32 %v9964_v62, %v11703_v38  ;;  %v13822_v62 = vld [vmem:[#allocation37_spill] sm:$0xff] }
 0x5f7   : > { %v9968_v4 = vpop.eup %9967  ;;  %v3548_v27 = vmul.f32 %v9966_v37, %v11684_v5  ;;  %v13823_v37 = vld [vmem:[#allocation19_spill] sm:$0xff] }
 0x5f8   : > { %v9970_v8 = vpop.eup %9969  ;;  %4773 = vrot.lane.b32.xlu0 %v13819_v19, %s10339_s28  ;;  %v3547_v11 = vmul.f32 %v9968_v4, %v11707_v14  ;;  %v13824_v4 = vld [vmem:[#allocation12_spill] sm:$0xff] }
 0x5f9   : > { %v9972_v54 = vpop.eup %9971  ;;  %4850 = vrot.lane.b32.xlu1 %v13820_v26, %s10339_s28  ;;  %v3553_v56 = vmul.f32 %v9970_v8, %v11698_v57  ;;  %v3577_v59 = vpack.c.bf16 %v3549_v58, %v3548_v27  ;;  %v13825_v8 = vld [vmem:[#allocation15_spill] sm:$0xff]  ;;  %v13833_v27 = vld [vmem:[#allocation20_spill] sm:$0xff] }
 0x5fa   : > { %v9974_v41 = vpop.eup %9973  ;;  %v3576_v50 = vpack.c.bf16 %v3547_v11, %v3546_v28  ;;  %v3550_v38 = vmul.f32 %v9972_v54, %v11712_v24  ;;  %v13826_v24 = vld [vmem:[#allocation16_spill] sm:$0xff]  ;;  %v13830_v28 = vld [vmem:[#allocation9_spill] sm:$0xff]  ;;  %v13832_v54 = vld [vmem:[#allocation26_spill] sm:$0xff] }
 0x5fb   : > { %v9976_v45 = vpop.eup %9975  ;;  %v3552_v5 = vmul.f32 %v9974_v41, %v11694_v33  ;;  %v13827_v33 = vld [vmem:[#allocation46_spill] sm:$0xff]  ;;  %v13831_v11 = vld [vmem:[#allocation45_spill] sm:$0xff] }
 0x5fc   : > { %4846 = vrot.lane.b32.xlu0 %v13821_v20, %s10339_s28  ;;  %9225 = vmatprep.mubr.msk.bf16.mxu1 %vm1160_vm0, %v3576_v50  ;;  %v3551_v14 = vmul.f32 %v9976_v45, %v11716_v15  ;;  %v13828_v15 = vld [vmem:[#allocation25_spill] sm:$0xff]  ;;  %v13835_v41 = vld [vmem:[#allocation18_spill] sm:$0xff]  ;;  %v13836_v50 = vld [vmem:[#allocation32_spill] sm:$0xff] }
 0x5fd   : > { %4771 = vrot.lane.b32.xlu1 %v13822_v62, %s10339_s28  ;;  %9226 = vmatmul.mubr.msk.bf16.vlgmr.msra.gmra.mrb[108].mxu1 %vm1160_vm0, %v3577_v59  ;;  %v3579_v58 = vpack.c.bf16 %v3553_v56, %v3552_v5  ;;  %v13829_v56 = vld [vmem:[#allocation22_spill] sm:$0xff]  ;;  %v13837_v45 = vld [vmem:[#allocation21_spill] sm:$0xff]  ;;  %v13840_v5 = vld [vmem:[#allocation40_spill] sm:$0xff] }
 0x5fe   : > { %9238 = vmatpush3.bf16.msra.mxu1 %v13823_v37  ;;  %v3578_v57 = vpack.c.bf16 %v3551_v14, %v3550_v38  ;;  %v13838_v59 = vld [vmem:[#allocation30_spill] sm:$0xff]  ;;  %v13839_v38 = vld [vmem:[#allocation28_spill] sm:$0xff]  ;;  %v3458_v14 = vpop.xlane.xlu0 %3457  ;;  %v13841_v37 = vld [vmem:[#allocation27_spill] sm:$0xff] }
 0x5ff   : > { %9239 = vmatprep.subr.bf16.mxu1 %v13824_v4 }
 0x600   : > { %4917 = vrot.lane.b32.xlu0 %v13825_v8, %s10339_s28  ;;  %9233 = vmatprep.mubr.msk.bf16.mxu0 %vm1160_vm0, %v3578_v57  ;;  %v13842_v57 = vld [vmem:[#allocation42_spill] sm:$0xff] }
 0x601   : > { %4923 = vrot.lane.b32.xlu1 %v13826_v24, %s10339_s28  ;;  %9234 = vmatmul.mubr.msk.bf16.vlgmr.msra.gmra.mrb[88].mxu0 %vm1160_vm0, %v3579_v58  ;;  %v13843_v58 = vld [vmem:[#allocation36_spill] sm:$0xff] }
 0x602   : > { %9240 = vmatpush3.bf16.msra.mxu1 %v13824_v4  ;;  %9246 = vmatpush3.bf16.msra.mxu0 %v13812_v49  ;;  %v13834_v49 = vld [vmem:[#allocation24_spill] sm:$0xff]  ;;  %v3470_v4 = vpop.xlane.xlu0 %3469 }
 0x603   : > { %9247 = vmatprep.subr.bf16.mxu0 %v13827_v33  ;;  %9253 = vmatprep.subr.bf16.mxu1 %v13828_v15 }
 0x604   : > { %5358 = vrot.lane.b32.xlu0 %v13829_v56, %s10339_s28 }
 0x605   : > { %4844 = vrot.lane.b32.xlu1 %v13830_v28, %s10339_s28 }
 0x606   : > { %9248 = vmatpush3.bf16.msra.mxu0 %v13827_v33  ;;  %v13844_v33 = vld [vmem:[#allocation38_spill] sm:$0xff] }
 0x607   : > { %9261 = vmatprep.subr.bf16.mxu0 %v13831_v11 }
 0x608   : > { %5421 = vrot.lane.b32.xlu0 %v13832_v54, %s10339_s28 }
 0x609   : > { %4925 = vrot.lane.b32.xlu1 %v13833_v27, %s10339_s28 }
 0x60c   : > { %5423 = vrot.lane.b32.xlu0 %v13834_v49, %s10339_s28 }
 0x60d   : > { %4919 = vrot.lane.b32.xlu1 %v13835_v41, %s10339_s28 }
 0x610   : > { %5547 = vrot.lane.b32.xlu0 %v13836_v50, %s10339_s28  ;;  %v13847_v50 = vld [vmem:[#allocation41_spill] sm:$0xff] }
 0x611   : > { %5360 = vrot.lane.b32.xlu1 %v13837_v45, %s10339_s28  ;;  %v3452_v45 = vpop.xlane.xlu0 %3451 }
 0x614   : > { %5549 = vrot.lane.b32.xlu0 %v13838_v59, %s10339_s28  ;;  %v11935_v59 = vpop.permute.xlu1 %4414 }
 0x615   : > { %5484 = vrot.lane.b32.xlu1 %v13839_v38, %s10339_s28  ;;  %v13845_v38 = vld [vmem:[#allocation34_spill] sm:$0xff] }
 0x618   : > { %5673 = vrot.lane.b32.xlu0 %v13840_v5, %s10339_s28  ;;  %v13846_v5 = vld [vmem:[#allocation44_spill] sm:$0xff] }
 0x619   : > { %5486 = vrot.lane.b32.xlu1 %v13841_v37, %s10339_s28 }
 0x61c   : > { %5736 = vrot.lane.b32.xlu0 %v13842_v57, %s10339_s28  ;;  %v3464_v57 = vpop.xlane.xlu0 %3463 }
 0x61d   : > { %5610 = vrot.lane.b32.xlu1 %v13843_v58, %s10339_s28  ;;  %v13848_v58 = vld [vmem:[#allocation43_spill] sm:$0xff] }
 0x620   : > { %5675 = vrot.lane.b32.xlu0 %v13844_v33, %s10339_s28  ;;  %v11945_v49 = vpop.permute.xlu0 %4412 }
 0x621   : > { %5612 = vrot.lane.b32.xlu1 %v13845_v38, %s10339_s28 }
 0x624   : > { %5799 = vrot.lane.b32.xlu0 %v13846_v5, %s10339_s28 }
 0x625   : > { %v3461_v37 = vpop.xlane.xlu1 %3460  ;;  %5738 = vrot.lane.b32.xlu1 %v13847_v50, %s10339_s28 }
 0x626   : > { %9977 = vrcp.f32 %v3461_v37 }
 0x627   : > { %9979 = vrcp.f32 %v3452_v45 }
 0x628   : > { %9981 = vrcp.f32 %v3458_v14 }
 0x629   : > { %v3473_v41 = vpop.xlane.xlu1 %3472  ;;  %5801 = vrot.lane.b32.xlu1 %v13848_v58, %s10339_s28 }
 0x62d   : > { %v3455_v33 = vpop.xlane.xlu1 %3454 }
 0x62e   : > { %9983 = vrcp.f32 %v3455_v33 }
 0x62f   : > { %9985 = vrcp.f32 %v3473_v41 }
 0x630   : > { %9987 = vrcp.f32 %v3464_v57  ;;  %v9978_v27 = vpop.eup %9977 }
 0x631   : > { %9989 = vrcp.f32 %v3470_v4  ;;  %v3467_v5 = vpop.xlane.xlu1 %3466  ;;  %v9980_v54 = vpop.eup %9979  ;;  %v3557_v37 = vmul.f32 %v9978_v27, %v11747_v52  ;;  %v13849_v52 = vld [vmem:[#allocation52_spill] sm:$0xff] }
 0x632   : > { %9991 = vrcp.f32 %v3467_v5  ;;  %v9982_v28 = vpop.eup %9981  ;;  %v3554_v33 = vmul.f32 %v9980_v54, %v11729_v17  ;;  %v13850_v17 = vld [vmem:[#allocation51_spill] sm:$0xff] }
 0x633   : > { %v3494_v38 = vpop.xlane.xlu0 %3493  ;;  %v3556_v57 = vmul.f32 %v9982_v28, %v11721_v53 }
 0x635   : > { %v3482_v50 = vpop.xlane.xlu1 %3481  ;;  %v3581_v24 = vpack.c.bf16 %v3557_v37, %v3556_v57 }
 0x637   : > { %v3488_v56 = vpop.xlane.xlu0 %3487 }
 0x638   : > { %v9984_v8 = vpop.eup %9983 }
 0x639   : > { %v9986_v45 = vpop.eup %9985  ;;  %v3476_v14 = vpop.xlane.xlu1 %3475  ;;  %v3555_v58 = vmul.f32 %v9984_v8, %v11759_v1  ;;  %v13851_v8 = vld [vmem:[#allocation47_spill] sm:$0xff] }
 0x63a   : > { %v9988_v41 = vpop.eup %9987  ;;  %v3561_v39 = vmul.f32 %v9986_v45, %v11753_v51 }
 0x63b   : > { %v9990_v4 = vpop.eup %9989  ;;  %v3506_v5 = vpop.xlane.xlu0 %3505  ;;  %v3580_v62 = vpack.c.bf16 %v3555_v58, %v3554_v33  ;;  %v3558_v27 = vmul.f32 %v9988_v41, %v13849_v52 }
 0x63c   : > { %v9992_v20 = vpop.eup %9991  ;;  %v3560_v54 = vmul.f32 %v9990_v4, %v13850_v17 }
 0x63d   : > { %v3485_v22 = vpop.xlane.xlu1 %3484  ;;  %9241 = vmatprep.mubr.msk.bf16.mxu1 %vm1160_vm0, %v3580_v62  ;;  %v3559_v19 = vmul.f32 %v9992_v20, %v11765_v44  ;;  %v13852_v20 = vld [vmem:[#allocation48_spill] sm:$0xff]  ;;  %v13853_v62 = vld [vmem:[#allocation49_spill] sm:$0xff] }
 0x63e   : > { %9242 = vmatmul.mubr.msk.bf16.vlgmr.msra.gmra.mrb[112].mxu1 %vm1160_vm0, %v3581_v24  ;;  %v3583_v28 = vpack.c.bf16 %v3561_v39, %v3560_v54  ;;  %9993 = vrcp.f32 %v3485_v22 }
 0x63f   : > { %9254 = vmatpush3.bf16.msra.mxu1 %v13828_v15  ;;  %v3500_v53 = vpop.xlane.xlu0 %3499  ;;  %v3582_v1 = vpack.c.bf16 %v3559_v19, %v3558_v27  ;;  %9995 = vrcp.f32 %v3476_v14 }
 0x640   : > { %9255 = vmatprep.subr.bf16.mxu1 %v13851_v8  ;;  %9997 = vrcp.f32 %v3482_v50 }
 0x641   : > { %v3497_v51 = vpop.xlane.xlu1 %3496  ;;  %9249 = vmatprep.mubr.msk.bf16.mxu0 %vm1160_vm0, %v3582_v1 }
 0x642   : > { %9250 = vmatmul.mubr.msk.bf16.vlgmr.msra.gmra.mrb[92].mxu0 %vm1160_vm0, %v3583_v28 }
 0x643   : > { %9256 = vmatpush3.bf16.msra.mxu1 %v13851_v8  ;;  %9262 = vmatpush3.bf16.msra.mxu0 %v13831_v11  ;;  %v11963_v44 = vpop.permute.xlu0 %4485  ;;  %v13854_v8 = vld [vmem:[#allocation50_spill] sm:$0xff] }
 0x644   : > { %9263 = vmatprep.subr.bf16.mxu0 %v13852_v20  ;;  %9269 = vmatprep.subr.bf16.mxu1 %v13853_v62 }
 0x645   : > { %v3479_v19 = vpop.xlane.xlu1 %3478 }
 0x646   : > { %9999 = vrcp.f32 %v3479_v19 }
 0x647   : > { %10001 = vrcp.f32 %v3497_v51  ;;  %9264 = vmatpush3.bf16.msra.mxu0 %v13852_v20  ;;  %v11968_v39 = vpop.permute.xlu0 %4487 }
 0x648   : > { %10003 = vrcp.f32 %v3488_v56  ;;  %9629 = vmatprep.subr.msk.bf16.mxu0 %vm1160_vm0, %v11945_v49  ;;  %v9994_v15 = vpop.eup %9993 }
 0x649   : > { %10005 = vrcp.f32 %v3494_v38  ;;  %v3491_v22 = vpop.xlane.xlu1 %3490  ;;  %v9996_v58 = vpop.eup %9995  ;;  %v3565_v14 = vmul.f32 %v9994_v15, %v11790_v13 }
 0x64a   : > { %10007 = vrcp.f32 %v3491_v22  ;;  %v9998_v50 = vpop.eup %9997  ;;  %v3562_v38 = vmul.f32 %v9996_v58, %v11781_v32 }
 0x64b   : > { %v11972_v24 = vpop.permute.xlu0 %4408  ;;  %v3564_v4 = vmul.f32 %v9998_v50, %v11772_v36 }
 0x64d   : > { %v3509_v11 = vpop.xlane.xlu1 %3508  ;;  %v3585_v13 = vpack.c.bf16 %v3565_v14, %v3564_v4 }
 0x64e   : > { %10009 = vrcp.f32 %v3509_v11 }
 0x64f   : > { %v11974_v37 = vpop.permute.xlu0 %4560  ;;  %10011 = vrcp.f32 %v3500_v53 }
 0x650   : > { %v10000_v45 = vpop.eup %9999  ;;  %10013 = vrcp.f32 %v3506_v5 }
 0x651   : > { %v10002_v56 = vpop.eup %10001  ;;  %v3503_v33 = vpop.xlane.xlu1 %3502  ;;  %v3563_v41 = vmul.f32 %v10000_v45, %v11805_v42 }
 0x652   : > { %v10004_v57 = vpop.eup %10003  ;;  %10015 = vrcp.f32 %v3503_v33  ;;  %v3569_v1 = vmul.f32 %v10002_v56, %v11799_v60  ;;  %v4496_v56 = vsel %vm1160_vm0, %v11963_v44, 0 }
 0x653   : > { %v10006_v52 = vpop.eup %10005  ;;  %v11980_v27 = vpop.permute.xlu0 %4481  ;;  %v3584_v17 = vpack.c.bf16 %v3563_v41, %v3562_v38  ;;  %v3566_v5 = vmul.f32 %v10004_v57, %v11776_v35 }
 0x654   : > { %v10008_v54 = vpop.eup %10007  ;;  %v3568_v42 = vmul.f32 %v10006_v52, %v11767_v55  ;;  %v4423_v55 = vsel %vm1160_vm0, %v11945_v49, 0 }
 0x655   : > { %v4407_v53 = vpop.permute.xlu1 %4406  ;;  %9257 = vmatprep.mubr.msk.bf16.mxu1 %vm1160_vm0, %v3584_v17  ;;  %v3567_v32 = vmul.f32 %v10008_v54, %v11809_v16 }
 0x656   : > { %9258 = vmatmul.mubr.msk.bf16.vlgmr.msra.gmra.mrb[116].mxu1 %vm1160_vm0, %v3585_v13  ;;  %v3587_v60 = vpack.c.bf16 %v3569_v1, %v3568_v42 }
 0x657   : > { %9270 = vmatpush3.bf16.msra.mxu1 %v13853_v62  ;;  %v3586_v36 = vpack.c.bf16 %v3567_v32, %v3566_v5  ;;  %v11990_v28 = vpop.permute.xlu0 %4633 }
 0x658   : > { %9271 = vmatprep.subr.bf16.mxu1 %v13854_v8  ;;  %v10010_v51 = vpop.eup %10009 }
 0x659   : > { %v4559_v20 = vpop.permute.xlu1 %4558  ;;  %9265 = vmatprep.mubr.msk.bf16.mxu0 %vm1160_vm0, %v3586_v36  ;;  %v10012_v19 = vpop.eup %10011  ;;  %v3573_v62 = vmul.f32 %v10010_v51, %v11813_v40  ;;  %v4426_v40 = vsel %vm1160_vm0, %v11935_v59, 0 }
 0x65a   : > { %9266 = vmatmul.mubr.msk.bf16.vlgmr.msra.gmra.mrb[96].mxu0 %vm1160_vm0, %v3587_v60  ;;  %v10014_v35 = vpop.eup %10013  ;;  %v3570_v15 = vmul.f32 %v10012_v19, %v11794_v10 }
 0x65b   : > { %9272 = vmatpush3.bf16.msra.mxu1 %v13854_v8  ;;  %9278 = vmatpush3.bf16.xpose.msra.mxu0 %v4423_v55  ;;  %v3572_v11 = vmul.f32 %v10014_v35, %v11785_v30  ;;  %v4555_v58 = vpop.permute.xlu0 %4554 }
 0x65c   : > { %v10016_v16 = vpop.eup %10015  ;;  %9630 = vmatprep.subr.msk.bf16.mxu0 %vm1160_vm0, %v11935_v59  ;;  %9281 = vmatprep.mubr.msk.bf16.mxu0 %vm1160_vm0, %v4407_v53  ;;  %v4569_v59 = vsel %vm1160_vm0, %v4559_v20, 0 }
 0x65d   : > { %9631 = vmatprep.subr.msk.bf16.mxu1 %vm1160_vm0, %v11963_v44  ;;  %v4480_v22 = vpop.permute.xlu1 %4479  ;;  %v3571_v49 = vmul.f32 %v10016_v16, %v11817_v25  ;;  %v3589_v45 = vpack.c.bf16 %v3573_v62, %v3572_v11  ;;  %v4499_v44 = vsel %vm1160_vm0, %v11968_v39, 0 }
 0x65f   : > { %v3588_v50 = vpack.c.bf16 %v3571_v49, %v3570_v15  ;;  %v4707_v10 = vpop.permute.xlu0 %4706 }
 0x660   : > { %v4718_v5 = vsel %vm1160_vm0, %v4707_v10, 0 }
 0x661   : > { %v4632_v14 = vpop.permute.xlu1 %4631  ;;  %9273 = vmatprep.mubr.msk.bf16.mxu1 %vm1160_vm0, %v3588_v50 }
 0x662   : > { %9274 = vmatmul.mubr.msk.bf16.vlgmr.msra.gmra.mrb[120].mxu1 %vm1160_vm0, %v3589_v45  ;;  %v4642_v4 = vsel %vm1160_vm0, %v4632_v14, 0 }
 0x663   : > { %9280 = vmatpush3.bf16.xpose.msra.mxu0 %v4426_v40  ;;  %9289 = vmatprep.mubr.msk.bf16.mxu1 %vm1160_vm0, %v4480_v22  ;;  %v4628_v33 = vpop.permute.xlu0 %4627 }
 0x664   : > { %9286 = vmatpush3.bf16.xpose.msra.mxu1 %v4496_v56  ;;  %9633 = vmatprep.subr.msk.bf16.mxu0 %vm1160_vm0, %v4559_v20 }
 0x665   : > { %9632 = vmatprep.subr.msk.bf16.mxu1 %vm1160_vm0, %v11968_v39  ;;  %v4553_v30 = vpop.permute.xlu1 %4552 }
 0x667   : > { %v4780_v41 = vpop.permute.xlu0 %4779 }
 0x669   : > { %v4705_v25 = vpop.permute.xlu1 %4704 }
 0x66a   : > { %9282 = vmatmul.mubr.msk.bf16.vlgmr.msra.gmra.mrb[100].mxu0 %vm1160_vm0, %v11972_v24  ;;  %v4572_v24 = vsel %vm1160_vm0, %v11974_v37, 0 }
 0x66b   : > { %9294 = vmatpush3.bf16.xpose.msra.mxu0 %v4569_v59  ;;  %9297 = vmatprep.mubr.msk.bf16.mxu0 %vm1160_vm0, %v4553_v30  ;;  %v4701_v52 = vpop.permute.xlu0 %4700 }
 0x66c   : > { %9288 = vmatpush3.bf16.xpose.msra.mxu1 %v4499_v44  ;;  %9634 = vmatprep.subr.msk.bf16.mxu0 %vm1160_vm0, %v11974_v37  ;;  %v4715_v37 = vsel %vm1160_vm0, %v4705_v25, 0 }
 0x66d   : > { %9635 = vmatprep.subr.msk.bf16.mxu1 %vm1160_vm0, %v4632_v14  ;;  %v4626_v38 = vpop.permute.xlu1 %4625 }
 0x66f   : > { %v4853_v54 = vpop.permute.xlu0 %4852 }
 0x670   : > { %v4864_v20 = vsel %vm1160_vm0, %v4853_v54, 0 }
 0x671   : > { %v4778_v57 = vpop.permute.xlu1 %4777 }
 0x672   : > { %v4788_v32 = vsel %vm1160_vm0, %v4778_v57, 0 }
 0x673   : > { %9290 = vmatmul.mubr.msk.bf16.vlgmr.msra.gmra.mrb[124].mxu1 %vm1160_vm0, %v11980_v27  ;;  %9296 = vmatpush3.bf16.xpose.msra.mxu0 %v4572_v24  ;;  %v4645_v27 = vsel %vm1160_vm0, %v11990_v28, 0  ;;  %v4774_v53 = vpop.permute.xlu0 %4773 }
 0x674   : > { %9302 = vmatpush3.bf16.xpose.msra.mxu1 %v4642_v4  ;;  %9305 = vmatprep.mubr.msk.bf16.mxu1 %vm1160_vm0, %v4626_v38 }
 0x675   : > { %9637 = vmatprep.subr.msk.bf16.mxu0 %vm1160_vm0, %v4705_v25  ;;  %9636 = vmatprep.subr.msk.bf16.mxu1 %vm1160_vm0, %v11990_v28  ;;  %v4699_v39 = vpop.permute.xlu1 %4698  ;;  %v4791_v28 = vsel %vm1160_vm0, %v4780_v41, 0 }
 0x677   : > { %v4847_v36 = vpop.permute.xlu0 %4846 }
 0x679   : > { %v4851_v17 = vpop.permute.xlu1 %4850 }
 0x67a   : > { %9298 = vmatmul.mubr.msk.bf16.vlgmr.msra.gmra.mrb[104].mxu0 %vm1160_vm0, %v4555_v58  ;;  %v4861_v8 = vsel %vm1160_vm0, %v4851_v17, 0 }
 0x67b   : > { %9310 = vmatpush3.bf16.xpose.msra.mxu0 %v4715_v37  ;;  %9313 = vmatprep.mubr.msk.bf16.mxu0 %vm1160_vm0, %v4699_v39  ;;  %v4918_v51 = vpop.permute.xlu0 %4917 }
 0x67c   : > { %9304 = vmatpush3.bf16.xpose.msra.mxu1 %v4645_v27  ;;  %9638 = vmatprep.subr.msk.bf16.mxu0 %vm1160_vm0, %v4707_v10 }
 0x67d   : > { %9639 = vmatprep.subr.msk.bf16.mxu1 %vm1160_vm0, %v4778_v57  ;;  %v4772_v1 = vpop.permute.xlu1 %4771 }
 0x67f   : > { %v5359_v35 = vpop.permute.xlu0 %5358 }
 0x681   : > { %v4924_v13 = vpop.permute.xlu1 %4923 }
 0x682   : > { %v4934_v55 = vsel %vm1160_vm0, %v4924_v13, 0 }
 0x683   : > { %9306 = vmatmul.mubr.msk.bf16.vlgmr.msra.gmra.mrb[128].mxu1 %vm1160_vm0, %v4628_v33  ;;  %9312 = vmatpush3.bf16.xpose.msra.mxu0 %v4718_v5  ;;  %v5422_v22 = vpop.permute.xlu0 %5421 }
 0x684   : > { %9318 = vmatpush3.bf16.xpose.msra.mxu1 %v4788_v32  ;;  %9321 = vmatprep.mubr.msk.bf16.mxu1 %vm1160_vm0, %v4772_v1 }
 0x685   : > { %9641 = vmatprep.subr.msk.bf16.mxu0 %vm1160_vm0, %v4851_v17  ;;  %9640 = vmatprep.subr.msk.bf16.mxu1 %vm1160_vm0, %v4780_v41  ;;  %v4845_v42 = vpop.permute.xlu1 %4844 }
 0x687   : > { %v5424_v49 = vpop.permute.xlu0 %5423 }
 0x689   : > { %v4926_v60 = vpop.permute.xlu1 %4925 }
 0x68a   : > { %9314 = vmatmul.mubr.msk.bf16.vlgmr.msra.gmra.mrb[108].mxu0 %vm1160_vm0, %v4701_v52  ;;  %v4937_v62 = vsel %vm1160_vm0, %v4926_v60, 0 }
 0x68b   : > { %9326 = vmatpush3.bf16.xpose.msra.mxu0 %v4861_v8  ;;  %9329 = vmatprep.mubr.msk.bf16.mxu0 %vm1160_vm0, %v4845_v42  ;;  %v12064_v11 = vpop.permute.xlu0 %5547 }
 0x68c   : > { %9320 = vmatpush3.bf16.xpose.msra.mxu1 %v4791_v28  ;;  %9642 = vmatprep.subr.msk.bf16.mxu0 %vm1160_vm0, %v4853_v54  ;;  %13856 = vst [vmem:[#allocation17_spill] sm:$0xff] %v12064_v11 }
 0x68d   : > { %9643 = vmatprep.subr.msk.bf16.mxu1 %vm1160_vm0, %v4924_v13  ;;  %v4920_v19 = vpop.permute.xlu1 %4919 }
 0x691   : > { %v5361_v16 = vpop.permute.xlu1 %5360 }
 0x693   : > { %9322 = vmatmul.mubr.msk.bf16.vlgmr.msra.gmra.mrb[132].mxu1 %vm1160_vm0, %v4774_v53  ;;  %9328 = vmatpush3.bf16.xpose.msra.mxu0 %v4864_v20  ;;  %v12139_v20 = vld [vmem:[%s13623_s5 + $0x40] sm:$0xff] }
 0x694   : > { %9334 = vmatpush3.bf16.xpose.msra.mxu1 %v4934_v55  ;;  %9337 = vmatprep.mubr.msk.bf16.mxu1 %vm1160_vm0, %v4918_v51 }
 0x695   : > { %9341 = vmatprep.subr.bf16.mxu0 %v5359_v35  ;;  %9644 = vmatprep.subr.msk.bf16.mxu1 %vm1160_vm0, %v4926_v60  ;;  %v12060_v15 = vpop.permute.xlu1 %5484  ;;  %v12134_v60 = vld [vmem:[%s13623_s5 + $0x50] sm:$0xff] }
 0x696   : > { %13855 = vst [vmem:[#allocation31_spill] sm:$0xff] %v12060_v15 }
 0x69a   : > { %9330 = vmatmul.mubr.msk.bf16.vlgmr.msra.gmra.mrb[112].mxu0 %vm1160_vm0, %v4847_v36 }
 0x69b   : > { %9342 = vmatpush3.bf16.msra.mxu0 %v5359_v35  ;;  %v12147_v35 = vld [vmem:[%s13623_s5 + $0x48] sm:$0xff] }
 0x69c   : > { %9336 = vmatpush3.bf16.xpose.msra.mxu1 %v4937_v62  ;;  %9343 = vmatprep.subr.bf16.mxu0 %v5361_v16 }
 0x69d   : > { %9349 = vmatprep.subr.bf16.mxu1 %v5422_v22 }
 0x69f   : > { %9344 = vmatpush3.bf16.msra.mxu0 %v5361_v16 }
 0x6a0   : > { %9357 = vmatprep.subr.bf16.mxu0 %v12060_v15 }
 0x6a3   : > { %9338 = vmatmul.mubr.msk.bf16.vlgmr.msra.gmra.mrb[136].mxu1 %vm1160_vm0, %v4920_v19 }
 0x6a4   : > { %9350 = vmatpush3.bf16.msra.mxu1 %v5422_v22 }
 0x6a5   : > { %9351 = vmatprep.subr.bf16.mxu1 %v5424_v49 }
 0x6a8   : > { %9352 = vmatpush3.bf16.msra.mxu1 %v5424_v49 }
 0x6a9   : > { %9365 = vmatprep.subr.bf16.mxu1 %v12064_v11 }
 0x6b7   : > { %v12067_v58 = vpop.f32.mrb[84].mxu0 }
 0x6b8   : > { %13857 = vst [vmem:[#allocation33_spill] sm:$0xff] %v12067_v58  ;;  %v12069_v50 = vpop.f32.mrb[85].mxu0 }
 0x6b9   : > { %13858 = vst [vmem:[#allocation39_spill] sm:$0xff] %v12069_v50  ;;  %v12071_v45 = vpop.f32.mrb[86].mxu0 }
 0x6ba   : > { %13859 = vst [vmem:[#allocation19_spill] sm:$0xff] %v12071_v45  ;;  %v12073_v14 = vpop.f32.mrb[87].mxu0 }
 0x6bb   : > { %13860 = vst [vmem:[#allocation12_spill] sm:$0xff] %v12073_v14 }
 0x6d0   : > { %v12075_v40 = vpop.f32.mrb[108].mxu1 }
 0x6d1   : > { %13861 = vst [vmem:[#allocation46_spill] sm:$0xff] %v12075_v40  ;;  %v12077_v56 = vpop.f32.mrb[109].mxu1 }
 0x6d2   : > { %13862 = vst [vmem:[#allocation25_spill] sm:$0xff] %v12077_v56  ;;  %v12079_v10 = vpop.f32.mrb[110].mxu1 }
 0x6d3   : > { %13863 = vst [vmem:[#allocation45_spill] sm:$0xff] %v12079_v10  ;;  %v12081_v30 = vpop.f32.mrb[111].mxu1 }
 0x6d4   : > { %13864 = vst [vmem:[#allocation52_spill] sm:$0xff] %v12081_v30  ;;  %v12083_v25 = vpop.f32.mrb[88].mxu0 }
 0x6d5   : > { %13865 = vst [vmem:[#allocation51_spill] sm:$0xff] %v12083_v25  ;;  %v12085_v33 = vpop.f32.mrb[89].mxu0 }
 0x6d6   : > { %13866 = vst [vmem:[#allocation47_spill] sm:$0xff] %v12085_v33  ;;  %v12087_v59 = vpop.f32.mrb[90].mxu0 }
 0x6d7   : > { %13867 = vst [vmem:[#allocation48_spill] sm:$0xff] %v12087_v59  ;;  %v12089_v44 = vpop.f32.mrb[91].mxu0 }
 0x6d8   : > { %13868 = vst [vmem:[#allocation49_spill] sm:$0xff] %v12089_v44 }
 0x711   : > { %v12091_v38 = vpop.f32.mrb[112].mxu1 }
 0x712   : > { %13869 = vst [vmem:[#allocation50_spill] sm:$0xff] %v12091_v38  ;;  %v12093_v41 = vpop.f32.mrb[113].mxu1 }
 0x713   : > { %13870 = vst [vmem:[#allocation53_spill] sm:$0xff] %v12093_v41  ;;  %v12095_v57 = vpop.f32.mrb[114].mxu1 }
 0x714   : > { %13871 = vst [vmem:[#allocation54_spill] sm:$0xff] %v12095_v57  ;;  %v12097_v24 = vpop.f32.mrb[115].mxu1 }
 0x715   : > { %13872 = vst [vmem:[#allocation55_spill] sm:$0xff] %v12097_v24  ;;  %v12099_v4 = vpop.f32.mrb[92].mxu0 }
 0x716   : > { %13873 = vst [vmem:[#allocation56_spill] sm:$0xff] %v12099_v4  ;;  %v12101_v39 = vpop.f32.mrb[93].mxu0 }
 0x717   : > { %13874 = vst [vmem:[#allocation57_spill] sm:$0xff] %v12101_v39  ;;  %v12103_v52 = vpop.f32.mrb[94].mxu0 }
 0x718   : > { %13875 = vst [vmem:[#allocation58_spill] sm:$0xff] %v12103_v52  ;;  %v12105_v17 = vpop.f32.mrb[95].mxu0 }
 0x719   : > { %13876 = vst [vmem:[#allocation59_spill] sm:$0xff] %v12105_v17 }
 0x729   : > { %v12107_v37 = vpop.f32.mrb[116].mxu1 }
 0x72a   : > { %13877 = vst [vmem:[#allocation60_spill] sm:$0xff] %v12107_v37  ;;  %v12109_v27 = vpop.f32.mrb[117].mxu1 }
 0x72b   : > { %13878 = vst [vmem:[#allocation61_spill] sm:$0xff] %v12109_v27  ;;  %v12111_v54 = vpop.f32.mrb[118].mxu1 }
 0x72c   : > { %13879 = vst [vmem:[#allocation62_spill] sm:$0xff] %v12111_v54  ;;  %v12113_v1 = vpop.f32.mrb[119].mxu1 }
 0x72d   : > { %13880 = vst [vmem:[#allocation63_spill] sm:$0xff] %v12113_v1  ;;  %v12115_v13 = vpop.f32.mrb[96].mxu0 }
 0x72e   : > { %13881 = vst [vmem:[#allocation64_spill] sm:$0xff] %v12115_v13  ;;  %v12117_v53 = vpop.f32.mrb[97].mxu0 }
 0x72f   : > { %13882 = vst [vmem:[#allocation65_spill] sm:$0xff] %v12117_v53  ;;  %v12119_v5 = vpop.f32.mrb[98].mxu0 }
 0x730   : > { %13883 = vst [vmem:[#allocation66_spill] sm:$0xff] %v12119_v5  ;;  %v12121_v32 = vpop.f32.mrb[99].mxu0 }
 0x731   : > { %13884 = vst [vmem:[#allocation67_spill] sm:$0xff] %v12121_v32 }
 0x735   : > { %v12123_v42 = vpop.f32.mrb[120].mxu1 }
 0x736   : > { %13885 = vst [vmem:[#allocation68_spill] sm:$0xff] %v12123_v42  ;;  %v12125_v36 = vpop.f32.mrb[121].mxu1  ;;  %v12157_v42 = vld [vmem:[%s13623_s5 + $0x58] sm:$0xff] }
 0x737   : > { %13886 = vst [vmem:[#allocation69_spill] sm:$0xff] %v12125_v36  ;;  %v12127_v8 = vpop.f32.mrb[122].mxu1 }
 0x738   : > { %13887 = vst [vmem:[#allocation70_spill] sm:$0xff] %v12127_v8  ;;  %v12129_v28 = vpop.f32.mrb[123].mxu1 }
 0x739   : > { %13888 = vst [vmem:[#allocation71_spill] sm:$0xff] %v12129_v28 }
 0x73d   : > { %v9283_v51 = vpop.f32.mrb[100].mxu0 }
 0x73e   : > { %v12142_v19 = vadd.f32 %v9283_v51, %v12134_v60  ;;  %v4462_v55 = vpop.f32.mrb[101].mxu0 }
 0x73f   : > { %v9284_v16 = vpop.f32.mrb[102].mxu0  ;;  %v12150_v62 = vadd.f32 %v12139_v20, %v4462_v55 }
 0x740   : > { %v4465_v22 = vpop.f32.mrb[103].mxu0  ;;  %v4994_v49 = vsel %vm1160_vm0, %v12142_v19, -inf  ;;  %v12165_v13 = vadd.f32 %v9284_v16, %v12157_v42 }
 0x741   : > { %v12160_v51 = vadd.f32 %v12147_v35, %v4465_v22  ;;  %4995 = vmax.xlane.f32.xlu0 %v4994_v49  ;;  %v4988_v55 = vsel %vm1160_vm0, %v12150_v62, -inf }
 0x742   : > { %v4997_v22 = vsel %vm1160_vm0, %v12165_v13, -inf }
 0x743   : > { %v4991_v36 = vsel %vm1160_vm0, %v12160_v51, -inf }
 0x744   : > { %4992 = vmax.xlane.f32.xlu1 %v4991_v36 }
 0x745   : > { %4989 = vmax.xlane.f32.xlu0 %v4988_v55 }
 0x746   : > { %v9291_v53 = vpop.f32.mrb[124].mxu1 }
 0x747   : > { %v4535_v37 = vpop.f32.mrb[125].mxu1  ;;  %v12170_v27 = vadd.f32 %v9291_v53, %v12134_v60 }
 0x748   : > { %v9292_v4 = vpop.f32.mrb[126].mxu1  ;;  %v12185_v38 = vadd.f32 %v12139_v20, %v4535_v37 }
 0x749   : > { %v12175_v49 = vadd.f32 %v9292_v4, %v12157_v42  ;;  %4998 = vmax.xlane.f32.xlu0 %v4997_v22  ;;  %v4538_v16 = vpop.f32.mrb[127].mxu1  ;;  %v5006_v55 = vsel %vm1160_vm0, %v12170_v27, -inf }
 0x74a   : > { %v12193_v5 = vadd.f32 %v12147_v35, %v4538_v16  ;;  %v5000_v37 = vsel %vm1160_vm0, %v12185_v38, -inf }
 0x74b   : > { %v5009_v36 = vsel %vm1160_vm0, %v12175_v49, -inf }
 0x74c   : > { %5010 = vmax.xlane.f32.xlu1 %v5009_v36 }
 0x74d   : > { %5007 = vmax.xlane.f32.xlu0 %v5006_v55  ;;  %v9299_v8 = vpop.f32.mrb[104].mxu0 }
 0x74e   : > { %v12182_v53 = vadd.f32 %v9299_v8, %v12134_v60  ;;  %v4608_v39 = vpop.f32.mrb[105].mxu0 }
 0x74f   : > { %v9300_v28 = vpop.f32.mrb[106].mxu0  ;;  %v12198_v55 = vadd.f32 %v12139_v20, %v4608_v39 }
 0x750   : > { %v12188_v4 = vadd.f32 %v9300_v28, %v12157_v42  ;;  %v4611_v22 = vpop.f32.mrb[107].mxu0  ;;  %v5018_v36 = vsel %vm1160_vm0, %v12182_v53, -inf }
 0x751   : > { %5019 = vmax.xlane.f32.xlu0 %v5018_v36  ;;  %v12203_v28 = vadd.f32 %v12147_v35, %v4611_v22  ;;  %v5003_v36 = vsel %vm1160_vm0, %v12193_v5, -inf  ;;  %v5012_v39 = vsel %vm1160_vm0, %v12198_v55, -inf }
 0x752   : > { %v5021_v8 = vsel %vm1160_vm0, %v12188_v4, -inf }
 0x753   : > { %5022 = vmax.xlane.f32.xlu1 %v5021_v8  ;;  %v5015_v22 = vsel %vm1160_vm0, %v12203_v28, -inf }
 0x755   : > { %5001 = vmax.xlane.f32.xlu0 %v5000_v37 }
 0x756   : > { %v9307_v41 = vpop.f32.mrb[128].mxu1 }
 0x757   : > { %5004 = vmax.xlane.f32.xlu1 %v5003_v36  ;;  %v4681_v16 = vpop.f32.mrb[129].mxu1  ;;  %v12208_v32 = vadd.f32 %v9307_v41, %v12134_v60 }
 0x758   : > { %v9308_v8 = vpop.f32.mrb[130].mxu1 }
 0x759   : > { %5013 = vmax.xlane.f32.xlu0 %v5012_v39  ;;  %v4684_v25 = vpop.f32.mrb[131].mxu1  ;;  %v12213_v37 = vadd.f32 %v9308_v8, %v12157_v42  ;;  %v5030_v36 = vsel %vm1160_vm0, %v12208_v32, -inf  ;;  %v12225_v8 = vadd.f32 %v12139_v20, %v4681_v16 }
 0x75b   : > { %5016 = vmax.xlane.f32.xlu1 %v5015_v22  ;;  %v5033_v39 = vsel %vm1160_vm0, %v12213_v37, -inf  ;;  %v5024_v16 = vsel %vm1160_vm0, %v12225_v8, -inf }
 0x75d   : > { %5031 = vmax.xlane.f32.xlu0 %v5030_v36  ;;  %v9315_v54 = vpop.f32.mrb[108].mxu0 }
 0x75e   : > { %v12220_v41 = vadd.f32 %v9315_v54, %v12134_v60  ;;  %v4754_v33 = vpop.f32.mrb[109].mxu0  ;;  %v12233_v54 = vadd.f32 %v12147_v35, %v4684_v25 }
 0x75f   : > { %5034 = vmax.xlane.f32.xlu1 %v5033_v39  ;;  %v9316_v1 = vpop.f32.mrb[110].mxu0  ;;  %v12238_v39 = vadd.f32 %v12139_v20, %v4754_v33 }
 0x760   : > { %v12228_v40 = vadd.f32 %v9316_v1, %v12157_v42  ;;  %v4757_v22 = vpop.f32.mrb[111].mxu0  ;;  %v5042_v36 = vsel %vm1160_vm0, %v12220_v41, -inf }
 0x761   : > { %5043 = vmax.xlane.f32.xlu0 %v5042_v36  ;;  %v12243_v1 = vadd.f32 %v12147_v35, %v4757_v22  ;;  %v5027_v36 = vsel %vm1160_vm0, %v12233_v54, -inf  ;;  %v5036_v33 = vsel %vm1160_vm0, %v12238_v39, -inf }
 0x762   : > { %v5045_v52 = vsel %vm1160_vm0, %v12228_v40, -inf }
 0x763   : > { %5046 = vmax.xlane.f32.xlu1 %v5045_v52  ;;  %v5039_v22 = vsel %vm1160_vm0, %v12243_v1, -inf }
 0x765   : > { %5025 = vmax.xlane.f32.xlu0 %v5024_v16 }
 0x766   : > { %v9323_v56 = vpop.f32.mrb[132].mxu1 }
 0x767   : > { %5028 = vmax.xlane.f32.xlu1 %v5027_v36  ;;  %v4827_v25 = vpop.f32.mrb[133].mxu1  ;;  %v12248_v17 = vadd.f32 %v9323_v56, %v12134_v60 }
 0x768   : > { %v9324_v52 = vpop.f32.mrb[134].mxu1 }
 0x769   : > { %5037 = vmax.xlane.f32.xlu0 %v5036_v33  ;;  %v4830_v58 = vpop.f32.mrb[135].mxu1  ;;  %v12253_v16 = vadd.f32 %v9324_v52, %v12157_v42  ;;  %v5054_v36 = vsel %vm1160_vm0, %v12248_v17, -inf  ;;  %v12265_v52 = vadd.f32 %v12139_v20, %v4827_v25 }
 0x76b   : > { %5040 = vmax.xlane.f32.xlu1 %v5039_v22  ;;  %v5057_v33 = vsel %vm1160_vm0, %v12253_v16, -inf  ;;  %v5048_v25 = vsel %vm1160_vm0, %v12265_v52, -inf }
 0x76d   : > { %5055 = vmax.xlane.f32.xlu0 %v5054_v36  ;;  %v9331_v57 = vpop.f32.mrb[112].mxu0 }
 0x76e   : > { %v12260_v56 = vadd.f32 %v9331_v57, %v12134_v60  ;;  %v4900_v50 = vpop.f32.mrb[113].mxu0  ;;  %v12273_v57 = vadd.f32 %v12147_v35, %v4830_v58 }
 0x76f   : > { %5058 = vmax.xlane.f32.xlu1 %v5057_v33  ;;  %v9332_v24 = vpop.f32.mrb[114].mxu0  ;;  %v12278_v33 = vadd.f32 %v12139_v20, %v4900_v50 }
 0x770   : > { %v12268_v59 = vadd.f32 %v9332_v24, %v12157_v42  ;;  %v4903_v22 = vpop.f32.mrb[115].mxu0  ;;  %v5066_v36 = vsel %vm1160_vm0, %v12260_v56, -inf }
 0x771   : > { %5067 = vmax.xlane.f32.xlu0 %v5066_v36  ;;  %v12283_v24 = vadd.f32 %v12147_v35, %v4903_v22  ;;  %v5051_v36 = vsel %vm1160_vm0, %v12273_v57, -inf  ;;  %v5060_v50 = vsel %vm1160_vm0, %v12278_v33, -inf }
 0x772   : > { %v5069_v44 = vsel %vm1160_vm0, %v12268_v59, -inf }
 0x773   : > { %5070 = vmax.xlane.f32.xlu1 %v5069_v44  ;;  %v5063_v22 = vsel %vm1160_vm0, %v12283_v24, -inf }
 0x775   : > { %5049 = vmax.xlane.f32.xlu0 %v5048_v25 }
 0x776   : > { %v9339_v10 = vpop.f32.mrb[136].mxu1 }
 0x777   : > { %5052 = vmax.xlane.f32.xlu1 %v5051_v36  ;;  %v4973_v58 = vpop.f32.mrb[137].mxu1  ;;  %v12288_v30 = vadd.f32 %v9339_v10, %v12134_v60 }
 0x778   : > { %v9340_v44 = vpop.f32.mrb[138].mxu1  ;;  %v12298_v14 = vadd.f32 %v12139_v20, %v4973_v58  ;;  %v12311_v20 = vpop.permute.xlu0 %5549 }
 0x779   : > { %5061 = vmax.xlane.f32.xlu0 %v5060_v50  ;;  %v4976_v45 = vpop.f32.mrb[139].mxu1  ;;  %v12293_v25 = vadd.f32 %v9340_v44, %v12157_v42  ;;  %v5078_v10 = vsel %vm1160_vm0, %v12288_v30, -inf  ;;  %13889 = vst [vmem:[#allocation72_spill] sm:$0xff] %v12311_v20  ;;  %v12313_v58 = vpop.permute.xlu1 %5486 }
 0x77a   : > { %v12303_v60 = vadd.f32 %v12147_v35, %v4976_v45  ;;  %v5072_v42 = vsel %vm1160_vm0, %v12298_v14, -inf  ;;  %13890 = vst [vmem:[#allocation73_spill] sm:$0xff] %v12313_v58 }
 0x77b   : > { %5064 = vmax.xlane.f32.xlu1 %v5063_v22  ;;  %v5081_v36 = vsel %vm1160_vm0, %v12293_v25, -inf }
 0x77c   : > { %v5075_v44 = vsel %vm1160_vm0, %v12303_v60, -inf  ;;  %v12315_v50 = vpop.permute.xlu0 %5673 }
 0x77d   : > { %5079 = vmax.xlane.f32.xlu0 %v5078_v10  ;;  %13891 = vst [vmem:[#allocation74_spill] sm:$0xff] %v12315_v50  ;;  %v12317_v45 = vpop.permute.xlu1 %5610 }
 0x77e   : > { %13892 = vst [vmem:[#allocation75_spill] sm:$0xff] %v12317_v45 }
 0x77f   : > { %5082 = vmax.xlane.f32.xlu1 %v5081_v36 }
 0x780   : > { %v12319_v35 = vpop.permute.xlu0 %5736 }
 0x781   : > { %5073 = vmax.xlane.f32.xlu0 %v5072_v42  ;;  %13893 = vst [vmem:[#allocation76_spill] sm:$0xff] %v12319_v35  ;;  %v12321_v22 = vpop.permute.xlu1 %5612 }
 0x782   : > { %13894 = vst [vmem:[#allocation77_spill] sm:$0xff] %v12321_v22 }
 0x783   : > { %5076 = vmax.xlane.f32.xlu1 %v5075_v44 }
 0x784   : > { %v12323_v10 = vpop.permute.xlu0 %5675 }
 0x785   : > { %13895 = vst [vmem:[#allocation78_spill] sm:$0xff] %v12323_v10  ;;  %v12325_v36 = vpop.permute.xlu1 %5738 }
 0x786   : > { %13896 = vst [vmem:[#allocation79_spill] sm:$0xff] %v12325_v36 }
 0x788   : > { %v12327_v42 = vpop.permute.xlu0 %5799 }
 0x789   : > { %13897 = vst [vmem:[#allocation80_spill] sm:$0xff] %v12327_v42  ;;  %v12329_v11 = vpop.permute.xlu1 %5801 }
 0x78a   : > { %13898 = vst [vmem:[#allocation81_spill] sm:$0xff] %v12329_v11 }
 0x7ce   : > { %v4996_v44 = vpop.xlane.xlu0 %4995 }
 0x7cf   : > { %v5086_v20 = vsub.f32 %v12142_v19, %v4996_v44 }
 0x7d1   : > { %v5120_v58 = vmul.f32 1.442695, %v5086_v20  ;;  %v4993_v15 = vpop.xlane.xlu1 %4992 }
 0x7d2   : > { %v4990_v50 = vpop.xlane.xlu0 %4989  ;;  %v5085_v35 = vsub.f32 %v12160_v51, %v4993_v15 }
 0x7d3   : > { %10017 = vpow2.f32 %v5120_v58  ;;  %v5084_v45 = vsub.f32 %v12150_v62, %v4990_v50 }
 0x7d4   : > { %v5118_v10 = vmul.f32 1.442695, %v5085_v35 }
 0x7d5   : > { %v5116_v22 = vmul.f32 1.442695, %v5084_v45 }
 0x7d6   : > { %v4999_v29 = vpop.xlane.xlu0 %4998 }
 0x7d7   : > { %10019 = vpow2.f32 %v5116_v22  ;;  %v5087_v36 = vsub.f32 %v12165_v13, %v4999_v29 }
 0x7d9   : > { %v5122_v42 = vmul.f32 1.442695, %v5087_v36  ;;  %v5011_v26 = vpop.xlane.xlu1 %5010 }
 0x7da   : > { %v5091_v11 = vsub.f32 %v12175_v49, %v5011_v26  ;;  %v5008_v23 = vpop.xlane.xlu0 %5007 }
 0x7db   : > { %10021 = vpow2.f32 %v5122_v42  ;;  %v5090_v19 = vsub.f32 %v12170_v27, %v5008_v23 }
 0x7dc   : > { %10023 = vpow2.f32 %v5118_v10  ;;  %v5130_v62 = vmul.f32 1.442695, %v5091_v11 }
 0x7dd   : > { %v12337_v20 = vpop.eup %10017  ;;  %v5128_v58 = vmul.f32 1.442695, %v5090_v19 }
 0x7de   : > { %v5020_v15 = vpop.xlane.xlu0 %5019  ;;  %v5186_v51 = vsel %vm1160_vm0, %v12337_v20, 0.0 }
 0x7df   : > { %10025 = vpow2.f32 %v5128_v58  ;;  %v5094_v29 = vsub.f32 %v12182_v53, %v5020_v15  ;;  %5187 = vadd.xlane.f32.xlu0 %v5186_v51 }
 0x7e0   : > { %v5023_v13 = vpop.xlane.xlu1 %5022  ;;  %10027 = vpow2.f32 %v5130_v62 }
 0x7e1   : > { %v12342_v50 = vpop.eup %10019  ;;  %v5136_v26 = vmul.f32 1.442695, %v5094_v29  ;;  %v5095_v23 = vsub.f32 %v12188_v4, %v5023_v13 }
 0x7e2   : > { %v5002_v27 = vpop.xlane.xlu0 %5001  ;;  %v5180_v11 = vsel %vm1160_vm0, %v12342_v50, 0.0 }
 0x7e3   : > { %10029 = vpow2.f32 %v5136_v26  ;;  %v5138_v49 = vmul.f32 1.442695, %v5095_v23  ;;  %v5088_v45 = vsub.f32 %v12185_v38, %v5002_v27  ;;  %5181 = vadd.xlane.f32.xlu0 %v5180_v11 }
 0x7e4   : > { %v5005_v35 = vpop.xlane.xlu1 %5004 }
 0x7e5   : > { %v12348_v22 = vpop.eup %10021  ;;  %10031 = vpow2.f32 %v5138_v49  ;;  %v5124_v53 = vmul.f32 1.442695, %v5088_v45  ;;  %v5089_v10 = vsub.f32 %v12193_v5, %v5005_v35 }
 0x7e6   : > { %v5014_v36 = vpop.xlane.xlu0 %5013  ;;  %v5189_v4 = vsel %vm1160_vm0, %v12348_v22, 0.0  ;;  %v12353_v42 = vpop.eup %10023 }
 0x7e7   : > { %10033 = vpow2.f32 %v5124_v53  ;;  %v5126_v44 = vmul.f32 1.442695, %v5089_v10  ;;  %v5092_v19 = vsub.f32 %v12198_v55, %v5014_v36  ;;  %5190 = vadd.xlane.f32.xlu1 %v5189_v4  ;;  %v5183_v5 = vsel %vm1160_vm0, %v12353_v42, 0.0 }
 0x7e8   : > { %v5017_v38 = vpop.xlane.xlu1 %5016 }
 0x7e9   : > { %v12356_v62 = vpop.eup %10025  ;;  %10035 = vpow2.f32 %v5126_v44  ;;  %v5132_v58 = vmul.f32 1.442695, %v5092_v19  ;;  %v5093_v15 = vsub.f32 %v12203_v28, %v5017_v38 }
 0x7ea   : > { %v5032_v51 = vpop.xlane.xlu0 %5031  ;;  %v5198_v29 = vsel %vm1160_vm0, %v12356_v62, 0.0  ;;  %v12363_v13 = vpop.eup %10027 }
 0x7eb   : > { %10037 = vpow2.f32 %v5132_v58  ;;  %v5134_v26 = vmul.f32 1.442695, %v5093_v15  ;;  %v5098_v55 = vsub.f32 %v12208_v32, %v5032_v51  ;;  %5184 = vadd.xlane.f32.xlu1 %v5183_v5  ;;  %5199 = vadd.xlane.f32.xlu0 %v5198_v29  ;;  %v5201_v11 = vsel %vm1160_vm0, %v12363_v13, 0.0 }
 0x7ed   : > { %v12366_v23 = vpop.eup %10029  ;;  %10039 = vpow2.f32 %v5134_v26  ;;  %v5144_v27 = vmul.f32 1.442695, %v5098_v55 }
 0x7ee   : > { %v5044_v28 = vpop.xlane.xlu0 %5043  ;;  %v5210_v49 = vsel %vm1160_vm0, %v12366_v23, 0.0 }
 0x7ef   : > { %v12372_v45 = vpop.eup %10031  ;;  %10041 = vpow2.f32 %v5144_v27  ;;  %v5102_v35 = vsub.f32 %v12220_v41, %v5044_v28  ;;  %5202 = vadd.xlane.f32.xlu1 %v5201_v11  ;;  %5211 = vadd.xlane.f32.xlu0 %v5210_v49 }
 0x7f0   : > { %v5213_v36 = vsel %vm1160_vm0, %v12372_v45, 0.0 }
 0x7f1   : > { %v12375_v32 = vpop.eup %10033  ;;  %v5152_v53 = vmul.f32 1.442695, %v5102_v35 }
 0x7f2   : > { %v5026_v10 = vpop.xlane.xlu0 %5025  ;;  %v5192_v4 = vsel %vm1160_vm0, %v12375_v32, 0.0 }
 0x7f3   : > { %v12381_v44 = vpop.eup %10035  ;;  %10043 = vpow2.f32 %v5152_v53  ;;  %v5096_v19 = vsub.f32 %v12225_v8, %v5026_v10  ;;  %5214 = vadd.xlane.f32.xlu1 %v5213_v36  ;;  %5193 = vadd.xlane.f32.xlu0 %v5192_v4  ;;  %v13901_v10 = vld [vmem:[#allocation10_spill] sm:$0xff]  ;;  %v5035_v36 = vpop.xlane.xlu1 %5034 }
 0x7f4   : > { %v5195_v15 = vsel %vm1160_vm0, %v12381_v44, 0.0 }
 0x7f5   : > { %v12384_v41 = vpop.eup %10037  ;;  %v5140_v38 = vmul.f32 1.442695, %v5096_v19 }
 0x7f6   : > { %v5038_v58 = vpop.xlane.xlu0 %5037  ;;  %v5204_v51 = vsel %vm1160_vm0, %v12384_v41, 0.0 }
 0x7f7   : > { %v12390_v5 = vpop.eup %10039  ;;  %10045 = vpow2.f32 %v5140_v38  ;;  %v5100_v29 = vsub.f32 %v12238_v39, %v5038_v58  ;;  %5196 = vadd.xlane.f32.xlu1 %v5195_v15  ;;  %5205 = vadd.xlane.f32.xlu0 %v5204_v51  ;;  %v5047_v19 = vpop.xlane.xlu1 %5046  ;;  %v5099_v15 = vsub.f32 %v12213_v37, %v5035_v36 }
 0x7f8   : > { %v5207_v55 = vsel %vm1160_vm0, %v12390_v5, 0.0 }
 0x7f9   : > { %v12393_v8 = vpop.eup %10041  ;;  %v5148_v26 = vmul.f32 1.442695, %v5100_v29  ;;  %v5146_v29 = vmul.f32 1.442695, %v5099_v15 }
 0x7fa   : > { %v5222_v27 = vsel %vm1160_vm0, %v12393_v8, 0.0  ;;  %v5056_v4 = vpop.xlane.xlu0 %5055 }
 0x7fb   : > { %10047 = vpow2.f32 %v5148_v26  ;;  %5208 = vadd.xlane.f32.xlu1 %v5207_v55  ;;  %5223 = vadd.xlane.f32.xlu0 %v5222_v27  ;;  %v5029_v58 = vpop.xlane.xlu1 %5028  ;;  %v5103_v26 = vsub.f32 %v12228_v40, %v5047_v19 }
 0x7fc   : > { %10049 = vpow2.f32 %v5146_v29 }
 0x7fd   : > { %v12399_v28 = vpop.eup %10043  ;;  %v5154_v27 = vmul.f32 1.442695, %v5103_v26 }
 0x7fe   : > { %13899 = vst [vmem:[#allocation82_spill] sm:$0xff] %v12399_v28  ;;  %v5234_v11 = vsel %vm1160_vm0, %v12399_v28, 0.0  ;;  %v5068_v38 = vpop.xlane.xlu0 %5067 }
 0x7ff   : > { %5235 = vadd.xlane.f32.xlu0 %v5234_v11  ;;  %v5041_v55 = vpop.xlane.xlu1 %5040  ;;  %v5097_v11 = vsub.f32 %v12233_v54, %v5029_v58  ;;  %10051 = vpow2.f32 %v5154_v27  ;;  %v5110_v37 = vsub.f32 %v12260_v56, %v5068_v38 }
 0x801   : > { %v12403_v39 = vpop.eup %10045  ;;  %v5142_v28 = vmul.f32 1.442695, %v5097_v11  ;;  %v5168_v15 = vmul.f32 1.442695, %v5110_v37 }
 0x802   : > { %v5216_v49 = vsel %vm1160_vm0, %v12403_v39, 0.0  ;;  %v5050_v51 = vpop.xlane.xlu0 %5049 }
 0x803   : > { %5217 = vadd.xlane.f32.xlu0 %v5216_v49  ;;  %10053 = vpow2.f32 %v5142_v28 }
 0x805   : > { %v12407_v35 = vpop.eup %10047 }
 0x806   : > { %13900 = vst [vmem:[#allocation83_spill] sm:$0xff] %v12407_v35  ;;  %v5228_v53 = vsel %vm1160_vm0, %v12407_v35, 0.0  ;;  %v5062_v49 = vpop.xlane.xlu0 %5061  ;;  %v5106_v35 = vsub.f32 %v12248_v17, %v5056_v4  ;;  %v12422_v29 = vpop.eup %10049 }
 0x807   : > { %5229 = vadd.xlane.f32.xlu0 %v5228_v53  ;;  %v5101_v53 = vsub.f32 %v12243_v1, %v5041_v55  ;;  %v5108_v40 = vsub.f32 %v12278_v33, %v5062_v49  ;;  %v5104_v1 = vsub.f32 %v12265_v52, %v5050_v51  ;;  %v5225_v17 = vsel %vm1160_vm0, %v12422_v29, 0.0 }
 0x808   : > { %v5160_v54 = vmul.f32 1.442695, %v5106_v35 }
 0x809   : > { %v5150_v36 = vmul.f32 1.442695, %v5101_v53  ;;  %v5164_v58 = vmul.f32 1.442695, %v5108_v40  ;;  %v12428_v4 = vpop.eup %10051  ;;  %v5156_v28 = vmul.f32 1.442695, %v5104_v1 }
 0x80a   : > { %v5237_v51 = vsel %vm1160_vm0, %v12428_v4, 0.0 }
 0x80b   : > { %10055 = vpow2.f32 %v5150_v36 }
 0x80c   : > { %6180 = vrot.lane.b32.xlu1 %v13901_v10, %s10340_s18  ;;  %v5059_v10 = vpop.xlane.xlu1 %5058  ;;  %10057 = vpow2.f32 %v5168_v15 }
 0x80d   : > { %10059 = vpow2.f32 %v5160_v54  ;;  %v5107_v33 = vsub.f32 %v12253_v16, %v5059_v10 }
 0x80e   : > { %10061 = vpow2.f32 %v5164_v58 }
 0x80f   : > { %v5162_v55 = vmul.f32 1.442695, %v5107_v33  ;;  %10063 = vpow2.f32 %v5156_v28 }
 0x810   : > { %v5071_v19 = vpop.xlane.xlu1 %5070 }
 0x811   : > { %v5111_v27 = vsub.f32 %v12268_v59, %v5071_v19 }
 0x814   : > { %v5053_v38 = vpop.xlane.xlu1 %5052 }
 0x815   : > { %v5105_v37 = vsub.f32 %v12273_v57, %v5053_v38 }
 0x817   : > { %v5158_v19 = vmul.f32 1.442695, %v5105_v37 }
 0x818   : > { %v5065_v16 = vpop.xlane.xlu1 %5064 }
 0x819   : > { %v5109_v54 = vsub.f32 %v12283_v24, %v5065_v16 }
 0x81c   : > { %v5083_v40 = vpop.xlane.xlu1 %5082 }
 0x81d   : > { %6178 = vrot.lane.b32.xlu0 %v10571_v2, %s10340_s18  ;;  %v5080_v2 = vpop.xlane.xlu0 %5079 }
 0x81e   : > { %v5114_v26 = vsub.f32 %v12288_v30, %v5080_v2  ;;  %v12434_v30 = vpop.eup %10053 }
 0x81f   : > { %v12437_v49 = vpop.eup %10055  ;;  %v5219_v53 = vsel %vm1160_vm0, %v12434_v30, 0.0 }
 0x820   : > { %v5176_v35 = vmul.f32 1.442695, %v5114_v26  ;;  %v12441_v10 = vpop.eup %10057  ;;  %v5231_v59 = vsel %vm1160_vm0, %v12437_v49, 0.0  ;;  %v5077_v28 = vpop.xlane.xlu1 %5076 }
 0x821   : > { %v5074_v56 = vpop.xlane.xlu0 %5073  ;;  %v12444_v36 = vpop.eup %10059  ;;  %v5258_v2 = vsel %vm1160_vm0, %v12441_v10, 0.0 }
 0x822   : > { %v5112_v52 = vsub.f32 %v12298_v14, %v5074_v56  ;;  %10065 = vpow2.f32 %v5176_v35  ;;  %v5170_v14 = vmul.f32 1.442695, %v5111_v27  ;;  %v12450_v15 = vpop.eup %10061  ;;  %v5246_v57 = vsel %vm1160_vm0, %v12444_v36, 0.0 }
 0x823   : > { %10067 = vpow2.f32 %v5162_v55  ;;  %v12453_v1 = vpop.eup %10063  ;;  %v5252_v58 = vsel %vm1160_vm0, %v12450_v15, 0.0  ;;  %v5166_v56 = vmul.f32 1.442695, %v5109_v54 }
 0x824   : > { %v5172_v11 = vmul.f32 1.442695, %v5112_v52  ;;  %v5240_v24 = vsel %vm1160_vm0, %v12453_v1, 0.0 }
 0x826   : > { %10069 = vpow2.f32 %v5172_v11 }
 0x827   : > { %10071 = vpow2.f32 %v5170_v14 }
 0x828   : > { %10073 = vpow2.f32 %v5158_v19 }
 0x829   : > { %10075 = vpow2.f32 %v5166_v56 }
 0x82c   : > { %v12459_v26 = vpop.eup %10065 }
 0x82d   : > { %v12462_v33 = vpop.eup %10067  ;;  %v5270_v38 = vsel %vm1160_vm0, %v12459_v26, 0.0 }
 0x830   : > { %5226 = vadd.xlane.f32.xlu1 %v5225_v17  ;;  %v5115_v17 = vsub.f32 %v12293_v25, %v5083_v40  ;;  %v12468_v35 = vpop.eup %10069  ;;  %v5249_v25 = vsel %vm1160_vm0, %v12462_v33, 0.0 }
 0x831   : > { %v5264_v55 = vsel %vm1160_vm0, %v12468_v35, 0.0  ;;  %v12475_v27 = vpop.eup %10071 }
 0x832   : > { %v5178_v52 = vmul.f32 1.442695, %v5115_v17  ;;  %v5261_v16 = vsel %vm1160_vm0, %v12475_v27, 0.0 }
 0x834   : > { %5238 = vadd.xlane.f32.xlu1 %v5237_v51  ;;  %v5113_v51 = vsub.f32 %v12303_v60, %v5077_v28  ;;  %10077 = vpow2.f32 %v5178_v52 }
 0x836   : > { %v5174_v11 = vmul.f32 1.442695, %v5113_v51 }
 0x838   : > { %5220 = vadd.xlane.f32.xlu1 %v5219_v53  ;;  %v12479_v53 = vpop.eup %10073  ;;  %10079 = vpow2.f32 %v5174_v11  ;;  %v13909_v11 = vld [vmem:[#allocation16_spill] sm:$0xff] }
 0x839   : > { %v5243_v60 = vsel %vm1160_vm0, %v12479_v53, 0.0  ;;  %v12483_v14 = vpop.eup %10075 }
 0x83a   : > { %v5255_v37 = vsel %vm1160_vm0, %v12483_v14, 0.0 }
 0x83c   : > { %5232 = vadd.xlane.f32.xlu1 %v5231_v59  ;;  %5259 = vadd.xlane.f32.xlu0 %v5258_v2 }
 0x83e   : > { %v12487_v59 = vpop.eup %10077 }
 0x83f   : > { %v5273_v2 = vsel %vm1160_vm0, %v12487_v59, 0.0 }
 0x840   : > { %5247 = vadd.xlane.f32.xlu1 %v5246_v57  ;;  %5253 = vadd.xlane.f32.xlu0 %v5252_v58 }
 0x842   : > { %v12491_v40 = vpop.eup %10079 }
 0x843   : > { %v5267_v19 = vsel %vm1160_vm0, %v12491_v40, 0.0 }
 0x844   : > { %5241 = vadd.xlane.f32.xlu1 %v5240_v24  ;;  %5271 = vadd.xlane.f32.xlu0 %v5270_v38  ;;  %v13907_v38 = vld [vmem:[#allocation73_spill] sm:$0xff] }
 0x848   : > { %5250 = vadd.xlane.f32.xlu1 %v5249_v25  ;;  %5265 = vadd.xlane.f32.xlu0 %v5264_v55  ;;  %v13908_v25 = vld [vmem:[#allocation29_spill] sm:$0xff] }
 0x84c   : > { %5262 = vadd.xlane.f32.xlu1 %v5261_v16 }
 0x850   : > { %5244 = vadd.xlane.f32.xlu1 %v5243_v60 }
 0x854   : > { %5256 = vadd.xlane.f32.xlu1 %v5255_v37  ;;  %v13910_v37 = vld [vmem:[#allocation75_spill] sm:$0xff] }
 0x858   : > { %5274 = vadd.xlane.f32.xlu1 %v5273_v2 }
 0x85c   : > { %5268 = vadd.xlane.f32.xlu1 %v5267_v19 }
 0x85e   : > { %6251 = vrot.lane.b32.xlu0 %v10613_v47, %s10340_s18 }
 0x862   : > { %6174 = vrot.lane.b32.xlu0 %v10589_v21, %s10340_s18 }
 0x866   : > { %6324 = vrot.lane.b32.xlu0 %v13769_v46, %s10340_s18 }
 0x86a   : > { %6247 = vrot.lane.b32.xlu0 %v10633_v7, %s10340_s18 }
 0x86c   : > { %v5188_v54 = vpop.xlane.xlu0 %5187 }
 0x86d   : > { %6172 = vrot.lane.b32.xlu1 %v10567_v0, %s10340_s18 }
 0x86e   : > { %6397 = vrot.lane.b32.xlu0 %v13775_v18, %s10340_s18 }
 0x870   : > { %v5182_v21 = vpop.xlane.xlu0 %5181 }
 0x871   : > { %6253 = vrot.lane.b32.xlu1 %v10637_v9, %s10340_s18 }
 0x872   : > { %6320 = vrot.lane.b32.xlu0 %v10681_v61, %s10340_s18 }
 0x874   : > { %v5191_v47 = vpop.xlane.xlu1 %5190 }
 0x875   : > { %6245 = vrot.lane.b32.xlu1 %v13771_v48, %s10340_s18  ;;  %10081 = vrcp.f32 %v5191_v47 }
 0x876   : > { %6470 = vrot.lane.b32.xlu0 %v13811_v3, %s10340_s18  ;;  %10083 = vrcp.f32 %v5182_v21 }
 0x877   : > { %10085 = vrcp.f32 %v5188_v54 }
 0x878   : > { %v5185_v0 = vpop.xlane.xlu1 %5184  ;;  %v5200_v7 = vpop.xlane.xlu0 %5199 }
 0x879   : > { %10087 = vrcp.f32 %v5185_v0  ;;  %6326 = vrot.lane.b32.xlu1 %v10685_v63, %s10340_s18  ;;  %v13911_v0 = vld [vmem:[#allocation8_spill] sm:$0xff] }
 0x87a   : > { %6393 = vrot.lane.b32.xlu0 %v10725_v6, %s10340_s18 }
 0x87c   : > { %v5203_v9 = vpop.xlane.xlu1 %5202  ;;  %v5212_v61 = vpop.xlane.xlu0 %5211 }
 0x87d   : > { %6318 = vrot.lane.b32.xlu1 %v13778_v31, %s10340_s18  ;;  %10089 = vrcp.f32 %v5203_v9  ;;  %v13912_v9 = vld [vmem:[#allocation13_spill] sm:$0xff] }
 0x87e   : > { %6543 = vrot.lane.b32.xlu0 %v13816_v43, %s10340_s18 }
 0x87f   : > { %v10082_v46 = vpop.eup %10081 }
 0x880   : > { %v5215_v48 = vpop.xlane.xlu1 %5214  ;;  %v5194_v18 = vpop.xlane.xlu0 %5193  ;;  %v5311_v6 = vmul.f32 %v10082_v46, %v12348_v22 }
 0x881   : > { %v10084_v3 = vpop.eup %10083  ;;  %6399 = vrot.lane.b32.xlu1 %v10729_v12, %s10340_s18  ;;  %10091 = vrcp.f32 %v5194_v18  ;;  %v13902_v12 = vld [vmem:[#allocation23_spill] sm:$0xff]  ;;  %v13913_v18 = vld [vmem:[#allocation37_spill] sm:$0xff] }
 0x882   : > { %v10086_v57 = vpop.eup %10085  ;;  %6466 = vrot.lane.b32.xlu0 %v13815_v34, %s10340_s18  ;;  %10093 = vrcp.f32 %v5200_v7  ;;  %v5308_v43 = vmul.f32 %v10084_v3, %v12342_v50  ;;  %v13903_v34 = vld [vmem:[#allocation11_spill] sm:$0xff]  ;;  %v13914_v3 = vld [vmem:[#allocation17_spill] sm:$0xff] }
 0x883   : > { %v10088_v63 = vpop.eup %10087  ;;  %v5310_v17 = vmul.f32 %v10086_v57, %v12337_v20  ;;  %v13904_v50 = vld [vmem:[#allocation35_spill] sm:$0xff] }
 0x884   : > { %v5197_v31 = vpop.xlane.xlu1 %5196  ;;  %v5206_v58 = vpop.xlane.xlu0 %5205  ;;  %v5309_v56 = vmul.f32 %v10088_v63, %v12353_v42  ;;  %v13905_v20 = vld [vmem:[#allocation31_spill] sm:$0xff]  ;;  %v13916_v63 = vld [vmem:[#allocation72_spill] sm:$0xff] }
 0x885   : > { %10095 = vrcp.f32 %v5197_v31  ;;  %6391 = vrot.lane.b32.xlu1 %v13902_v12, %s10340_s18  ;;  %v5341_v22 = vpack.c.bf16 %v5311_v6, %v5310_v17  ;;  %v13906_v42 = vld [vmem:[#allocation7_spill] sm:$0xff]  ;;  %v13920_v31 = vld [vmem:[#allocation74_spill] sm:$0xff]  ;;  %v13924_v17 = vld [vmem:[#allocation20_spill] sm:$0xff] }
 0x886   : > { %10097 = vrcp.f32 %v5215_v48  ;;  %6616 = vrot.lane.b32.xlu0 %v13903_v34, %s10340_s18  ;;  %v5340_v28 = vpack.c.bf16 %v5309_v56, %v5308_v43  ;;  %v13915_v57 = vld [vmem:[#allocation15_spill] sm:$0xff]  ;;  %v13922_v43 = vld [vmem:[#allocation26_spill] sm:$0xff]  ;;  %v13923_v56 = vld [vmem:[#allocation76_spill] sm:$0xff] }
 0x887   : > { %10099 = vrcp.f32 %v5206_v58  ;;  %v10090_v52 = vpop.eup %10089  ;;  %v13921_v58 = vld [vmem:[#allocation9_spill] sm:$0xff]  ;;  %v13925_v12 = vld [vmem:[#allocation24_spill] sm:$0xff]  ;;  %v13926_v34 = vld [vmem:[#allocation18_spill] sm:$0xff] }
 0x888   : > { %10101 = vrcp.f32 %v5212_v61  ;;  %v5209_v24 = vpop.xlane.xlu1 %5208  ;;  %9345 = vmatprep.mubr.msk.bf16.mxu0 %vm1160_vm0, %v5340_v28  ;;  %v5315_v60 = vmul.f32 %v10090_v52, %v12363_v13  ;;  %v13927_v28 = vld [vmem:[#allocation32_spill] sm:$0xff]  ;;  %v13932_v52 = vld [vmem:[#allocation30_spill] sm:$0xff] }
 0x889   : > { %10103 = vrcp.f32 %v5209_v24  ;;  %6472 = vrot.lane.b32.xlu1 %v13904_v50, %s10340_s18  ;;  %9346 = vmatmul.mubr.msk.bf16.vlgmr.msra.gmra.mrb[116].mxu0 %vm1160_vm0, %v5341_v22  ;;  %v13928_v22 = vld [vmem:[#allocation21_spill] sm:$0xff]  ;;  %v13929_v24 = vld [vmem:[#allocation36_spill] sm:$0xff]  ;;  %v5224_v50 = vpop.xlane.xlu0 %5223 }
 0x88a   : > { %9358 = vmatpush3.bf16.msra.mxu0 %v13905_v20  ;;  %6539 = vrot.lane.b32.xlu0 %v13906_v42, %s10340_s18  ;;  %v13930_v20 = vld [vmem:[#allocation28_spill] sm:$0xff]  ;;  %v13931_v42 = vld [vmem:[#allocation27_spill] sm:$0xff] }
 0x88b   : > { %9359 = vmatprep.subr.bf16.mxu0 %v13907_v38  ;;  %v10092_v51 = vpop.eup %10091 }
 0x88c   : > { %v10094_v55 = vpop.eup %10093  ;;  %v5312_v19 = vmul.f32 %v10092_v51, %v12375_v32  ;;  %v12603_v51 = vpop.permute.xlu1 %6180 }
 0x88d   : > { %6464 = vrot.lane.b32.xlu1 %v13908_v25, %s10340_s18  ;;  %v5314_v47 = vmul.f32 %v10094_v55, %v12356_v62  ;;  %v13933_v55 = vld [vmem:[#allocation34_spill] sm:$0xff] }
 0x88e   : > { %9360 = vmatpush3.bf16.msra.mxu0 %v13907_v38  ;;  %6689 = vrot.lane.b32.xlu0 %v13909_v11, %s10340_s18  ;;  %v5236_v38 = vpop.xlane.xlu0 %5235 }
 0x88f   : > { %v10096_v16 = vpop.eup %10095  ;;  %9373 = vmatprep.subr.bf16.mxu0 %v13910_v37  ;;  %v5343_v48 = vpack.c.bf16 %v5315_v60, %v5314_v47 }
 0x890   : > { %v10098_v2 = vpop.eup %10097  ;;  %v5313_v54 = vmul.f32 %v10096_v16, %v12381_v44 }
 0x891   : > { %v10100_v21 = vpop.eup %10099  ;;  %6545 = vrot.lane.b32.xlu1 %v13911_v0, %s10340_s18  ;;  %v5319_v13 = vmul.f32 %v10098_v2, %v12372_v45 }
 0x892   : > { %v10102_v7 = vpop.eup %10101  ;;  %6612 = vrot.lane.b32.xlu0 %v13912_v9, %s10340_s18  ;;  %v5342_v61 = vpack.c.bf16 %v5313_v54, %v5312_v19  ;;  %v5316_v32 = vmul.f32 %v10100_v21, %v12384_v41  ;;  %v13917_v41 = vld [vmem:[#allocation14_spill] sm:$0xff]  ;;  %v5218_v25 = vpop.xlane.xlu0 %5217 }
 0x893   : > { %v10104_v46 = vpop.eup %10103  ;;  %v5318_v62 = vmul.f32 %v10102_v7, %v12366_v23  ;;  %v13918_v23 = vld [vmem:[#allocation22_spill] sm:$0xff] }
 0x894   : > { %9353 = vmatprep.mubr.msk.bf16.mxu1 %vm1160_vm0, %v5342_v61  ;;  %v5317_v44 = vmul.f32 %v10104_v46, %v12390_v5  ;;  %v13919_v5 = vld [vmem:[#allocation77_spill] sm:$0xff] }
 0x895   : > { %6537 = vrot.lane.b32.xlu1 %v13913_v18, %s10340_s18  ;;  %9354 = vmatmul.mubr.msk.bf16.vlgmr.msra.gmra.mrb[140].mxu1 %vm1160_vm0, %v5343_v48  ;;  %v5345_v6 = vpack.c.bf16 %v5319_v13, %v5318_v62 }
 0x896   : > { %9366 = vmatpush3.bf16.msra.mxu1 %v13914_v3  ;;  %6683 = vrot.lane.b32.xlu0 %v13915_v57, %s10340_s18  ;;  %v5344_v45 = vpack.c.bf16 %v5317_v44, %v5316_v32  ;;  %v5230_v16 = vpop.xlane.xlu0 %5229 }
 0x897   : > { %9367 = vmatprep.subr.bf16.mxu1 %v13916_v63 }
 0x898   : > { %9361 = vmatprep.mubr.msk.bf16.mxu0 %vm1160_vm0, %v5344_v45 }
 0x899   : > { %6618 = vrot.lane.b32.xlu1 %v13917_v41, %s10340_s18  ;;  %9362 = vmatmul.mubr.msk.bf16.vlgmr.msra.gmra.mrb[120].mxu0 %vm1160_vm0, %v5345_v6 }
 0x89a   : > { %9368 = vmatpush3.bf16.msra.mxu1 %v13916_v63  ;;  %9374 = vmatpush3.bf16.msra.mxu0 %v13910_v37  ;;  %v12607_v37 = vpop.permute.xlu0 %6178 }
 0x89b   : > { %7124 = vrot.lane.b32.xlu0 %v13918_v23, %s10340_s18  ;;  %9375 = vmatprep.subr.bf16.mxu0 %v13919_v5 }
 0x89c   : > { %9381 = vmatprep.subr.bf16.mxu1 %v13920_v31 }
 0x89d   : > { %6610 = vrot.lane.b32.xlu1 %v13921_v58, %s10340_s18 }
 0x89e   : > { %9376 = vmatpush3.bf16.msra.mxu0 %v13919_v5  ;;  %v13934_v5 = vld [vmem:[#allocation83_spill] sm:$0xff] }
 0x89f   : > { %7187 = vrot.lane.b32.xlu0 %v13922_v43, %s10340_s18  ;;  %9389 = vmatprep.subr.bf16.mxu0 %v13923_v56 }
 0x8a1   : > { %6691 = vrot.lane.b32.xlu1 %v13924_v17, %s10340_s18 }
 0x8a3   : > { %7189 = vrot.lane.b32.xlu0 %v13925_v12, %s10340_s18 }
 0x8a5   : > { %6685 = vrot.lane.b32.xlu1 %v13926_v34, %s10340_s18 }
 0x8a7   : > { %7313 = vrot.lane.b32.xlu0 %v13927_v28, %s10340_s18 }
 0x8a9   : > { %7126 = vrot.lane.b32.xlu1 %v13928_v22, %s10340_s18 }
 0x8ab   : > { %7376 = vrot.lane.b32.xlu0 %v13929_v24, %s10340_s18 }
 0x8ad   : > { %7250 = vrot.lane.b32.xlu1 %v13930_v20, %s10340_s18 }
 0x8b1   : > { %7252 = vrot.lane.b32.xlu1 %v13931_v42, %s10340_s18 }
 0x8b5   : > { %7315 = vrot.lane.b32.xlu1 %v13932_v52, %s10340_s18 }
 0x8b9   : > { %7378 = vrot.lane.b32.xlu1 %v13933_v55, %s10340_s18 }
 0x8bd   : > { %v5227_v11 = vpop.xlane.xlu1 %5226 }
 0x8be   : > { %10105 = vrcp.f32 %v5227_v11 }
 0x8bf   : > { %10107 = vrcp.f32 %v5218_v25 }
 0x8c0   : > { %10109 = vrcp.f32 %v5224_v50 }
 0x8c1   : > { %v5239_v60 = vpop.xlane.xlu1 %5238 }
 0x8c5   : > { %v5221_v2 = vpop.xlane.xlu1 %5220 }
 0x8c6   : > { %10111 = vrcp.f32 %v5221_v2 }
 0x8c7   : > { %10113 = vrcp.f32 %v5239_v60 }
 0x8c8   : > { %10115 = vrcp.f32 %v5230_v16  ;;  %v10106_v21 = vpop.eup %10105 }
 0x8c9   : > { %10117 = vrcp.f32 %v5236_v38  ;;  %v5233_v19 = vpop.xlane.xlu1 %5232  ;;  %v5260_v54 = vpop.xlane.xlu0 %5259  ;;  %v5323_v46 = vmul.f32 %v10106_v21, %v12422_v29 }
 0x8ca   : > { %10119 = vrcp.f32 %v5233_v19  ;;  %v10108_v7 = vpop.eup %10107 }
 0x8cb   : > { %v10110_v9 = vpop.eup %10109  ;;  %v5320_v44 = vmul.f32 %v10108_v7, %v12403_v39  ;;  %v13935_v39 = vld [vmem:[#allocation82_spill] sm:$0xff] }
 0x8cc   : > { %v5322_v3 = vmul.f32 %v10110_v9, %v12393_v8 }
 0x8cd   : > { %v5248_v47 = vpop.xlane.xlu1 %5247  ;;  %v5254_v0 = vpop.xlane.xlu0 %5253 }
 0x8ce   : > { %v5347_v41 = vpack.c.bf16 %v5323_v46, %v5322_v3 }
 0x8d0   : > { %v10112_v61 = vpop.eup %10111 }
 0x8d1   : > { %v10114_v13 = vpop.eup %10113  ;;  %v5242_v48 = vpop.xlane.xlu1 %5241  ;;  %v5321_v62 = vmul.f32 %v10112_v61, %v12434_v30  ;;  %v13936_v30 = vld [vmem:[#allocation78_spill] sm:$0xff] }
 0x8d2   : > { %v5272_v32 = vpop.xlane.xlu0 %5271  ;;  %v10116_v18 = vpop.eup %10115  ;;  %v5327_v6 = vmul.f32 %v10114_v13, %v12428_v4 }
 0x8d3   : > { %v10118_v57 = vpop.eup %10117  ;;  %v5346_v45 = vpack.c.bf16 %v5321_v62, %v5320_v44  ;;  %v5324_v58 = vmul.f32 %v10116_v18, %v13934_v5 }
 0x8d4   : > { %v10120_v63 = vpop.eup %10119  ;;  %v5326_v17 = vmul.f32 %v10118_v57, %v13935_v39 }
 0x8d5   : > { %v5251_v23 = vpop.xlane.xlu1 %5250  ;;  %9369 = vmatprep.mubr.msk.bf16.mxu1 %vm1160_vm0, %v5346_v45  ;;  %v5325_v43 = vmul.f32 %v10120_v63, %v12437_v49  ;;  %v13937_v49 = vld [vmem:[#allocation79_spill] sm:$0xff] }
 0x8d6   : > { %v5266_v29 = vpop.xlane.xlu0 %5265  ;;  %9370 = vmatmul.mubr.msk.bf16.vlgmr.msra.gmra.mrb[144].mxu1 %vm1160_vm0, %v5347_v41  ;;  %v5349_v12 = vpack.c.bf16 %v5327_v6, %v5326_v17  ;;  %10121 = vrcp.f32 %v5251_v23 }
 0x8d7   : > { %9382 = vmatpush3.bf16.msra.mxu1 %v13920_v31  ;;  %v5348_v8 = vpack.c.bf16 %v5325_v43, %v5324_v58  ;;  %10123 = vrcp.f32 %v5242_v48  ;;  %v13938_v31 = vld [vmem:[#allocation80_spill] sm:$0xff]  ;;  %v13939_v48 = vld [vmem:[#allocation81_spill] sm:$0xff] }
 0x8d8   : > { %9383 = vmatprep.subr.bf16.mxu1 %v13936_v30  ;;  %10125 = vrcp.f32 %v5248_v47 }
 0x8d9   : > { %v5263_v4 = vpop.xlane.xlu1 %5262  ;;  %9377 = vmatprep.mubr.msk.bf16.mxu0 %vm1160_vm0, %v5348_v8 }
 0x8da   : > { %v12622_v34 = vpop.permute.xlu0 %6251  ;;  %9378 = vmatmul.mubr.msk.bf16.vlgmr.msra.gmra.mrb[124].mxu0 %vm1160_vm0, %v5349_v12 }
 0x8db   : > { %9384 = vmatpush3.bf16.msra.mxu1 %v13936_v30  ;;  %9390 = vmatpush3.bf16.msra.mxu0 %v13923_v56 }
 0x8dc   : > { %9391 = vmatprep.subr.bf16.mxu0 %v13937_v49  ;;  %9397 = vmatprep.subr.bf16.mxu1 %v13938_v31 }
 0x8dd   : > { %v5245_v28 = vpop.xlane.xlu1 %5244 }
 0x8de   : > { %v12629_v22 = vpop.permute.xlu0 %6174  ;;  %10127 = vrcp.f32 %v5245_v28 }
 0x8df   : > { %10129 = vrcp.f32 %v5263_v4  ;;  %9392 = vmatpush3.bf16.msra.mxu0 %v13937_v49 }
 0x8e0   : > { %10131 = vrcp.f32 %v5254_v0  ;;  %9645 = vmatprep.subr.msk.bf16.mxu0 %vm1160_vm0, %v12607_v37  ;;  %v10122_v50 = vpop.eup %10121 }
 0x8e1   : > { %10133 = vrcp.f32 %v5260_v54  ;;  %v5257_v24 = vpop.xlane.xlu1 %5256  ;;  %v10124_v38 = vpop.eup %10123  ;;  %v5331_v55 = vmul.f32 %v10122_v50, %v12462_v33 }
 0x8e2   : > { %v12634_v56 = vpop.permute.xlu0 %6324  ;;  %10135 = vrcp.f32 %v5257_v24  ;;  %v10126_v52 = vpop.eup %10125  ;;  %v5328_v60 = vmul.f32 %v10124_v38, %v12453_v1 }
 0x8e3   : > { %v5330_v54 = vmul.f32 %v10126_v52, %v12444_v36 }
 0x8e5   : > { %v5275_v20 = vpop.xlane.xlu1 %5274  ;;  %v5351_v33 = vpack.c.bf16 %v5331_v55, %v5330_v54 }
 0x8e6   : > { %v12636_v42 = vpop.permute.xlu0 %6247  ;;  %10137 = vrcp.f32 %v5275_v20 }
 0x8e7   : > { %10139 = vrcp.f32 %v5266_v29  ;;  %v6262_v29 = vsel %vm1160_vm0, %v12622_v34, 0 }
 0x8e8   : > { %v10128_v25 = vpop.eup %10127  ;;  %10141 = vrcp.f32 %v5272_v32 }
 0x8e9   : > { %v10130_v11 = vpop.eup %10129  ;;  %v5269_v16 = vpop.xlane.xlu1 %5268  ;;  %v5329_v2 = vmul.f32 %v10128_v25, %v12479_v53 }
 0x8ea   : > { %v10132_v19 = vpop.eup %10131  ;;  %10143 = vrcp.f32 %v5269_v16  ;;  %v12642_v21 = vpop.permute.xlu0 %6397  ;;  %v5335_v9 = vmul.f32 %v10130_v11, %v12475_v27 }
 0x8eb   : > { %v10134_v47 = vpop.eup %10133  ;;  %v5350_v0 = vpack.c.bf16 %v5329_v2, %v5328_v60  ;;  %v5332_v46 = vmul.f32 %v10132_v19, %v12450_v15  ;;  %v6189_v15 = vsel %vm1160_vm0, %v12607_v37, 0  ;;  %v6408_v30 = vsel %vm1160_vm0, %v12642_v21, 0 }
 0x8ec   : > { %v10136_v7 = vpop.eup %10135  ;;  %v5334_v53 = vmul.f32 %v10134_v47, %v12441_v10 }
 0x8ed   : > { %v6173_v61 = vpop.permute.xlu1 %6172  ;;  %9385 = vmatprep.mubr.msk.bf16.mxu1 %vm1160_vm0, %v5350_v0  ;;  %v5333_v1 = vmul.f32 %v10136_v7, %v12483_v14 }
 0x8ee   : > { %9386 = vmatmul.mubr.msk.bf16.vlgmr.msra.gmra.mrb[148].mxu1 %vm1160_vm0, %v5351_v33  ;;  %v6321_v13 = vpop.permute.xlu0 %6320  ;;  %v5353_v32 = vpack.c.bf16 %v5335_v9, %v5334_v53 }
 0x8ef   : > { %9398 = vmatpush3.bf16.msra.mxu1 %v13938_v31  ;;  %v5352_v36 = vpack.c.bf16 %v5333_v1, %v5332_v46 }
 0x8f0   : > { %9399 = vmatprep.subr.bf16.mxu1 %v13939_v48  ;;  %v10138_v27 = vpop.eup %10137 }
 0x8f1   : > { %v6254_v44 = vpop.permute.xlu1 %6253  ;;  %9393 = vmatprep.mubr.msk.bf16.mxu0 %vm1160_vm0, %v5352_v36  ;;  %v10140_v62 = vpop.eup %10139  ;;  %v5339_v18 = vmul.f32 %v10138_v27, %v12487_v59  ;;  %v6192_v59 = vsel %vm1160_vm0, %v12603_v51, 0 }
 0x8f2   : > { %9394 = vmatmul.mubr.msk.bf16.vlgmr.msra.gmra.mrb[128].mxu0 %vm1160_vm0, %v5353_v32  ;;  %v10142_v10 = vpop.eup %10141  ;;  %v5336_v57 = vmul.f32 %v10140_v62, %v12468_v35  ;;  %v6471_v63 = vpop.permute.xlu0 %6470  ;;  %v6265_v58 = vsel %vm1160_vm0, %v6254_v44, 0 }
 0x8f3   : > { %9400 = vmatpush3.bf16.msra.mxu1 %v13939_v48  ;;  %9406 = vmatpush3.bf16.xpose.msra.mxu0 %v6189_v15  ;;  %v5338_v45 = vmul.f32 %v10142_v10, %v12459_v26  ;;  %v6481_v49 = vsel %vm1160_vm0, %v6471_v63, 0 }
 0x8f4   : > { %v10144_v14 = vpop.eup %10143  ;;  %9646 = vmatprep.subr.msk.bf16.mxu0 %vm1160_vm0, %v12603_v51  ;;  %9409 = vmatprep.mubr.msk.bf16.mxu0 %vm1160_vm0, %v6173_v61  ;;  %v6335_v51 = vsel %vm1160_vm0, %v12634_v56, 0 }
 0x8f5   : > { %9647 = vmatprep.subr.msk.bf16.mxu1 %vm1160_vm0, %v12622_v34  ;;  %v6246_v3 = vpop.permute.xlu1 %6245  ;;  %v5337_v37 = vmul.f32 %v10144_v14, %v12491_v40  ;;  %v5355_v41 = vpack.c.bf16 %v5339_v18, %v5338_v45 }
 0x8f6   : > { %v6394_v35 = vpop.permute.xlu0 %6393 }
 0x8f7   : > { %v5354_v6 = vpack.c.bf16 %v5337_v37, %v5336_v57 }
 0x8f9   : > { %v6327_v23 = vpop.permute.xlu1 %6326  ;;  %9401 = vmatprep.mubr.msk.bf16.mxu1 %vm1160_vm0, %v5354_v6 }
 0x8fa   : > { %9402 = vmatmul.mubr.msk.bf16.vlgmr.msra.gmra.mrb[152].mxu1 %vm1160_vm0, %v5355_v41  ;;  %v6544_v5 = vpop.permute.xlu0 %6543  ;;  %v6338_v8 = vsel %vm1160_vm0, %v6327_v23, 0 }
 0x8fb   : > { %9408 = vmatpush3.bf16.xpose.msra.mxu0 %v6192_v59  ;;  %9417 = vmatprep.mubr.msk.bf16.mxu1 %vm1160_vm0, %v6246_v3  ;;  %v6554_v20 = vsel %vm1160_vm0, %v6544_v5, 0 }
 0x8fc   : > { %9414 = vmatpush3.bf16.xpose.msra.mxu1 %v6262_v29  ;;  %9649 = vmatprep.subr.msk.bf16.mxu0 %vm1160_vm0, %v12634_v56 }
 0x8fd   : > { %9648 = vmatprep.subr.msk.bf16.mxu1 %vm1160_vm0, %v6254_v44  ;;  %v6319_v26 = vpop.permute.xlu1 %6318 }
 0x8fe   : > { %v6467_v39 = vpop.permute.xlu0 %6466 }
 0x901   : > { %v6400_v40 = vpop.permute.xlu1 %6399 }
 0x902   : > { %9410 = vmatmul.mubr.msk.bf16.vlgmr.msra.gmra.mrb[132].mxu0 %vm1160_vm0, %v12629_v22  ;;  %v6617_v4 = vpop.permute.xlu0 %6616  ;;  %v6411_v31 = vsel %vm1160_vm0, %v6400_v40, 0 }
 0x903   : > { %9422 = vmatpush3.bf16.xpose.msra.mxu0 %v6335_v51  ;;  %9425 = vmatprep.mubr.msk.bf16.mxu0 %vm1160_vm0, %v6319_v26  ;;  %v6627_v52 = vsel %vm1160_vm0, %v6617_v4, 0 }
 0x904   : > { %9416 = vmatpush3.bf16.xpose.msra.mxu1 %v6265_v58  ;;  %9650 = vmatprep.subr.msk.bf16.mxu0 %vm1160_vm0, %v6327_v23 }
 0x905   : > { %9651 = vmatprep.subr.msk.bf16.mxu1 %vm1160_vm0, %v12642_v21  ;;  %v6392_v43 = vpop.permute.xlu1 %6391 }
 0x906   : > { %v6540_v28 = vpop.permute.xlu0 %6539 }
 0x909   : > { %v6473_v17 = vpop.permute.xlu1 %6472 }
 0x90a   : > { %v6690_v56 = vpop.permute.xlu0 %6689  ;;  %v6484_v50 = vsel %vm1160_vm0, %v6473_v17, 0 }
 0x90b   : > { %9418 = vmatmul.mubr.msk.bf16.vlgmr.msra.gmra.mrb[156].mxu1 %vm1160_vm0, %v12636_v42  ;;  %9424 = vmatpush3.bf16.xpose.msra.mxu0 %v6338_v8  ;;  %v6700_v2 = vsel %vm1160_vm0, %v6690_v56, 0 }
 0x90c   : > { %9430 = vmatpush3.bf16.xpose.msra.mxu1 %v6408_v30  ;;  %9433 = vmatprep.mubr.msk.bf16.mxu1 %vm1160_vm0, %v6392_v43  ;;  %v12792_v43 = vld [vmem:[%s13623_s5 + $0x70] sm:$0xff] }
 0x90d   : > { %9653 = vmatprep.subr.msk.bf16.mxu0 %vm1160_vm0, %v6471_v63  ;;  %9652 = vmatprep.subr.msk.bf16.mxu1 %vm1160_vm0, %v6400_v40  ;;  %v6465_v12 = vpop.permute.xlu1 %6464 }
 0x90e   : > { %v6613_v38 = vpop.permute.xlu0 %6612 }
 0x911   : > { %v6546_v34 = vpop.permute.xlu1 %6545 }
 0x912   : > { %9426 = vmatmul.mubr.msk.bf16.vlgmr.msra.gmra.mrb[136].mxu0 %vm1160_vm0, %v6321_v13  ;;  %v6557_v25 = vsel %vm1160_vm0, %v6546_v34, 0  ;;  %v6684_v11 = vpop.permute.xlu0 %6683 }
 0x913   : > { %9438 = vmatpush3.bf16.xpose.msra.mxu0 %v6481_v49  ;;  %9441 = vmatprep.mubr.msk.bf16.mxu0 %vm1160_vm0, %v6465_v12  ;;  %v12805_v12 = vld [vmem:[%s13623_s5 + $0x68] sm:$0xff] }
 0x914   : > { %9432 = vmatpush3.bf16.xpose.msra.mxu1 %v6411_v31  ;;  %9654 = vmatprep.subr.msk.bf16.mxu0 %vm1160_vm0, %v6473_v17  ;;  %v12797_v17 = vld [vmem:[%s13623_s5 + $0x60] sm:$0xff] }
 0x915   : > { %9655 = vmatprep.subr.msk.bf16.mxu1 %vm1160_vm0, %v6544_v5  ;;  %v6538_v22 = vpop.permute.xlu1 %6537 }
 0x916   : > { %v7125_v19 = vpop.permute.xlu0 %7124 }
 0x919   : > { %v6619_v24 = vpop.permute.xlu1 %6618 }
 0x91a   : > { %v6630_v16 = vsel %vm1160_vm0, %v6619_v24, 0  ;;  %v7188_v47 = vpop.permute.xlu0 %7187 }
 0x91b   : > { %9434 = vmatmul.mubr.msk.bf16.vlgmr.msra.gmra.mrb[160].mxu1 %vm1160_vm0, %v6394_v35  ;;  %9440 = vmatpush3.bf16.xpose.msra.mxu0 %v6484_v50 }
 0x91c   : > { %9446 = vmatpush3.bf16.xpose.msra.mxu1 %v6554_v20  ;;  %9449 = vmatprep.mubr.msk.bf16.mxu1 %vm1160_vm0, %v6538_v22 }
 0x91d   : > { %9657 = vmatprep.subr.msk.bf16.mxu0 %vm1160_vm0, %v6617_v4  ;;  %9656 = vmatprep.subr.msk.bf16.mxu1 %vm1160_vm0, %v6546_v34  ;;  %v6611_v42 = vpop.permute.xlu1 %6610 }
 0x91e   : > { %v7190_v7 = vpop.permute.xlu0 %7189 }
 0x921   : > { %v6692_v55 = vpop.permute.xlu1 %6691 }
 0x922   : > { %9442 = vmatmul.mubr.msk.bf16.vlgmr.msra.gmra.mrb[140].mxu0 %vm1160_vm0, %v6467_v39  ;;  %v6703_v21 = vsel %vm1160_vm0, %v6692_v55, 0  ;;  %v12722_v9 = vpop.permute.xlu0 %7313 }
 0x923   : > { %9454 = vmatpush3.bf16.xpose.msra.mxu0 %v6627_v52  ;;  %9457 = vmatprep.mubr.msk.bf16.mxu0 %vm1160_vm0, %v6611_v42  ;;  %13940 = vst [vmem:[#allocation10_spill] sm:$0xff] %v12722_v9 }
 0x924   : > { %9448 = vmatpush3.bf16.xpose.msra.mxu1 %v6557_v25  ;;  %9658 = vmatprep.subr.msk.bf16.mxu0 %vm1160_vm0, %v6619_v24 }
 0x925   : > { %9659 = vmatprep.subr.msk.bf16.mxu1 %vm1160_vm0, %v6690_v56  ;;  %v6686_v60 = vpop.permute.xlu1 %6685 }
 0x929   : > { %v7127_v54 = vpop.permute.xlu1 %7126 }
 0x92b   : > { %9450 = vmatmul.mubr.msk.bf16.vlgmr.msra.gmra.mrb[164].mxu1 %vm1160_vm0, %v6540_v28  ;;  %9456 = vmatpush3.bf16.xpose.msra.mxu0 %v6630_v16  ;;  %v12815_v28 = vld [vmem:[%s13623_s5 + $0x78] sm:$0xff] }
 0x92c   : > { %9462 = vmatpush3.bf16.xpose.msra.mxu1 %v6700_v2  ;;  %9465 = vmatprep.mubr.msk.bf16.mxu1 %vm1160_vm0, %v6684_v11 }
 0x92d   : > { %9469 = vmatprep.subr.bf16.mxu0 %v7125_v19  ;;  %9660 = vmatprep.subr.msk.bf16.mxu1 %vm1160_vm0, %v6692_v55  ;;  %v12718_v0 = vpop.permute.xlu1 %7250 }
 0x932   : > { %9458 = vmatmul.mubr.msk.bf16.vlgmr.msra.gmra.mrb[144].mxu0 %vm1160_vm0, %v6613_v38 }
 0x933   : > { %9470 = vmatpush3.bf16.msra.mxu0 %v7125_v19 }
 0x934   : > { %9464 = vmatpush3.bf16.xpose.msra.mxu1 %v6703_v21  ;;  %9471 = vmatprep.subr.bf16.mxu0 %v7127_v54 }
 0x935   : > { %9477 = vmatprep.subr.bf16.mxu1 %v7188_v47 }
 0x937   : > { %9472 = vmatpush3.bf16.msra.mxu0 %v7127_v54 }
 0x938   : > { %9485 = vmatprep.subr.bf16.mxu0 %v12718_v0 }
 0x93b   : > { %9466 = vmatmul.mubr.msk.bf16.vlgmr.msra.gmra.mrb[168].mxu1 %vm1160_vm0, %v6686_v60 }
 0x93c   : > { %9478 = vmatpush3.bf16.msra.mxu1 %v7188_v47 }
 0x93d   : > { %9479 = vmatprep.subr.bf16.mxu1 %v7190_v7 }
 0x940   : > { %9480 = vmatpush3.bf16.msra.mxu1 %v7190_v7 }
 0x941   : > { %9493 = vmatprep.subr.bf16.mxu1 %v12722_v9 }
 0x95c   : > { %v12725_v33 = vpop.f32.mrb[116].mxu0 }
 0x95d   : > { %v12727_v61 = vpop.f32.mrb[117].mxu0 }
 0x95e   : > { %v12729_v46 = vpop.f32.mrb[118].mxu0 }
 0x95f   : > { %v12731_v1 = vpop.f32.mrb[119].mxu0 }
 0x968   : > { %v12733_v53 = vpop.f32.mrb[140].mxu1 }
 0x969   : > { %v12735_v36 = vpop.f32.mrb[141].mxu1 }
 0x96a   : > { %v12737_v13 = vpop.f32.mrb[142].mxu1 }
 0x96b   : > { %v12739_v48 = vpop.f32.mrb[143].mxu1 }
 0x96c   : > { %v12741_v32 = vpop.f32.mrb[120].mxu0 }
 0x96d   : > { %13941 = vst [vmem:[#allocation23_spill] sm:$0xff] %v12741_v32  ;;  %v12743_v27 = vpop.f32.mrb[121].mxu0 }
 0x96e   : > { %13942 = vst [vmem:[#allocation11_spill] sm:$0xff] %v12743_v27  ;;  %v12745_v44 = vpop.f32.mrb[122].mxu0 }
 0x96f   : > { %v12747_v62 = vpop.f32.mrb[123].mxu0 }
 0x9a9   : > { %v12749_v15 = vpop.f32.mrb[144].mxu1 }
 0x9aa   : > { %13943 = vst [vmem:[#allocation35_spill] sm:$0xff] %v12749_v15  ;;  %v12751_v10 = vpop.f32.mrb[145].mxu1 }
 0x9ab   : > { %13944 = vst [vmem:[#allocation31_spill] sm:$0xff] %v12751_v10  ;;  %v12753_v14 = vpop.f32.mrb[146].mxu1 }
 0x9ac   : > { %v12755_v18 = vpop.f32.mrb[147].mxu1 }
 0x9ad   : > { %v12757_v3 = vpop.f32.mrb[124].mxu0 }
 0x9ae   : > { %13945 = vst [vmem:[#allocation7_spill] sm:$0xff] %v12757_v3  ;;  %v12759_v57 = vpop.f32.mrb[125].mxu0 }
 0x9af   : > { %13946 = vst [vmem:[#allocation73_spill] sm:$0xff] %v12759_v57  ;;  %v12761_v37 = vpop.f32.mrb[126].mxu0 }
 0x9b0   : > { %v12763_v45 = vpop.f32.mrb[127].mxu0 }
 0x9c1   : > { %v12765_v63 = vpop.f32.mrb[148].mxu1 }
 0x9c2   : > { %13947 = vst [vmem:[#allocation29_spill] sm:$0xff] %v12765_v63  ;;  %v12767_v6 = vpop.f32.mrb[149].mxu1 }
 0x9c3   : > { %13948 = vst [vmem:[#allocation16_spill] sm:$0xff] %v12767_v6  ;;  %v12769_v41 = vpop.f32.mrb[150].mxu1 }
 0x9c4   : > { %13949 = vst [vmem:[#allocation75_spill] sm:$0xff] %v12769_v41  ;;  %v12771_v23 = vpop.f32.mrb[151].mxu1 }
 0x9c5   : > { %v12773_v59 = vpop.f32.mrb[128].mxu0 }
 0x9c6   : > { %13950 = vst [vmem:[#allocation8_spill] sm:$0xff] %v12773_v59  ;;  %v12775_v29 = vpop.f32.mrb[129].mxu0 }
 0x9c7   : > { %13951 = vst [vmem:[#allocation13_spill] sm:$0xff] %v12775_v29  ;;  %v12777_v35 = vpop.f32.mrb[130].mxu0 }
 0x9c8   : > { %13952 = vst [vmem:[#allocation37_spill] sm:$0xff] %v12777_v35  ;;  %v12779_v26 = vpop.f32.mrb[131].mxu0 }
 0x9c9   : > { %13953 = vst [vmem:[#allocation17_spill] sm:$0xff] %v12779_v26 }
 0x9cd   : > { %v12781_v40 = vpop.f32.mrb[152].mxu1 }
 0x9ce   : > { %13954 = vst [vmem:[#allocation15_spill] sm:$0xff] %v12781_v40  ;;  %v12783_v5 = vpop.f32.mrb[153].mxu1 }
 0x9cf   : > { %13955 = vst [vmem:[#allocation72_spill] sm:$0xff] %v12783_v5  ;;  %v12785_v51 = vpop.f32.mrb[154].mxu1 }
 0x9d0   : > { %13956 = vst [vmem:[#allocation14_spill] sm:$0xff] %v12785_v51  ;;  %v12787_v58 = vpop.f32.mrb[155].mxu1 }
 0x9d1   : > { %13957 = vst [vmem:[#allocation22_spill] sm:$0xff] %v12787_v58 }
 0x9d5   : > { %v9411_v39 = vpop.f32.mrb[132].mxu0 }
 0x9d6   : > { %v12800_v8 = vadd.f32 %v9411_v39, %v12792_v43  ;;  %v6228_v30 = vpop.f32.mrb[133].mxu0 }
 0x9d7   : > { %v9412_v4 = vpop.f32.mrb[134].mxu0  ;;  %v12808_v34 = vadd.f32 %v12797_v17, %v6228_v30 }
 0x9d8   : > { %v6231_v49 = vpop.f32.mrb[135].mxu0  ;;  %v6760_v31 = vsel %vm1160_vm0, %v12800_v8, -inf  ;;  %v12823_v56 = vadd.f32 %v9412_v4, %v12815_v28 }
 0x9d9   : > { %v12818_v22 = vadd.f32 %v12805_v12, %v6231_v49  ;;  %6761 = vmax.xlane.f32.xlu0 %v6760_v31  ;;  %v6754_v50 = vsel %vm1160_vm0, %v12808_v34, -inf }
 0x9da   : > { %v6763_v25 = vsel %vm1160_vm0, %v12823_v56, -inf }
 0x9db   : > { %v6757_v24 = vsel %vm1160_vm0, %v12818_v22, -inf }
 0x9dc   : > { %6758 = vmax.xlane.f32.xlu1 %v6757_v24 }
 0x9dd   : > { %6755 = vmax.xlane.f32.xlu0 %v6754_v50 }
 0x9de   : > { %v9419_v20 = vpop.f32.mrb[156].mxu1 }
 0x9df   : > { %v6301_v42 = vpop.f32.mrb[157].mxu1  ;;  %v12828_v38 = vadd.f32 %v9419_v20, %v12792_v43 }
 0x9e0   : > { %v9420_v52 = vpop.f32.mrb[158].mxu1  ;;  %v12843_v47 = vadd.f32 %v12797_v17, %v6301_v42 }
 0x9e1   : > { %v12833_v55 = vadd.f32 %v9420_v52, %v12815_v28  ;;  %6764 = vmax.xlane.f32.xlu0 %v6763_v25  ;;  %v6304_v11 = vpop.f32.mrb[159].mxu1  ;;  %v6772_v60 = vsel %vm1160_vm0, %v12828_v38, -inf }
 0x9e2   : > { %v12851_v4 = vadd.f32 %v12805_v12, %v6304_v11  ;;  %v6766_v24 = vsel %vm1160_vm0, %v12843_v47, -inf }
 0x9e3   : > { %v6775_v16 = vsel %vm1160_vm0, %v12833_v55, -inf }
 0x9e4   : > { %6776 = vmax.xlane.f32.xlu1 %v6775_v16  ;;  %v6769_v42 = vsel %vm1160_vm0, %v12851_v4, -inf }
 0x9e5   : > { %6773 = vmax.xlane.f32.xlu0 %v6772_v60  ;;  %v9427_v2 = vpop.f32.mrb[136].mxu0 }
 0x9e6   : > { %v12840_v19 = vadd.f32 %v9427_v2, %v12792_v43  ;;  %v6374_v54 = vpop.f32.mrb[137].mxu0 }
 0x9e7   : > { %v9428_v21 = vpop.f32.mrb[138].mxu0  ;;  %v12856_v31 = vadd.f32 %v12797_v17, %v6374_v54 }
 0x9e8   : > { %v12846_v7 = vadd.f32 %v9428_v21, %v12815_v28  ;;  %v6377_v39 = vpop.f32.mrb[139].mxu0  ;;  %v6784_v30 = vsel %vm1160_vm0, %v12840_v19, -inf }
 0x9e9   : > { %6785 = vmax.xlane.f32.xlu0 %v6784_v30  ;;  %v12861_v50 = vadd.f32 %v12805_v12, %v6377_v39  ;;  %v6778_v16 = vsel %vm1160_vm0, %v12856_v31, -inf }
 0x9ea   : > { %v6787_v49 = vsel %vm1160_vm0, %v12846_v7, -inf }
 0x9eb   : > { %6788 = vmax.xlane.f32.xlu1 %v6787_v49  ;;  %v6781_v54 = vsel %vm1160_vm0, %v12861_v50, -inf }
 0x9ed   : > { %6767 = vmax.xlane.f32.xlu0 %v6766_v24 }
 0x9ee   : > { %v9435_v20 = vpop.f32.mrb[160].mxu1 }
 0x9ef   : > { %6770 = vmax.xlane.f32.xlu1 %v6769_v42  ;;  %v6447_v52 = vpop.f32.mrb[161].mxu1  ;;  %v12866_v25 = vadd.f32 %v9435_v20, %v12792_v43 }
 0x9f0   : > { %v9436_v11 = vpop.f32.mrb[162].mxu1  ;;  %v12883_v42 = vadd.f32 %v12797_v17, %v6447_v52 }
 0x9f1   : > { %6779 = vmax.xlane.f32.xlu0 %v6778_v16  ;;  %v6450_v60 = vpop.f32.mrb[163].mxu1  ;;  %v12871_v2 = vadd.f32 %v9436_v11, %v12815_v28  ;;  %v6796_v21 = vsel %vm1160_vm0, %v12866_v25, -inf }
 0x9f2   : > { %v6790_v52 = vsel %vm1160_vm0, %v12883_v42, -inf }
 0x9f3   : > { %6782 = vmax.xlane.f32.xlu1 %v6781_v54  ;;  %v6799_v24 = vsel %vm1160_vm0, %v12871_v2, -inf }
 0x9f5   : > { %6797 = vmax.xlane.f32.xlu0 %v6796_v21  ;;  %v9443_v39 = vpop.f32.mrb[140].mxu0  ;;  %v12891_v21 = vadd.f32 %v12805_v12, %v6450_v60 }
 0x9f6   : > { %v12878_v30 = vadd.f32 %v9443_v39, %v12792_v43  ;;  %v6520_v49 = vpop.f32.mrb[141].mxu0 }
 0x9f7   : > { %6800 = vmax.xlane.f32.xlu1 %v6799_v24  ;;  %v9444_v20 = vpop.f32.mrb[142].mxu0  ;;  %v12896_v24 = vadd.f32 %v12797_v17, %v6520_v49 }
 0x9f8   : > { %v12886_v11 = vadd.f32 %v9444_v20, %v12815_v28  ;;  %v6523_v16 = vpop.f32.mrb[143].mxu0  ;;  %v6808_v54 = vsel %vm1160_vm0, %v12878_v30, -inf }
 0x9f9   : > { %6809 = vmax.xlane.f32.xlu0 %v6808_v54  ;;  %v12901_v20 = vadd.f32 %v12805_v12, %v6523_v16  ;;  %v6793_v54 = vsel %vm1160_vm0, %v12891_v21, -inf  ;;  %v6802_v49 = vsel %vm1160_vm0, %v12896_v24, -inf }
 0x9fa   : > { %v6811_v39 = vsel %vm1160_vm0, %v12886_v11, -inf }
 0x9fb   : > { %6812 = vmax.xlane.f32.xlu1 %v6811_v39  ;;  %v6805_v16 = vsel %vm1160_vm0, %v12901_v20, -inf }
 0x9fd   : > { %6791 = vmax.xlane.f32.xlu0 %v6790_v52 }
 0x9fe   : > { %v9451_v51 = vpop.f32.mrb[164].mxu1 }
 0x9ff   : > { %6794 = vmax.xlane.f32.xlu1 %v6793_v54  ;;  %v6593_v60 = vpop.f32.mrb[165].mxu1  ;;  %v12906_v40 = vadd.f32 %v9451_v51, %v12792_v43 }
 0xa00   : > { %v9452_v39 = vpop.f32.mrb[166].mxu1 }
 0xa01   : > { %6803 = vmax.xlane.f32.xlu0 %v6802_v49  ;;  %v6596_v58 = vpop.f32.mrb[167].mxu1  ;;  %v12911_v52 = vadd.f32 %v9452_v39, %v12815_v28  ;;  %v6820_v54 = vsel %vm1160_vm0, %v12906_v40, -inf  ;;  %v12923_v39 = vadd.f32 %v12797_v17, %v6593_v60 }
 0xa03   : > { %6806 = vmax.xlane.f32.xlu1 %v6805_v16  ;;  %v6823_v49 = vsel %vm1160_vm0, %v12911_v52, -inf  ;;  %v6814_v60 = vsel %vm1160_vm0, %v12923_v39, -inf }
 0xa05   : > { %6821 = vmax.xlane.f32.xlu0 %v6820_v54  ;;  %v9459_v5 = vpop.f32.mrb[144].mxu0 }
 0xa06   : > { %v12918_v51 = vadd.f32 %v9459_v5, %v12792_v43  ;;  %v6666_v59 = vpop.f32.mrb[145].mxu0  ;;  %v12931_v5 = vadd.f32 %v12805_v12, %v6596_v58 }
 0xa07   : > { %6824 = vmax.xlane.f32.xlu1 %v6823_v49  ;;  %v9460_v29 = vpop.f32.mrb[146].mxu0  ;;  %v12936_v49 = vadd.f32 %v12797_v17, %v6666_v59 }
 0xa08   : > { %v12926_v63 = vadd.f32 %v9460_v29, %v12815_v28  ;;  %v6669_v16 = vpop.f32.mrb[147].mxu0  ;;  %v6832_v54 = vsel %vm1160_vm0, %v12918_v51, -inf }
 0xa09   : > { %6833 = vmax.xlane.f32.xlu0 %v6832_v54  ;;  %v12941_v29 = vadd.f32 %v12805_v12, %v6669_v16  ;;  %v6817_v54 = vsel %vm1160_vm0, %v12931_v5, -inf  ;;  %v6826_v59 = vsel %vm1160_vm0, %v12936_v49, -inf }
 0xa0a   : > { %v6835_v6 = vsel %vm1160_vm0, %v12926_v63, -inf }
 0xa0b   : > { %6836 = vmax.xlane.f32.xlu1 %v6835_v6  ;;  %v6829_v35 = vsel %vm1160_vm0, %v12941_v29, -inf }
 0xa0d   : > { %6815 = vmax.xlane.f32.xlu0 %v6814_v60 }
 0xa0e   : > { %v9467_v3 = vpop.f32.mrb[168].mxu1 }
 0xa0f   : > { %6818 = vmax.xlane.f32.xlu1 %v6817_v54  ;;  %v6739_v58 = vpop.f32.mrb[169].mxu1  ;;  %v12946_v57 = vadd.f32 %v9467_v3, %v12792_v43 }
 0xa10   : > { %v9468_v6 = vpop.f32.mrb[170].mxu1  ;;  %v12959_v54 = vadd.f32 %v12797_v17, %v6739_v58  ;;  %v12975_v58 = vpop.permute.xlu1 %7252 }
 0xa11   : > { %v12951_v15 = vadd.f32 %v9468_v6, %v12815_v28  ;;  %6827 = vmax.xlane.f32.xlu0 %v6826_v59  ;;  %v6742_v60 = vpop.f32.mrb[171].mxu1  ;;  %v6844_v3 = vsel %vm1160_vm0, %v12946_v57, -inf  ;;  %v13958_v28 = vld [vmem:[#allocation38_spill] sm:$0xff]  ;;  %v13960_v6 = vld [vmem:[#allocation40_spill] sm:$0xff]  ;;  %v13961_v59 = vld [vmem:[#allocation41_spill] sm:$0xff] }
 0xa12   : > { %v12954_v16 = vadd.f32 %v12805_v12, %v6742_v60  ;;  %v6838_v43 = vsel %vm1160_vm0, %v12959_v54, -inf  ;;  %v13959_v12 = vld [vmem:[#allocation42_spill] sm:$0xff]  ;;  %v12979_v60 = vpop.permute.xlu0 %7376 }
 0xa13   : > { %6830 = vmax.xlane.f32.xlu1 %v6829_v35  ;;  %v6847_v35 = vsel %vm1160_vm0, %v12951_v15, -inf }
 0xa14   : > { %v6841_v17 = vsel %vm1160_vm0, %v12954_v16, -inf }
 0xa15   : > { %6845 = vmax.xlane.f32.xlu0 %v6844_v3  ;;  %v12981_v3 = vpop.permute.xlu1 %7315 }
 0xa16   : > { %13962 = vst [vmem:[#allocation77_spill] sm:$0xff] %v12981_v3 }
 0xa19   : > { %6839 = vmax.xlane.f32.xlu0 %v6838_v43  ;;  %v12984_v10 = vpop.permute.xlu1 %7378 }
 0xa1a   : > { %13963 = vst [vmem:[#allocation74_spill] sm:$0xff] %v12984_v10 }
 0xa24   : > { %7441 = vrot.lane.b32.xlu1 %v13958_v28, %s10340_s18 }
 0xa28   : > { %7502 = vrot.lane.b32.xlu1 %v13959_v12, %s10340_s18 }
 0xa2f   : > { %7439 = vrot.lane.b32.xlu0 %v13960_v6, %s10340_s18 }
 0xa4c   : > { %6848 = vmax.xlane.f32.xlu1 %v6847_v35 }
 0xa50   : > { %6842 = vmax.xlane.f32.xlu1 %v6841_v17 }
 0xa61   : > { %7504 = vrot.lane.b32.xlu1 %v13961_v59, %s10340_s18 }
 0xa66   : > { %v6762_v43 = vpop.xlane.xlu0 %6761 }
 0xa67   : > { %v6852_v28 = vsub.f32 %v12800_v8, %v6762_v43 }
 0xa69   : > { %v6886_v12 = vmul.f32 1.442695, %v6852_v28  ;;  %v6759_v32 = vpop.xlane.xlu1 %6758 }
 0xa6a   : > { %v6756_v6 = vpop.xlane.xlu0 %6755  ;;  %v6851_v9 = vsub.f32 %v12818_v22, %v6759_v32 }
 0xa6b   : > { %10145 = vpow2.f32 %v6886_v12  ;;  %v6850_v35 = vsub.f32 %v12808_v34, %v6756_v6 }
 0xa6c   : > { %v6884_v10 = vmul.f32 1.442695, %v6851_v9 }
 0xa6d   : > { %v6882_v17 = vmul.f32 1.442695, %v6850_v35 }
 0xa6e   : > { %v6765_v26 = vpop.xlane.xlu0 %6764 }
 0xa6f   : > { %10147 = vpow2.f32 %v6882_v17  ;;  %v6853_v59 = vsub.f32 %v12823_v56, %v6765_v26 }
 0xa71   : > { %v6888_v41 = vmul.f32 1.442695, %v6853_v59  ;;  %v6777_v27 = vpop.xlane.xlu1 %6776 }
 0xa72   : > { %v6774_v3 = vpop.xlane.xlu0 %6773  ;;  %v6857_v34 = vsub.f32 %v12833_v55, %v6777_v27 }
 0xa73   : > { %v6856_v8 = vsub.f32 %v12828_v38, %v6774_v3  ;;  %10149 = vpow2.f32 %v6888_v41 }
 0xa74   : > { %v6896_v38 = vmul.f32 1.442695, %v6857_v34 }
 0xa75   : > { %v12990_v43 = vpop.eup %10145  ;;  %v6894_v28 = vmul.f32 1.442695, %v6856_v8 }
 0xa76   : > { %v6786_v12 = vpop.xlane.xlu0 %6785  ;;  %v6952_v6 = vsel %vm1160_vm0, %v12990_v43, 0.0 }
 0xa77   : > { %10151 = vpow2.f32 %v6894_v28  ;;  %v6860_v26 = vsub.f32 %v12840_v19, %v6786_v12  ;;  %6953 = vadd.xlane.f32.xlu0 %v6952_v6 }
 0xa78   : > { %v6789_v32 = vpop.xlane.xlu1 %6788  ;;  %10153 = vpow2.f32 %v6884_v10 }
 0xa79   : > { %v12996_v22 = vpop.eup %10147  ;;  %v6902_v56 = vmul.f32 1.442695, %v6860_v26  ;;  %v6861_v3 = vsub.f32 %v12846_v7, %v6789_v32 }
 0xa7a   : > { %v6768_v9 = vpop.xlane.xlu0 %6767  ;;  %v6946_v27 = vsel %vm1160_vm0, %v12996_v22, 0.0 }
 0xa7b   : > { %10155 = vpow2.f32 %v6902_v56  ;;  %v6854_v41 = vsub.f32 %v12843_v47, %v6768_v9  ;;  %6947 = vadd.xlane.f32.xlu0 %v6946_v27  ;;  %v6904_v19 = vmul.f32 1.442695, %v6861_v3 }
 0xa7c   : > { %v6771_v55 = vpop.xlane.xlu1 %6770  ;;  %10157 = vpow2.f32 %v6896_v38 }
 0xa7d   : > { %v6890_v35 = vmul.f32 1.442695, %v6854_v41  ;;  %v6855_v59 = vsub.f32 %v12851_v4, %v6771_v55  ;;  %v13004_v8 = vpop.eup %10149 }
 0xa7e   : > { %v6780_v17 = vpop.xlane.xlu0 %6779 }
 0xa7f   : > { %10159 = vpow2.f32 %v6890_v35  ;;  %v6858_v10 = vsub.f32 %v12856_v31, %v6780_v17  ;;  %v6892_v26 = vmul.f32 1.442695, %v6855_v59  ;;  %v6955_v31 = vsel %vm1160_vm0, %v13004_v8, 0.0 }
 0xa80   : > { %v6783_v7 = vpop.xlane.xlu1 %6782  ;;  %10161 = vpow2.f32 %v6904_v19 }
 0xa81   : > { %v13006_v28 = vpop.eup %10151  ;;  %v6898_v34 = vmul.f32 1.442695, %v6858_v10  ;;  %v6859_v47 = vsub.f32 %v12861_v50, %v6783_v7 }
 0xa82   : > { %v6798_v12 = vpop.xlane.xlu0 %6797  ;;  %v6964_v6 = vsel %vm1160_vm0, %v13006_v28, 0.0  ;;  %v13011_v32 = vpop.eup %10153 }
 0xa83   : > { %10163 = vpow2.f32 %v6898_v34  ;;  %6965 = vadd.xlane.f32.xlu0 %v6964_v6  ;;  %v6900_v38 = vmul.f32 1.442695, %v6859_v47  ;;  %v6864_v9 = vsub.f32 %v12866_v25, %v6798_v12  ;;  %v6949_v35 = vsel %vm1160_vm0, %v13011_v32, 0.0 }
 0xa84   : > { %v6801_v4 = vpop.xlane.xlu1 %6800  ;;  %10165 = vpow2.f32 %v6892_v26 }
 0xa85   : > { %v13015_v56 = vpop.eup %10155  ;;  %6956 = vadd.xlane.f32.xlu1 %v6955_v31  ;;  %10167 = vpow2.f32 %v6900_v38  ;;  %v6910_v7 = vmul.f32 1.442695, %v6864_v9 }
 0xa86   : > { %v6810_v3 = vpop.xlane.xlu0 %6809  ;;  %v6976_v50 = vsel %vm1160_vm0, %v13015_v56, 0.0  ;;  %v13021_v41 = vpop.eup %10157 }
 0xa87   : > { %v6868_v27 = vsub.f32 %v12878_v30, %v6810_v3  ;;  %6977 = vadd.xlane.f32.xlu0 %v6976_v50  ;;  %v6967_v47 = vsel %vm1160_vm0, %v13021_v41, 0.0 }
 0xa88   : > { %v6813_v55 = vpop.xlane.xlu1 %6812 }
 0xa89   : > { %v13025_v19 = vpop.eup %10159  ;;  %v6918_v17 = vmul.f32 1.442695, %v6868_v27  ;;  %6950 = vadd.xlane.f32.xlu1 %v6949_v35  ;;  %v6869_v6 = vsub.f32 %v12886_v11, %v6813_v55 }
 0xa8a   : > { %v6792_v59 = vpop.xlane.xlu0 %6791  ;;  %v6958_v10 = vsel %vm1160_vm0, %v13025_v19, 0.0  ;;  %v13030_v30 = vpop.eup %10161 }
 0xa8b   : > { %10169 = vpow2.f32 %v6918_v17  ;;  %v6862_v25 = vsub.f32 %v12883_v42, %v6792_v59  ;;  %6959 = vadd.xlane.f32.xlu0 %v6958_v10  ;;  %v6865_v42 = vsub.f32 %v12871_v2, %v6801_v4  ;;  %v6979_v9 = vsel %vm1160_vm0, %v13030_v30, 0.0 }
 0xa8c   : > { %v6795_v34 = vpop.xlane.xlu1 %6794  ;;  %10171 = vpow2.f32 %v6910_v7  ;;  %v6920_v35 = vmul.f32 1.442695, %v6869_v6 }
 0xa8d   : > { %v13034_v12 = vpop.eup %10163  ;;  %6968 = vadd.xlane.f32.xlu1 %v6967_v47  ;;  %v6906_v26 = vmul.f32 1.442695, %v6862_v25  ;;  %v6912_v17 = vmul.f32 1.442695, %v6865_v42  ;;  %v6863_v59 = vsub.f32 %v12891_v21, %v6795_v34 }
 0xa8e   : > { %v6804_v31 = vpop.xlane.xlu0 %6803  ;;  %v6970_v38 = vsel %vm1160_vm0, %v13034_v12, 0.0  ;;  %v13043_v27 = vpop.eup %10165 }
 0xa8f   : > { %v6866_v3 = vsub.f32 %v12896_v24, %v6804_v31  ;;  %6971 = vadd.xlane.f32.xlu0 %v6970_v38  ;;  %10173 = vpow2.f32 %v6906_v26  ;;  %v13047_v4 = vpop.eup %10167  ;;  %v6961_v10 = vsel %vm1160_vm0, %v13043_v27, 0.0  ;;  %v6908_v34 = vmul.f32 1.442695, %v6863_v59 }
 0xa90   : > { %v6807_v50 = vpop.xlane.xlu1 %6806  ;;  %v6973_v31 = vsel %vm1160_vm0, %v13047_v4, 0.0 }
 0xa91   : > { %v6914_v11 = vmul.f32 1.442695, %v6866_v3  ;;  %6980 = vadd.xlane.f32.xlu1 %v6979_v9 }
 0xa92   : > { %v6822_v55 = vpop.xlane.xlu0 %6821 }
 0xa93   : > { %10175 = vpow2.f32 %v6914_v11  ;;  %v6872_v2 = vsub.f32 %v12906_v40, %v6822_v55  ;;  %v6867_v40 = vsub.f32 %v12901_v20, %v6807_v50 }
 0xa94   : > { %v6825_v24 = vpop.xlane.xlu1 %6824  ;;  %10177 = vpow2.f32 %v6920_v35 }
 0xa95   : > { %v13051_v7 = vpop.eup %10169  ;;  %v6926_v25 = vmul.f32 1.442695, %v6872_v2  ;;  %v6873_v47 = vsub.f32 %v12911_v52, %v6825_v24  ;;  %6962 = vadd.xlane.f32.xlu1 %v6961_v10  ;;  %10179 = vpow2.f32 %v6912_v17  ;;  %v6916_v9 = vmul.f32 1.442695, %v6867_v40 }
 0xa96   : > { %v6834_v6 = vpop.xlane.xlu0 %6833  ;;  %v7000_v21 = vsel %vm1160_vm0, %v13051_v7, 0.0  ;;  %v13059_v38 = vpop.eup %10171 }
 0xa97   : > { %7001 = vadd.xlane.f32.xlu0 %v7000_v21  ;;  %10181 = vpow2.f32 %v6926_v25  ;;  %v6928_v42 = vmul.f32 1.442695, %v6873_v47  ;;  %v6876_v35 = vsub.f32 %v12918_v51, %v6834_v6  ;;  %v6988_v50 = vsel %vm1160_vm0, %v13059_v38, 0.0 }
 0xa98   : > { %v6837_v26 = vpop.xlane.xlu1 %6836  ;;  %10183 = vpow2.f32 %v6908_v34 }
 0xa99   : > { %v6877_v52 = vsub.f32 %v12926_v63, %v6837_v26  ;;  %6974 = vadd.xlane.f32.xlu1 %v6973_v31  ;;  %v13063_v11 = vpop.eup %10173  ;;  %10185 = vpow2.f32 %v6928_v42  ;;  %v6934_v51 = vmul.f32 1.442695, %v6876_v35 }
 0xa9a   : > { %v6816_v3 = vpop.xlane.xlu0 %6815  ;;  %10187 = vpow2.f32 %v6916_v9  ;;  %v6982_v47 = vsel %vm1160_vm0, %v13063_v11, 0.0 }
 0xa9b   : > { %v6936_v17 = vmul.f32 1.442695, %v6877_v52  ;;  %v6870_v10 = vsub.f32 %v12923_v39, %v6816_v3 }
 0xa9c   : > { %v6819_v20 = vpop.xlane.xlu1 %6818 }
 0xa9d   : > { %v13067_v55 = vpop.eup %10175  ;;  %v6871_v59 = vsub.f32 %v12931_v5, %v6819_v20  ;;  %6989 = vadd.xlane.f32.xlu1 %v6988_v50  ;;  %10189 = vpow2.f32 %v6936_v17  ;;  %v6922_v39 = vmul.f32 1.442695, %v6870_v10 }
 0xa9e   : > { %v6828_v63 = vpop.xlane.xlu0 %6827  ;;  %v6994_v2 = vsel %vm1160_vm0, %v13067_v55, 0.0  ;;  %v13072_v24 = vpop.eup %10177  ;;  %10191 = vpow2.f32 %v6934_v51 }
 0xa9f   : > { %6995 = vadd.xlane.f32.xlu0 %v6994_v2  ;;  %v13077_v6 = vpop.eup %10179  ;;  %v6924_v5 = vmul.f32 1.442695, %v6871_v59  ;;  %v7003_v40 = vsel %vm1160_vm0, %v13072_v24, 0.0  ;;  %v6874_v31 = vsub.f32 %v12936_v49, %v6828_v63 }
 0xaa0   : > { %v6831_v25 = vpop.xlane.xlu1 %6830  ;;  %v6991_v42 = vsel %vm1160_vm0, %v13077_v6, 0.0 }
 0xaa1   : > { %v6875_v21 = vsub.f32 %v12941_v29, %v6831_v25  ;;  %6983 = vadd.xlane.f32.xlu1 %v6982_v47  ;;  %v13082_v26 = vpop.eup %10181  ;;  %10193 = vpow2.f32 %v6924_v5  ;;  %v6930_v35 = vmul.f32 1.442695, %v6874_v31 }
 0xaa2   : > { %v6846_v34 = vpop.xlane.xlu0 %6845  ;;  %v13087_v52 = vpop.eup %10183  ;;  %v7012_v29 = vsel %vm1160_vm0, %v13082_v26, 0.0  ;;  %10195 = vpow2.f32 %v6922_v39 }
 0xaa3   : > { %7004 = vadd.xlane.f32.xlu0 %v7003_v40  ;;  %v6932_v3 = vmul.f32 1.442695, %v6875_v21  ;;  %v13091_v9 = vpop.eup %10185  ;;  %v6880_v20 = vsub.f32 %v12946_v57, %v6846_v34  ;;  %v6985_v50 = vsel %vm1160_vm0, %v13087_v52, 0.0 }
 0xaa4   : > { %v13096_v17 = vpop.eup %10187  ;;  %v7015_v59 = vsel %vm1160_vm0, %v13091_v9, 0.0 }
 0xaa5   : > { %6992 = vadd.xlane.f32.xlu1 %v6991_v42  ;;  %10197 = vpow2.f32 %v6932_v3  ;;  %v6942_v2 = vmul.f32 1.442695, %v6880_v20  ;;  %v6997_v57 = vsel %vm1160_vm0, %v13096_v17, 0.0 }
 0xaa6   : > { %v6840_v49 = vpop.xlane.xlu0 %6839  ;;  %10199 = vpow2.f32 %v6930_v35 }
 0xaa7   : > { %7013 = vadd.xlane.f32.xlu0 %v7012_v29  ;;  %v13100_v63 = vpop.eup %10189  ;;  %v6878_v51 = vsub.f32 %v12959_v54, %v6840_v49  ;;  %10201 = vpow2.f32 %v6942_v2 }
 0xaa8   : > { %v13105_v10 = vpop.eup %10191  ;;  %v7027_v25 = vsel %vm1160_vm0, %v13100_v63, 0.0 }
 0xaa9   : > { %6986 = vadd.xlane.f32.xlu1 %v6985_v50  ;;  %v6938_v5 = vmul.f32 1.442695, %v6878_v51  ;;  %v7024_v21 = vsel %vm1160_vm0, %v13105_v10, 0.0  ;;  %v13135_v50 = vpop.permute.xlu1 %7441  ;;  %v13965_v51 = vld [vmem:[#allocation12_spill] sm:$0xff] }
 0xaab   : > { %7016 = vadd.xlane.f32.xlu0 %v7015_v59  ;;  %v13109_v47 = vpop.eup %10193  ;;  %10203 = vpow2.f32 %v6938_v5  ;;  %v13964_v59 = vld [vmem:[#allocation43_spill] sm:$0xff] }
 0xaac   : > { %v13113_v34 = vpop.eup %10195  ;;  %v7009_v54 = vsel %vm1160_vm0, %v13109_v47, 0.0  ;;  %v13966_v5 = vld [vmem:[#allocation19_spill] sm:$0xff] }
 0xaad   : > { %6998 = vadd.xlane.f32.xlu1 %v6997_v57  ;;  %v7006_v39 = vsel %vm1160_vm0, %v13113_v34, 0.0  ;;  %v13139_v2 = vpop.permute.xlu1 %7502 }
 0xaaf   : > { %7028 = vadd.xlane.f32.xlu0 %v7027_v25  ;;  %v13117_v40 = vpop.eup %10197 }
 0xab0   : > { %v13121_v31 = vpop.eup %10199  ;;  %v7021_v42 = vsel %vm1160_vm0, %v13117_v40, 0.0 }
 0xab1   : > { %7025 = vadd.xlane.f32.xlu1 %v7024_v21  ;;  %v7018_v3 = vsel %vm1160_vm0, %v13121_v31, 0.0  ;;  %v13127_v29 = vpop.eup %10201 }
 0xab2   : > { %v7036_v35 = vsel %vm1160_vm0, %v13127_v29, 0.0 }
 0xab3   : > { %7010 = vadd.xlane.f32.xlu0 %v7009_v54 }
 0xab5   : > { %7007 = vadd.xlane.f32.xlu1 %v7006_v39  ;;  %v13131_v20 = vpop.eup %10203 }
 0xab6   : > { %v7030_v49 = vsel %vm1160_vm0, %v13131_v20, 0.0 }
 0xab7   : > { %7022 = vadd.xlane.f32.xlu0 %v7021_v42 }
 0xab9   : > { %7019 = vadd.xlane.f32.xlu1 %v7018_v3  ;;  %v13967_v3 = vld [vmem:[#allocation52_spill] sm:$0xff] }
 0xabd   : > { %7037 = vadd.xlane.f32.xlu1 %v7036_v35 }
 0xac1   : > { %7031 = vadd.xlane.f32.xlu1 %v7030_v49  ;;  %v13968_v49 = vld [vmem:[#allocation45_spill] sm:$0xff] }
 0xad2   : > { %7567 = vrot.lane.b32.xlu1 %v13964_v59, %s10340_s18  ;;  %v13970_v59 = vld [vmem:[#allocation48_spill] sm:$0xff] }
 0xad6   : > { %4128 = vrot.lane.b32.xlu1 %v13965_v51, %s10340_s18  ;;  %v13173_v51 = vpop.permute.xlu0 %7439 }
 0xad9   : > { %v6849_v57 = vpop.xlane.xlu1 %6848 }
 0xada   : > { %v6881_v25 = vsub.f32 %v12951_v15, %v6849_v57  ;;  %4132 = vrot.lane.b32.xlu1 %v13966_v5, %s10340_s18  ;;  %v13971_v57 = vld [vmem:[#allocation44_spill] sm:$0xff]  ;;  %v13974_v5 = vld [vmem:[#allocation54_spill] sm:$0xff] }
 0xadc   : > { %v6944_v21 = vmul.f32 1.442695, %v6881_v25  ;;  %v13973_v25 = vld [vmem:[#allocation39_spill] sm:$0xff] }
 0xadd   : > { %v6843_v54 = vpop.xlane.xlu1 %6842 }
 0xade   : > { %10205 = vpow2.f32 %v6944_v21  ;;  %v6879_v39 = vsub.f32 %v12954_v16, %v6843_v54  ;;  %5894 = vrot.lane.b32.xlu1 %v12731_v1, %s10339_s28 }
 0xae0   : > { %v6940_v42 = vmul.f32 1.442695, %v6879_v39 }
 0xae1   : > { %v13187_v54 = vpop.permute.xlu1 %7504 }
 0xae2   : > { %10207 = vpow2.f32 %v6940_v42  ;;  %5898 = vrot.lane.b32.xlu1 %v12729_v46, %s10339_s28  ;;  %v13969_v46 = vld [vmem:[#allocation49_spill] sm:$0xff] }
 0xae6   : > { %4136 = vrot.lane.b32.xlu1 %v13967_v3, %s10340_s18 }
 0xae8   : > { %v13153_v15 = vpop.eup %10205 }
 0xae9   : > { %v7039_v35 = vsel %vm1160_vm0, %v13153_v15, 0.0 }
 0xaea   : > { %7040 = vadd.xlane.f32.xlu0 %v7039_v35  ;;  %4140 = vrot.lane.b32.xlu1 %v13968_v49, %s10340_s18  ;;  %v13976_v35 = vld [vmem:[#allocation59_spill] sm:$0xff]  ;;  %v13978_v49 = vld [vmem:[#allocation58_spill] sm:$0xff] }
 0xaec   : > { %v13159_v16 = vpop.eup %10207 }
 0xaed   : > { %v7033_v1 = vsel %vm1160_vm0, %v13159_v16, 0.0 }
 0xaee   : > { %7034 = vadd.xlane.f32.xlu0 %v7033_v1  ;;  %5902 = vrot.lane.b32.xlu1 %v12739_v48, %s10339_s28  ;;  %v13979_v1 = vld [vmem:[#allocation46_spill] sm:$0xff] }
 0xaf2   : > { %5906 = vrot.lane.b32.xlu1 %v12737_v13, %s10339_s28  ;;  %v13972_v13 = vld [vmem:[#allocation55_spill] sm:$0xff] }
 0xaf6   : > { %4144 = vrot.lane.b32.xlu1 %v13969_v46, %s10340_s18 }
 0xafa   : > { %4148 = vrot.lane.b32.xlu1 %v13970_v59, %s10340_s18 }
 0xafe   : > { %5910 = vrot.lane.b32.xlu1 %v12747_v62, %s10339_s28  ;;  %v13975_v62 = vld [vmem:[#allocation33_spill] sm:$0xff] }
 0xb02   : > { %5914 = vrot.lane.b32.xlu1 %v12745_v44, %s10339_s28 }
 0xb04   : > { %7565 = vrot.lane.b32.xlu0 %v13971_v57, %s10340_s18  ;;  %v6954_v48 = vpop.xlane.xlu0 %6953 }
 0xb06   : > { %4152 = vrot.lane.b32.xlu1 %v13972_v13, %s10340_s18 }
 0xb08   : > { %4126 = vrot.lane.b32.xlu0 %v13973_v25, %s10340_s18  ;;  %v6948_v21 = vpop.xlane.xlu0 %6947 }
 0xb0a   : > { %4156 = vrot.lane.b32.xlu1 %v13974_v5, %s10340_s18 }
 0xb0c   : > { %4130 = vrot.lane.b32.xlu0 %v13975_v62, %s10340_s18 }
 0xb0e   : > { %5918 = vrot.lane.b32.xlu1 %v12755_v18, %s10339_s28  ;;  %v13977_v18 = vld [vmem:[#allocation25_spill] sm:$0xff] }
 0xb10   : > { %5892 = vrot.lane.b32.xlu0 %v12727_v61, %s10339_s28  ;;  %v6966_v44 = vpop.xlane.xlu0 %6965 }
 0xb12   : > { %v6957_v39 = vpop.xlane.xlu1 %6956  ;;  %5922 = vrot.lane.b32.xlu1 %v12753_v14, %s10339_s28 }
 0xb13   : > { %10209 = vrcp.f32 %v6957_v39  ;;  %v13980_v39 = vld [vmem:[#allocation63_spill] sm:$0xff] }
 0xb14   : > { %5896 = vrot.lane.b32.xlu0 %v12725_v33, %s10339_s28  ;;  %10211 = vrcp.f32 %v6948_v21  ;;  %v6978_v42 = vpop.xlane.xlu0 %6977 }
 0xb15   : > { %10213 = vrcp.f32 %v6954_v48 }
 0xb16   : > { %v6951_v3 = vpop.xlane.xlu1 %6950  ;;  %4160 = vrot.lane.b32.xlu1 %v13976_v35, %s10340_s18  ;;  %v13983_v35 = vld [vmem:[#allocation51_spill] sm:$0xff] }
 0xb17   : > { %10215 = vrcp.f32 %v6951_v3 }
 0xb18   : > { %4134 = vrot.lane.b32.xlu0 %v13977_v18, %s10340_s18  ;;  %v6960_v14 = vpop.xlane.xlu0 %6959 }
 0xb1a   : > { %v6969_v61 = vpop.xlane.xlu1 %6968  ;;  %4164 = vrot.lane.b32.xlu1 %v13978_v49, %s10340_s18 }
 0xb1b   : > { %10217 = vrcp.f32 %v6969_v61 }
 0xb1c   : > { %4138 = vrot.lane.b32.xlu0 %v13979_v1, %s10340_s18  ;;  %10219 = vrcp.f32 %v6960_v14  ;;  %v6972_v25 = vpop.xlane.xlu0 %6971 }
 0xb1d   : > { %v10210_v33 = vpop.eup %10209  ;;  %10221 = vrcp.f32 %v6966_v44 }
 0xb1e   : > { %v6981_v46 = vpop.xlane.xlu1 %6980  ;;  %5926 = vrot.lane.b32.xlu1 %v12763_v45, %s10339_s28  ;;  %v10212_v59 = vpop.eup %10211  ;;  %v7077_v13 = vmul.f32 %v10210_v33, %v13004_v8 }
 0xb1f   : > { %v10214_v57 = vpop.eup %10213  ;;  %v7074_v21 = vmul.f32 %v10212_v59, %v12996_v22 }
 0xb20   : > { %5900 = vrot.lane.b32.xlu0 %v12735_v36, %s10339_s28  ;;  %v7076_v62 = vmul.f32 %v10214_v57, %v12990_v43  ;;  %v13981_v43 = vld [vmem:[#allocation47_spill] sm:$0xff] }
 0xb21   : > { %v10216_v48 = vpop.eup %10215  ;;  %v13984_v57 = vld [vmem:[#allocation11_spill] sm:$0xff] }
 0xb22   : > { %v6963_v5 = vpop.xlane.xlu1 %6962  ;;  %5930 = vrot.lane.b32.xlu1 %v12761_v37, %s10339_s28  ;;  %v7075_v45 = vmul.f32 %v10216_v48, %v13011_v32  ;;  %v7107_v8 = vpack.c.bf16 %v7077_v13, %v7076_v62  ;;  %v13982_v32 = vld [vmem:[#allocation62_spill] sm:$0xff] }
 0xb23   : > { %10223 = vrcp.f32 %v6963_v5 }
 0xb24   : > { %10225 = vrcp.f32 %v6981_v46  ;;  %5904 = vrot.lane.b32.xlu0 %v12733_v53, %s10339_s28  ;;  %v7106_v36 = vpack.c.bf16 %v7075_v45, %v7074_v21  ;;  %v7002_v37 = vpop.xlane.xlu0 %7001  ;;  %v13986_v45 = vld [vmem:[#allocation10_spill] sm:$0xff] }
 0xb25   : > { %10227 = vrcp.f32 %v6972_v25  ;;  %v10218_v53 = vpop.eup %10217 }
 0xb26   : > { %10229 = vrcp.f32 %v6978_v42  ;;  %v6975_v44 = vpop.xlane.xlu1 %6974  ;;  %4168 = vrot.lane.b32.xlu1 %v13980_v39, %s10340_s18  ;;  %9473 = vmatprep.mubr.msk.bf16.mxu0 %vm1160_vm0, %v7106_v36  ;;  %v10220_v42 = vpop.eup %10219  ;;  %v13990_v39 = vld [vmem:[#allocation53_spill] sm:$0xff] }
 0xb27   : > { %10231 = vrcp.f32 %v6975_v44  ;;  %9474 = vmatmul.mubr.msk.bf16.vlgmr.msra.gmra.mrb[148].mxu0 %vm1160_vm0, %v7107_v8  ;;  %v10222_v3 = vpop.eup %10221  ;;  %v7078_v1 = vmul.f32 %v10220_v42, %v13025_v19  ;;  %v13988_v8 = vld [vmem:[#allocation77_spill] sm:$0xff] }
 0xb28   : > { %9486 = vmatpush3.bf16.msra.mxu0 %v12718_v0  ;;  %4142 = vrot.lane.b32.xlu0 %v13981_v43, %s10340_s18  ;;  %v7081_v0 = vmul.f32 %v10218_v53, %v13021_v41  ;;  %v13991_v43 = vld [vmem:[#allocation74_spill] sm:$0xff] }
 0xb29   : > { %9487 = vmatprep.subr.bf16.mxu0 %v12975_v58 }
 0xb2a   : > { %v6990_v22 = vpop.xlane.xlu1 %6989  ;;  %4172 = vrot.lane.b32.xlu1 %v13982_v32, %s10340_s18 }
 0xb2c   : > { %9488 = vmatpush3.bf16.msra.mxu0 %v12975_v58  ;;  %4146 = vrot.lane.b32.xlu0 %v13983_v35, %s10340_s18  ;;  %v6996_v18 = vpop.xlane.xlu0 %6995  ;;  %v7080_v58 = vmul.f32 %v10222_v3, %v13006_v28  ;;  %v13994_v35 = vld [vmem:[#allocation17_spill] sm:$0xff] }
 0xb2d   : > { %v10224_v61 = vpop.eup %10223  ;;  %9501 = vmatprep.subr.bf16.mxu0 %v12979_v60 }
 0xb2e   : > { %v10226_v49 = vpop.eup %10225  ;;  %v6984_v14 = vpop.xlane.xlu1 %6983  ;;  %5934 = vrot.lane.b32.xlu1 %v12771_v23, %s10339_s28  ;;  %v7079_v33 = vmul.f32 %v10224_v61, %v13043_v27  ;;  %v7109_v5 = vpack.c.bf16 %v7081_v0, %v7080_v58  ;;  %v13985_v23 = vld [vmem:[#allocation75_spill] sm:$0xff] }
 0xb2f   : > { %v10228_v46 = vpop.eup %10227  ;;  %v7085_v25 = vmul.f32 %v10226_v49, %v13030_v30  ;;  %v13987_v30 = vld [vmem:[#allocation23_spill] sm:$0xff] }
 0xb30   : > { %v10230_v59 = vpop.eup %10229  ;;  %5908 = vrot.lane.b32.xlu0 %v13984_v57, %s10339_s28  ;;  %v7005_v48 = vpop.xlane.xlu0 %7004  ;;  %v7108_v41 = vpack.c.bf16 %v7079_v33, %v7078_v1  ;;  %v7082_v19 = vmul.f32 %v10228_v46, %v13034_v12  ;;  %v13996_v46 = vld [vmem:[#allocation37_spill] sm:$0xff] }
 0xb31   : > { %v10232_v13 = vpop.eup %10231  ;;  %v7084_v27 = vmul.f32 %v10230_v59, %v13015_v56 }
 0xb32   : > { %v6993_v21 = vpop.xlane.xlu1 %6992  ;;  %5938 = vrot.lane.b32.xlu1 %v13985_v23, %s10339_s28  ;;  %9481 = vmatprep.mubr.msk.bf16.mxu1 %vm1160_vm0, %v7108_v41  ;;  %v7083_v28 = vmul.f32 %v10232_v13, %v13047_v4  ;;  %v13989_v4 = vld [vmem:[#allocation67_spill] sm:$0xff] }
 0xb33   : > { %9482 = vmatmul.mubr.msk.bf16.vlgmr.msra.gmra.mrb[172].mxu1 %vm1160_vm0, %v7109_v5  ;;  %10233 = vrcp.f32 %v6993_v21  ;;  %v7111_v44 = vpack.c.bf16 %v7085_v25, %v7084_v27  ;;  %v13997_v21 = vld [vmem:[#allocation35_spill] sm:$0xff]  ;;  %v13999_v27 = vld [vmem:[#allocation57_spill] sm:$0xff] }
 0xb34   : > { %9494 = vmatpush3.bf16.msra.mxu1 %v13986_v45  ;;  %5912 = vrot.lane.b32.xlu0 %v13987_v30, %s10339_s28  ;;  %v7014_v62 = vpop.xlane.xlu0 %7013  ;;  %v7110_v36 = vpack.c.bf16 %v7083_v28, %v7082_v19  ;;  %10235 = vrcp.f32 %v6984_v14  ;;  %v13995_v14 = vld [vmem:[#allocation31_spill] sm:$0xff] }
 0xb35   : > { %9495 = vmatprep.subr.bf16.mxu1 %v13988_v8  ;;  %10237 = vrcp.f32 %v6990_v22  ;;  %v13992_v22 = vld [vmem:[#allocation66_spill] sm:$0xff] }
 0xb36   : > { %v6987_v12 = vpop.xlane.xlu1 %6986  ;;  %4176 = vrot.lane.b32.xlu1 %v13989_v4, %s10340_s18  ;;  %9489 = vmatprep.mubr.msk.bf16.mxu0 %vm1160_vm0, %v7110_v36 }
 0xb37   : > { %10239 = vrcp.f32 %v6987_v12  ;;  %9490 = vmatmul.mubr.msk.bf16.vlgmr.msra.gmra.mrb[152].mxu0 %vm1160_vm0, %v7111_v44 }
 0xb38   : > { %10241 = vrcp.f32 %v7005_v48  ;;  %9496 = vmatpush3.bf16.msra.mxu1 %v13988_v8  ;;  %9502 = vmatpush3.bf16.msra.mxu0 %v12979_v60  ;;  %v7017_v56 = vpop.xlane.xlu0 %7016  ;;  %v13993_v60 = vld [vmem:[#allocation50_spill] sm:$0xff]  ;;  %v14001_v8 = vld [vmem:[#allocation56_spill] sm:$0xff] }
 0xb39   : > { %10243 = vrcp.f32 %v6996_v18  ;;  %4150 = vrot.lane.b32.xlu0 %v13990_v39, %s10340_s18  ;;  %9503 = vmatprep.subr.bf16.mxu0 %v13991_v43 }
 0xb3a   : > { %10245 = vrcp.f32 %v7002_v37  ;;  %9509 = vmatprep.subr.bf16.mxu1 %v13173_v51  ;;  %v6999_v53 = vpop.xlane.xlu1 %6998  ;;  %4180 = vrot.lane.b32.xlu1 %v13992_v22, %s10340_s18  ;;  %v14002_v22 = vld [vmem:[#allocation73_spill] sm:$0xff] }
 0xb3b   : > { %10247 = vrcp.f32 %v6999_v53 }
 0xb3c   : > { %9504 = vmatpush3.bf16.msra.mxu0 %v13991_v43  ;;  %v7029_v32 = vpop.xlane.xlu0 %7028  ;;  %10249 = vrcp.f32 %v7017_v56 }
 0xb3d   : > { %4154 = vrot.lane.b32.xlu0 %v13993_v60, %s10340_s18  ;;  %9517 = vmatprep.subr.bf16.mxu0 %v13139_v2  ;;  %v10234_v42 = vpop.eup %10233 }
 0xb3e   : > { %v7026_v3 = vpop.xlane.xlu1 %7025  ;;  %5942 = vrot.lane.b32.xlu1 %v13994_v35, %s10339_s28  ;;  %v10236_v37 = vpop.eup %10235  ;;  %v7089_v49 = vmul.f32 %v10234_v42, %v13077_v6  ;;  %v14003_v42 = vld [vmem:[#allocation7_spill] sm:$0xff] }
 0xb3f   : > { %v10238_v18 = vpop.eup %10237  ;;  %v7086_v58 = vmul.f32 %v10236_v37, %v13063_v11  ;;  %v14006_v37 = vld [vmem:[#allocation16_spill] sm:$0xff] }
 0xb40   : > { %v7011_v61 = vpop.xlane.xlu0 %7010  ;;  %v7088_v48 = vmul.f32 %v10238_v18, %v13059_v38 }
 0xb41   : > { %v10240_v0 = vpop.eup %10239  ;;  %5916 = vrot.lane.b32.xlu0 %v13995_v14, %s10339_s28  ;;  %10251 = vrcp.f32 %v7011_v61  ;;  %v14007_v61 = vld [vmem:[#allocation29_spill] sm:$0xff] }
 0xb42   : > { %v10242_v1 = vpop.eup %10241  ;;  %10253 = vrcp.f32 %v7014_v62  ;;  %v7008_v33 = vpop.xlane.xlu1 %7007  ;;  %5946 = vrot.lane.b32.xlu1 %v13996_v46, %s10339_s28  ;;  %v7087_v59 = vmul.f32 %v10240_v0, %v13087_v52  ;;  %v7113_v23 = vpack.c.bf16 %v7089_v49, %v7088_v48  ;;  %v13998_v52 = vld [vmem:[#allocation71_spill] sm:$0xff]  ;;  %v14008_v49 = vld [vmem:[#allocation65_spill] sm:$0xff] }
 0xb43   : > { %v10244_v57 = vpop.eup %10243  ;;  %10255 = vrcp.f32 %v7008_v33  ;;  %v7093_v5 = vmul.f32 %v10242_v1, %v13072_v24  ;;  %v14009_v1 = vld [vmem:[#allocation64_spill] sm:$0xff]  ;;  %v14010_v46 = vld [vmem:[#allocation13_spill] sm:$0xff] }
 0xb44   : > { %v10246_v41 = vpop.eup %10245  ;;  %10257 = vrcp.f32 %v7026_v3  ;;  %v7023_v6 = vpop.xlane.xlu0 %7022  ;;  %v7112_v13 = vpack.c.bf16 %v7087_v59, %v7086_v58  ;;  %v7090_v38 = vmul.f32 %v10244_v57, %v13067_v55  ;;  %v14000_v55 = vld [vmem:[#allocation70_spill] sm:$0xff]  ;;  %v14011_v59 = vld [vmem:[#allocation8_spill] sm:$0xff] }
 0xb45   : > { %v10248_v25 = vpop.eup %10247  ;;  %5920 = vrot.lane.b32.xlu0 %v13997_v21, %s10339_s28  ;;  %10259 = vrcp.f32 %v7023_v6  ;;  %v7092_v28 = vmul.f32 %v10246_v41, %v13051_v7  ;;  %v14012_v41 = vld [vmem:[#allocation69_spill] sm:$0xff] }
 0xb46   : > { %10261 = vrcp.f32 %v7029_v32  ;;  %v7020_v11 = vpop.xlane.xlu1 %7019  ;;  %4184 = vrot.lane.b32.xlu1 %v13998_v52, %s10340_s18  ;;  %9497 = vmatprep.mubr.msk.bf16.mxu1 %vm1160_vm0, %v7112_v13  ;;  %v7091_v19 = vmul.f32 %v10248_v25, %v13096_v17  ;;  %v10250_v30 = vpop.eup %10249  ;;  %v14013_v25 = vld [vmem:[#allocation68_spill] sm:$0xff] }
 0xb47   : > { %10263 = vrcp.f32 %v7020_v11  ;;  %9498 = vmatmul.mubr.msk.bf16.vlgmr.msra.gmra.mrb[176].mxu1 %vm1160_vm0, %v7113_v23  ;;  %v7115_v45 = vpack.c.bf16 %v7093_v5, %v7092_v28  ;;  %v7097_v36 = vmul.f32 %v10250_v30, %v13091_v9 }
 0xb48   : > { %9510 = vmatpush3.bf16.msra.mxu1 %v13173_v51  ;;  %v7114_v24 = vpack.c.bf16 %v7091_v19, %v7090_v38 }
 0xb49   : > { %4158 = vrot.lane.b32.xlu0 %v13999_v27, %s10340_s18  ;;  %9511 = vmatprep.subr.bf16.mxu1 %v13135_v50 }
 0xb4a   : > { %v13291_v62 = vpop.xlane.xlu1 %7037  ;;  %4188 = vrot.lane.b32.xlu1 %v14000_v55, %s10340_s18  ;;  %9505 = vmatprep.mubr.msk.bf16.mxu0 %vm1160_vm0, %v7114_v24 }
 0xb4b   : > { %v10252_v7 = vpop.eup %10251  ;;  %9506 = vmatmul.mubr.msk.bf16.vlgmr.msra.gmra.mrb[156].mxu0 %vm1160_vm0, %v7115_v45 }
 0xb4c   : > { %v10254_v17 = vpop.eup %10253  ;;  %9512 = vmatpush3.bf16.msra.mxu1 %v13135_v50  ;;  %9518 = vmatpush3.bf16.msra.mxu0 %v13139_v2  ;;  %v7095_v56 = vmul.f32 %v10252_v7, %v13109_v47 }
 0xb4d   : > { %v10256_v51 = vpop.eup %10255  ;;  %4162 = vrot.lane.b32.xlu0 %v14001_v8, %s10340_s18  ;;  %9519 = vmatprep.subr.bf16.mxu0 %v13187_v54  ;;  %v7096_v43 = vmul.f32 %v10254_v17, %v13082_v26 }
 0xb4e   : > { %v10258_v44 = vpop.eup %10257  ;;  %v7032_v12 = vpop.xlane.xlu1 %7031  ;;  %v7094_v4 = vmul.f32 %v10256_v51, %v13113_v34 }
 0xb4f   : > { %v10260_v39 = vpop.eup %10259  ;;  %v7100_v9 = vmul.f32 %v10258_v44, %v13105_v10  ;;  %v7117_v32 = vpack.c.bf16 %v7097_v36, %v7096_v43 }
 0xb50   : > { %v10262_v50 = vpop.eup %10261  ;;  %9520 = vmatpush3.bf16.msra.mxu0 %v13187_v54  ;;  %v7116_v2 = vpack.c.bf16 %v7095_v56, %v7094_v4  ;;  %v7099_v47 = vmul.f32 %v10260_v39, %v13117_v40 }
 0xb51   : > { %v10264_v53 = vpop.eup %10263  ;;  %5924 = vrot.lane.b32.xlu0 %v14002_v22, %s10339_s28  ;;  %v7101_v26 = vmul.f32 %v10262_v50, %v13100_v63  ;;  %v14005_v63 = vld [vmem:[#allocation60_spill] sm:$0xff] }
 0xb52   : > { %v7568_v60 = vpop.permute.xlu1 %7567  ;;  %9513 = vmatprep.mubr.msk.bf16.mxu1 %vm1160_vm0, %v7116_v2  ;;  %v7098_v34 = vmul.f32 %v10264_v53, %v13121_v31  ;;  %v14004_v31 = vld [vmem:[#allocation61_spill] sm:$0xff] }
 0xb53   : > { %9514 = vmatmul.mubr.msk.bf16.vlgmr.msra.gmra.mrb[180].mxu1 %vm1160_vm0, %v7117_v32  ;;  %v7119_v10 = vpack.c.bf16 %v7101_v26, %v7100_v9 }
 0xb54   : > { %v7118_v54 = vpack.c.bf16 %v7099_v47, %v7098_v34 }
 0xb55   : > { %5928 = vrot.lane.b32.xlu0 %v14003_v42, %s10339_s28 }
 0xb56   : > { %v4129_v3 = vpop.permute.xlu1 %4128  ;;  %9521 = vmatprep.mubr.msk.bf16.mxu0 %vm1160_vm0, %v7118_v54 }
 0xb57   : > { %4224 = vst.msk [vmem:[#allocation3 + $0x8] sm:$0xff] %vm4222_vm1, %v4129_v3  ;;  %9522 = vmatmul.mubr.msk.bf16.vlgmr.msra.gmra.mrb[160].mxu0 %vm1160_vm0, %v7119_v10 }
 0xb59   : > { %4166 = vrot.lane.b32.xlu0 %v14004_v31, %s10340_s18 }
 0xb5a   : > { %v4133_v40 = vpop.permute.xlu1 %4132 }
 0xb5b   : > { %4226 = vst.msk [vmem:[#allocation3 + $0x18] sm:$0xff] %vm4222_vm1, %v4133_v40 }
 0xb5d   : > { %4170 = vrot.lane.b32.xlu0 %v14005_v63, %s10340_s18 }
 0xb5e   : > { %v5895_v35 = vpop.permute.xlu1 %5894 }
 0xb5f   : > { %5990 = vst.msk [vmem:[#allocation3 + $0x8] sm:$0xff] %vm5988_vm2, %v5895_v35 }
 0xb61   : > { %5932 = vrot.lane.b32.xlu0 %v14006_v37, %s10339_s28 }
 0xb62   : > { %v5899_v18 = vpop.permute.xlu1 %5898 }
 0xb63   : > { %5992 = vst.msk [vmem:[#allocation3 + $0x18] sm:$0xff] %vm5988_vm2, %v5899_v18 }
 0xb65   : > { %5936 = vrot.lane.b32.xlu0 %v14007_v61, %s10339_s28 }
 0xb66   : > { %v4137_v0 = vpop.permute.xlu1 %4136 }
 0xb67   : > { %4228 = vst.msk [vmem:[#allocation3 + $0x28] sm:$0xff] %vm4222_vm1, %v4137_v0 }
 0xb69   : > { %4174 = vrot.lane.b32.xlu0 %v14008_v49, %s10340_s18 }
 0xb6a   : > { %v4141_v14 = vpop.permute.xlu1 %4140 }
 0xb6b   : > { %4230 = vst.msk [vmem:[#allocation3 + $0x38] sm:$0xff] %vm4222_vm1, %v4141_v14 }
 0xb6d   : > { %4178 = vrot.lane.b32.xlu0 %v14009_v1, %s10340_s18 }
 0xb6e   : > { %v5903_v33 = vpop.permute.xlu1 %5902 }
 0xb6f   : > { %5994 = vst.msk [vmem:[#allocation3 + $0x28] sm:$0xff] %vm5988_vm2, %v5903_v33 }
 0xb71   : > { %5940 = vrot.lane.b32.xlu0 %v14010_v46, %s10339_s28  ;;  %v9753_v46 = vld [vmem:[%s13621_s3] sm:$0xff]  }
 0xb72   : > { %v5907_v58 = vpop.permute.xlu1 %5906  ;;  %9533 = vmatprep.subr.bf16.mxu0 %v9753_v46 }
 0xb73   : > { %5996 = vst.msk [vmem:[#allocation3 + $0x38] sm:$0xff] %vm5988_vm2, %v5907_v58  ;;  %9534 = vmatpush3.bf16.msra.mxu0 %v9753_v46  ;;  %v9754_v58 = vld [vmem:[%s13621_s3 + $0x8] sm:$0xff]  }
 0xb74   : > { %9535 = vmatprep.subr.bf16.mxu0 %v9754_v58 }
 0xb75   : > { %5944 = vrot.lane.b32.xlu0 %v14011_v59, %s10339_s28 }
 0xb76   : > { %v4145_v57 = vpop.permute.xlu1 %4144 }
 0xb77   : > { %4232 = vst.msk [vmem:[#allocation3 + $0x48] sm:$0xff] %vm4222_vm1, %v4145_v57  ;;  %v7041_v48 = vpop.xlane.xlu0 %7040  ;;  %v9755_v57 = vld [vmem:[%s13621_s3 + $0x10] sm:$0xff]   ;;  %9536 = vmatpush3.bf16.msra.mxu0 %v9754_v58 }
 0xb78   : > { %10265 = vrcp.f32 %v7041_v48  ;;  %9537 = vmatprep.subr.bf16.mxu0 %v9755_v57 }
 0xb79   : > { %4182 = vrot.lane.b32.xlu0 %v14012_v41, %s10340_s18  ;;  %10267 = vrcp.f32 %v7032_v12  ;;  %v9756_v41 = vld [vmem:[%s13621_s3 + $0x18] sm:$0xff]  }
 0xb7a   : > { %v4149_v6 = vpop.permute.xlu1 %4148  ;;  %10269 = vrcp.f32 %v13291_v62 }
 0xb7b   : > { %4234 = vst.msk [vmem:[#allocation3 + $0x58] sm:$0xff] %vm4222_vm1, %v4149_v6  ;;  %v7035_v13 = vpop.xlane.xlu0 %7034  ;;  %9538 = vmatpush3.bf16.msra.mxu0 %v9755_v57 }
 0xb7c   : > { %10271 = vrcp.f32 %v7035_v13  ;;  %9539 = vmatprep.subr.bf16.mxu0 %v9756_v41 }
 0xb7d   : > { %4186 = vrot.lane.b32.xlu0 %v14013_v25, %s10340_s18  ;;  %v9757_v25 = vld [vmem:[%s13621_s3 + $0x20] sm:$0xff]  }
 0xb7e   : > { %v5911_v5 = vpop.permute.xlu1 %5910 }
 0xb7f   : > { %5998 = vst.msk [vmem:[#allocation3 + $0x48] sm:$0xff] %vm5988_vm2, %v5911_v5  ;;  %v7566_v21 = vpop.permute.xlu0 %7565  ;;  %9540 = vmatpush3.bf16.msra.mxu0 %v9756_v41 }
 0xb80   : > { %9525 = vmatprep.subr.bf16.mxu1 %v7566_v21  ;;  %9541 = vmatprep.subr.bf16.mxu0 %v9757_v25 }
 0xb81   : > { %9526 = vmatpush3.bf16.msra.mxu1 %v7566_v21  ;;  %v9758_v21 = vld [vmem:[%s13621_s3 + $0x28] sm:$0xff]  }
 0xb82   : > { %v5915_v23 = vpop.permute.xlu1 %5914  ;;  %9527 = vmatprep.subr.bf16.mxu1 %v7568_v60  ;;  %v10266_v11 = vpop.eup %10265 }
 0xb83   : > { %6000 = vst.msk [vmem:[#allocation3 + $0x58] sm:$0xff] %vm5988_vm2, %v5915_v23  ;;  %v4127_v52 = vpop.permute.xlu0 %4126  ;;  %v10268_v38 = vpop.eup %10267  ;;  %v7105_v24 = vmul.f32 %v10266_v11, %v13153_v15  ;;  %9542 = vmatpush3.bf16.msra.mxu0 %v9757_v25  ;;  %v9759_v23 = vld [vmem:[%s13621_s3 + $0x30] sm:$0xff]  }
 0xb84   : > { %4223 = vst.msk [vmem:[#allocation3] sm:$0xff] %vm4222_vm1, %v4127_v52  ;;  %v10270_v19 = vpop.eup %10269  ;;  %v7102_v30 = vmul.f32 %v10268_v38, %v13131_v20  ;;  %9543 = vmatprep.subr.bf16.mxu0 %v9758_v21 }
 0xb85   : > { %9528 = vmatpush3.bf16.msra.mxu1 %v7568_v60  ;;  %v7104_v55 = vmul.f32 %v10270_v19, %v13127_v29  ;;  %v9760_v19 = vld [vmem:[%s13621_s3 + $0x38] sm:$0xff]  }
 0xb86   : > { %v10272_v28 = vpop.eup %10271  ;;  %v4153_v27 = vpop.permute.xlu1 %4152 }
 0xb87   : > { %4236 = vst.msk [vmem:[#allocation3 + $0x68] sm:$0xff] %vm4222_vm1, %v4153_v27  ;;  %v4131_v45 = vpop.permute.xlu0 %4130  ;;  %v7103_v62 = vmul.f32 %v10272_v28, %v13159_v16  ;;  %v7121_v51 = vpack.c.bf16 %v7105_v24, %v7104_v55  ;;  %9544 = vmatpush3.bf16.msra.mxu0 %v9758_v21 }
 0xb88   : > { %4225 = vst.msk [vmem:[#allocation3 + $0x10] sm:$0xff] %vm4222_vm1, %v4131_v45  ;;  %9545 = vmatprep.subr.bf16.mxu0 %v9759_v23 }
 0xb89   : > { %v7120_v7 = vpack.c.bf16 %v7103_v62, %v7102_v30 }
 0xb8a   : > { %v4157_v17 = vpop.permute.xlu1 %4156 }
 0xb8b   : > { %4238 = vst.msk [vmem:[#allocation3 + $0x78] sm:$0xff] %vm4222_vm1, %v4157_v17  ;;  %9529 = vmatprep.mubr.msk.bf16.mxu1 %vm1160_vm0, %v7120_v7  ;;  %v5893_v15 = vpop.permute.xlu0 %5892  ;;  %9546 = vmatpush3.bf16.msra.mxu0 %v9759_v23 }
 0xb8c   : > { %5989 = vst.msk [vmem:[#allocation3] sm:$0xff] %vm5988_vm2, %v5893_v15  ;;  %9530 = vmatmul.mubr.msk.bf16.vlgmr.msra.gmra.mrb[184].mxu1 %vm1160_vm0, %v7121_v51  ;;  %9547 = vmatprep.subr.bf16.mxu0 %v9760_v19 }
 0xb8e   : > { %v5919_v36 = vpop.permute.xlu1 %5918 }
 0xb8f   : > { %6002 = vst.msk [vmem:[#allocation3 + $0x68] sm:$0xff] %vm5988_vm2, %v5919_v36  ;;  %v5897_v20 = vpop.permute.xlu0 %5896  ;;  %9548 = vmatpush3.bf16.msra.mxu0 %v9760_v19 }
 0xb90   : > { %5991 = vst.msk [vmem:[#allocation3 + $0x10] sm:$0xff] %vm5988_vm2, %v5897_v20 }
 0xb92   : > { %v5923_v29 = vpop.permute.xlu1 %5922 }
 0xb93   : > { %6004 = vst.msk [vmem:[#allocation3 + $0x78] sm:$0xff] %vm5988_vm2, %v5923_v29  ;;  %v4135_v16 = vpop.permute.xlu0 %4134 }
 0xb94   : > { %4227 = vst.msk [vmem:[#allocation3 + $0x20] sm:$0xff] %vm4222_vm1, %v4135_v16 }
 0xb96   : > { %v4161_v8 = vpop.permute.xlu1 %4160 }
 0xb97   : > { %4240 = vst.msk [vmem:[#allocation3 + $0x88] sm:$0xff] %vm4222_vm1, %v4161_v8  ;;  %v4139_v44 = vpop.permute.xlu0 %4138 }
 0xb98   : > { %4229 = vst.msk [vmem:[#allocation3 + $0x30] sm:$0xff] %vm4222_vm1, %v4139_v44 }
 0xb9a   : > { %v4165_v12 = vpop.permute.xlu1 %4164 }
 0xb9b   : > { %4242 = vst.msk [vmem:[#allocation3 + $0x98] sm:$0xff] %vm4222_vm1, %v4165_v12  ;;  %v5901_v4 = vpop.permute.xlu0 %5900 }
 0xb9c   : > { %5993 = vst.msk [vmem:[#allocation3 + $0x20] sm:$0xff] %vm5988_vm2, %v5901_v4 }
 0xb9e   : > { %v5927_v56 = vpop.permute.xlu1 %5926 }
 0xb9f   : > { %6006 = vst.msk [vmem:[#allocation3 + $0x88] sm:$0xff] %vm5988_vm2, %v5927_v56  ;;  %v5905_v39 = vpop.permute.xlu0 %5904 }
 0xba0   : > { %5995 = vst.msk [vmem:[#allocation3 + $0x30] sm:$0xff] %vm5988_vm2, %v5905_v39 }
 0xba2   : > { %v5931_v43 = vpop.permute.xlu1 %5930 }
 0xba3   : > { %6008 = vst.msk [vmem:[#allocation3 + $0x98] sm:$0xff] %vm5988_vm2, %v5931_v43  ;;  %v4143_v50 = vpop.permute.xlu0 %4142 }
 0xba4   : > { %4231 = vst.msk [vmem:[#allocation3 + $0x40] sm:$0xff] %vm4222_vm1, %v4143_v50 }
 0xba6   : > { %v4169_v2 = vpop.permute.xlu1 %4168 }
 0xba7   : > { %4244 = vst.msk [vmem:[#allocation3 + $0xa8] sm:$0xff] %vm4222_vm1, %v4169_v2  ;;  %v4147_v53 = vpop.permute.xlu0 %4146 }
 0xba8   : > { %4233 = vst.msk [vmem:[#allocation3 + $0x50] sm:$0xff] %vm4222_vm1, %v4147_v53 }
 0xbaa   : > { %v4173_v9 = vpop.permute.xlu1 %4172 }
 0xbab   : > { %4246 = vst.msk [vmem:[#allocation3 + $0xb8] sm:$0xff] %vm4222_vm1, %v4173_v9  ;;  %v5909_v22 = vpop.permute.xlu0 %5908 }
 0xbac   : > { %5997 = vst.msk [vmem:[#allocation3 + $0x40] sm:$0xff] %vm5988_vm2, %v5909_v22  ;;  %v14014_v22 = vld [vmem:[#allocation72_spill] sm:$0xff] }
 0xbae   : > { %v5935_v32 = vpop.permute.xlu1 %5934 }
 0xbaf   : > { %6010 = vst.msk [vmem:[#allocation3 + $0xa8] sm:$0xff] %vm5988_vm2, %v5935_v32  ;;  %v5913_v60 = vpop.permute.xlu0 %5912  ;;  %v14015_v32 = vld [vmem:[#allocation22_spill] sm:$0xff] }
 0xbb0   : > { %5999 = vst.msk [vmem:[#allocation3 + $0x50] sm:$0xff] %vm5988_vm2, %v5913_v60  ;;  %v14016_v60 = vld [vmem:[#allocation15_spill] sm:$0xff] }
 0xbb2   : > { %v5939_v34 = vpop.permute.xlu1 %5938 }
 0xbb3   : > { %6012 = vst.msk [vmem:[#allocation3 + $0xb8] sm:$0xff] %vm5988_vm2, %v5939_v34  ;;  %v4151_v47 = vpop.permute.xlu0 %4150  ;;  %v14017_v34 = vld [vmem:[#allocation14_spill] sm:$0xff] }
 0xbb4   : > { %4235 = vst.msk [vmem:[#allocation3 + $0x60] sm:$0xff] %vm4222_vm1, %v4151_v47 }
 0xbb6   : > { %v4177_v26 = vpop.permute.xlu1 %4176 }
 0xbb7   : > { %4248 = vst.msk [vmem:[#allocation3 + $0xc8] sm:$0xff] %vm4222_vm1, %v4177_v26  ;;  %v4155_v54 = vpop.permute.xlu0 %4154 }
 0xbb8   : > { %4237 = vst.msk [vmem:[#allocation3 + $0x70] sm:$0xff] %vm4222_vm1, %v4155_v54 }
 0xbba   : > { %v4181_v42 = vpop.permute.xlu1 %4180 }
 0xbbb   : > { %4250 = vst.msk [vmem:[#allocation3 + $0xd8] sm:$0xff] %vm4222_vm1, %v4181_v42  ;;  %v5917_v10 = vpop.permute.xlu0 %5916 }
 0xbbc   : > { %6001 = vst.msk [vmem:[#allocation3 + $0x60] sm:$0xff] %vm5988_vm2, %v5917_v10 }
 0xbbe   : > { %v5943_v3 = vpop.permute.xlu1 %5942 }
 0xbbf   : > { %6014 = vst.msk [vmem:[#allocation3 + $0xc8] sm:$0xff] %vm5988_vm2, %v5943_v3  ;;  %v5921_v31 = vpop.permute.xlu0 %5920 }
 0xbc0   : > { %6003 = vst.msk [vmem:[#allocation3 + $0x70] sm:$0xff] %vm5988_vm2, %v5921_v31 }
 0xbc2   : > { %v5947_v40 = vpop.permute.xlu1 %5946 }
 0xbc3   : > { %6016 = vst.msk [vmem:[#allocation3 + $0xd8] sm:$0xff] %vm5988_vm2, %v5947_v40  ;;  %v4159_v63 = vpop.permute.xlu0 %4158 }
 0xbc4   : > { %4239 = vst.msk [vmem:[#allocation3 + $0x80] sm:$0xff] %vm4222_vm1, %v4159_v63 }
 0xbc6   : > { %v4185_v35 = vpop.permute.xlu1 %4184 }
 0xbc7   : > { %4252 = vst.msk [vmem:[#allocation3 + $0xe8] sm:$0xff] %vm4222_vm1, %v4185_v35  ;;  %v4163_v37 = vpop.permute.xlu0 %4162 }
 0xbc8   : > { %4241 = vst.msk [vmem:[#allocation3 + $0x90] sm:$0xff] %vm4222_vm1, %v4163_v37 }
 0xbca   : > { %v4189_v18 = vpop.permute.xlu1 %4188 }
 0xbcb   : > { %4254 = vst.msk [vmem:[#allocation3 + $0xf8] sm:$0xff] %vm4222_vm1, %v4189_v18  ;;  %v5925_v61 = vpop.permute.xlu0 %5924 }
 0xbcc   : > { %6005 = vst.msk [vmem:[#allocation3 + $0x80] sm:$0xff] %vm5988_vm2, %v5925_v61 }
 0xbcf   : > { %v5929_v0 = vpop.permute.xlu0 %5928 }
 0xbd0   : > { %6007 = vst.msk [vmem:[#allocation3 + $0x90] sm:$0xff] %vm5988_vm2, %v5929_v0 }
 0xbd3   : > { %v4167_v49 = vpop.permute.xlu0 %4166 }
 0xbd4   : > { %4243 = vst.msk [vmem:[#allocation3 + $0xa0] sm:$0xff] %vm4222_vm1, %v4167_v49 }
 0xbd7   : > { %v4171_v14 = vpop.permute.xlu0 %4170 }
 0xbd8   : > { %4245 = vst.msk [vmem:[#allocation3 + $0xb0] sm:$0xff] %vm4222_vm1, %v4171_v14 }
 0xbdb   : > { %v5933_v1 = vpop.permute.xlu0 %5932 }
 0xbdc   : > { %6009 = vst.msk [vmem:[#allocation3 + $0xa0] sm:$0xff] %vm5988_vm2, %v5933_v1 }
 0xbdf   : > { %v5937_v33 = vpop.permute.xlu0 %5936 }
 0xbe0   : > { %6011 = vst.msk [vmem:[#allocation3 + $0xb0] sm:$0xff] %vm5988_vm2, %v5937_v33 }
 0xbe3   : > { %v4175_v59 = vpop.permute.xlu0 %4174 }
 0xbe4   : > { %4247 = vst.msk [vmem:[#allocation3 + $0xc0] sm:$0xff] %vm4222_vm1, %v4175_v59 }
 0xbe7   : > { %v4179_v48 = vpop.permute.xlu0 %4178 }
 0xbe8   : > { %4249 = vst.msk [vmem:[#allocation3 + $0xd0] sm:$0xff] %vm4222_vm1, %v4179_v48 }
 0xbeb   : > { %v5941_v6 = vpop.permute.xlu0 %5940 }
 0xbec   : > { %6013 = vst.msk [vmem:[#allocation3 + $0xc0] sm:$0xff] %vm5988_vm2, %v5941_v6 }
 0xbef   : > { %v5945_v13 = vpop.permute.xlu0 %5944 }
 0xbf0   : > { %6015 = vst.msk [vmem:[#allocation3 + $0xd0] sm:$0xff] %vm5988_vm2, %v5945_v13 }
 0xbf3   : > { %v4183_v5 = vpop.permute.xlu0 %4182 }
 0xbf4   : > { %4251 = vst.msk [vmem:[#allocation3 + $0xe0] sm:$0xff] %vm4222_vm1, %v4183_v5 }
 0xbf7   : > { %v4187_v11 = vpop.permute.xlu0 %4186 }
 0xbf8   : > { %4253 = vst.msk [vmem:[#allocation3 + $0xf0] sm:$0xff] %vm4222_vm1, %v4187_v11 }
 0xbfa   : > { %v9475_v52 = vpop.f32.mrb[148].mxu0 }
 0xbfb   : > { %7662 = vrot.lane.b32.xlu0 %v9475_v52, %s10338_s11  ;;  %v7170_v38 = vpop.f32.mrb[149].mxu0 }
 0xbfc   : > { %v9476_v28 = vpop.f32.mrb[150].mxu0 }
 0xbfd   : > { %7664 = vrot.lane.b32.xlu1 %v9476_v28, %s10338_s11  ;;  %v7173_v24 = vpop.f32.mrb[151].mxu0 }
 0xbff   : > { %7658 = vrot.lane.b32.xlu0 %v7170_v38, %s10338_s11 }
 0xc01   : > { %7660 = vrot.lane.b32.xlu1 %v7173_v24, %s10338_s11 }
 0xc06   : > { %v9483_v27 = vpop.f32.mrb[172].mxu1 }
 0xc07   : > { %7670 = vrot.lane.b32.xlu0 %v9483_v27, %s10338_s11  ;;  %v7233_v45 = vpop.f32.mrb[173].mxu1 }
 0xc08   : > { %v9484_v30 = vpop.f32.mrb[174].mxu1 }
 0xc09   : > { %7672 = vrot.lane.b32.xlu1 %v9484_v30, %s10338_s11  ;;  %v7236_v62 = vpop.f32.mrb[175].mxu1 }
 0xc0a   : > { %v9491_v55 = vpop.f32.mrb[152].mxu0 }
 0xc0b   : > { %7678 = vrot.lane.b32.xlu0 %v9491_v55, %s10338_s11  ;;  %v7296_v7 = vpop.f32.mrb[153].mxu0 }
 0xc0c   : > { %v9492_v17 = vpop.f32.mrb[154].mxu0 }
 0xc0d   : > { %7680 = vrot.lane.b32.xlu1 %v9492_v17, %s10338_s11  ;;  %v7299_v51 = vpop.f32.mrb[155].mxu0 }
 0xc0f   : > { %7666 = vrot.lane.b32.xlu0 %v7233_v45, %s10338_s11 }
 0xc11   : > { %7668 = vrot.lane.b32.xlu1 %v7236_v62, %s10338_s11 }
 0xc13   : > { %7674 = vrot.lane.b32.xlu0 %v7296_v7, %s10338_s11 }
 0xc15   : > { %7676 = vrot.lane.b32.xlu1 %v7299_v51, %s10338_s11 }
 0xc1a   : > { %v9499_v15 = vpop.f32.mrb[176].mxu1 }
 0xc1b   : > { %v7359_v36 = vpop.f32.mrb[177].mxu1  ;;  %7686 = vrot.lane.b32.xlu0 %v9499_v15, %s10338_s11 }
 0xc1c   : > { %v9500_v20 = vpop.f32.mrb[178].mxu1 }
 0xc1d   : > { %v7362_v29 = vpop.f32.mrb[179].mxu1  ;;  %7688 = vrot.lane.b32.xlu1 %v9500_v20, %s10338_s11 }
 0xc1e   : > { %v9507_v16 = vpop.f32.mrb[156].mxu0 }
 0xc1f   : > { %7694 = vrot.lane.b32.xlu0 %v9507_v16, %s10338_s11  ;;  %v7422_v8 = vpop.f32.mrb[157].mxu0 }
 0xc20   : > { %v9508_v44 = vpop.f32.mrb[158].mxu0 }
 0xc21   : > { %7696 = vrot.lane.b32.xlu1 %v9508_v44, %s10338_s11  ;;  %v7425_v12 = vpop.f32.mrb[159].mxu0 }
 0xc23   : > { %7682 = vrot.lane.b32.xlu0 %v7359_v36, %s10338_s11 }
 0xc25   : > { %7684 = vrot.lane.b32.xlu1 %v7362_v29, %s10338_s11 }
 0xc26   : > { %v9515_v4 = vpop.f32.mrb[180].mxu1 }
 0xc27   : > { %7690 = vrot.lane.b32.xlu0 %v7422_v8, %s10338_s11  ;;  %v7485_v56 = vpop.f32.mrb[181].mxu1 }
 0xc28   : > { %v9516_v39 = vpop.f32.mrb[182].mxu1 }
 0xc29   : > { %7692 = vrot.lane.b32.xlu1 %v7425_v12, %s10338_s11  ;;  %v7488_v43 = vpop.f32.mrb[183].mxu1 }
 0xc2a   : > { %v9523_v50 = vpop.f32.mrb[160].mxu0 }
 0xc2b   : > { %7702 = vrot.lane.b32.xlu0 %v9515_v4, %s10338_s11  ;;  %v7548_v2 = vpop.f32.mrb[161].mxu0 }
 0xc2c   : > { %v9524_v53 = vpop.f32.mrb[162].mxu0 }
 0xc2d   : > { %7704 = vrot.lane.b32.xlu1 %v9516_v39, %s10338_s11  ;;  %v7551_v9 = vpop.f32.mrb[163].mxu0 }
 0xc2f   : > { %7710 = vrot.lane.b32.xlu0 %v9523_v50, %s10338_s11 }
 0xc31   : > { %7712 = vrot.lane.b32.xlu1 %v9524_v53, %s10338_s11 }
 0xc33   : > { %7698 = vrot.lane.b32.xlu0 %v7485_v56, %s10338_s11 }
 0xc35   : > { %7700 = vrot.lane.b32.xlu1 %v7488_v43, %s10338_s11 }
 0xc37   : > { %5948 = vrot.lane.b32.xlu0 %v14014_v22, %s10339_s28 }
 0xc39   : > { %5950 = vrot.lane.b32.xlu1 %v14015_v32, %s10339_s28 }
 0xc3b   : > { %7706 = vrot.lane.b32.xlu0 %v7548_v2, %s10338_s11 }
 0xc3d   : > { %7708 = vrot.lane.b32.xlu1 %v7551_v9, %s10338_s11 }
 0xc3f   : > { %5952 = vrot.lane.b32.xlu0 %v14016_v60, %s10339_s28 }
 0xc41   : > { %5954 = vrot.lane.b32.xlu1 %v14017_v34, %s10339_s28 }
 0xc5f   : > { %v9531_v47 = vpop.f32.mrb[184].mxu1 }
 0xc60   : > { %v7611_v26 = vpop.f32.mrb[185].mxu1 }
 0xc61   : > { %7714 = vrot.lane.b32.xlu0 %v7611_v26, %s10338_s11  ;;  %v9532_v54 = vpop.f32.mrb[186].mxu1 }
 0xc62   : > { %v7614_v42 = vpop.f32.mrb[187].mxu1 }
 0xc63   : > { %7716 = vrot.lane.b32.xlu1 %v7614_v42, %s10338_s11 }
 0xc65   : > { %7718 = vrot.lane.b32.xlu0 %v9531_v47, %s10338_s11 }
 0xc67   : > { %7720 = vrot.lane.b32.xlu1 %v9532_v54, %s10338_s11  ;;  %s245_s11 = sand.u32 1, %s10327_s22  }
 0xc68   : > { %s8308_s19 = sshll.u32 %s245_s11, 7  ;;  %s13575_s25 = scalar_lea.sflag [#allocation5], %s245_s11 }
 0xc69   : > { %s13518_s13 = scalar_lea.vmem [#allocation4], %s8308_s19 }
 0xc6a   : > { %s8242_s26 = sshll.u32 %s13518_s13, 4  ;;  %s13569_s26 = int_to_ptr.vmem [resolvable:$true] %s8242_s26 }
 0xc6b   : > { %s10273_s12 = scalar_lea.vmem %s13569_s26, 2048  ;;  %p10280_p0 = scmp.lt.s32.totalorder %s13569_s26, %s10278_s15 }
 0xc6c   : > { %p10274_p11 = scmp.ne.s32.totalorder %s13569_s26, %s10273_s12  ;;  %p10281_p1 = scmp.lt.s32.totalorder %s10279_s16, %s10273_s12 }
 0xc6d   : > { %v7663_v10 = vpop.permute.xlu0 %7662 }
 0xc6e   : > { %7757 = vst.msk [vmem:[#allocation3 + $0x10] sm:$0xff] %vm7754_vm3, %v7663_v10  ;;  %p10275_p12 = pnand %p10274_p11, %p10416_p5  ;;  %p10282_p2 = por %p10281_p1, %p10280_p0 }
 0xc6f   : > { %v7665_v3 = vpop.permute.xlu1 %7664 }
 0xc70   : > { %7758 = vst.msk [vmem:[#allocation3 + $0x18] sm:$0xff] %vm7754_vm3, %v7665_v3  ;;  %p10276_p13 = pneg %p10275_p12 }
 0xc71   : > { %v7659_v31 = vpop.permute.xlu0 %7658 }
 0xc72   : > { %7755 = vst.msk [vmem:[#allocation3] sm:$0xff] %vm7754_vm3, %v7659_v31  ;;  %p10283_p3 = pnand %p10282_p2, %p10276_p13 }
 0xc73   : > { %v7661_v40 = vpop.permute.xlu1 %7660 }
 0xc74   : > { %7756 = vst.msk [vmem:[#allocation3 + $0x8] sm:$0xff] %vm7754_vm3, %v7661_v40 }
 0xc75   : > { %v7789_v49 = vld [vmem:[#allocation3 + $0x10] sm:$0xff] }
 0xc77   : > { %v7790_v35 = vld [vmem:[#allocation3 + $0x18] sm:$0xff] }
 0xc78   : > { %v7820_v1 = vpack.c.bf16 %v7790_v35, %v7789_v49 }
 0xc79   : > { %v7671_v63 = vpop.permute.xlu0 %7670  ;;  %v7787_v18 = vld [vmem:[#allocation3] sm:$0xff] }
 0xc7a   : > { %7761 = vst.msk [vmem:[#allocation3 + $0x30] sm:$0xff] %vm7754_vm3, %v7671_v63 }
 0xc7b   : > { %v7673_v37 = vpop.permute.xlu1 %7672  ;;  %v7788_v61 = vld [vmem:[#allocation3 + $0x8] sm:$0xff] }
 0xc7c   : > { %7762 = vst.msk [vmem:[#allocation3 + $0x38] sm:$0xff] %vm7754_vm3, %v7673_v37  ;;  %v7819_v0 = vpack.c.bf16 %v7788_v61, %v7787_v18 }
 0xc7d   : > { %v7679_v14 = vpop.permute.xlu0 %7678 }
 0xc7e   : > { %7765 = vst.msk [vmem:[#allocation3 + $0x50] sm:$0xff] %vm7754_vm3, %v7679_v14  ;;  %9549 = vmatprep.mubr.bf16.mxu0 %v7819_v0 }
 0xc7f   : > { %v7681_v33 = vpop.permute.xlu1 %7680  ;;  %9550 = vmatmul.mubr.bf16.vlgmr.msra.gmra.mrb[164].mxu0 %v7820_v1 }
 0xc80   : > { %7766 = vst.msk [vmem:[#allocation3 + $0x58] sm:$0xff] %vm7754_vm3, %v7681_v33 }
 0xc81   : > { %v7667_v46 = vpop.permute.xlu0 %7666  ;;  %v7793_v25 = vld [vmem:[#allocation3 + $0x30] sm:$0xff] }
 0xc82   : > { %7759 = vst.msk [vmem:[#allocation3 + $0x20] sm:$0xff] %vm7754_vm3, %v7667_v46 }
 0xc83   : > { %v7669_v58 = vpop.permute.xlu1 %7668  ;;  %v7794_v48 = vld [vmem:[#allocation3 + $0x38] sm:$0xff] }
 0xc84   : > { %7760 = vst.msk [vmem:[#allocation3 + $0x28] sm:$0xff] %vm7754_vm3, %v7669_v58  ;;  %v7822_v21 = vpack.c.bf16 %v7794_v48, %v7793_v25 }
 0xc85   : > { %v7675_v59 = vpop.permute.xlu0 %7674  ;;  %v7797_v27 = vld [vmem:[#allocation3 + $0x50] sm:$0xff] }
 0xc86   : > { %7763 = vst.msk [vmem:[#allocation3 + $0x40] sm:$0xff] %vm7754_vm3, %v7675_v59 }
 0xc87   : > { %v7677_v57 = vpop.permute.xlu1 %7676  ;;  %v7798_v28 = vld [vmem:[#allocation3 + $0x58] sm:$0xff] }
 0xc88   : > { %7764 = vst.msk [vmem:[#allocation3 + $0x48] sm:$0xff] %vm7754_vm3, %v7677_v57  ;;  %v7824_v30 = vpack.c.bf16 %v7798_v28, %v7797_v27 }
 0xc89   : > { %v7791_v41 = vld [vmem:[#allocation3 + $0x20] sm:$0xff] }
 0xc8b   : > { %v7792_v6 = vld [vmem:[#allocation3 + $0x28] sm:$0xff] }
 0xc8c   : > { %v7821_v13 = vpack.c.bf16 %v7792_v6, %v7791_v41 }
 0xc8d   : > { %v7687_v5 = vpop.permute.xlu0 %7686  ;;  %v7795_v11 = vld [vmem:[#allocation3 + $0x40] sm:$0xff] }
 0xc8e   : > { %7769 = vst.msk [vmem:[#allocation3 + $0x70] sm:$0xff] %vm7754_vm3, %v7687_v5  ;;  %9553 = vmatprep.mubr.bf16.mxu0 %v7821_v13  ;;  %v13510_v13 = vld [vmem:[%s13622_s4] ss:$0 sm:$0xff] }
 0xc8f   : > { %v7689_v23 = vpop.permute.xlu1 %7688  ;;  %9554 = vmatmul.mubr.bf16.gmra.mrb[168].mxu0 %v7822_v21  ;;  %v7796_v52 = vld [vmem:[#allocation3 + $0x48] sm:$0xff] }
 0xc90   : > { %7770 = vst.msk [vmem:[#allocation3 + $0x78] sm:$0xff] %vm7754_vm3, %v7689_v23  ;;  %v7823_v38 = vpack.c.bf16 %v7796_v52, %v7795_v11 }
 0xc91   : > { %v7695_v19 = vpop.permute.xlu0 %7694 }
 0xc92   : > { %7773 = vst.msk [vmem:[#allocation3 + $0x90] sm:$0xff] %vm7754_vm3, %v7695_v19  ;;  %9557 = vmatprep.mubr.bf16.mxu0 %v7823_v38 }
 0xc93   : > { %v7697_v24 = vpop.permute.xlu1 %7696 }
 0xc94   : > { %7774 = vst.msk [vmem:[#allocation3 + $0x98] sm:$0xff] %vm7754_vm3, %v7697_v24 }
 0xc95   : > { %v7683_v45 = vpop.permute.xlu0 %7682  ;;  %v7801_v16 = vld [vmem:[#allocation3 + $0x70] sm:$0xff] }
 0xc96   : > { %7767 = vst.msk [vmem:[#allocation3 + $0x60] sm:$0xff] %vm7754_vm3, %v7683_v45 }
 0xc97   : > { %v7685_v62 = vpop.permute.xlu1 %7684  ;;  %9558 = vmatmul.mubr.bf16.gmra.mrb[172].mxu0 %v7824_v30  ;;  %v7802_v51 = vld [vmem:[#allocation3 + $0x78] sm:$0xff] }
 0xc98   : > { %7768 = vst.msk [vmem:[#allocation3 + $0x68] sm:$0xff] %vm7754_vm3, %v7685_v62  ;;  %v7826_v44 = vpack.c.bf16 %v7802_v51, %v7801_v16 }
 0xc99   : > { %v7691_v55 = vpop.permute.xlu0 %7690  ;;  %v7805_v53 = vld [vmem:[#allocation3 + $0x90] sm:$0xff] }
 0xc9a   : > { %7771 = vst.msk [vmem:[#allocation3 + $0x80] sm:$0xff] %vm7754_vm3, %v7691_v55 }
 0xc9b   : > { %v7693_v7 = vpop.permute.xlu1 %7692  ;;  %v7806_v50 = vld [vmem:[#allocation3 + $0x98] sm:$0xff] }
 0xc9c   : > { %7772 = vst.msk [vmem:[#allocation3 + $0x88] sm:$0xff] %vm7754_vm3, %v7693_v7  ;;  %v7828_v22 = vpack.c.bf16 %v7806_v50, %v7805_v53 }
 0xc9d   : > { %v7703_v17 = vpop.permute.xlu0 %7702  ;;  %v7799_v36 = vld [vmem:[#allocation3 + $0x60] sm:$0xff] }
 0xc9e   : > { %7777 = vst.msk [vmem:[#allocation3 + $0xb0] sm:$0xff] %vm7754_vm3, %v7703_v17 }
 0xc9f   : > { %v7705_v15 = vpop.permute.xlu1 %7704  ;;  %v7800_v20 = vld [vmem:[#allocation3 + $0x68] sm:$0xff] }
 0xca0   : > { %7778 = vst.msk [vmem:[#allocation3 + $0xb8] sm:$0xff] %vm7754_vm3, %v7705_v15  ;;  %v7825_v29 = vpack.c.bf16 %v7800_v20, %v7799_v36 }
 0xca1   : > { %v7711_v8 = vpop.permute.xlu0 %7710  ;;  %v7803_v4 = vld [vmem:[#allocation3 + $0x80] sm:$0xff] }
 0xca2   : > { %7781 = vst.msk [vmem:[#allocation3 + $0xd0] sm:$0xff] %vm7754_vm3, %v7711_v8  ;;  %9561 = vmatprep.mubr.bf16.mxu0 %v7825_v29 }
 0xca3   : > { %v7713_v12 = vpop.permute.xlu1 %7712  ;;  %9562 = vmatmul.mubr.bf16.gmra.mrb[176].mxu0 %v7826_v44  ;;  %v7804_v56 = vld [vmem:[#allocation3 + $0x88] sm:$0xff] }
 0xca4   : > { %7782 = vst.msk [vmem:[#allocation3 + $0xd8] sm:$0xff] %vm7754_vm3, %v7713_v12  ;;  %v7827_v39 = vpack.c.bf16 %v7804_v56, %v7803_v4 }
 0xca5   : > { %v7699_v43 = vpop.permute.xlu0 %7698  ;;  %v7809_v10 = vld [vmem:[#allocation3 + $0xb0] sm:$0xff] }
 0xca6   : > { %7775 = vst.msk [vmem:[#allocation3 + $0xa0] sm:$0xff] %vm7754_vm3, %v7699_v43  ;;  %9565 = vmatprep.mubr.bf16.mxu0 %v7827_v39 }
 0xca7   : > { %v7701_v2 = vpop.permute.xlu1 %7700  ;;  %v7810_v34 = vld [vmem:[#allocation3 + $0xb8] sm:$0xff] }
 0xca8   : > { %7776 = vst.msk [vmem:[#allocation3 + $0xa8] sm:$0xff] %vm7754_vm3, %v7701_v2  ;;  %v7830_v31 = vpack.c.bf16 %v7810_v34, %v7809_v10 }
 0xca9   : > { %v5949_v9 = vpop.permute.xlu0 %5948  ;;  %v7813_v61 = vld [vmem:[#allocation3 + $0xd0] sm:$0xff] }
 0xcaa   : > { %6017 = vst.msk [vmem:[#allocation3 + $0xe0] sm:$0xff] %vm5988_vm2, %v5949_v9 }
 0xcab   : > { %v5951_v32 = vpop.permute.xlu1 %5950  ;;  %9566 = vmatmul.mubr.bf16.gmra.mrb[180].mxu0 %v7828_v22  ;;  %v7814_v63 = vld [vmem:[#allocation3 + $0xd8] sm:$0xff] }
 0xcac   : > { %6018 = vst.msk [vmem:[#allocation3 + $0xe8] sm:$0xff] %vm5988_vm2, %v5951_v32  ;;  %v7832_v0 = vpack.c.bf16 %v7814_v63, %v7813_v61 }
 0xcad   : > { %v7707_v60 = vpop.permute.xlu0 %7706  ;;  %v7807_v26 = vld [vmem:[#allocation3 + $0xa0] sm:$0xff] }
 0xcae   : > { %7779 = vst.msk [vmem:[#allocation3 + $0xc0] sm:$0xff] %vm7754_vm3, %v7707_v60 }
 0xcaf   : > { %v7709_v47 = vpop.permute.xlu1 %7708  ;;  %v7808_v54 = vld [vmem:[#allocation3 + $0xa8] sm:$0xff] }
 0xcb0   : > { %7780 = vst.msk [vmem:[#allocation3 + $0xc8] sm:$0xff] %vm7754_vm3, %v7709_v47  ;;  %v7829_v42 = vpack.c.bf16 %v7808_v54, %v7807_v26 }
 0xcb1   : > { %v5953_v3 = vpop.permute.xlu0 %5952 }
 0xcb2   : > { %6019 = vst.msk [vmem:[#allocation3 + $0xf0] sm:$0xff] %vm5988_vm2, %v5953_v3  ;;  %9569 = vmatprep.mubr.bf16.mxu0 %v7829_v42 }
 0xcb3   : > { %v5955_v40 = vpop.permute.xlu1 %5954  ;;  %9570 = vmatmul.mubr.bf16.gmra.mrb[184].mxu0 %v7830_v31 }
 0xcb4   : > { %6020 = vst.msk [vmem:[#allocation3 + $0xf8] sm:$0xff] %vm5988_vm2, %v5955_v40 }
 0xcb5   : > { %v7811_v35 = vld [vmem:[#allocation3 + $0xc0] sm:$0xff] }
 0xcb7   : > { %v7812_v37 = vld [vmem:[#allocation3 + $0xc8] sm:$0xff] }
 0xcb8   : > { %v7831_v18 = vpack.c.bf16 %v7812_v37, %v7811_v35 }
 0xcba   : > { %9573 = vmatprep.mubr.bf16.mxu0 %v7831_v18 }
 0xcbb   : > { %9574 = vmatmul.mubr.bf16.gmra.mrb[188].mxu0 %v7832_v0 }
 0xcd3   : > { %v7715_v49 = vpop.permute.xlu0 %7714 }
 0xcd4   : > { %7783 = vst.msk [vmem:[#allocation3 + $0xe0] sm:$0xff] %vm7754_vm3, %v7715_v49 }
 0xcd5   : > { %v7717_v14 = vpop.permute.xlu1 %7716 }
 0xcd6   : > { %7784 = vst.msk [vmem:[#allocation3 + $0xe8] sm:$0xff] %vm7754_vm3, %v7717_v14 }
 0xcd7   : > { %v7719_v1 = vpop.permute.xlu0 %7718 }
 0xcd8   : > { %7785 = vst.msk [vmem:[#allocation3 + $0xf0] sm:$0xff] %vm7754_vm3, %v7719_v1 }
 0xcd9   : > { %v7721_v33 = vpop.permute.xlu1 %7720 }
 0xcda   : > { %7786 = vst.msk [vmem:[#allocation3 + $0xf8] sm:$0xff] %vm7754_vm3, %v7721_v33 }
 0xcdb   : > { %v7815_v46 = vld [vmem:[#allocation3 + $0xe0] sm:$0xff] }
 0xcdd   : > { %v7816_v58 = vld [vmem:[#allocation3 + $0xe8] sm:$0xff] }
 0xcde   : > { %v7833_v59 = vpack.c.bf16 %v7816_v58, %v7815_v46 }
 0xcdf   : > { %v7817_v57 = vld [vmem:[#allocation3 + $0xf0] sm:$0xff] }
 0xce0   : > { %9577 = vmatprep.mubr.bf16.mxu0 %v7833_v59 }
 0xce1   : > { %v7818_v48 = vld [vmem:[#allocation3 + $0xf8] sm:$0xff] }
 0xce2   : > { %v7834_v41 = vpack.c.bf16 %v7818_v48, %v7817_v57 }
 0xce4   : > { %9578 = vmatmul.mubr.bf16.gmra.mrb[192].mxu0 %v7834_v41 }
 0xd52   : > { %v9551_v6 = vpop.f32.mrb[164].mxu0 }
 0xd53   : > { %v7940_v25 = vpop.f32.mrb[165].mxu0  ;;  %v7949_v21 = vadd.f32 %v9551_v6, %v13510_v13 }
 0xd54   : > { %v9552_v5 = vpop.f32.mrb[166].mxu0  ;;  %v7941_v52 = vadd.f32 %v13510_v13, %v7940_v25 }
 0xd55   : > { %v7952_v23 = vadd.f32 %v9552_v5, %v13510_v13  ;;  %v7943_v11 = vpop.f32.mrb[167].mxu0 }
 0xd56   : > { %v7944_v38 = vadd.f32 %v13510_v13, %v7943_v11 }
 0xd57   : > { %v8582_v19 = vpack.c.bf16 %v7952_v23, %v7949_v21 }
 0xd58   : > { %v8577_v28 = vpack.c.bf16 %v7944_v38, %v7941_v52 }
 0xd59   : > { %8654 = vst [vmem:[%s13518_s13 + $0x8] sm:$0xff] %v8582_v19  }
 0xd5a   : > { %8578 = vst [vmem:[%s13518_s13] sm:$0xff] %v8577_v28  }
 0xd62   : > { %v9555_v24 = vpop.f32.mrb[168].mxu0 }
 0xd63   : > { %v7956_v27 = vpop.f32.mrb[169].mxu0  ;;  %v7965_v30 = vadd.f32 %v9555_v24, %v13510_v13 }
 0xd64   : > { %v9556_v45 = vpop.f32.mrb[170].mxu0  ;;  %v7957_v7 = vadd.f32 %v13510_v13, %v7956_v27 }
 0xd65   : > { %v7968_v62 = vadd.f32 %v9556_v45, %v13510_v13  ;;  %v7959_v55 = vpop.f32.mrb[171].mxu0 }
 0xd66   : > { %v7960_v17 = vadd.f32 %v13510_v13, %v7959_v55 }
 0xd67   : > { %v8592_v51 = vpack.c.bf16 %v7968_v62, %v7965_v30 }
 0xd68   : > { %v8587_v15 = vpack.c.bf16 %v7960_v17, %v7957_v7 }
 0xd69   : > { %8656 = vst [vmem:[%s13518_s13 + $0x18] sm:$0xff] %v8592_v51  }
 0xd6a   : > { %8655 = vst [vmem:[%s13518_s13 + $0x10] sm:$0xff] %v8587_v15   ;;  %v9559_v36 = vpop.f32.mrb[172].mxu0 }
 0xd6b   : > { %v7972_v20 = vpop.f32.mrb[173].mxu0  ;;  %v7981_v16 = vadd.f32 %v9559_v36, %v13510_v13 }
 0xd6c   : > { %v9560_v29 = vpop.f32.mrb[174].mxu0  ;;  %v7973_v12 = vadd.f32 %v13510_v13, %v7972_v20 }
 0xd6d   : > { %v7984_v8 = vadd.f32 %v9560_v29, %v13510_v13  ;;  %v7975_v44 = vpop.f32.mrb[175].mxu0 }
 0xd6e   : > { %v7976_v4 = vadd.f32 %v13510_v13, %v7975_v44 }
 0xd6f   : > { %v8602_v56 = vpack.c.bf16 %v7984_v8, %v7981_v16 }
 0xd70   : > { %v8597_v39 = vpack.c.bf16 %v7976_v4, %v7973_v12 }
 0xd71   : > { %8658 = vst [vmem:[%s13518_s13 + $0x28] sm:$0xff] %v8602_v56  }
 0xd72   : > { %8657 = vst [vmem:[%s13518_s13 + $0x20] sm:$0xff] %v8597_v39  }
 0xd76   : > { %v9563_v43 = vpop.f32.mrb[176].mxu0 }
 0xd77   : > { %v7988_v50 = vpop.f32.mrb[177].mxu0  ;;  %v7997_v53 = vadd.f32 %v9563_v43, %v13510_v13 }
 0xd78   : > { %v9564_v2 = vpop.f32.mrb[178].mxu0  ;;  %v7989_v32 = vadd.f32 %v13510_v13, %v7988_v50 }
 0xd79   : > { %v8000_v9 = vadd.f32 %v9564_v2, %v13510_v13  ;;  %v7991_v22 = vpop.f32.mrb[179].mxu0 }
 0xd7a   : > { %v7992_v60 = vadd.f32 %v13510_v13, %v7991_v22 }
 0xd7b   : > { %v8612_v34 = vpack.c.bf16 %v8000_v9, %v7997_v53 }
 0xd7c   : > { %v8607_v47 = vpack.c.bf16 %v7992_v60, %v7989_v32 }
 0xd7d   : > { %8660 = vst [vmem:[%s13518_s13 + $0x38] sm:$0xff] %v8612_v34  }
 0xd7e   : > { %8659 = vst [vmem:[%s13518_s13 + $0x30] sm:$0xff] %v8607_v47   ;;  %v9567_v26 = vpop.f32.mrb[180].mxu0 }
 0xd7f   : > { %v8004_v54 = vpop.f32.mrb[181].mxu0  ;;  %v8013_v10 = vadd.f32 %v9567_v26, %v13510_v13 }
 0xd80   : > { %v9568_v42 = vpop.f32.mrb[182].mxu0  ;;  %v8005_v40 = vadd.f32 %v13510_v13, %v8004_v54 }
 0xd81   : > { %v8016_v3 = vadd.f32 %v9568_v42, %v13510_v13  ;;  %v8007_v31 = vpop.f32.mrb[183].mxu0 }
 0xd82   : > { %v8008_v63 = vadd.f32 %v13510_v13, %v8007_v31 }
 0xd83   : > { %v8622_v35 = vpack.c.bf16 %v8016_v3, %v8013_v10 }
 0xd84   : > { %v8617_v37 = vpack.c.bf16 %v8008_v63, %v8005_v40 }
 0xd85   : > { %8662 = vst [vmem:[%s13518_s13 + $0x48] sm:$0xff] %v8622_v35  }
 0xd86   : > { %8661 = vst [vmem:[%s13518_s13 + $0x40] sm:$0xff] %v8617_v37   ;;  %v9571_v18 = vpop.f32.mrb[184].mxu0 }
 0xd87   : > { %v8020_v61 = vpop.f32.mrb[185].mxu0  ;;  %v8029_v49 = vadd.f32 %v9571_v18, %v13510_v13 }
 0xd88   : > { %v9572_v0 = vpop.f32.mrb[186].mxu0  ;;  %v8021_v33 = vadd.f32 %v13510_v13, %v8020_v61 }
 0xd89   : > { %v8032_v14 = vadd.f32 %v9572_v0, %v13510_v13  ;;  %v8023_v1 = vpop.f32.mrb[187].mxu0 }
 0xd8a   : > { %v8024_v46 = vadd.f32 %v13510_v13, %v8023_v1 }
 0xd8b   : > { %v8632_v58 = vpack.c.bf16 %v8032_v14, %v8029_v49 }
 0xd8c   : > { %v8627_v59 = vpack.c.bf16 %v8024_v46, %v8021_v33 }
 0xd8d   : > { %8664 = vst [vmem:[%s13518_s13 + $0x58] sm:$0xff] %v8632_v58  }
 0xd8e   : > { %8663 = vst [vmem:[%s13518_s13 + $0x50] sm:$0xff] %v8627_v59   ;;  %v9575_v57 = vpop.f32.mrb[188].mxu0 }
 0xd8f   : > { %v8036_v48 = vpop.f32.mrb[189].mxu0  ;;  %v8045_v6 = vadd.f32 %v9575_v57, %v13510_v13 }
 0xd90   : > { %v9576_v41 = vpop.f32.mrb[190].mxu0  ;;  %v8037_v21 = vadd.f32 %v13510_v13, %v8036_v48 }
 0xd91   : > { %v8048_v25 = vadd.f32 %v9576_v41, %v13510_v13  ;;  %v8039_v5 = vpop.f32.mrb[191].mxu0 }
 0xd92   : > { %v8040_v23 = vadd.f32 %v13510_v13, %v8039_v5 }
 0xd93   : > { %v8642_v11 = vpack.c.bf16 %v8048_v25, %v8045_v6 }
 0xd94   : > { %v8637_v52 = vpack.c.bf16 %v8040_v23, %v8037_v21 }
 0xd95   : > { %8666 = vst [vmem:[%s13518_s13 + $0x68] sm:$0xff] %v8642_v11  }
 0xd96   : > { %8665 = vst [vmem:[%s13518_s13 + $0x60] sm:$0xff] %v8637_v52  }
 0xdb7   : > { %v9579_v38 = vpop.f32.mrb[192].mxu0 }
 0xdb8   : > { %v8052_v19 = vpop.f32.mrb[193].mxu0  ;;  %v8061_v24 = vadd.f32 %v9579_v38, %v13510_v13 }
 0xdb9   : > { %v9580_v28 = vpop.f32.mrb[194].mxu0  ;;  %v8053_v30 = vadd.f32 %v13510_v13, %v8052_v19 }
 0xdba   : > { %v8064_v27 = vadd.f32 %v9580_v28, %v13510_v13  ;;  %v8055_v45 = vpop.f32.mrb[195].mxu0 }
 0xdbb   : > { %v8056_v62 = vadd.f32 %v13510_v13, %v8055_v45 }
 0xdbc   : > { %v8652_v55 = vpack.c.bf16 %v8064_v27, %v8061_v24 }
 0xdbd   : > { %v8647_v7 = vpack.c.bf16 %v8056_v62, %v8053_v30 }
 0xdbe   : > { %8668 = vst [vmem:[%s13518_s13 + $0x78] sm:$0xff] %v8652_v55  }
 0xdbf   : > { %8667 = vst [vmem:[%s13518_s13 + $0x70] sm:$0xff] %v8647_v7  }
 0xdc0   : > { %10286 = shalt.err (!%p10283_p3)
}
 0xdc1   : > { %s10287_s11 = scalar_lea.hbm %s13567_s10, 2048  ;;  %s10291_s19 = scalar_lea.hbm %s13624_s6, 16384 }
 0xdc2   : > { %p10288_p4 = scmp.ne.s32.totalorder %s13567_s10, %s10287_s11  ;;  %p10292_p9 = scmp.lt.u32.totalorder %s13567_s10, %s13624_s6 }
 0xdc3   : > { %p10293_p10 = scmp.lt.u32.totalorder %s10291_s19, %s10287_s11  ;;  %p10295_p12 = scmp.lt.u32.totalorder %s10287_s11, %s13567_s10 }
 0xdc4   : > { %p10289_p7 = pnand %p10288_p4, %p10416_p5 }
 0xdc5   : > { %p10294_p11 = por %p10293_p10, %p10292_p9 }
 0xdc6   : > { %p10290_p8 = pneg %p10289_p7 }
 0xdc7   : > { %p10296_p13 = por %p10295_p12, %p10294_p11 }
 0xdc9   : > { %p10297_p0 = pnand %p10296_p13, %p10290_p8 }
 0xdcb   : > { %10300 = shalt.err (!%p10297_p0)
}
 0xdcc   : > { %s10342_s29 = smov 4  }
 0xdcd   : > { %9661 = dma.vmem_to_hbm [thread:$0]  (%p10416_p5), %s13569_s26, 2048, %s13567_s10, %s13575_s25, %s10339_s28, %s10339_s28, %s10342_s29  }
 0xdce PF: > { %p9667_p1 = scmp.ge.s32.totalorder %s10335_s24, 2  ;;  %s8257_s9 = sand.u32 1, %s10323_s21  }
 0xdcf   : > { %s8258_s12 = scalar_lea.sflag [#allocation5], %s8257_s9 }
 0xdd0   : > { %p9664_p2 = pnand %p9667_p1, %p10420_p6 }
 0xdd2   : > { %10318 = dma.done.wait (!%p9664_p2), %s8258_s12, 2048  }
 0xdd3   : > { %10320 = vsyncadd (!%p9664_p2), %s8258_s12, 4294965248  ;;  %p16_p3 = scmp.ge.s32.totalorder %s10403_s27, 10   ;;  %s14018_s21 = smov %s10327_s22 }
 0xdd4   : > { %s14019_s22 = smov %s10331_s23  ;;  %s14020_s23 = smov %s10414_s30 }
 0xdd5   : > { %s14021_s24 = smov %s10403_s27  ;;  %18 = sbr.rel (!%p16_p3) target bundleno = 3 (0x3), region = 82 }
 0xddc   :  { %8263 = vsyncpa [#allocation5], 1 }
 0xddd   :  { %8265 = vsyncpa [#allocation5 + $0x1], 1 }

</bundles_post_ra>
